<compile_context>
chip_gen: v7x
topology: tpu7x:2x2x1
jax: 0.10.0
libtpu: 0.0.40
codegen_flags: <defaults>
</compile_context>

<pallas_src>
import math

import jax
import jax.numpy as jnp
from jax.experimental import pallas as pl
from jax.experimental.pallas import tpu as pltpu

# ------------------------- small, module-consistent sizes -------------------
DIM      = 3     # point coordinate dimension
C_DIM    = 32    # latent code dimension
HIDDEN   = 64    # decoder hidden size (module default 256; kept small here)
N_BLOCKS = 3     # number of ResnetBlockFC blocks (module default 5)
GRID_RES = 8     # feature-grid resolution (D = H = W)
PADDING  = 0.1


# ------------------------------- glue (plain JAX) ---------------------------
def normalize_3d_coordinate(p, padding=PADDING):
    """ONet-style normalization of coords from ~[-0.5, 0.5] to [0, 1)."""
    p_nor = p / (1.0 + padding + 1e-3) + 0.5
    return jnp.clip(p_nor, 0.0, 1.0 - 1e-3)


def _trilinear_corners(pts, sizes):
    """Corner indices / weights for trilinear interp (align_corners=True,
    border padding; coords already clipped to [0, 1))."""
    Dd, Hh, Ww = sizes
    x = pts[:, 0] * (Ww - 1)
    y = pts[:, 1] * (Hh - 1)
    z = pts[:, 2] * (Dd - 1)

    def prep(v, size):
        v0 = jnp.floor(v)
        w1 = v - v0
        i0 = jnp.clip(v0, 0, size - 1).astype(jnp.int32)
        i1 = jnp.clip(v0 + 1, 0, size - 1).astype(jnp.int32)
        return (i0, i1), (1.0 - w1, w1)

    return prep(x, Ww), prep(y, Hh), prep(z, Dd)


def _grid_sample_onehot(grid, pts):
    """grid: [C, D, H, W]; pts: [T, 3] in [0,1] (x->W, y->H, z->D).

    Gather-free formulation of F.grid_sample(mode='bilinear',
    padding_mode='border', align_corners=True): build a [T, D*H*W] trilinear
    weight matrix with broadcast compares (no XLA gather HLO) and contract it
    with the flattened grid on the MXU.  D*H*W = 512 here."""
    C, Dd, Hh, Ww = grid.shape
    ncells = Dd * Hh * Ww
    (x_idx, x_w), (y_idx, y_w), (z_idx, z_w) = _trilinear_corners(pts, (Dd, Hh, Ww))

    cell_ids = jax.lax.broadcasted_iota(jnp.int32, (pts.shape[0], ncells), 1)
    wmat = jnp.zeros((pts.shape[0], ncells), jnp.float32)
    for iz in range(2):
        for iy in range(2):
            for ix in range(2):
                lin = (z_idx[iz] * Hh + y_idx[iy]) * Ww + x_idx[ix]       # [T]
                w = z_w[iz] * y_w[iy] * x_w[ix]                           # [T]
                wmat = wmat + jnp.where(cell_ids == lin[:, None],
                                        w[:, None], 0.0)
    grid_flat = grid.reshape(C, ncells).T                                 # [D^3, C]
    return wmat @ grid_flat                                               # [T, C]


def _grid_sample_gather(grid, pts):
    """Gather-based reference implementation (same semantics); used only by
    the pure-JAX reference to independently check the one-hot formulation."""
    _, Dd, Hh, Ww = grid.shape
    (x_idx, x_w), (y_idx, y_w), (z_idx, z_w) = _trilinear_corners(pts, (Dd, Hh, Ww))
    out = 0.0
    for iz in range(2):
        for iy in range(2):
            for ix in range(2):
                w = (z_w[iz] * y_w[iy] * x_w[ix])[:, None]
                out = out + w * grid[:, z_idx[iz], y_idx[iy], x_idx[ix]].T
    return out


# --------------------------------- kernel -----------------------------------
def _make_kernel(g_tile, n_pts):
    """MLP-trunk kernel for one tile of `g_tile` groups x `n_pts` points."""
    tile_rows = g_tile * n_pts

    def kernel(net0_ref, c_ref,
               wc_ref, bc_ref,
               w0a_ref, w0b_ref, b0_ref,
               w1_ref, b1_ref,
               wsa_ref, wsb_ref,
               wout_ref, bout_ref,
               out_ref):
        c_bf = c_ref[...].astype(jnp.bfloat16)                   # [R, C] MXU operand
        # fc_c for ALL blocks fused into one lane-dense N = N_BLOCKS*H matmul.
        cc = (jnp.dot(c_bf, wc_ref[...], preferred_element_type=jnp.float32)
              + bc_ref[...])                                     # [R, N_BLOCKS*H] f32
        net = net0_ref[...]                                      # [R, H] f32 (fc_p host-side)

        def group_max(x):                                        # [R, H] -> [g_tile, H]
            return jnp.max(x.reshape(g_tile, n_pts, HIDDEN), axis=1)

        def group_bcast(z):                                      # [g_tile, H] -> [R, H]
            return jnp.broadcast_to(
                z[:, None, :], (g_tile, n_pts, HIDDEN)).reshape(tile_rows, HIDDEN)

        for i in range(N_BLOCKS):
            # net = net + fc_c[i](c)   (64-column static slice of the fused cc)
            net = net + cc[:, i * HIDDEN:(i + 1) * HIDDEN]
            a = jnp.maximum(net, 0.0).astype(jnp.bfloat16)
            if i == 0:
                # ResnetBlockFC(H): identity shortcut, no pooled concat.
                h = jnp.dot(a, w0a_ref[i],
                            preferred_element_type=jnp.float32) + b0_ref[i]
                x_s = net
            else:
                # cat([net, pooled]) @ W == net @ Wa + pooled @ Wb (pooled per
                # group, broadcast back to its points); ditto for the bias-free
                # shortcut.
                pooled = group_max(net)                                    # [g_tile, H]
                a_p = jnp.maximum(pooled, 0.0).astype(jnp.bfloat16)
                h = (jnp.dot(a, w0a_ref[i], preferred_element_type=jnp.float32)
                     + group_bcast(jnp.dot(a_p, w0b_ref[i - 1],
                                           preferred_element_type=jnp.float32))
                     + b0_ref[i])
                x_s = (jnp.dot(net.astype(jnp.bfloat16), wsa_ref[i - 1],
                               preferred_element_type=jnp.float32)
                       + group_bcast(jnp.dot(pooled.astype(jnp.bfloat16),
                                             wsb_ref[i - 1],
                                             preferred_element_type=jnp.float32)))
            dx = jnp.dot(jnp.maximum(h, 0.0).astype(jnp.bfloat16), w1_ref[i],
                         preferred_element_type=jnp.float32) + b1_ref[i]
            net = x_s + dx                                                 # [R, H]

        # final per-group max-pool, fc_out and tanh.  Contract the last dims of
        # wout [1,H] and relu(pooled) [g_tile,H] (q@k.T pattern) so the result
        # is a lane-dense [1, g_tile] row -> unmasked store.
        pooled_a = jnp.maximum(group_max(net), 0.0).astype(jnp.bfloat16)   # [g_tile, H]
        val = jax.lax.dot_general(
            wout_ref[...], pooled_a, (((1,), (1,)), ((), ())),
            preferred_element_type=jnp.float32) + bout_ref[...]            # [1, g_tile]
        out_ref[...] = jnp.tanh(val).astype(out_ref.dtype)

    return kernel


def _choose_tiling(num_groups, n_pts, target_rows=1024):
    """Groups per grid step + number of steps.

    Targets ~1024 point rows per step (single step whenever the whole problem
    fits, as at the shipped shape -> no padding), an even group count per tile
    (tile_rows % 16 for bf16 sublane packing), and an even number of tiles so
    the "parallel" grid axis load-balances across v7x's two TensorCores."""
    gt = max(1, target_rows // max(n_pts, 1))
    if gt >= num_groups:
        return num_groups, 1                       # single step, full-extent blocks
    gt = max(2, (gt // 2) * 2)
    num_tiles = -(-num_groups // gt)
    if num_tiles % 2:
        num_tiles += 1
        gt = max(2, ((-(-num_groups // num_tiles) + 1) // 2) * 2)
        num_tiles = -(-num_groups // gt)
    return gt, num_tiles


# ------------------------------ wrapper --------------------------------------
def grasp_quality_forward(p, grid_feat, kp):
    """p: [b1, b2, n, 3]; grid_feat: [b1, 1, C, D, H, W] -> out [b1, b2]."""
    b1, b2, n, _ = p.shape
    G = b1 * b2

    # Pad each group's points to a multiple of 8 by replicating the last point:
    # keeps the in-kernel (rows -> groups x points) reshape sublane-aligned and
    # is a no-op under max pooling (duplicated points never change the max).
    n_pad = -(-n // 8) * 8
    if n_pad != n:
        tail = jnp.broadcast_to(p[:, :, -1:, :], (b1, b2, n_pad - n, DIM))
        p = jnp.concatenate([p, tail], axis=2)

    # ---- host-side glue (plain XLA, gather-free): grid_sample + fc_p ----
    p_flat = p.reshape(b1, b2 * n_pad, DIM).astype(jnp.float32)
    p_nor = normalize_3d_coordinate(p_flat)
    c = jax.vmap(_grid_sample_onehot)(grid_feat[:, 0].astype(jnp.float32), p_nor)
    c = c.reshape(G * n_pad, C_DIM)                                   # [G*n, C]
    net0 = p_flat.reshape(G * n_pad, DIM) @ kp['wp'] + kp['bp']       # [G*n, H]

    # ---- tiling ----
    g_tile, num_tiles = _choose_tiling(G, n_pad)
    Gp = num_tiles * g_tile
    pad_rows = (Gp - G) * n_pad
    if pad_rows:
        c = jnp.pad(c, ((0, pad_rows), (0, 0)))
        net0 = jnp.pad(net0, ((0, pad_rows), (0, 0)))
    tile_rows = g_tile * n_pad

    inputs = (net0, c,
              kp['wc'], kp['bc'],
              kp['w0a'], kp['w0b'], kp['b0'],
              kp['w1'], kp['b1'],
              kp['wsa'], kp['wsb'],
              kp['wout'], kp['bout'])

    def full(shape):
        return pl.BlockSpec(shape, lambda t, _s=len(shape): (0,) * _s)

    in_specs = [
        pl.BlockSpec((tile_rows, HIDDEN), lambda t: (t, 0)),
        pl.BlockSpec((tile_rows, C_DIM), lambda t: (t, 0)),
        full((C_DIM, N_BLOCKS * HIDDEN)), full((1, N_BLOCKS * HIDDEN)),
        full((N_BLOCKS, HIDDEN, HIDDEN)), full((N_BLOCKS - 1, HIDDEN, HIDDEN)),
        full((N_BLOCKS, 1, HIDDEN)),
        full((N_BLOCKS, HIDDEN, HIDDEN)), full((N_BLOCKS, 1, HIDDEN)),
        full((N_BLOCKS - 1, HIDDEN, HIDDEN)), full((N_BLOCKS - 1, HIDDEN, HIDDEN)),
        full((1, HIDDEN)), full((1, 1)),
    ]

    # advisory cost estimate for the XLA scheduler
    row_mm = 3 * N_BLOCKS - 1          # w0a x3 + w1 x3 + wsa x2 per-row HxH matmuls
    flops = (Gp * n_pad * (2 * C_DIM * N_BLOCKS * HIDDEN
                           + row_mm * 2 * HIDDEN * HIDDEN)
             + Gp * (2 * (N_BLOCKS - 1) * 2 * HIDDEN * HIDDEN + 2 * HIDDEN))
    bytes_accessed = sum(int(x.size) * x.dtype.itemsize for x in inputs) + Gp * 4

    # NOTE: at HIDDEN=64 a 1024-row tile is ~1 MiB of activations — far below
    # the default scoped VMEM on every generation (v7x's 64 MiB included).  If
    # HIDDEN / tile_rows are scaled back up, re-derive the tiling per chip and
    # set pltpu.CompilerParams(vmem_limit_bytes=...) accordingly.
    out = pl.pallas_call(
        _make_kernel(g_tile, n_pad),
        out_shape=jax.ShapeDtypeStruct((num_tiles, 1, g_tile), jnp.float32),
        grid=(num_tiles,),
        in_specs=in_specs,
        # disjoint, lane-dense per-tile output rows -> grid axis is shardable
        out_specs=pl.BlockSpec((None, 1, g_tile), lambda t: (t, 0, 0)),
        compiler_params=pltpu.CompilerParams(dimension_semantics=("parallel",)),
        cost_estimate=pl.CostEstimate(flops=flops, transcendentals=Gp,
                                      bytes_accessed=bytes_accessed),
    )(*inputs)
    return out.reshape(Gp)[:G].reshape(b1, b2)


# ------------------------- parameters (deterministic) ------------------------
def init_params(key):
    """Synthetic deterministic params (PyTorch-Linear-style uniform init).

    NOTE: the original ResnetBlockFC zero-inits fc_1.weight; random init is used
    here so the kernel exercises the full compute path.
    Returns (torch_layout_params, kernel_params)."""
    keys = iter(jax.random.split(key, 64))

    def linear(fan_in, fan_out, bias=True):
        bound = 1.0 / math.sqrt(fan_in)
        w = jax.random.uniform(next(keys), (fan_out, fan_in), jnp.float32, -bound, bound)
        b = (jax.random.uniform(next(keys), (fan_out,), jnp.float32, -bound, bound)
             if bias else None)
        return w, b

    tp = {'fc_c_w': [], 'fc_c_b': [], 'fc0_w': [], 'fc0_b': [],
          'fc1_w': [], 'fc1_b': [], 'sc_w': []}
    tp['fc_p_w'], tp['fc_p_b'] = linear(DIM, HIDDEN)
    for _ in range(N_BLOCKS):
        w, b = linear(C_DIM, HIDDEN)
        tp['fc_c_w'].append(w); tp['fc_c_b'].append(b)
    for i in range(N_BLOCKS):
        size_in = HIDDEN if i == 0 else 2 * HIDDEN
        w0, b0 = linear(size_in, HIDDEN)
        w1, b1 = linear(HIDDEN, HIDDEN)
        tp['fc0_w'].append(w0); tp['fc0_b'].append(b0)
        tp['fc1_w'].append(w1); tp['fc1_b'].append(b1)
        if i == 0:
            tp['sc_w'].append(None)
        else:
            ws, _ = linear(size_in, HIDDEN, bias=False)
            tp['sc_w'].append(ws)
    tp['fc_out_w'], tp['fc_out_b'] = linear(HIDDEN, 1)

    # repack for the kernel: [in, out] layout, cat-weights split into (net,
    # pooled) parts, block-0 dead weights dropped, fc_c weights/biases fused
    # into one [C, N_BLOCKS*H] / [1, N_BLOCKS*H], MXU weights bf16, biases f32.
    w0a, w0b, wsa, wsb, w1s, b0s, b1s = [], [], [], [], [], [], []
    for i in range(N_BLOCKS):
        f0t = tp['fc0_w'][i].T
        if i == 0:
            w0a.append(f0t)
        else:
            w0a.append(f0t[:HIDDEN]); w0b.append(f0t[HIDDEN:])
            st = tp['sc_w'][i].T
            wsa.append(st[:HIDDEN]); wsb.append(st[HIDDEN:])
        w1s.append(tp['fc1_w'][i].T)
        b0s.append(tp['fc0_b'][i][None, :])
        b1s.append(tp['fc1_b'][i][None, :])

    bf = jnp.bfloat16
    kp = dict(
        wp=tp['fc_p_w'].T, bp=tp['fc_p_b'][None, :],                    # host-side fc_p (f32)
        wc=jnp.concatenate([w.T for w in tp['fc_c_w']], axis=1).astype(bf),
        bc=jnp.concatenate(tp['fc_c_b'])[None, :],
        w0a=jnp.stack(w0a).astype(bf), w0b=jnp.stack(w0b).astype(bf),
        b0=jnp.stack(b0s),
        w1=jnp.stack(w1s).astype(bf), b1=jnp.stack(b1s),
        wsa=jnp.stack(wsa).astype(bf), wsb=jnp.stack(wsb).astype(bf),
        wout=tp['fc_out_w'].astype(bf), bout=tp['fc_out_b'][None, :],   # [1,H], [1,1]
    )
    return tp, kp


# -------------------- pure-JAX reference (torch-faithful) --------------------
def reference_forward(p, grid_feat, tp):
    b1, b2, n, _ = p.shape
    p_flat = p.reshape(b1, b2 * n, DIM)
    p_nor = normalize_3d_coordinate(p_flat)
    c = jax.vmap(_grid_sample_gather)(grid_feat[:, 0], p_nor)   # [b1, T, C]
    c = c.reshape(b1, b2, n, C_DIM)

    net = p @ tp['fc_p_w'].T + tp['fc_p_b']
    for i in range(N_BLOCKS):
        net = net + c @ tp['fc_c_w'][i].T + tp['fc_c_b'][i]
        if i > 0:
            pooled = jnp.max(net, axis=-2, keepdims=True)
            pooled = jnp.broadcast_to(pooled, net.shape)
            net = jnp.concatenate([net, pooled], axis=-1)
        h = jnp.maximum(net, 0.0) @ tp['fc0_w'][i].T + tp['fc0_b'][i]
        dx = jnp.maximum(h, 0.0) @ tp['fc1_w'][i].T + tp['fc1_b'][i]
        x_s = net if i == 0 else net @ tp['sc_w'][i].T
        net = x_s + dx
    net = jnp.max(net, axis=-2)
    out = jnp.maximum(net, 0.0) @ tp['fc_out_w'].T + tp['fc_out_b']
    return jnp.tanh(jnp.squeeze(out, -1))


# TODO(synk): sample_plane_feature ('xz'/'xy'/'yz' planes) is not defined in the
# provided snippet; only the 'grid' feature branch is implemented.

# ---------------------------------- main --------------------------------------
if __name__ == "__main__":
    key = jax.random.PRNGKey(0)
    k_p, k_grid, k_param = jax.random.split(key, 3)

    # G = b1*b2 = 40 groups x 8 points = 320 rows -> a single grid step with
    # full-extent blocks and no padding (per the perf review).
    b1, b2, n = 2, 20, 8
    p = jax.random.uniform(k_p, (b1, b2, n, DIM), jnp.float32, -0.5, 0.5)
    grid_feat = jax.random.normal(
        k_grid, (b1, 1, C_DIM, GRID_RES, GRID_RES, GRID_RES), jnp.float32)

    tparams, kparams = init_params(k_param)

    out = jax.jit(grasp_quality_forward)(p, grid_feat, kparams)
    out = jax.block_until_ready(out)

    ref = reference_forward(p, grid_feat, tparams)
    assert out.shape == (b1, b2), out.shape
    assert jnp.allclose(out, ref, atol=5e-2, rtol=5e-2), (out, ref)

    print("KERNEL_OK")
</pallas_src>

<mosaic_0001>
module attributes {stable_mosaic.version = 11 : i64} {
  func.func @kernel(%arg0: i32, %arg1: memref<320x64xf32, #tpu.memory_space<vmem>>, %arg2: memref<320x32xf32, #tpu.memory_space<vmem>>, %arg3: memref<32x192xbf16, #tpu.memory_space<vmem>>, %arg4: memref<1x192xf32, #tpu.memory_space<vmem>>, %arg5: memref<3x64x64xbf16, #tpu.memory_space<vmem>>, %arg6: memref<2x64x64xbf16, #tpu.memory_space<vmem>>, %arg7: memref<3x1x64xf32, #tpu.memory_space<vmem>>, %arg8: memref<3x64x64xbf16, #tpu.memory_space<vmem>>, %arg9: memref<3x1x64xf32, #tpu.memory_space<vmem>>, %arg10: memref<2x64x64xbf16, #tpu.memory_space<vmem>>, %arg11: memref<2x64x64xbf16, #tpu.memory_space<vmem>>, %arg12: memref<1x64xbf16, #tpu.memory_space<vmem>>, %arg13: memref<1x1xf32, #tpu.memory_space<vmem>>, %arg14: memref<1x1x40xf32, #tpu.memory_space<vmem>>) attributes {dimension_semantics = [#tpu.dimension_semantics<parallel>], iteration_bounds = array<i64: 1>, scalar_prefetch = 0 : i64, scratch_operands = 0 : i64, tpu.core_type = #tpu.core_type<tc>, window_params = [{transform_indices = @transform_0, window_bounds = array<i64: 320, 64>}, {transform_indices = @transform_1, window_bounds = array<i64: 320, 32>}, {pipeline_mode = #tpu.pipeline_mode<synchronous>, transform_indices = @transform_2, window_bounds = array<i64: 32, 192>}, {pipeline_mode = #tpu.pipeline_mode<synchronous>, transform_indices = @transform_3, window_bounds = array<i64: 1, 192>}, {pipeline_mode = #tpu.pipeline_mode<synchronous>, transform_indices = @transform_4, window_bounds = array<i64: 3, 64, 64>}, {pipeline_mode = #tpu.pipeline_mode<synchronous>, transform_indices = @transform_5, window_bounds = array<i64: 2, 64, 64>}, {pipeline_mode = #tpu.pipeline_mode<synchronous>, transform_indices = @transform_6, window_bounds = array<i64: 3, 1, 64>}, {pipeline_mode = #tpu.pipeline_mode<synchronous>, transform_indices = @transform_7, window_bounds = array<i64: 3, 64, 64>}, {pipeline_mode = #tpu.pipeline_mode<synchronous>, transform_indices = @transform_8, window_bounds = array<i64: 3, 1, 64>}, {pipeline_mode = #tpu.pipeline_mode<synchronous>, transform_indices = @transform_9, window_bounds = array<i64: 2, 64, 64>}, {pipeline_mode = #tpu.pipeline_mode<synchronous>, transform_indices = @transform_10, window_bounds = array<i64: 2, 64, 64>}, {pipeline_mode = #tpu.pipeline_mode<synchronous>, transform_indices = @transform_11, window_bounds = array<i64: 1, 64>}, {pipeline_mode = #tpu.pipeline_mode<synchronous>, transform_indices = @transform_12, window_bounds = array<i64: 1, 1>}, {transform_indices = @transform_13, window_bounds = array<i64: 1, 1, 40>}]} {
    %c0 = arith.constant 0 : index
    %c0_0 = arith.constant 0 : index
    %0 = vector.load %arg2[%c0, %c0_0] : memref<320x32xf32, #tpu.memory_space<vmem>>, vector<320x32xf32>
    %1 = arith.truncf %0 : vector<320x32xf32> to vector<320x32xbf16>
    %c0_1 = arith.constant 0 : index
    %c0_2 = arith.constant 0 : index
    %2 = vector.load %arg3[%c0_1, %c0_2] : memref<32x192xbf16, #tpu.memory_space<vmem>>, vector<32x192xbf16>
    %cst = arith.constant dense<0.000000e+00> : vector<320x192xf32>
    %3 = tpu.matmul %1, %2, %cst {dimension_numbers = #tpu.dot_dimension_numbers<[1], [0], [0], [1], [0, 0, 1, 1], [], []>} : vector<320x32xbf16>, vector<32x192xbf16>, vector<320x192xf32> -> vector<320x192xf32>
    %c0_3 = arith.constant 0 : index
    %c0_4 = arith.constant 0 : index
    %4 = vector.load %arg4[%c0_3, %c0_4] : memref<1x192xf32, #tpu.memory_space<vmem>>, vector<1x192xf32>
    %5 = vector.broadcast %4 : vector<1x192xf32> to vector<320x192xf32>
    %6 = arith.addf %3, %5 : vector<320x192xf32>
    %c0_5 = arith.constant 0 : index
    %c0_6 = arith.constant 0 : index
    %7 = vector.load %arg1[%c0_5, %c0_6] : memref<320x64xf32, #tpu.memory_space<vmem>>, vector<320x64xf32>
    %8 = vector.extract_strided_slice %6 {offsets = [0, 0], sizes = [320, 64], strides = [1, 1]} : vector<320x192xf32> to vector<320x64xf32>
    %9 = arith.addf %7, %8 : vector<320x64xf32>
    %cst_7 = arith.constant 0.000000e+00 : f32
    %10 = vector.broadcast %cst_7 : f32 to vector<320x64xf32>
    %11 = arith.maximumf %9, %10 : vector<320x64xf32>
    %12 = arith.truncf %11 : vector<320x64xf32> to vector<320x64xbf16>
    %c0_8 = arith.constant 0 : index
    %c0_9 = arith.constant 0 : index
    %c0_10 = arith.constant 0 : index
    %13 = vector.load %arg5[%c0_8, %c0_9, %c0_10] : memref<3x64x64xbf16, #tpu.memory_space<vmem>>, vector<1x64x64xbf16>
    %14 = vector.shape_cast %13 : vector<1x64x64xbf16> to vector<64x64xbf16>
    %cst_11 = arith.constant dense<0.000000e+00> : vector<320x64xf32>
    %15 = tpu.matmul %12, %14, %cst_11 {dimension_numbers = #tpu.dot_dimension_numbers<[1], [0], [0], [1], [0, 0, 1, 1], [], []>} : vector<320x64xbf16>, vector<64x64xbf16>, vector<320x64xf32> -> vector<320x64xf32>
    %c0_12 = arith.constant 0 : index
    %c0_13 = arith.constant 0 : index
    %c0_14 = arith.constant 0 : index
    %16 = vector.load %arg7[%c0_12, %c0_13, %c0_14] : memref<3x1x64xf32, #tpu.memory_space<vmem>>, vector<1x1x64xf32>
    %17 = vector.shape_cast %16 : vector<1x1x64xf32> to vector<1x64xf32>
    %18 = vector.broadcast %17 : vector<1x64xf32> to vector<320x64xf32>
    %19 = arith.addf %15, %18 : vector<320x64xf32>
    %cst_15 = arith.constant 0.000000e+00 : f32
    %20 = vector.broadcast %cst_15 : f32 to vector<320x64xf32>
    %21 = arith.maximumf %19, %20 : vector<320x64xf32>
    %22 = arith.truncf %21 : vector<320x64xf32> to vector<320x64xbf16>
    %c0_16 = arith.constant 0 : index
    %c0_17 = arith.constant 0 : index
    %c0_18 = arith.constant 0 : index
    %23 = vector.load %arg8[%c0_16, %c0_17, %c0_18] : memref<3x64x64xbf16, #tpu.memory_space<vmem>>, vector<1x64x64xbf16>
    %24 = vector.shape_cast %23 : vector<1x64x64xbf16> to vector<64x64xbf16>
    %cst_19 = arith.constant dense<0.000000e+00> : vector<320x64xf32>
    %25 = tpu.matmul %22, %24, %cst_19 {dimension_numbers = #tpu.dot_dimension_numbers<[1], [0], [0], [1], [0, 0, 1, 1], [], []>} : vector<320x64xbf16>, vector<64x64xbf16>, vector<320x64xf32> -> vector<320x64xf32>
    %c0_20 = arith.constant 0 : index
    %c0_21 = arith.constant 0 : index
    %c0_22 = arith.constant 0 : index
    %26 = vector.load %arg9[%c0_20, %c0_21, %c0_22] : memref<3x1x64xf32, #tpu.memory_space<vmem>>, vector<1x1x64xf32>
    %27 = vector.shape_cast %26 : vector<1x1x64xf32> to vector<1x64xf32>
    %28 = vector.broadcast %27 : vector<1x64xf32> to vector<320x64xf32>
    %29 = arith.addf %25, %28 : vector<320x64xf32>
    %30 = arith.addf %9, %29 : vector<320x64xf32>
    %31 = vector.extract_strided_slice %6 {offsets = [0, 64], sizes = [320, 64], strides = [1, 1]} : vector<320x192xf32> to vector<320x64xf32>
    %32 = arith.addf %30, %31 : vector<320x64xf32>
    %cst_23 = arith.constant 0.000000e+00 : f32
    %33 = vector.broadcast %cst_23 : f32 to vector<320x64xf32>
    %34 = arith.maximumf %32, %33 : vector<320x64xf32>
    %35 = arith.truncf %34 : vector<320x64xf32> to vector<320x64xbf16>
    %36 = vector.shape_cast %32 : vector<320x64xf32> to vector<40x8x64xf32>
    %cst_24 = arith.constant dense<0xFF800000> : vector<40x64xf32>
    %37 = vector.multi_reduction <maximumf>, %36, %cst_24 [1] : vector<40x8x64xf32> to vector<40x64xf32>
    %cst_25 = arith.constant 0.000000e+00 : f32
    %38 = vector.broadcast %cst_25 : f32 to vector<40x64xf32>
    %39 = arith.maximumf %37, %38 : vector<40x64xf32>
    %40 = arith.truncf %39 : vector<40x64xf32> to vector<40x64xbf16>
    %c1 = arith.constant 1 : index
    %c0_26 = arith.constant 0 : index
    %c0_27 = arith.constant 0 : index
    %41 = vector.load %arg5[%c1, %c0_26, %c0_27] : memref<3x64x64xbf16, #tpu.memory_space<vmem>>, vector<1x64x64xbf16>
    %42 = vector.shape_cast %41 : vector<1x64x64xbf16> to vector<64x64xbf16>
    %cst_28 = arith.constant dense<0.000000e+00> : vector<320x64xf32>
    %43 = tpu.matmul %35, %42, %cst_28 {dimension_numbers = #tpu.dot_dimension_numbers<[1], [0], [0], [1], [0, 0, 1, 1], [], []>} : vector<320x64xbf16>, vector<64x64xbf16>, vector<320x64xf32> -> vector<320x64xf32>
    %c0_29 = arith.constant 0 : index
    %c0_30 = arith.constant 0 : index
    %c0_31 = arith.constant 0 : index
    %44 = vector.load %arg6[%c0_29, %c0_30, %c0_31] : memref<2x64x64xbf16, #tpu.memory_space<vmem>>, vector<1x64x64xbf16>
    %45 = vector.shape_cast %44 : vector<1x64x64xbf16> to vector<64x64xbf16>
    %cst_32 = arith.constant dense<0.000000e+00> : vector<40x64xf32>
    %46 = tpu.matmul %40, %45, %cst_32 {dimension_numbers = #tpu.dot_dimension_numbers<[1], [0], [0], [1], [0, 0, 1, 1], [], []>} : vector<40x64xbf16>, vector<64x64xbf16>, vector<40x64xf32> -> vector<40x64xf32>
    %47 = vector.shape_cast %46 : vector<40x64xf32> to vector<40x1x64xf32>
    %48 = vector.shape_cast %47 : vector<40x1x64xf32> to vector<40x1x64xf32>
    %49 = vector.broadcast %48 : vector<40x1x64xf32> to vector<40x8x64xf32>
    %50 = vector.shape_cast %49 : vector<40x8x64xf32> to vector<320x64xf32>
    %51 = arith.addf %43, %50 : vector<320x64xf32>
    %c1_33 = arith.constant 1 : index
    %c0_34 = arith.constant 0 : index
    %c0_35 = arith.constant 0 : index
    %52 = vector.load %arg7[%c1_33, %c0_34, %c0_35] : memref<3x1x64xf32, #tpu.memory_space<vmem>>, vector<1x1x64xf32>
    %53 = vector.shape_cast %52 : vector<1x1x64xf32> to vector<1x64xf32>
    %54 = vector.broadcast %53 : vector<1x64xf32> to vector<320x64xf32>
    %55 = arith.addf %51, %54 : vector<320x64xf32>
    %56 = arith.truncf %32 : vector<320x64xf32> to vector<320x64xbf16>
    %c0_36 = arith.constant 0 : index
    %c0_37 = arith.constant 0 : index
    %c0_38 = arith.constant 0 : index
    %57 = vector.load %arg10[%c0_36, %c0_37, %c0_38] : memref<2x64x64xbf16, #tpu.memory_space<vmem>>, vector<1x64x64xbf16>
    %58 = vector.shape_cast %57 : vector<1x64x64xbf16> to vector<64x64xbf16>
    %cst_39 = arith.constant dense<0.000000e+00> : vector<320x64xf32>
    %59 = tpu.matmul %56, %58, %cst_39 {dimension_numbers = #tpu.dot_dimension_numbers<[1], [0], [0], [1], [0, 0, 1, 1], [], []>} : vector<320x64xbf16>, vector<64x64xbf16>, vector<320x64xf32> -> vector<320x64xf32>
    %60 = arith.truncf %37 : vector<40x64xf32> to vector<40x64xbf16>
    %c0_40 = arith.constant 0 : index
    %c0_41 = arith.constant 0 : index
    %c0_42 = arith.constant 0 : index
    %61 = vector.load %arg11[%c0_40, %c0_41, %c0_42] : memref<2x64x64xbf16, #tpu.memory_space<vmem>>, vector<1x64x64xbf16>
    %62 = vector.shape_cast %61 : vector<1x64x64xbf16> to vector<64x64xbf16>
    %cst_43 = arith.constant dense<0.000000e+00> : vector<40x64xf32>
    %63 = tpu.matmul %60, %62, %cst_43 {dimension_numbers = #tpu.dot_dimension_numbers<[1], [0], [0], [1], [0, 0, 1, 1], [], []>} : vector<40x64xbf16>, vector<64x64xbf16>, vector<40x64xf32> -> vector<40x64xf32>
    %64 = vector.shape_cast %63 : vector<40x64xf32> to vector<40x1x64xf32>
    %65 = vector.shape_cast %64 : vector<40x1x64xf32> to vector<40x1x64xf32>
    %66 = vector.broadcast %65 : vector<40x1x64xf32> to vector<40x8x64xf32>
    %67 = vector.shape_cast %66 : vector<40x8x64xf32> to vector<320x64xf32>
    %68 = arith.addf %59, %67 : vector<320x64xf32>
    %cst_44 = arith.constant 0.000000e+00 : f32
    %69 = vector.broadcast %cst_44 : f32 to vector<320x64xf32>
    %70 = arith.maximumf %55, %69 : vector<320x64xf32>
    %71 = arith.truncf %70 : vector<320x64xf32> to vector<320x64xbf16>
    %c1_45 = arith.constant 1 : index
    %c0_46 = arith.constant 0 : index
    %c0_47 = arith.constant 0 : index
    %72 = vector.load %arg8[%c1_45, %c0_46, %c0_47] : memref<3x64x64xbf16, #tpu.memory_space<vmem>>, vector<1x64x64xbf16>
    %73 = vector.shape_cast %72 : vector<1x64x64xbf16> to vector<64x64xbf16>
    %cst_48 = arith.constant dense<0.000000e+00> : vector<320x64xf32>
    %74 = tpu.matmul %71, %73, %cst_48 {dimension_numbers = #tpu.dot_dimension_numbers<[1], [0], [0], [1], [0, 0, 1, 1], [], []>} : vector<320x64xbf16>, vector<64x64xbf16>, vector<320x64xf32> -> vector<320x64xf32>
    %c1_49 = arith.constant 1 : index
    %c0_50 = arith.constant 0 : index
    %c0_51 = arith.constant 0 : index
    %75 = vector.load %arg9[%c1_49, %c0_50, %c0_51] : memref<3x1x64xf32, #tpu.memory_space<vmem>>, vector<1x1x64xf32>
    %76 = vector.shape_cast %75 : vector<1x1x64xf32> to vector<1x64xf32>
    %77 = vector.broadcast %76 : vector<1x64xf32> to vector<320x64xf32>
    %78 = arith.addf %74, %77 : vector<320x64xf32>
    %79 = arith.addf %68, %78 : vector<320x64xf32>
    %80 = vector.extract_strided_slice %6 {offsets = [0, 128], sizes = [320, 64], strides = [1, 1]} : vector<320x192xf32> to vector<320x64xf32>
    %81 = arith.addf %79, %80 : vector<320x64xf32>
    %cst_52 = arith.constant 0.000000e+00 : f32
    %82 = vector.broadcast %cst_52 : f32 to vector<320x64xf32>
    %83 = arith.maximumf %81, %82 : vector<320x64xf32>
    %84 = arith.truncf %83 : vector<320x64xf32> to vector<320x64xbf16>
    %85 = vector.shape_cast %81 : vector<320x64xf32> to vector<40x8x64xf32>
    %cst_53 = arith.constant dense<0xFF800000> : vector<40x64xf32>
    %86 = vector.multi_reduction <maximumf>, %85, %cst_53 [1] : vector<40x8x64xf32> to vector<40x64xf32>
    %cst_54 = arith.constant 0.000000e+00 : f32
    %87 = vector.broadcast %cst_54 : f32 to vector<40x64xf32>
    %88 = arith.maximumf %86, %87 : vector<40x64xf32>
    %89 = arith.truncf %88 : vector<40x64xf32> to vector<40x64xbf16>
    %c2 = arith.constant 2 : index
    %c0_55 = arith.constant 0 : index
    %c0_56 = arith.constant 0 : index
    %90 = vector.load %arg5[%c2, %c0_55, %c0_56] : memref<3x64x64xbf16, #tpu.memory_space<vmem>>, vector<1x64x64xbf16>
    %91 = vector.shape_cast %90 : vector<1x64x64xbf16> to vector<64x64xbf16>
    %cst_57 = arith.constant dense<0.000000e+00> : vector<320x64xf32>
    %92 = tpu.matmul %84, %91, %cst_57 {dimension_numbers = #tpu.dot_dimension_numbers<[1], [0], [0], [1], [0, 0, 1, 1], [], []>} : vector<320x64xbf16>, vector<64x64xbf16>, vector<320x64xf32> -> vector<320x64xf32>
    %c1_58 = arith.constant 1 : index
    %c0_59 = arith.constant 0 : index
    %c0_60 = arith.constant 0 : index
    %93 = vector.load %arg6[%c1_58, %c0_59, %c0_60] : memref<2x64x64xbf16, #tpu.memory_space<vmem>>, vector<1x64x64xbf16>
    %94 = vector.shape_cast %93 : vector<1x64x64xbf16> to vector<64x64xbf16>
    %cst_61 = arith.constant dense<0.000000e+00> : vector<40x64xf32>
    %95 = tpu.matmul %89, %94, %cst_61 {dimension_numbers = #tpu.dot_dimension_numbers<[1], [0], [0], [1], [0, 0, 1, 1], [], []>} : vector<40x64xbf16>, vector<64x64xbf16>, vector<40x64xf32> -> vector<40x64xf32>
    %96 = vector.shape_cast %95 : vector<40x64xf32> to vector<40x1x64xf32>
    %97 = vector.shape_cast %96 : vector<40x1x64xf32> to vector<40x1x64xf32>
    %98 = vector.broadcast %97 : vector<40x1x64xf32> to vector<40x8x64xf32>
    %99 = vector.shape_cast %98 : vector<40x8x64xf32> to vector<320x64xf32>
    %100 = arith.addf %92, %99 : vector<320x64xf32>
    %c2_62 = arith.constant 2 : index
    %c0_63 = arith.constant 0 : index
    %c0_64 = arith.constant 0 : index
    %101 = vector.load %arg7[%c2_62, %c0_63, %c0_64] : memref<3x1x64xf32, #tpu.memory_space<vmem>>, vector<1x1x64xf32>
    %102 = vector.shape_cast %101 : vector<1x1x64xf32> to vector<1x64xf32>
    %103 = vector.broadcast %102 : vector<1x64xf32> to vector<320x64xf32>
    %104 = arith.addf %100, %103 : vector<320x64xf32>
    %105 = arith.truncf %81 : vector<320x64xf32> to vector<320x64xbf16>
    %c1_65 = arith.constant 1 : index
    %c0_66 = arith.constant 0 : index
    %c0_67 = arith.constant 0 : index
    %106 = vector.load %arg10[%c1_65, %c0_66, %c0_67] : memref<2x64x64xbf16, #tpu.memory_space<vmem>>, vector<1x64x64xbf16>
    %107 = vector.shape_cast %106 : vector<1x64x64xbf16> to vector<64x64xbf16>
    %cst_68 = arith.constant dense<0.000000e+00> : vector<320x64xf32>
    %108 = tpu.matmul %105, %107, %cst_68 {dimension_numbers = #tpu.dot_dimension_numbers<[1], [0], [0], [1], [0, 0, 1, 1], [], []>} : vector<320x64xbf16>, vector<64x64xbf16>, vector<320x64xf32> -> vector<320x64xf32>
    %109 = arith.truncf %86 : vector<40x64xf32> to vector<40x64xbf16>
    %c1_69 = arith.constant 1 : index
    %c0_70 = arith.constant 0 : index
    %c0_71 = arith.constant 0 : index
    %110 = vector.load %arg11[%c1_69, %c0_70, %c0_71] : memref<2x64x64xbf16, #tpu.memory_space<vmem>>, vector<1x64x64xbf16>
    %111 = vector.shape_cast %110 : vector<1x64x64xbf16> to vector<64x64xbf16>
    %cst_72 = arith.constant dense<0.000000e+00> : vector<40x64xf32>
    %112 = tpu.matmul %109, %111, %cst_72 {dimension_numbers = #tpu.dot_dimension_numbers<[1], [0], [0], [1], [0, 0, 1, 1], [], []>} : vector<40x64xbf16>, vector<64x64xbf16>, vector<40x64xf32> -> vector<40x64xf32>
    %113 = vector.shape_cast %112 : vector<40x64xf32> to vector<40x1x64xf32>
    %114 = vector.shape_cast %113 : vector<40x1x64xf32> to vector<40x1x64xf32>
    %115 = vector.broadcast %114 : vector<40x1x64xf32> to vector<40x8x64xf32>
    %116 = vector.shape_cast %115 : vector<40x8x64xf32> to vector<320x64xf32>
    %117 = arith.addf %108, %116 : vector<320x64xf32>
    %cst_73 = arith.constant 0.000000e+00 : f32
    %118 = vector.broadcast %cst_73 : f32 to vector<320x64xf32>
    %119 = arith.maximumf %104, %118 : vector<320x64xf32>
    %120 = arith.truncf %119 : vector<320x64xf32> to vector<320x64xbf16>
    %c2_74 = arith.constant 2 : index
    %c0_75 = arith.constant 0 : index
    %c0_76 = arith.constant 0 : index
    %121 = vector.load %arg8[%c2_74, %c0_75, %c0_76] : memref<3x64x64xbf16, #tpu.memory_space<vmem>>, vector<1x64x64xbf16>
    %122 = vector.shape_cast %121 : vector<1x64x64xbf16> to vector<64x64xbf16>
    %cst_77 = arith.constant dense<0.000000e+00> : vector<320x64xf32>
    %123 = tpu.matmul %120, %122, %cst_77 {dimension_numbers = #tpu.dot_dimension_numbers<[1], [0], [0], [1], [0, 0, 1, 1], [], []>} : vector<320x64xbf16>, vector<64x64xbf16>, vector<320x64xf32> -> vector<320x64xf32>
    %c2_78 = arith.constant 2 : index
    %c0_79 = arith.constant 0 : index
    %c0_80 = arith.constant 0 : index
    %124 = vector.load %arg9[%c2_78, %c0_79, %c0_80] : memref<3x1x64xf32, #tpu.memory_space<vmem>>, vector<1x1x64xf32>
    %125 = vector.shape_cast %124 : vector<1x1x64xf32> to vector<1x64xf32>
    %126 = vector.broadcast %125 : vector<1x64xf32> to vector<320x64xf32>
    %127 = arith.addf %123, %126 : vector<320x64xf32>
    %128 = arith.addf %117, %127 : vector<320x64xf32>
    %129 = vector.shape_cast %128 : vector<320x64xf32> to vector<40x8x64xf32>
    %cst_81 = arith.constant dense<0xFF800000> : vector<40x64xf32>
    %130 = vector.multi_reduction <maximumf>, %129, %cst_81 [1] : vector<40x8x64xf32> to vector<40x64xf32>
    %cst_82 = arith.constant 0.000000e+00 : f32
    %131 = vector.broadcast %cst_82 : f32 to vector<40x64xf32>
    %132 = arith.maximumf %130, %131 : vector<40x64xf32>
    %133 = arith.truncf %132 : vector<40x64xf32> to vector<40x64xbf16>
    %c0_83 = arith.constant 0 : index
    %c0_84 = arith.constant 0 : index
    %134 = vector.load %arg12[%c0_83, %c0_84] : memref<1x64xbf16, #tpu.memory_space<vmem>>, vector<1x64xbf16>
    %cst_85 = arith.constant dense<0.000000e+00> : vector<1x40xf32>
    %135 = tpu.matmul %134, %133, %cst_85 {dimension_numbers = #tpu.dot_dimension_numbers<[1], [1], [0], [0], [0, 0, 1, 0], [], []>} : vector<1x64xbf16>, vector<40x64xbf16>, vector<1x40xf32> -> vector<1x40xf32>
    %c0_86 = arith.constant 0 : index
    %c0_87 = arith.constant 0 : index
    %136 = vector.load %arg13[%c0_86, %c0_87] : memref<1x1xf32, #tpu.memory_space<vmem>>, vector<1x1xf32>
    %137 = vector.broadcast %136 : vector<1x1xf32> to vector<1x40xf32>
    %138 = arith.addf %135, %137 : vector<1x40xf32>
    %139 = math.tanh %138 : vector<1x40xf32>
    %c0_88 = arith.constant 0 : index
    %c0_89 = arith.constant 0 : index
    %c0_90 = arith.constant 0 : index
    %140 = vector.load %arg14[%c0_88, %c0_89, %c0_90] : memref<1x1x40xf32, #tpu.memory_space<vmem>>, vector<1x1x40xf32>
    %141 = vector.shape_cast %140 : vector<1x1x40xf32> to vector<1x40xf32>
    %142 = vector.shape_cast %139 : vector<1x40xf32> to vector<1x1x40xf32>
    tpu.vector_store %arg14[%c0_88, %c0_89, %c0_90], %142 {strides = array<i32>} : memref<1x1x40xf32, #tpu.memory_space<vmem>>, vector<1x1x40xf32>,
    return
  }
  func.func @transform_0(%arg0: i32) -> (i32, i32) {
    %c0_i32 = arith.constant 0 : i32
    %c0_i32_0 = arith.constant 0 : i32
    return %arg0, %c0_i32 : i32, i32
  }
  func.func @transform_1(%arg0: i32) -> (i32, i32) {
    %c0_i32 = arith.constant 0 : i32
    %c0_i32_0 = arith.constant 0 : i32
    return %arg0, %c0_i32 : i32, i32
  }
  func.func @transform_2(%arg0: i32) -> (i32, i32) {
    %c0_i32 = arith.constant 0 : i32
    %c0_i32_0 = arith.constant 0 : i32
    %c0_i32_1 = arith.constant 0 : i32
    return %c0_i32, %c0_i32_0 : i32, i32
  }
  func.func @transform_3(%arg0: i32) -> (i32, i32) {
    %c0_i32 = arith.constant 0 : i32
    %c0_i32_0 = arith.constant 0 : i32
    %c0_i32_1 = arith.constant 0 : i32
    return %c0_i32, %c0_i32_0 : i32, i32
  }
  func.func @transform_4(%arg0: i32) -> (i32, i32, i32) {
    %c0_i32 = arith.constant 0 : i32
    %c0_i32_0 = arith.constant 0 : i32
    %c0_i32_1 = arith.constant 0 : i32
    %c0_i32_2 = arith.constant 0 : i32
    return %c0_i32, %c0_i32_0, %c0_i32_1 : i32, i32, i32
  }
  func.func @transform_5(%arg0: i32) -> (i32, i32, i32) {
    %c0_i32 = arith.constant 0 : i32
    %c0_i32_0 = arith.constant 0 : i32
    %c0_i32_1 = arith.constant 0 : i32
    %c0_i32_2 = arith.constant 0 : i32
    return %c0_i32, %c0_i32_0, %c0_i32_1 : i32, i32, i32
  }
  func.func @transform_6(%arg0: i32) -> (i32, i32, i32) {
    %c0_i32 = arith.constant 0 : i32
    %c0_i32_0 = arith.constant 0 : i32
    %c0_i32_1 = arith.constant 0 : i32
    %c0_i32_2 = arith.constant 0 : i32
    return %c0_i32, %c0_i32_0, %c0_i32_1 : i32, i32, i32
  }
  func.func @transform_7(%arg0: i32) -> (i32, i32, i32) {
    %c0_i32 = arith.constant 0 : i32
    %c0_i32_0 = arith.constant 0 : i32
    %c0_i32_1 = arith.constant 0 : i32
    %c0_i32_2 = arith.constant 0 : i32
    return %c0_i32, %c0_i32_0, %c0_i32_1 : i32, i32, i32
  }
  func.func @transform_8(%arg0: i32) -> (i32, i32, i32) {
    %c0_i32 = arith.constant 0 : i32
    %c0_i32_0 = arith.constant 0 : i32
    %c0_i32_1 = arith.constant 0 : i32
    %c0_i32_2 = arith.constant 0 : i32
    return %c0_i32, %c0_i32_0, %c0_i32_1 : i32, i32, i32
  }
  func.func @transform_9(%arg0: i32) -> (i32, i32, i32) {
    %c0_i32 = arith.constant 0 : i32
    %c0_i32_0 = arith.constant 0 : i32
    %c0_i32_1 = arith.constant 0 : i32
    %c0_i32_2 = arith.constant 0 : i32
    return %c0_i32, %c0_i32_0, %c0_i32_1 : i32, i32, i32
  }
  func.func @transform_10(%arg0: i32) -> (i32, i32, i32) {
    %c0_i32 = arith.constant 0 : i32
    %c0_i32_0 = arith.constant 0 : i32
    %c0_i32_1 = arith.constant 0 : i32
    %c0_i32_2 = arith.constant 0 : i32
    return %c0_i32, %c0_i32_0, %c0_i32_1 : i32, i32, i32
  }
  func.func @transform_11(%arg0: i32) -> (i32, i32) {
    %c0_i32 = arith.constant 0 : i32
    %c0_i32_0 = arith.constant 0 : i32
    %c0_i32_1 = arith.constant 0 : i32
    return %c0_i32, %c0_i32_0 : i32, i32
  }
  func.func @transform_12(%arg0: i32) -> (i32, i32) {
    %c0_i32 = arith.constant 0 : i32
    %c0_i32_0 = arith.constant 0 : i32
    %c0_i32_1 = arith.constant 0 : i32
    return %c0_i32, %c0_i32_0 : i32, i32
  }
  func.func @transform_13(%arg0: i32) -> (i32, i32, i32) {
    %c0_i32 = arith.constant 0 : i32
    %c0_i32_0 = arith.constant 0 : i32
    %c0_i32_1 = arith.constant 0 : i32
    return %arg0, %c0_i32, %c0_i32_0 : i32, i32, i32
  }
}

</mosaic_0001>

<bundles_post_ra>
// kernel: grasp_quality_forward.1
= control target key start
LH: loop header
LB: loop body
LE: loop exit
PB: predicated region body
PF: predicated region fallthrough
CT: control target
= control target key end

     0   :  { %v9023_v1 = vmov 0   ;;  %vm143_vm0 = vcmask 261120   ;;  %s9024_s19 = smov 64   ;;  %vm616_vm1 = vcmask 523264   ;;  %vm9026_vm2 = vmmov 0   ;;  %s13041_s2 = inlined_call_operand.vmem [shape: bf16[32,192], index: 2, kind: input, shape index: {}]   ;;  %s13042_s1 = inlined_call_operand.vmem [shape: f32[320,32], index: 1, kind: input, shape index: {}]   ;;  %s13043_s4 = inlined_call_operand.vmem [shape: bf16[3,64,64], index: 4, kind: input, shape index: {}]   ;;  %s13044_s3 = inlined_call_operand.vmem [shape: f32[1,192], index: 3, kind: input, shape index: {}]   ;;  %s13045_s0 = inlined_call_operand.vmem [shape: f32[320,64], index: 0, kind: input, shape index: {}]   ;;  %s13046_s7 = inlined_call_operand.vmem [shape: bf16[3,64,64], index: 7, kind: input, shape index: {}]   ;;  %s13047_s6 = inlined_call_operand.vmem [shape: f32[3,1,64], index: 6, kind: input, shape index: {}]   ;;  %s13048_s5 = inlined_call_operand.vmem [shape: bf16[2,64,64], index: 5, kind: input, shape index: {}]   ;;  %s13049_s8 = inlined_call_operand.vmem [shape: f32[3,1,64], index: 8, kind: input, shape index: {}]   ;;  %s13050_s10 = inlined_call_operand.vmem [shape: bf16[2,64,64], index: 10, kind: input, shape index: {}]   ;;  %s13051_s9 = inlined_call_operand.vmem [shape: bf16[2,64,64], index: 9, kind: input, shape index: {}]   ;;  %s13052_s12 = inlined_call_operand.<no memory space> [shape: f32[1,1], index: 12, kind: input, shape index: {}]   ;;  %s13053_s11 = inlined_call_operand.vmem [shape: bf16[1,64], index: 11, kind: input, shape index: {}]   ;;  %s13054_s13 = inlined_call_operand.vmem [shape: f32[1,1,40], index: 13, kind: output, shape index: {}]  }
   0x1   :  { %v8965_v0 = vld [vmem:[%s13041_s2 + $0x4] ss:$8 sps:$4 sm:$0xff]   ;;  %236 = vmatprep.mubr.bf16.mxu0 %v9023_v1  ;;  %346 = vmatprep.mubr.bf16.mxu1 %v9023_v1  ;;  %v8967_v2 = vld [vmem:[%s13041_s2] ss:$8 sps:$4 sm:$0xff]   ;;  %v8968_v3 = vld [vmem:[%s13041_s2 + $0x14] ss:$8 sps:$4 sm:$0xff]  }
   0x2   :  { %8964 = vset.pattern.permute.xlu0 %v9023_v1  ;;  %204 = vmatprep.subr.bf16.mxu0 %v8965_v0  ;;  %v8970_v4 = vld [vmem:[%s13041_s2 + $0x10] ss:$8 sps:$4 sm:$0xff]   ;;  %v47_v5 = vld [vmem:[%s13042_s1] sm:$0xff]  ;;  %v48_v6 = vld [vmem:[%s13042_s1 + $0x8] sm:$0xff]  ;;  %vm1979_vm3 = vcmask 1041409   ;;  %vm1981_vm4 = vcmask 1042434  }
   0x3   :  { %8715 = vmatprep.subr.bf16.mxu1 %v8965_v0  ;;  %205 = vmatpush1.bf16.msra.mxu0 %v8967_v2  ;;  %v87_v7 = vpack.c.bf16 %v48_v6, %v47_v5  ;;  %v69_v8 = vld [vmem:[%s13042_s1 + $0xb0] sm:$0xff]  ;;  %v70_v9 = vld [vmem:[%s13042_s1 + $0xb8] sm:$0xff]  ;;  %v71_v13 = vld [vmem:[%s13042_s1 + $0xc0] sm:$0xff]  ;;  %v113_v5 = vlaneseq  ;;  %vm1983_vm5 = vcmask 1043459   ;;  %vm1985_vm6 = vcmask 1044484  }
   0x4   :  { %8717 = vmatpush1.bf16.msra.mxu1 %v8967_v2  ;;  %206 = vmatprep.subr.bf16.mxu0 %v8968_v3  ;;  %v98_v10 = vpack.c.bf16 %v70_v9, %v69_v8  ;;  %v49_v11 = vld [vmem:[%s13042_s1 + $0x10] sm:$0xff]  ;;  %v50_v12 = vld [vmem:[%s13042_s1 + $0x18] sm:$0xff]  ;;  %v72_v14 = vld [vmem:[%s13042_s1 + $0xc8] sm:$0xff]  ;;  %vm1987_vm7 = vcmask 1045509   ;;  %vm1989_vm8 = vcmask 1046534   ;;  %vm1991_vm9 = vcmask 1047559  }
   0x5   :  { %8716 = vmatprep.subr.bf16.mxu1 %v8968_v3  ;;  %v88_v15 = vpack.c.bf16 %v50_v12, %v49_v11  ;;  %v99_v16 = vpack.c.bf16 %v72_v14, %v71_v13  ;;  %v8971_v17 = vld [vmem:[%s13043_s4] sm:$0xff]   ;;  %v52_v19 = vld [vmem:[%s13042_s1 + $0x28] sm:$0xff]  ;;  %v73_v20 = vld [vmem:[%s13042_s1 + $0xd0] sm:$0xff]  ;;  %v9283_v6 = vshrl.u32 %v113_v5, 7  ;;  %vm7700_vm10 = vcmask 319488  }
   0x6   :  { %v51_v18 = vld [vmem:[%s13042_s1 + $0x20] sm:$0xff]  ;;  %v74_v21 = vld [vmem:[%s13042_s1 + $0xd8] sm:$0xff]  ;;  %v8972_v22 = vld [vmem:[%s13043_s4 + $0x8] sm:$0xff]  }
   0x7   :  { %207 = vmatpush1.bf16.msra.mxu0 %v8970_v4  ;;  %v89_v23 = vpack.c.bf16 %v52_v19, %v51_v18  ;;  %v100_v24 = vpack.c.bf16 %v74_v21, %v73_v20  ;;  %v53_v25 = vld [vmem:[%s13042_s1 + $0x30] sm:$0xff]  ;;  %v54_v26 = vld [vmem:[%s13042_s1 + $0x38] sm:$0xff]  ;;  %v75_v27 = vld [vmem:[%s13042_s1 + $0xe0] sm:$0xff]  ;;  %13123 = vst [vmem:[#allocation3_spill] sm:$0xff] %v9283_v6 }
   0x8   :  { %8718 = vmatpush1.bf16.msra.mxu1 %v8970_v4  ;;  %v76_v28 = vld [vmem:[%s13042_s1 + $0xe8] sm:$0xff]  ;;  %v90_v29 = vpack.c.bf16 %v54_v26, %v53_v25  ;;  %v55_v31 = vld [vmem:[%s13042_s1 + $0x40] sm:$0xff]  ;;  %v77_v33 = vld [vmem:[%s13042_s1 + $0xf0] sm:$0xff] }
   0x9   :  { %8241 = vmatprep.subr.bf16.mxu1 %v8971_v17  ;;  %v101_v30 = vpack.c.bf16 %v76_v28, %v75_v27  ;;  %v56_v32 = vld [vmem:[%s13042_s1 + $0x48] sm:$0xff]  ;;  %v78_v34 = vld [vmem:[%s13042_s1 + $0xf8] sm:$0xff]  ;;  %v57_v37 = vld [vmem:[%s13042_s1 + $0x50] sm:$0xff] }
   0xa   :  { %7710 = vmatmul.mubr.msk.bf16.vlgmr.msra.gmra.mrb[0].mxu0 %vm143_vm0, %v87_v7  ;;  %v91_v35 = vpack.c.bf16 %v56_v32, %v55_v31  ;;  %v102_v36 = vpack.c.bf16 %v78_v34, %v77_v33  ;;  %v58_v38 = vld [vmem:[%s13042_s1 + $0x58] sm:$0xff]  ;;  %v79_v39 = vld [vmem:[%s13042_s1 + $0x100] sm:$0xff]  ;;  %v80_v40 = vld [vmem:[%s13042_s1 + $0x108] sm:$0xff]  ;;  %v9286_v7 = vsub.s32 0, %v9283_v6 }
   0xb   :  { %7721 = vmatmul.mubr.msk.bf16.vlgmr.msra.gmra.mrb[0].mxu1 %vm143_vm0, %v98_v10  ;;  %246 = vmatprep.mubr.bf16.mxu0 %v9023_v1  ;;  %v92_v41 = vpack.c.bf16 %v58_v38, %v57_v37  ;;  %v103_v42 = vpack.c.bf16 %v80_v40, %v79_v39  ;;  %v59_v43 = vld [vmem:[%s13042_s1 + $0x60] sm:$0xff]  ;;  %v60_v44 = vld [vmem:[%s13042_s1 + $0x68] sm:$0xff]  ;;  %v81_v45 = vld [vmem:[%s13042_s1 + $0x110] sm:$0xff] }
   0xc   :  { %356 = vmatprep.mubr.bf16.mxu1 %v9023_v1  ;;  %8242 = vmatpush3.bf16.msra.mxu1 %v8971_v17  ;;  %v82_v46 = vld [vmem:[%s13042_s1 + $0x118] sm:$0xff]  ;;  %v93_v47 = vpack.c.bf16 %v60_v44, %v59_v43  ;;  %v61_v49 = vld [vmem:[%s13042_s1 + $0x70] sm:$0xff]  ;;  %v83_v51 = vld [vmem:[%s13042_s1 + $0x120] sm:$0xff]  ;;  %13124 = vst [vmem:[#allocation4_spill] sm:$0xff] %v9286_v7 }
   0xd   :  { %8243 = vmatprep.subr.bf16.mxu1 %v8972_v22  ;;  %v104_v48 = vpack.c.bf16 %v82_v46, %v81_v45  ;;  %v62_v50 = vld [vmem:[%s13042_s1 + $0x78] sm:$0xff]  ;;  %v84_v52 = vld [vmem:[%s13042_s1 + $0x128] sm:$0xff]  ;;  %v63_v55 = vld [vmem:[%s13042_s1 + $0x80] sm:$0xff] }
   0xe   :  { %v94_v53 = vpack.c.bf16 %v62_v50, %v61_v49  ;;  %v105_v54 = vpack.c.bf16 %v84_v52, %v83_v51  ;;  %v64_v56 = vld [vmem:[%s13042_s1 + $0x88] sm:$0xff]  ;;  %v85_v57 = vld [vmem:[%s13042_s1 + $0x130] sm:$0xff]  ;;  %v86_v58 = vld [vmem:[%s13042_s1 + $0x138] sm:$0xff] }
   0xf   :  { %v95_v59 = vpack.c.bf16 %v64_v56, %v63_v55  ;;  %v106_v60 = vpack.c.bf16 %v86_v58, %v85_v57  ;;  %v65_v61 = vld [vmem:[%s13042_s1 + $0x90] sm:$0xff]  ;;  %v66_v62 = vld [vmem:[%s13042_s1 + $0x98] sm:$0xff]  ;;  %v67_v0 = vld [vmem:[%s13042_s1 + $0xa0] sm:$0xff] }
  0x10   :  { %8244 = vmatpush3.bf16.msra.mxu1 %v8972_v22  ;;  %v96_v63 = vpack.c.bf16 %v66_v62, %v65_v61  ;;  %v68_v2 = vld [vmem:[%s13042_s1 + $0xa8] sm:$0xff]  ;;  %v8973_v4 = vld [vmem:[%s13043_s4 + $0x10] sm:$0xff]   ;;  %v111_v8 = vld [vmem:[%s13044_s3] sm:$0x3] }
  0x11   :  { %v97_v3 = vpack.c.bf16 %v68_v2, %v67_v0  ;;  %8245 = vmatprep.subr.bf16.mxu1 %v8973_v4  ;;  %v9292_v9 = vrot.slane %v111_v8, %v9286_v7  ;;  %v437_v11 = vld [vmem:[%s13045_s0] sm:$0xff]  ;;  %v438_v17 = vld [vmem:[%s13045_s0 + $0x8] sm:$0xff]  ;;  %v439_v27 = vld [vmem:[%s13045_s0 + $0x10] sm:$0xff] }
  0x12   :  { %7711 = vmatmul.mubr.msk.bf16.gmra.mrb[4].mxu0 %vm143_vm0, %v88_v15  ;;  %v440_v34 = vld [vmem:[%s13045_s0 + $0x18] sm:$0xff]  ;;  %v441_v44 = vld [vmem:[%s13045_s0 + $0x20] sm:$0xff]  ;;  %v442_v51 = vld [vmem:[%s13045_s0 + $0x28] sm:$0xff] }
  0x13   :  { %7722 = vmatmul.mubr.msk.bf16.gmra.mrb[4].mxu1 %vm143_vm0, %v99_v16  ;;  %256 = vmatprep.mubr.bf16.mxu0 %v9023_v1  ;;  %v443_v61 = vld [vmem:[%s13045_s0 + $0x30] sm:$0xff] }
  0x14   :  { %366 = vmatprep.mubr.bf16.mxu1 %v9023_v1  ;;  %8246 = vmatpush3.bf16.msra.mxu1 %v8973_v4 }
  0x1a   :  { %7712 = vmatmul.mubr.msk.bf16.gmra.mrb[8].mxu0 %vm143_vm0, %v89_v23 }
  0x1b   :  { %7723 = vmatmul.mubr.msk.bf16.gmra.mrb[8].mxu1 %vm143_vm0, %v100_v24  ;;  %266 = vmatprep.mubr.bf16.mxu0 %v9023_v1 }
  0x1c   :  { %376 = vmatprep.mubr.bf16.mxu1 %v9023_v1 }
  0x22   :  { %7713 = vmatmul.mubr.msk.bf16.gmra.mrb[12].mxu0 %vm143_vm0, %v90_v29 }
  0x23   :  { %7724 = vmatmul.mubr.msk.bf16.gmra.mrb[12].mxu1 %vm143_vm0, %v101_v30  ;;  %276 = vmatprep.mubr.bf16.mxu0 %v9023_v1 }
  0x24   :  { %386 = vmatprep.mubr.bf16.mxu1 %v9023_v1 }
  0x2a   :  { %7714 = vmatmul.mubr.msk.bf16.gmra.mrb[16].mxu0 %vm143_vm0, %v91_v35 }
  0x2b   :  { %7725 = vmatmul.mubr.msk.bf16.gmra.mrb[16].mxu1 %vm143_vm0, %v102_v36  ;;  %286 = vmatprep.mubr.bf16.mxu0 %v9023_v1 }
  0x2c   :  { %396 = vmatprep.mubr.bf16.mxu1 %v9023_v1 }
  0x32   :  { %7715 = vmatmul.mubr.msk.bf16.gmra.mrb[20].mxu0 %vm143_vm0, %v92_v41 }
  0x33   :  { %7726 = vmatmul.mubr.msk.bf16.gmra.mrb[20].mxu1 %vm143_vm0, %v103_v42  ;;  %296 = vmatprep.mubr.bf16.mxu0 %v9023_v1 }
  0x34   :  { %406 = vmatprep.mubr.bf16.mxu1 %v9023_v1 }
  0x3a   :  { %7716 = vmatmul.mubr.msk.bf16.gmra.mrb[24].mxu0 %vm143_vm0, %v93_v47 }
  0x3b   :  { %7727 = vmatmul.mubr.msk.bf16.gmra.mrb[24].mxu1 %vm143_vm0, %v104_v48  ;;  %306 = vmatprep.mubr.bf16.mxu0 %v9023_v1 }
  0x3c   :  { %416 = vmatprep.mubr.bf16.mxu1 %v9023_v1 }
  0x42   :  { %7717 = vmatmul.mubr.msk.bf16.gmra.mrb[28].mxu0 %vm143_vm0, %v94_v53 }
  0x43   :  { %7728 = vmatmul.mubr.msk.bf16.gmra.mrb[28].mxu1 %vm143_vm0, %v105_v54  ;;  %316 = vmatprep.mubr.bf16.mxu0 %v9023_v1 }
  0x44   :  { %426 = vmatprep.mubr.bf16.mxu1 %v9023_v1 }
  0x4a   :  { %7718 = vmatmul.mubr.msk.bf16.gmra.mrb[32].mxu0 %vm143_vm0, %v95_v59 }
  0x4b   :  { %7729 = vmatmul.mubr.msk.bf16.gmra.mrb[32].mxu1 %vm143_vm0, %v106_v60  ;;  %326 = vmatprep.mubr.bf16.mxu0 %v9023_v1 }
  0x52   :  { %7719 = vmatmul.mubr.msk.bf16.gmra.mrb[36].mxu0 %vm143_vm0, %v96_v63 }
  0x53   :  { %336 = vmatprep.mubr.bf16.mxu0 %v9023_v1  ;;  %v8974_v1 = vld [vmem:[%s13043_s4 + $0x18] sm:$0xff]  }
  0x54   :  { %8247 = vmatprep.subr.bf16.mxu1 %v8974_v1 }
  0x55   :  { %8248 = vmatpush3.bf16.msra.mxu1 %v8974_v1  ;;  %v444_v1 = vld [vmem:[%s13045_s0 + $0x38] sm:$0xff] }
  0x5a   :  { %7720 = vmatmul.mubr.msk.bf16.gmra.mrb[40].mxu0 %vm143_vm0, %v97_v3 }
  0xdd   :  { %v238_v10 = vpop.f32.mrb[0].mxu0 }
  0xde   :  { %v9297_v12 = vpop.f32.mrb[0].mxu1  ;;  %v239_v13 = vadd.f32 %v238_v10, %v9292_v9  ;;  %v9300_v14 = vpop.f32.mrb[1].mxu0 }
  0xdf   :  { %13125 = vst [vmem:[#allocation5_spill] sm:$0xff] %v9300_v14  ;;  %v9302_v15 = vpop.f32.mrb[1].mxu1  ;;  %v242_v16 = vpop.f32.mrb[2].mxu0 }
  0xe0   :  { %13126 = vst [vmem:[#allocation6_spill] sm:$0xff] %v9302_v15  ;;  %v9307_v18 = vpop.f32.mrb[2].mxu1  ;;  %v9309_v19 = vadd.f32 %v437_v11, %v239_v13  ;;  %v243_v20 = vadd.f32 %v242_v16, %v9292_v9  ;;  %v9312_v21 = vpop.f32.mrb[3].mxu0  ;;  %1302 = vrot.lane.b32.xlu0 %v239_v13, %s9024_s19 }
  0xe1   :  { %13127 = vst [vmem:[#allocation7_spill] sm:$0xff] %v9312_v21  ;;  %v9315_v22 = vpop.f32.mrb[3].mxu1 }
  0xe2   :  { %13128 = vst [vmem:[#allocation8_spill] sm:$0xff] %v9315_v22  ;;  %v9317_v23 = vadd.f32 %v438_v17, %v243_v20  ;;  %v517_v24 = vmax.f32 %v9309_v19, 0.0 }
  0xe4   :  { %v518_v25 = vmax.f32 %v9317_v23, 0.0  ;;  %1304 = vrot.lane.b32.xlu0 %v243_v20, %s9024_s19 }
  0xe5   :  { %v248_v26 = vpop.f32.mrb[4].mxu0 }
  0xe6   :  { %v358_v28 = vpop.f32.mrb[4].mxu1  ;;  %v557_v29 = vpack.c.bf16 %v518_v25, %v517_v24  ;;  %v249_v30 = vadd.f32 %v248_v26, %v9292_v9  ;;  %v9326_v31 = vpop.f32.mrb[5].mxu0  ;;  %v445_v25 = vld [vmem:[%s13045_s0 + $0x40] sm:$0xff] }
  0xe7   :  { %13129 = vst [vmem:[#allocation9_spill] sm:$0xff] %v9326_v31  ;;  %v9328_v32 = vpop.f32.mrb[5].mxu1  ;;  %v252_v33 = vpop.f32.mrb[6].mxu0  ;;  %v9411_v26 = vadd.f32 %v358_v28, %v9292_v9 }
  0xe8   :  { %13130 = vst [vmem:[#allocation10_spill] sm:$0xff] %v9328_v32  ;;  %v9333_v35 = vpop.f32.mrb[6].mxu1  ;;  %v9335_v36 = vadd.f32 %v439_v27, %v249_v30  ;;  %v253_v37 = vadd.f32 %v252_v33, %v9292_v9  ;;  %v9338_v38 = vpop.f32.mrb[7].mxu0  ;;  %1306 = vrot.lane.b32.xlu0 %v249_v30, %s9024_s19  ;;  %8249 = vmatprep.mubr.msk.bf16.mxu1 %vm616_vm1, %v557_v29  ;;  %v458_v32 = vld [vmem:[%s13045_s0 + $0xa8] sm:$0xff] }
  0xe9   :  { %13131 = vst [vmem:[#allocation11_spill] sm:$0xff] %v9338_v38  ;;  %v9342_v39 = vpop.f32.mrb[7].mxu1 }
  0xea   :  { %13132 = vst [vmem:[#allocation12_spill] sm:$0xff] %v9342_v39  ;;  %v9344_v40 = vadd.f32 %v440_v34, %v253_v37  ;;  %v519_v41 = vmax.f32 %v9335_v36, 0.0 }
  0xec   :  { %v520_v42 = vmax.f32 %v9344_v40, 0.0  ;;  %1308 = vrot.lane.b32.xlu0 %v253_v37, %s9024_s19 }
  0xed   :  { %v258_v43 = vpop.f32.mrb[8].mxu0 }
  0xee   :  { %v9352_v45 = vpop.f32.mrb[8].mxu1  ;;  %v558_v46 = vpack.c.bf16 %v520_v42, %v519_v41  ;;  %v259_v47 = vadd.f32 %v258_v43, %v9292_v9  ;;  %v9355_v48 = vpop.f32.mrb[9].mxu0  ;;  %v446_v41 = vld [vmem:[%s13045_s0 + $0x48] sm:$0xff] }
  0xef   :  { %13133 = vst [vmem:[#allocation13_spill] sm:$0xff] %v9355_v48  ;;  %v9357_v49 = vpop.f32.mrb[9].mxu1  ;;  %v262_v50 = vpop.f32.mrb[10].mxu0 }
  0xf0   :  { %13134 = vst [vmem:[#allocation14_spill] sm:$0xff] %v9357_v49  ;;  %v9362_v52 = vpop.f32.mrb[10].mxu1  ;;  %v9364_v53 = vadd.f32 %v441_v44, %v259_v47  ;;  %v263_v54 = vadd.f32 %v262_v50, %v9292_v9  ;;  %v9367_v55 = vpop.f32.mrb[11].mxu0  ;;  %1310 = vrot.lane.b32.xlu0 %v259_v47, %s9024_s19  ;;  %8250 = vmatmul.mubr.msk.bf16.vlgmr.msra.gmra.mrb[36].mxu1 %vm616_vm1, %v558_v46 }
  0xf1   :  { %13135 = vst [vmem:[#allocation15_spill] sm:$0xff] %v9367_v55  ;;  %v9371_v56 = vpop.f32.mrb[11].mxu1  ;;  %v9436_v47 = vadd.f32 %v9297_v12, %v9292_v9 }
  0xf2   :  { %13136 = vst [vmem:[#allocation16_spill] sm:$0xff] %v9371_v56  ;;  %v9373_v57 = vadd.f32 %v442_v51, %v263_v54  ;;  %v521_v58 = vmax.f32 %v9364_v53, 0.0 }
  0xf4   :  { %v522_v59 = vmax.f32 %v9373_v57, 0.0  ;;  %1312 = vrot.lane.b32.xlu0 %v263_v54, %s9024_s19 }
  0xf5   :  { %v268_v60 = vpop.f32.mrb[12].mxu0 }
  0xf6   :  { %v9381_v62 = vpop.f32.mrb[12].mxu1  ;;  %v559_v63 = vpack.c.bf16 %v522_v59, %v521_v58  ;;  %v269_v0 = vadd.f32 %v268_v60, %v9292_v9  ;;  %v9384_v2 = vpop.f32.mrb[13].mxu0  ;;  %v447_v59 = vld [vmem:[%s13045_s0 + $0x50] sm:$0xff] }
  0xf7   :  { %13137 = vst [vmem:[#allocation17_spill] sm:$0xff] %v9384_v2  ;;  %v9386_v3 = vpop.f32.mrb[13].mxu1  ;;  %v272_v4 = vpop.f32.mrb[14].mxu0 }
  0xf8   :  { %13138 = vst [vmem:[#allocation18_spill] sm:$0xff] %v9386_v3  ;;  %v9391_v5 = vpop.f32.mrb[14].mxu1  ;;  %v9393_v8 = vadd.f32 %v443_v61, %v269_v0  ;;  %v273_v10 = vadd.f32 %v272_v4, %v9292_v9  ;;  %v9396_v11 = vpop.f32.mrb[15].mxu0  ;;  %1314 = vrot.lane.b32.xlu0 %v269_v0, %s9024_s19  ;;  %8253 = vmatprep.mubr.msk.bf16.mxu1 %vm616_vm1, %v559_v63 }
  0xf9   :  { %13139 = vst [vmem:[#allocation19_spill] sm:$0xff] %v9396_v11  ;;  %v9400_v13 = vpop.f32.mrb[15].mxu1 }
  0xfa   :  { %13140 = vst [vmem:[#allocation20_spill] sm:$0xff] %v9400_v13  ;;  %v9402_v16 = vadd.f32 %v444_v1, %v273_v10  ;;  %v523_v17 = vmax.f32 %v9393_v8, 0.0  ;;  %v448_v1 = vld [vmem:[%s13045_s0 + $0x58] sm:$0xff] }
  0xfc   :  { %v524_v20 = vmax.f32 %v9402_v16, 0.0  ;;  %1316 = vrot.lane.b32.xlu0 %v273_v10, %s9024_s19 }
  0xfd   :  { %v278_v24 = vpop.f32.mrb[16].mxu0 }
  0xfe   :  { %v9413_v27 = vpop.f32.mrb[16].mxu1  ;;  %v560_v29 = vpack.c.bf16 %v524_v20, %v523_v17  ;;  %v279_v30 = vadd.f32 %v278_v24, %v9292_v9  ;;  %v9416_v33 = vpop.f32.mrb[17].mxu0 }
  0xff   :  { %13141 = vst [vmem:[#allocation21_spill] sm:$0xff] %v9416_v33  ;;  %v9418_v34 = vpop.f32.mrb[17].mxu1  ;;  %v282_v37 = vpop.f32.mrb[18].mxu0 }
 0x100   :  { %13142 = vst [vmem:[#allocation22_spill] sm:$0xff] %v9418_v34  ;;  %v9423_v42 = vpop.f32.mrb[18].mxu1  ;;  %v9425_v43 = vadd.f32 %v445_v25, %v279_v30  ;;  %v283_v28 = vadd.f32 %v282_v37, %v9292_v9  ;;  %v9428_v44 = vpop.f32.mrb[19].mxu0  ;;  %1318 = vrot.lane.b32.xlu1 %v279_v30, %s9024_s19  ;;  %8254 = vmatmul.mubr.msk.bf16.gmra.mrb[40].mxu1 %vm616_vm1, %v560_v29 }
 0x101   :  { %13143 = vst [vmem:[#allocation23_spill] sm:$0xff] %v9428_v44  ;;  %v9432_v46 = vpop.f32.mrb[19].mxu1  ;;  %1350 = vrot.lane.b32.xlu0 %v9411_v26, %s9024_s19 }
 0x102   :  { %13144 = vst [vmem:[#allocation24_spill] sm:$0xff] %v9432_v46  ;;  %v9440_v50 = vadd.f32 %v446_v41, %v283_v28  ;;  %v525_v51 = vmax.f32 %v9425_v43, 0.0 }
 0x104   :  { %v526_v54 = vmax.f32 %v9440_v50, 0.0  ;;  %1320 = vrot.lane.b32.xlu1 %v283_v28, %s9024_s19  ;;  %v449_v28 = vld [vmem:[%s13045_s0 + $0x60] sm:$0xff] }
 0x105   :  { %v288_v58 = vpop.f32.mrb[20].mxu0  ;;  %1346 = vrot.lane.b32.xlu0 %v9436_v47, %s9024_s19 }
 0x106   :  { %v9450_v12 = vpop.f32.mrb[20].mxu1  ;;  %v561_v60 = vpack.c.bf16 %v526_v54, %v525_v51  ;;  %v289_v61 = vadd.f32 %v288_v58, %v9292_v9  ;;  %v9453_v63 = vpop.f32.mrb[21].mxu0 }
 0x107   :  { %13145 = vst [vmem:[#allocation25_spill] sm:$0xff] %v9453_v63  ;;  %v9455_v0 = vpop.f32.mrb[21].mxu1  ;;  %v292_v4 = vpop.f32.mrb[22].mxu0 }
 0x108   :  { %13146 = vst [vmem:[#allocation26_spill] sm:$0xff] %v9455_v0  ;;  %v9460_v10 = vpop.f32.mrb[22].mxu1  ;;  %v9462_v17 = vadd.f32 %v447_v59, %v289_v61  ;;  %v293_v20 = vadd.f32 %v292_v4, %v9292_v9  ;;  %v9465_v24 = vpop.f32.mrb[23].mxu0  ;;  %1322 = vrot.lane.b32.xlu1 %v289_v61, %s9024_s19  ;;  %8257 = vmatprep.mubr.msk.bf16.mxu1 %vm616_vm1, %v561_v60  ;;  %v450_v4 = vld [vmem:[%s13045_s0 + $0x68] sm:$0xff] }
 0x109   :  { %13147 = vst [vmem:[#allocation27_spill] sm:$0xff] %v9465_v24  ;;  %v9469_v25 = vpop.f32.mrb[23].mxu1  ;;  %v452_v24 = vld [vmem:[%s13045_s0 + $0x78] sm:$0xff] }
 0x10a   :  { %13148 = vst [vmem:[#allocation28_spill] sm:$0xff] %v9469_v25  ;;  %v9471_v29 = vadd.f32 %v448_v1, %v293_v20  ;;  %v527_v30 = vmax.f32 %v9462_v17, 0.0 }
 0x10c   :  { %v528_v37 = vmax.f32 %v9471_v29, 0.0  ;;  %1324 = vrot.lane.b32.xlu1 %v293_v20, %s9024_s19 }
 0x10d   :  { %v298_v41 = vpop.f32.mrb[24].mxu0 }
 0x10e   :  { %v9479_v51 = vpop.f32.mrb[24].mxu1  ;;  %v562_v54 = vpack.c.bf16 %v528_v37, %v527_v30  ;;  %v299_v58 = vadd.f32 %v298_v41, %v9292_v9  ;;  %v9482_v59 = vpop.f32.mrb[25].mxu0 }
 0x10f   :  { %13149 = vst [vmem:[#allocation29_spill] sm:$0xff] %v9482_v59  ;;  %v9484_v60 = vpop.f32.mrb[25].mxu1  ;;  %v302_v61 = vpop.f32.mrb[26].mxu0 }
 0x110   :  { %13150 = vst [vmem:[#allocation30_spill] sm:$0xff] %v9484_v60  ;;  %v9489_v1 = vpop.f32.mrb[26].mxu1  ;;  %v9491_v20 = vadd.f32 %v449_v28, %v299_v58  ;;  %v303_v25 = vadd.f32 %v302_v61, %v9292_v9  ;;  %v9494_v0 = vpop.f32.mrb[27].mxu0  ;;  %1326 = vrot.lane.b32.xlu1 %v299_v58, %s9024_s19  ;;  %8258 = vmatmul.mubr.msk.bf16.gmra.mrb[44].mxu1 %vm616_vm1, %v562_v54  ;;  %v451_v61 = vld [vmem:[%s13045_s0 + $0x70] sm:$0xff] }
 0x111   :  { %13151 = vst [vmem:[#allocation31_spill] sm:$0xff] %v9494_v0  ;;  %v9498_v30 = vpop.f32.mrb[27].mxu1 }
 0x112   :  { %13152 = vst [vmem:[#allocation32_spill] sm:$0xff] %v9498_v30  ;;  %v9500_v37 = vadd.f32 %v450_v4, %v303_v25  ;;  %v529_v41 = vmax.f32 %v9491_v20, 0.0 }
 0x114   :  { %v530_v60 = vmax.f32 %v9500_v37, 0.0  ;;  %1328 = vrot.lane.b32.xlu1 %v303_v25, %s9024_s19 }
 0x115   :  { %v308_v28 = vpop.f32.mrb[28].mxu0 }
 0x116   :  { %v9508_v0 = vpop.f32.mrb[28].mxu1  ;;  %v563_v58 = vpack.c.bf16 %v530_v60, %v529_v41  ;;  %v309_v54 = vadd.f32 %v308_v28, %v9292_v9  ;;  %v9511_v59 = vpop.f32.mrb[29].mxu0 }
 0x117   :  { %13153 = vst [vmem:[#allocation33_spill] sm:$0xff] %v9511_v59  ;;  %v9513_v4 = vpop.f32.mrb[29].mxu1  ;;  %v312_v30 = vpop.f32.mrb[30].mxu0  ;;  %v454_v59 = vld [vmem:[%s13045_s0 + $0x88] sm:$0xff] }
 0x118   :  { %13154 = vst [vmem:[#allocation34_spill] sm:$0xff] %v9513_v4  ;;  %v9518_v25 = vpop.f32.mrb[30].mxu1  ;;  %v9520_v46 = vadd.f32 %v451_v61, %v309_v54  ;;  %v313_v63 = vadd.f32 %v312_v30, %v9292_v9  ;;  %v9523_v44 = vpop.f32.mrb[31].mxu0  ;;  %1330 = vrot.lane.b32.xlu1 %v309_v54, %s9024_s19  ;;  %8261 = vmatprep.mubr.msk.bf16.mxu1 %vm616_vm1, %v563_v58  ;;  %v453_v54 = vld [vmem:[%s13045_s0 + $0x80] sm:$0xff] }
 0x119   :  { %13155 = vst [vmem:[#allocation35_spill] sm:$0xff] %v9523_v44  ;;  %v9527_v60 = vpop.f32.mrb[31].mxu1  ;;  %v363_v61 = vadd.f32 %v9333_v35, %v9292_v9 }
 0x11a   :  { %13156 = vst [vmem:[#allocation36_spill] sm:$0xff] %v9527_v60  ;;  %v9529_v41 = vadd.f32 %v452_v24, %v313_v63  ;;  %v531_v28 = vmax.f32 %v9520_v46, 0.0 }
 0x11c   :  { %v532_v4 = vmax.f32 %v9529_v41, 0.0  ;;  %1332 = vrot.lane.b32.xlu1 %v313_v63, %s9024_s19 }
 0x11d   :  { %v318_v30 = vpop.f32.mrb[32].mxu0 }
 0x11e   :  { %v9539_v44 = vpop.f32.mrb[32].mxu1  ;;  %v564_v58 = vpack.c.bf16 %v532_v4, %v531_v28  ;;  %v319_v24 = vadd.f32 %v318_v30, %v9292_v9  ;;  %v9542_v60 = vpop.f32.mrb[33].mxu0  ;;  %v9562_v4 = vadd.f32 %v9352_v45, %v9292_v9  ;;  %v8975_v30 = vld [vmem:[%s13046_s7] sm:$0xff]   ;;  %v9579_v45 = vadd.f32 %v9362_v52, %v9292_v9 }
 0x11f   :  { %13157 = vst [vmem:[#allocation37_spill] sm:$0xff] %v9542_v60  ;;  %v9547_v63 = vpop.f32.mrb[33].mxu1  ;;  %v322_v34 = vpop.f32.mrb[34].mxu0  ;;  %8289 = vmatprep.subr.bf16.mxu1 %v8975_v30  ;;  %v456_v60 = vld [vmem:[%s13045_s0 + $0x98] sm:$0xff] }
 0x120   :  { %13158 = vst [vmem:[#allocation38_spill] sm:$0xff] %v9547_v63  ;;  %v9549_v35 = vpop.f32.mrb[34].mxu1  ;;  %v9551_v13 = vadd.f32 %v453_v54, %v319_v24  ;;  %v9554_v33 = vadd.f32 %v322_v34, %v9292_v9  ;;  %v9556_v11 = vpop.f32.mrb[35].mxu0  ;;  %1352 = vrot.lane.b32.xlu1 %v363_v61, %s9024_s19  ;;  %1334 = vrot.lane.b32.xlu0 %v319_v24, %s9024_s19 }
 0x121   :  { %13159 = vst [vmem:[#allocation39_spill] sm:$0xff] %v9556_v11  ;;  %v9564_v28 = vpop.f32.mrb[35].mxu1  ;;  %8262 = vmatmul.mubr.msk.bf16.gmra.mrb[48].mxu1 %vm616_vm1, %v564_v58  ;;  %v455_v58 = vld [vmem:[%s13045_s0 + $0x90] sm:$0xff] }
 0x122   :  { %13160 = vst [vmem:[#allocation40_spill] sm:$0xff] %v9564_v28  ;;  %v9571_v34 = vadd.f32 %v454_v59, %v9554_v33  ;;  %8290 = vmatpush3.bf16.msra.mxu1 %v8975_v30  ;;  %v533_v54 = vmax.f32 %v9551_v13, 0.0 }
 0x124   :  { %v534_v24 = vmax.f32 %v9571_v34, 0.0  ;;  %1354 = vrot.lane.b32.xlu1 %v9562_v4, %s9024_s19 }
 0x125   :  { %v328_v28 = vpop.f32.mrb[36].mxu0 }
 0x126   :  { %v565_v59 = vpack.c.bf16 %v534_v24, %v533_v54  ;;  %v329_v63 = vadd.f32 %v328_v28, %v9292_v9  ;;  %v9585_v30 = vpop.f32.mrb[37].mxu0  ;;  %v379_v28 = vadd.f32 %v9381_v62, %v9292_v9  ;;  %v459_v24 = vld [vmem:[%s13045_s0 + $0xb0] sm:$0xff]  ;;  %v462_v62 = vld [vmem:[%s13045_s0 + $0xc8] sm:$0xff] }
 0x127   :  { %13161 = vst [vmem:[#allocation41_spill] sm:$0xff] %v9585_v30  ;;  %v332_v11 = vpop.f32.mrb[38].mxu0  ;;  %v457_v30 = vld [vmem:[%s13045_s0 + $0xa0] sm:$0xff]  ;;  %v9630_v39 = vadd.f32 %v459_v24, %v9436_v47  ;;  %v9637_v38 = vadd.f32 %v462_v62, %v363_v61  ;;  %v463_v62 = vld [vmem:[%s13045_s0 + $0xd0] sm:$0xff] }
 0x128   :  { %v9590_v3 = vadd.f32 %v455_v58, %v329_v63  ;;  %v333_v52 = vadd.f32 %v332_v11, %v9292_v9  ;;  %v9593_v56 = vpop.f32.mrb[39].mxu0  ;;  %1356 = vrot.lane.b32.xlu1 %v9579_v45, %s9024_s19  ;;  %1338 = vrot.lane.b32.xlu0 %v329_v63, %s9024_s19  ;;  %v353_v11 = vadd.f32 %v9307_v18, %v9292_v9  ;;  %v460_v58 = vld [vmem:[%s13045_s0 + $0xb8] sm:$0xff]  ;;  %v461_v63 = vld [vmem:[%s13045_s0 + $0xc0] sm:$0xff] }
 0x129   :  { %13162 = vst [vmem:[#allocation42_spill] sm:$0xff] %v9593_v56  ;;  %8265 = vmatprep.mubr.msk.bf16.mxu1 %vm616_vm1, %v565_v59  ;;  %v383_v18 = vadd.f32 %v9391_v5, %v9292_v9  ;;  %v539_v61 = vmax.f32 %v9630_v39, 0.0  ;;  %v9679_v31 = vadd.f32 %v463_v62, %v9562_v4  ;;  %v393_v4 = vadd.f32 %v9423_v42, %v9292_v9 }
 0x12a   :  { %v9601_v54 = vadd.f32 %v456_v60, %v333_v52  ;;  %v535_v60 = vmax.f32 %v9590_v3, 0.0  ;;  %v9632_v48 = vadd.f32 %v460_v58, %v353_v11 }
 0x12c   :  { %v536_v59 = vmax.f32 %v9601_v54, 0.0  ;;  %1358 = vrot.lane.b32.xlu1 %v379_v28, %s9024_s19  ;;  %1340 = vrot.lane.b32.xlu0 %v333_v52, %s9024_s19  ;;  %v9635_v52 = vadd.f32 %v461_v63, %v9411_v26  ;;  %v540_v58 = vmax.f32 %v9632_v48, 0.0  ;;  %v542_v63 = vmax.f32 %v9637_v38, 0.0 }
 0x12d   :  { %v338_v56 = vpop.f32.mrb[40].mxu0 }
 0x12e   :  { %v566_v2 = vpack.c.bf16 %v536_v59, %v535_v60  ;;  %v339_v55 = vadd.f32 %v338_v56, %v9292_v9  ;;  %v9627_v49 = vpop.f32.mrb[41].mxu0  ;;  %v8976_v56 = vld [vmem:[%s13046_s7 + $0x8] sm:$0xff]   ;;  %v465_v59 = vld [vmem:[%s13045_s0 + $0xe0] sm:$0xff] }
 0x12f   :  { %13163 = vst [vmem:[#allocation43_spill] sm:$0xff] %v9627_v49  ;;  %v342_v5 = vpop.f32.mrb[42].mxu0  ;;  %8291 = vmatprep.subr.bf16.mxu1 %v8976_v56  ;;  %v568_v49 = vpack.c.bf16 %v540_v58, %v539_v61  ;;  %v409_v58 = vadd.f32 %v9479_v51, %v9292_v9 }
 0x130   :  { %v9645_v60 = vadd.f32 %v457_v30, %v339_v55  ;;  %v343_v47 = vadd.f32 %v342_v5, %v9292_v9  ;;  %v9648_v24 = vpop.f32.mrb[43].mxu0  ;;  %1360 = vrot.lane.b32.xlu1 %v383_v18, %s9024_s19  ;;  %1342 = vrot.lane.b32.xlu0 %v339_v55, %s9024_s19  ;;  %v541_v30 = vmax.f32 %v9635_v52, 0.0  ;;  %v464_v55 = vld [vmem:[%s13045_s0 + $0xd8] sm:$0xff]  ;;  %v466_v5 = vld [vmem:[%s13045_s0 + $0xe8] sm:$0xff] }
 0x131   :  { %13164 = vst [vmem:[#allocation44_spill] sm:$0xff] %v9648_v24  ;;  %8266 = vmatmul.mubr.msk.bf16.gmra.mrb[52].mxu1 %vm616_vm1, %v566_v2  ;;  %v9686_v21 = vadd.f32 %v466_v5, %v383_v18  ;;  %v472_v5 = vld [vmem:[%s13045_s0 + $0x118] sm:$0xff] }
 0x132   :  { %v9653_v26 = vadd.f32 %v458_v32, %v343_v47  ;;  %8292 = vmatpush3.bf16.msra.mxu1 %v8976_v56  ;;  %v537_v32 = vmax.f32 %v9645_v60, 0.0  ;;  %v389_v56 = vadd.f32 %v9413_v27, %v9292_v9  ;;  %v569_v22 = vpack.c.bf16 %v542_v63, %v541_v30 }
 0x133   :  { %13165 = vst [vmem:[#allocation45_spill] sm:$0xff] %v9686_v21  ;;  %v399_v27 = vadd.f32 %v9450_v12, %v9292_v9  ;;  %v469_v12 = vld [vmem:[%s13045_s0 + $0x100] sm:$0xff]  ;;  %v546_v18 = vmax.f32 %v9686_v21, 0.0 }
 0x134   :  { %v538_v2 = vmax.f32 %v9653_v26, 0.0  ;;  %1336 = vrot.lane.b32.xlu1 %v9554_v33, %s9024_s19  ;;  %1344 = vrot.lane.b32.xlu0 %v343_v47, %s9024_s19  ;;  %v9682_v33 = vadd.f32 %v464_v55, %v9579_v45  ;;  %v9684_v47 = vadd.f32 %v465_v59, %v379_v28  ;;  %v403_v45 = vadd.f32 %v9460_v10, %v9292_v9  ;;  %v468_v10 = vld [vmem:[%s13045_s0 + $0xf8] sm:$0xff]  ;;  %v471_v59 = vld [vmem:[%s13045_s0 + $0x110] sm:$0xff] }
 0x135   :  { %v543_v28 = vmax.f32 %v9679_v31, 0.0  ;;  %v9725_v62 = vadd.f32 %v468_v10, %v393_v4 }
 0x136   :  { %v567_v24 = vpack.c.bf16 %v538_v2, %v537_v32  ;;  %v545_v42 = vmax.f32 %v9684_v47, 0.0  ;;  %v413_v32 = vadd.f32 %v9489_v1, %v9292_v9  ;;  %v423_v1 = vadd.f32 %v9518_v25, %v9292_v9  ;;  %v8977_v25 = vld [vmem:[%s13046_s7 + $0x10] sm:$0xff]  }
 0x137   :  { %8293 = vmatprep.subr.bf16.mxu1 %v8977_v25 }
 0x138   :  { %1348 = vrot.lane.b32.xlu0 %v353_v11, %s9024_s19  ;;  %8269 = vmatprep.mubr.msk.bf16.mxu1 %vm616_vm1, %v567_v24  ;;  %v544_v11 = vmax.f32 %v9682_v33, 0.0  ;;  %v9717_v24 = vadd.f32 %v469_v12, %v399_v27  ;;  %v571_v55 = vpack.c.bf16 %v546_v18, %v545_v42  ;;  %v429_v18 = vadd.f32 %v9539_v44, %v9292_v9  ;;  %v8978_v44 = vld [vmem:[%s13046_s7 + $0x18] sm:$0xff]  }
 0x139   :  { %8270 = vmatmul.mubr.msk.bf16.gmra.mrb[56].mxu1 %vm616_vm1, %v568_v49  ;;  %1362 = vrot.lane.b32.xlu1 %v389_v56, %s9024_s19  ;;  %v470_v49 = vld [vmem:[%s13045_s0 + $0x108] sm:$0xff] }
 0x13a   :  { %8273 = vmatprep.mubr.msk.bf16.mxu1 %vm616_vm1, %v569_v22  ;;  %v467_v22 = vld [vmem:[%s13045_s0 + $0xf0] sm:$0xff]  ;;  %13166 = vst [vmem:[#allocation46_spill] sm:$0xff] %v9717_v24  ;;  %v9719_v61 = vadd.f32 %v470_v49, %v403_v45  ;;  %v570_v30 = vpack.c.bf16 %v544_v11, %v543_v28  ;;  %v549_v2 = vmax.f32 %v9717_v24, 0.0  ;;  %v474_v28 = vld [vmem:[%s13045_s0 + $0x128] sm:$0xff]  ;;  %v9754_v11 = vadd.f32 %v471_v59, %v409_v58 }
 0x13b   :  { %v9723_v63 = vadd.f32 %v467_v22, %v389_v56  ;;  %v419_v56 = vadd.f32 %v9508_v0, %v9292_v9  ;;  %v9756_v0 = vadd.f32 %v472_v5, %v413_v32  ;;  %v9764_v42 = vadd.f32 %v474_v28, %v423_v1  ;;  %8294 = vmatpush3.bf16.msra.mxu1 %v8977_v25 }
 0x13c   :  { %1366 = vrot.lane.b32.xlu0 %v399_v27, %s9024_s19  ;;  %13167 = vst [vmem:[#allocation47_spill] sm:$0xff] %v9719_v61  ;;  %v550_v51 = vmax.f32 %v9719_v61, 0.0  ;;  %13168 = vst [vmem:[#allocation48_spill] sm:$0xff] %v9754_v11  ;;  %v551_v10 = vmax.f32 %v9754_v11, 0.0  ;;  %8295 = vmatprep.subr.bf16.mxu1 %v8978_v44 }
 0x13d   :  { %1364 = vrot.lane.b32.xlu1 %v393_v4, %s9024_s19  ;;  %v547_v27 = vmax.f32 %v9723_v63, 0.0  ;;  %v548_v4 = vmax.f32 %v9725_v62, 0.0  ;;  %13169 = vst [vmem:[#allocation49_spill] sm:$0xff] %v9756_v0  ;;  %13171 = vst [vmem:[#allocation51_spill] sm:$0xff] %v9764_v42 }
 0x13e   :  { %v573_v12 = vpack.c.bf16 %v550_v51, %v549_v2  ;;  %v475_v2 = vld [vmem:[%s13045_s0 + $0x130] sm:$0xff] }
 0x13f   :  { %v572_v22 = vpack.c.bf16 %v548_v4, %v547_v27  ;;  %8296 = vmatpush3.bf16.msra.mxu1 %v8978_v44  ;;  %v9787_v51 = vadd.f32 %v475_v2, %v429_v18  ;;  %v8979_v4 = vld [vmem:[%s13043_s4 + $0x20] sm:$0xff]  }
 0x140   :  { %1370 = vrot.lane.b32.xlu0 %v409_v58, %s9024_s19  ;;  %v552_v58 = vmax.f32 %v9756_v0, 0.0  ;;  %8357 = vmatprep.subr.bf16.mxu1 %v8979_v4 }
 0x141   :  { %8274 = vmatmul.mubr.msk.bf16.gmra.mrb[60].mxu1 %vm616_vm1, %v570_v30  ;;  %1368 = vrot.lane.b32.xlu1 %v403_v45, %s9024_s19  ;;  %v473_v45 = vld [vmem:[%s13045_s0 + $0x120] sm:$0xff]  ;;  %v433_v30 = vadd.f32 %v9549_v35, %v9292_v9  ;;  %v476_v9 = vld [vmem:[%s13045_s0 + $0x138] sm:$0xff]  ;;  %13172 = vst [vmem:[#allocation52_spill] sm:$0xff] %v9787_v51 }
 0x142   :  { %8277 = vmatprep.mubr.msk.bf16.mxu1 %vm616_vm1, %v571_v55  ;;  %v9762_v49 = vadd.f32 %v473_v45, %v419_v56  ;;  %v574_v35 = vpack.c.bf16 %v552_v58, %v551_v10  ;;  %v9803_v45 = vld [vmem:[%s13047_s6] ss:$0 sm:$0xff] }
 0x143   :  { %v9789_v59 = vadd.f32 %v476_v9, %v433_v30 }
 0x144   :  { %1374 = vrot.lane.b32.xlu0 %v419_v56, %s9024_s19  ;;  %13170 = vst [vmem:[#allocation50_spill] sm:$0xff] %v9762_v49  ;;  %v553_v55 = vmax.f32 %v9762_v49, 0.0  ;;  %v555_v56 = vmax.f32 %v9787_v51, 0.0 }
 0x145   :  { %1372 = vrot.lane.b32.xlu1 %v413_v32, %s9024_s19  ;;  %v554_v32 = vmax.f32 %v9764_v42, 0.0  ;;  %13173 = vst [vmem:[#allocation53_spill] sm:$0xff] %v9789_v59 }
 0x147   :  { %v575_v5 = vpack.c.bf16 %v554_v32, %v553_v55 }
 0x148   :  { %1378 = vrot.lane.b32.xlu0 %v429_v18, %s9024_s19 }
 0x149   :  { %8278 = vmatmul.mubr.msk.bf16.gmra.mrb[64].mxu1 %vm616_vm1, %v572_v22  ;;  %1376 = vrot.lane.b32.xlu1 %v423_v1, %s9024_s19  ;;  %v556_v1 = vmax.f32 %v9789_v59, 0.0 }
 0x14a   :  { %8281 = vmatprep.mubr.msk.bf16.mxu1 %vm616_vm1, %v573_v12 }
 0x14b   :  { %v576_v27 = vpack.c.bf16 %v556_v1, %v555_v56 }
 0x14d   :  { %1380 = vrot.lane.b32.xlu1 %v433_v30, %s9024_s19 }
 0x151   :  { %8282 = vmatmul.mubr.msk.bf16.gmra.mrb[68].mxu1 %vm616_vm1, %v574_v35 }
 0x152   :  { %8285 = vmatprep.mubr.msk.bf16.mxu1 %vm616_vm1, %v575_v5 }
 0x159   :  { %8286 = vmatmul.mubr.msk.bf16.gmra.mrb[72].mxu1 %vm616_vm1, %v576_v27 }
 0x1c3   :  { %v8251_v28 = vpop.f32.mrb[36].mxu1 }
 0x1c4   :  { %v720_v25 = vadd.f32 %v8251_v28, %v9803_v45  ;;  %v711_v12 = vpop.f32.mrb[37].mxu1 }
 0x1c5   :  { %v712_v18 = vadd.f32 %v9803_v45, %v711_v12  ;;  %v8252_v22 = vpop.f32.mrb[38].mxu1 }
 0x1c6   :  { %v723_v10 = vadd.f32 %v8252_v22, %v9803_v45  ;;  %v714_v58 = vpop.f32.mrb[39].mxu1  ;;  %v872_v44 = vmax.f32 %v720_v25, 0.0 }
 0x1c7   :  { %v715_v30 = vadd.f32 %v9803_v45, %v714_v58  ;;  %v870_v32 = vmax.f32 %v712_v18, 0.0 }
 0x1c8   :  { %v873_v55 = vmax.f32 %v723_v10, 0.0 }
 0x1c9   :  { %v871_v2 = vmax.f32 %v715_v30, 0.0 }
 0x1ca   :  { %v911_v9 = vpack.c.bf16 %v873_v55, %v872_v44 }
 0x1cb   :  { %v910_v35 = vpack.c.bf16 %v871_v2, %v870_v32 }
 0x1cd   :  { %8297 = vmatprep.mubr.msk.bf16.mxu1 %vm616_vm1, %v910_v35 }
 0x1ce   :  { %8298 = vmatmul.mubr.msk.bf16.vlgmr.msra.gmra.mrb[76].mxu1 %vm616_vm1, %v911_v9 }
 0x1cf   :  { %8358 = vmatpush3.bf16.msra.mxu1 %v8979_v4 }
 0x1d3   :  { %v8255_v5 = vpop.f32.mrb[40].mxu1 }
 0x1d4   :  { %v736_v56 = vadd.f32 %v8255_v5, %v9803_v45  ;;  %v727_v1 = vpop.f32.mrb[41].mxu1 }
 0x1d5   :  { %v728_v27 = vadd.f32 %v9803_v45, %v727_v1  ;;  %v8256_v28 = vpop.f32.mrb[42].mxu1 }
 0x1d6   :  { %v739_v12 = vadd.f32 %v8256_v28, %v9803_v45  ;;  %v730_v25 = vpop.f32.mrb[43].mxu1  ;;  %v876_v22 = vmax.f32 %v736_v56, 0.0 }
 0x1d7   :  { %v731_v18 = vadd.f32 %v9803_v45, %v730_v25  ;;  %v874_v58 = vmax.f32 %v728_v27, 0.0 }
 0x1d8   :  { %v877_v10 = vmax.f32 %v739_v12, 0.0 }
 0x1d9   :  { %v875_v30 = vmax.f32 %v731_v18, 0.0 }
 0x1da   :  { %v913_v44 = vpack.c.bf16 %v877_v10, %v876_v22 }
 0x1db   :  { %v912_v55 = vpack.c.bf16 %v875_v30, %v874_v58 }
 0x1dd   :  { %8301 = vmatprep.mubr.msk.bf16.mxu1 %vm616_vm1, %v912_v55 }
 0x1de   :  { %8302 = vmatmul.mubr.msk.bf16.gmra.mrb[80].mxu1 %vm616_vm1, %v913_v44 }
 0x1e3   :  { %v8259_v4 = vpop.f32.mrb[44].mxu1 }
 0x1e4   :  { %v752_v32 = vadd.f32 %v8259_v4, %v9803_v45  ;;  %v743_v2 = vpop.f32.mrb[45].mxu1 }
 0x1e5   :  { %v744_v9 = vadd.f32 %v9803_v45, %v743_v2  ;;  %v8260_v35 = vpop.f32.mrb[46].mxu1 }
 0x1e6   :  { %v755_v5 = vadd.f32 %v8260_v35, %v9803_v45  ;;  %v746_v1 = vpop.f32.mrb[47].mxu1  ;;  %v880_v27 = vmax.f32 %v752_v32, 0.0 }
 0x1e7   :  { %v747_v56 = vadd.f32 %v9803_v45, %v746_v1  ;;  %v878_v12 = vmax.f32 %v744_v9, 0.0 }
 0x1e8   :  { %v881_v28 = vmax.f32 %v755_v5, 0.0 }
 0x1e9   :  { %v879_v25 = vmax.f32 %v747_v56, 0.0 }
 0x1ea   :  { %v915_v18 = vpack.c.bf16 %v881_v28, %v880_v27 }
 0x1eb   :  { %v914_v22 = vpack.c.bf16 %v879_v25, %v878_v12 }
 0x1ed   :  { %8305 = vmatprep.mubr.msk.bf16.mxu1 %vm616_vm1, %v914_v22 }
 0x1ee   :  { %8306 = vmatmul.mubr.msk.bf16.gmra.mrb[84].mxu1 %vm616_vm1, %v915_v18 }
 0x1f4   :  { %v8263_v10 = vpop.f32.mrb[48].mxu1 }
 0x1f5   :  { %v768_v58 = vadd.f32 %v8263_v10, %v9803_v45  ;;  %v759_v30 = vpop.f32.mrb[49].mxu1 }
 0x1f6   :  { %v760_v44 = vadd.f32 %v9803_v45, %v759_v30  ;;  %v8264_v55 = vpop.f32.mrb[50].mxu1 }
 0x1f7   :  { %v771_v4 = vadd.f32 %v8264_v55, %v9803_v45  ;;  %v762_v2 = vpop.f32.mrb[51].mxu1  ;;  %v884_v9 = vmax.f32 %v768_v58, 0.0 }
 0x1f8   :  { %v763_v32 = vadd.f32 %v9803_v45, %v762_v2  ;;  %v882_v5 = vmax.f32 %v760_v44, 0.0 }
 0x1f9   :  { %v885_v35 = vmax.f32 %v771_v4, 0.0 }
 0x1fa   :  { %v883_v1 = vmax.f32 %v763_v32, 0.0 }
 0x1fb   :  { %v917_v56 = vpack.c.bf16 %v885_v35, %v884_v9 }
 0x1fc   :  { %v916_v27 = vpack.c.bf16 %v883_v1, %v882_v5 }
 0x1fe   :  { %8309 = vmatprep.mubr.msk.bf16.mxu1 %vm616_vm1, %v916_v27 }
 0x1ff   :  { %8310 = vmatmul.mubr.msk.bf16.gmra.mrb[88].mxu1 %vm616_vm1, %v917_v56 }
 0x204   :  { %v8267_v28 = vpop.f32.mrb[52].mxu1 }
 0x205   :  { %v784_v12 = vadd.f32 %v8267_v28, %v9803_v45  ;;  %v775_v25 = vpop.f32.mrb[53].mxu1 }
 0x206   :  { %v776_v18 = vadd.f32 %v9803_v45, %v775_v25  ;;  %v8268_v22 = vpop.f32.mrb[54].mxu1 }
 0x207   :  { %v787_v10 = vadd.f32 %v8268_v22, %v9803_v45  ;;  %v778_v30 = vpop.f32.mrb[55].mxu1  ;;  %v888_v44 = vmax.f32 %v784_v12, 0.0 }
 0x208   :  { %v779_v58 = vadd.f32 %v9803_v45, %v778_v30  ;;  %v886_v4 = vmax.f32 %v776_v18, 0.0 }
 0x209   :  { %v889_v55 = vmax.f32 %v787_v10, 0.0 }
 0x20a   :  { %v887_v2 = vmax.f32 %v779_v58, 0.0 }
 0x20b   :  { %v919_v32 = vpack.c.bf16 %v889_v55, %v888_v44 }
 0x20c   :  { %v918_v9 = vpack.c.bf16 %v887_v2, %v886_v4  ;;  %v8271_v35 = vpop.f32.mrb[56].mxu1 }
 0x20d   :  { %v800_v5 = vadd.f32 %v8271_v35, %v9803_v45  ;;  %v791_v1 = vpop.f32.mrb[57].mxu1 }
 0x20e   :  { %v792_v56 = vadd.f32 %v9803_v45, %v791_v1  ;;  %8313 = vmatprep.mubr.msk.bf16.mxu1 %vm616_vm1, %v918_v9  ;;  %v8272_v27 = vpop.f32.mrb[58].mxu1 }
 0x20f   :  { %v803_v28 = vadd.f32 %v8272_v27, %v9803_v45  ;;  %8314 = vmatmul.mubr.msk.bf16.gmra.mrb[92].mxu1 %vm616_vm1, %v919_v32  ;;  %v794_v25 = vpop.f32.mrb[59].mxu1  ;;  %v892_v18 = vmax.f32 %v800_v5, 0.0 }
 0x210   :  { %v795_v12 = vadd.f32 %v9803_v45, %v794_v25  ;;  %v890_v10 = vmax.f32 %v792_v56, 0.0 }
 0x211   :  { %v893_v22 = vmax.f32 %v803_v28, 0.0 }
 0x212   :  { %v891_v30 = vmax.f32 %v795_v12, 0.0 }
 0x213   :  { %v921_v58 = vpack.c.bf16 %v893_v22, %v892_v18 }
 0x214   :  { %v920_v44 = vpack.c.bf16 %v891_v30, %v890_v10  ;;  %v8275_v55 = vpop.f32.mrb[60].mxu1 }
 0x215   :  { %v816_v4 = vadd.f32 %v8275_v55, %v9803_v45  ;;  %v807_v2 = vpop.f32.mrb[61].mxu1 }
 0x216   :  { %v808_v9 = vadd.f32 %v9803_v45, %v807_v2  ;;  %v8276_v35 = vpop.f32.mrb[62].mxu1  ;;  %8317 = vmatprep.mubr.msk.bf16.mxu1 %vm616_vm1, %v920_v44 }
 0x217   :  { %v819_v32 = vadd.f32 %v8276_v35, %v9803_v45  ;;  %v810_v1 = vpop.f32.mrb[63].mxu1  ;;  %8318 = vmatmul.mubr.msk.bf16.gmra.mrb[96].mxu1 %vm616_vm1, %v921_v58  ;;  %v896_v56 = vmax.f32 %v816_v4, 0.0 }
 0x218   :  { %v811_v5 = vadd.f32 %v9803_v45, %v810_v1  ;;  %v894_v28 = vmax.f32 %v808_v9, 0.0 }
 0x219   :  { %v897_v27 = vmax.f32 %v819_v32, 0.0 }
 0x21a   :  { %v895_v25 = vmax.f32 %v811_v5, 0.0 }
 0x21b   :  { %v923_v12 = vpack.c.bf16 %v897_v27, %v896_v56  ;;  %v8980_v56 = vld [vmem:[%s13043_s4 + $0x28] sm:$0xff]  }
 0x21c   :  { %v922_v18 = vpack.c.bf16 %v895_v25, %v894_v28  ;;  %v8279_v22 = vpop.f32.mrb[64].mxu1  ;;  %8359 = vmatprep.subr.bf16.mxu1 %v8980_v56 }
 0x21d   :  { %v832_v10 = vadd.f32 %v8279_v22, %v9803_v45  ;;  %v823_v30 = vpop.f32.mrb[65].mxu1  ;;  %8360 = vmatpush3.bf16.msra.mxu1 %v8980_v56 }
 0x21e   :  { %v824_v55 = vadd.f32 %v9803_v45, %v823_v30  ;;  %v8280_v44 = vpop.f32.mrb[66].mxu1  ;;  %8321 = vmatprep.mubr.msk.bf16.mxu1 %vm616_vm1, %v922_v18 }
 0x21f   :  { %v835_v2 = vadd.f32 %v8280_v44, %v9803_v45  ;;  %v826_v58 = vpop.f32.mrb[67].mxu1  ;;  %8322 = vmatmul.mubr.msk.bf16.gmra.mrb[100].mxu1 %vm616_vm1, %v923_v12  ;;  %v900_v9 = vmax.f32 %v832_v10, 0.0  ;;  %v8982_v44 = vld [vmem:[%s13043_s4 + $0x30] sm:$0xff]  }
 0x220   :  { %v827_v4 = vadd.f32 %v9803_v45, %v826_v58  ;;  %v898_v32 = vmax.f32 %v824_v55, 0.0  ;;  %8361 = vmatprep.subr.bf16.mxu1 %v8982_v44 }
 0x221   :  { %v901_v35 = vmax.f32 %v835_v2, 0.0  ;;  %8362 = vmatpush3.bf16.msra.mxu1 %v8982_v44 }
 0x222   :  { %v899_v1 = vmax.f32 %v827_v4, 0.0 }
 0x223   :  { %v925_v5 = vpack.c.bf16 %v901_v35, %v900_v9 }
 0x224   :  { %v924_v27 = vpack.c.bf16 %v899_v1, %v898_v32  ;;  %v8283_v28 = vpop.f32.mrb[68].mxu1  ;;  %v8983_v32 = vld [vmem:[%s13043_s4 + $0x38] sm:$0xff]  }
 0x225   :  { %v848_v25 = vadd.f32 %v8283_v28, %v9803_v45  ;;  %v839_v18 = vpop.f32.mrb[69].mxu1  ;;  %8363 = vmatprep.subr.bf16.mxu1 %v8983_v32 }
 0x226   :  { %v840_v22 = vadd.f32 %v9803_v45, %v839_v18  ;;  %v8284_v12 = vpop.f32.mrb[70].mxu1  ;;  %8325 = vmatprep.mubr.msk.bf16.mxu1 %vm616_vm1, %v924_v27  ;;  %8364 = vmatpush3.bf16.msra.mxu1 %v8983_v32  ;;  %v8986_v32 = vld [vmem:[%s13048_s5 + $0x18] sm:$0xff]  }
 0x227   :  { %v904_v10 = vmax.f32 %v848_v25, 0.0  ;;  %v851_v30 = vadd.f32 %v8284_v12, %v9803_v45  ;;  %v842_v55 = vpop.f32.mrb[71].mxu1  ;;  %8326 = vmatmul.mubr.msk.bf16.gmra.mrb[104].mxu1 %vm616_vm1, %v925_v5 }
 0x228   :  { %v902_v2 = vmax.f32 %v840_v22, 0.0  ;;  %v843_v58 = vadd.f32 %v9803_v45, %v842_v55 }
 0x229   :  { %v905_v4 = vmax.f32 %v851_v30, 0.0 }
 0x22a   :  { %v903_v9 = vmax.f32 %v843_v58, 0.0 }
 0x22b   :  { %v927_v35 = vpack.c.bf16 %v905_v4, %v904_v10  ;;  %v13055_v4 = vmov 0.0  }
 0x22c   :  { %v926_v1 = vpack.c.bf16 %v903_v9, %v902_v2  ;;  %v8287_v56 = vpop.f32.mrb[72].mxu1  ;;  %8337 = vmatprep.subr.bf16.mxu0 %v13055_v4  ;;  %v8981_v9 = vld [vmem:[%s13048_s5] sm:$0xff]   ;;  %8521 = vmatprep.subr.bf16.mxu1 %v13055_v4 }
 0x22d   :  { %v864_v5 = vadd.f32 %v8287_v56, %v9803_v45  ;;  %v855_v27 = vpop.f32.mrb[73].mxu1  ;;  %8338 = vmatpush3.bf16.msra.mxu0 %v8981_v9  ;;  %8345 = vmatprep.mubr.msk.bf16.mxu0 %vm9026_vm2, %v13055_v4 }
 0x22e   :  { %v856_v28 = vadd.f32 %v9803_v45, %v855_v27  ;;  %v8288_v25 = vpop.f32.mrb[74].mxu1  ;;  %8329 = vmatprep.mubr.msk.bf16.mxu1 %vm616_vm1, %v926_v1  ;;  %8339 = vmatprep.subr.bf16.mxu0 %v13055_v4  ;;  %v1303_v1 = vpop.permute.xlu0 %1302  ;;  %v9897_v27 = vld [vmem:[%s13049_s8] ss:$0 sm:$0xff] }
 0x22f   :  { %v908_v18 = vmax.f32 %v864_v5, 0.0  ;;  %v867_v22 = vadd.f32 %v8288_v25, %v9803_v45  ;;  %v858_v12 = vpop.f32.mrb[75].mxu1  ;;  %8330 = vmatmul.mubr.msk.bf16.gmra.mrb[108].mxu1 %vm616_vm1, %v927_v35  ;;  %v8985_v35 = vld [vmem:[%s13048_s5 + $0x10] sm:$0xff]  }
 0x230   :  { %v906_v10 = vmax.f32 %v856_v28, 0.0  ;;  %v859_v30 = vadd.f32 %v9803_v45, %v858_v12  ;;  %v8984_v45 = vld [vmem:[%s13048_s5 + $0x8] sm:$0xff]  }
 0x231   :  { %v909_v55 = vmax.f32 %v867_v22, 0.0  ;;  %8340 = vmatpush3.bf16.msra.mxu0 %v8984_v45 }
 0x232   :  { %v907_v44 = vmax.f32 %v859_v30, 0.0  ;;  %8341 = vmatprep.subr.bf16.mxu0 %v13055_v4  ;;  %v1305_v56 = vpop.permute.xlu0 %1304 }
 0x233   :  { %v929_v2 = vpack.c.bf16 %v909_v55, %v908_v18 }
 0x234   :  { %v928_v58 = vpack.c.bf16 %v907_v44, %v906_v10 }
 0x235   :  { %8342 = vmatpush3.bf16.msra.mxu0 %v8985_v35  ;;  %v9908_v35 = vpop.permute.xlu1 %1318 }
 0x236   :  { %8333 = vmatprep.mubr.msk.bf16.mxu1 %vm616_vm1, %v928_v58  ;;  %8343 = vmatprep.subr.bf16.mxu0 %v13055_v4  ;;  %v1307_v5 = vpop.permute.xlu0 %1306 }
 0x237   :  { %8334 = vmatmul.mubr.msk.bf16.gmra.mrb[112].mxu1 %vm616_vm1, %v929_v2 }
 0x239   :  { %8344 = vmatpush3.bf16.msra.mxu0 %v8986_v32 }
 0x23a   :  { %8405 = vmatprep.subr.bf16.mxu0 %v13055_v4  ;;  %v1309_v22 = vpop.permute.xlu0 %1308 }
 0x2a1   :  { %v8299_v28 = vpop.f32.mrb[76].mxu1 }
 0x2a2   :  { %v1072_v25 = vadd.f32 %v8299_v28, %v9897_v27  ;;  %v1063_v18 = vpop.f32.mrb[77].mxu1 }
 0x2a3   :  { %v1064_v12 = vadd.f32 %v9897_v27, %v1063_v18  ;;  %v8300_v10 = vpop.f32.mrb[78].mxu1 }
 0x2a4   :  { %v1224_v30 = vadd.f32 %v1072_v25, %v9335_v36  ;;  %v1075_v55 = vadd.f32 %v8300_v10, %v9897_v27  ;;  %v1066_v44 = vpop.f32.mrb[79].mxu1 }
 0x2a5   :  { %v1222_v2 = vadd.f32 %v1064_v12, %v9309_v19  ;;  %v1067_v58 = vadd.f32 %v9897_v27, %v1066_v44  ;;  %v9918_v19 = vpop.permute.xlu0 %1310 }
 0x2a6   :  { %v9905_v9 = vadd.f32 %v1307_v5, %v1224_v30  ;;  %v1225_v45 = vadd.f32 %v1075_v55, %v9344_v40 }
 0x2a7   :  { %v9910_v32 = vadd.f32 %v1303_v1, %v1222_v2  ;;  %v1223_v28 = vadd.f32 %v1067_v58, %v9317_v23 }
 0x2a8   :  { %13174 = vst [vmem:[#allocation54_spill] sm:$0xff] %v9905_v9  ;;  %v1464_v18 = vmax.f32 %v9905_v9, 0.0  ;;  %v1536_v36 = vsel %vm616_vm1, %v9905_v9, -inf  ;;  %v9916_v25 = vadd.f32 %v1309_v22, %v1225_v45 }
 0x2a9   :  { %13175 = vst [vmem:[#allocation55_spill] sm:$0xff] %v9910_v32  ;;  %v1537_v12 = vrot.slane %v1536_v36, 4  ;;  %v1462_v5 = vmax.f32 %v9910_v32, 0.0  ;;  %v1522_v40 = vsel %vm616_vm1, %v9910_v32, -inf  ;;  %v9923_v10 = vadd.f32 %v1305_v56, %v1223_v28  ;;  %v9933_v28 = vpop.permute.xlu1 %1320  ;;  %v9935_v59 = vpop.permute.xlu0 %1312 }
 0x2aa   :  { %13176 = vst [vmem:[#allocation56_spill] sm:$0xff] %v9916_v25  ;;  %v1523_v1 = vrot.slane %v1522_v40, 4  ;;  %v1465_v23 = vmax.f32 %v9916_v25, 0.0  ;;  %v1543_v30 = vsel %vm616_vm1, %v9916_v25, -inf }
 0x2ab   :  { %13177 = vst [vmem:[#allocation57_spill] sm:$0xff] %v9923_v10  ;;  %v1538_v55 = vmax.f32 %v1536_v36, %v1537_v12  ;;  %v1544_v44 = vrot.slane %v1543_v30, 4  ;;  %v1463_v2 = vmax.f32 %v9923_v10, 0.0  ;;  %v1529_v58 = vsel %vm616_vm1, %v9923_v10, -inf }
 0x2ac   :  { %v1524_v45 = vmax.f32 %v1522_v40, %v1523_v1  ;;  %v1503_v4 = vpack.c.bf16 %v1465_v23, %v1464_v18  ;;  %v1530_v56 = vrot.slane %v1529_v58, 4 }
 0x2ad   :  { %v1539_v15 = vrot.slane %v1538_v55, 2  ;;  %v1545_v14 = vmax.f32 %v1543_v30, %v1544_v44  ;;  %v1502_v7 = vpack.c.bf16 %v1463_v2, %v1462_v5  ;;  %v9940_v44 = vpop.permute.xlu1 %1322 }
 0x2ae   :  { %v1525_v6 = vrot.slane %v1524_v45, 2  ;;  %v1531_v42 = vmax.f32 %v1529_v58, %v1530_v56 }
 0x2af   :  { %v1540_v22 = vmax.f32 %v1538_v55, %v1539_v15  ;;  %v1546_v36 = vrot.slane %v1545_v14, 2  ;;  %8365 = vmatprep.mubr.msk.bf16.mxu1 %vm616_vm1, %v1502_v7 }
 0x2b0   :  { %v1526_v12 = vmax.f32 %v1524_v45, %v1525_v6  ;;  %v1532_v9 = vrot.slane %v1531_v42, 2  ;;  %8366 = vmatmul.mubr.msk.bf16.vlgmr.msra.gmra.mrb[116].mxu1 %vm616_vm1, %v1503_v4  ;;  %v1315_v45 = vpop.permute.xlu0 %1314 }
 0x2b1   :  { %v1541_v40 = vrot.slane %v1540_v22, 1  ;;  %v1547_v18 = vmax.f32 %v1545_v14, %v1546_v36  ;;  %v8303_v1 = vpop.f32.mrb[80].mxu1 }
 0x2b2   :  { %v1527_v23 = vrot.slane %v1526_v12, 1  ;;  %v1533_v25 = vmax.f32 %v1531_v42, %v1532_v9  ;;  %v1088_v30 = vadd.f32 %v8303_v1, %v9897_v27  ;;  %v1079_v5 = vpop.f32.mrb[81].mxu1 }
 0x2b3   :  { %v1542_v2 = vmax.f32 %v1540_v22, %v1541_v40  ;;  %v1548_v58 = vrot.slane %v1547_v18, 1  ;;  %v1080_v15 = vadd.f32 %v9897_v27, %v1079_v5  ;;  %v8304_v7 = vpop.f32.mrb[82].mxu1 }
 0x2b4   :  { %v1528_v6 = vmax.f32 %v1526_v12, %v1527_v23  ;;  %v1534_v55 = vrot.slane %v1533_v25, 1  ;;  %v1228_v4 = vadd.f32 %v1088_v30, %v9393_v8  ;;  %v1082_v14 = vpop.f32.mrb[83].mxu1  ;;  %v1091_v36 = vadd.f32 %v8304_v7, %v9897_v27  ;;  %v9948_v30 = vpop.permute.xlu1 %1324 }
 0x2b5   :  { %v1804_v56 = vmax.f32 %v1542_v2, 0.0  ;;  %v2918_v42 = vpack.c.bf16 %v1542_v2, %v1542_v2  ;;  %v1549_v9 = vmax.f32 %v1547_v18, %v1548_v58  ;;  %v1226_v12 = vadd.f32 %v1080_v15, %v9364_v53 }
 0x2b6   :  { %v1802_v1 = vmax.f32 %v1528_v6, 0.0  ;;  %v2916_v49 = vpack.c.bf16 %v1528_v6, %v1528_v6  ;;  %v1535_v22 = vmax.f32 %v1533_v25, %v1534_v55  ;;  %v9945_v40 = vadd.f32 %v1315_v45, %v1228_v4 }
 0x2b7   :  { %v1844_v51 = vpack.c.bf16 %v1804_v56, %v1804_v56  ;;  %v1805_v5 = vmax.f32 %v1549_v9, 0.0  ;;  %v2919_v61 = vpack.c.bf16 %v1549_v9, %v1549_v9  ;;  %v3006_v18 = vunpack.c.l.b16 %v2918_v42 }
 0x2b8   :  { %13178 = vst [vmem:[#allocation58_spill] sm:$0xff] %v9945_v40  ;;  %v1842_v23 = vpack.c.bf16 %v1802_v1, %v1802_v1  ;;  %v1803_v0 = vmax.f32 %v1535_v22, 0.0  ;;  %v2917_v8 = vpack.c.bf16 %v1535_v22, %v1535_v22  ;;  %v3004_v58 = vunpack.c.l.b16 %v2916_v49 }
 0x2b9   :  { %v1941_v2 = vunpack.c.l.b16 %v1844_v51  ;;  %v1845_v7 = vpack.c.bf16 %v1805_v5, %v1805_v5  ;;  %v3007_v24 = vunpack.c.l.b16 %v2919_v61  ;;  %v1564_v55 = vsel %vm616_vm1, %v9945_v40, -inf }
 0x2ba   :  { %v1843_v6 = vpack.c.bf16 %v1803_v0, %v1803_v0  ;;  %v3005_v25 = vunpack.c.l.b16 %v2917_v8  ;;  %v1939_v4 = vunpack.c.l.b16 %v1842_v23  ;;  %v1565_v45 = vrot.slane %v1564_v55, 4  ;;  %v1317_v0 = vpop.permute.xlu0 %1316 }
 0x2bb   :  { %v9953_v53 = vadd.f32 %v9918_v19, %v1226_v12  ;;  %v1229_v15 = vadd.f32 %v1091_v36, %v9402_v16  ;;  %v1083_v51 = vadd.f32 %v9897_v27, %v1082_v14  ;;  %v1942_v49 = vunpack.c.l.b16 %v1845_v7  ;;  %v9967_v12 = vpop.permute.xlu1 %1326 }
 0x2bc   :  { %v1940_v56 = vunpack.c.l.b16 %v1843_v6  ;;  %v3044_v9 = vsel %vm1979_vm3, %v3005_v25, %v3004_v58  ;;  %v1566_v1 = vmax.f32 %v1564_v55, %v1565_v45 }
 0x2bd   :  { %13179 = vst [vmem:[#allocation59_spill] sm:$0xff] %v9953_v53  ;;  %v3045_v42 = vsel %vm1981_vm4, %v3006_v18, %v3044_v9  ;;  %v1550_v22 = vsel %vm616_vm1, %v9953_v53, -inf  ;;  %v9965_v36 = vadd.f32 %v1317_v0, %v1229_v15  ;;  %v1227_v8 = vadd.f32 %v1083_v51, %v9373_v57 }
 0x2be   :  { %v1980_v19 = vsel %vm1979_vm3, %v1940_v56, %v1939_v4  ;;  %v1551_v5 = vrot.slane %v1550_v22, 4  ;;  %v3046_v16 = vsel %vm1983_vm5, %v3007_v24, %v3045_v42  ;;  %v1567_v23 = vrot.slane %v1566_v1, 2 }
 0x2bf   :  { %13180 = vst [vmem:[#allocation60_spill] sm:$0xff] %v9965_v36  ;;  %v1982_v14 = vsel %vm1981_vm4, %v1941_v2, %v1980_v19  ;;  %v1571_v7 = vsel %vm616_vm1, %v9965_v36, -inf  ;;  %v1469_v25 = vmax.f32 %v9965_v36, 0.0  ;;  %v9978_v55 = vadd.f32 %v9935_v59, %v1227_v8 }
 0x2c0   :  { %v1552_v58 = vmax.f32 %v1550_v22, %v1551_v5  ;;  %v9972_v18 = vsel %vm1983_vm5, %v1942_v49, %v1982_v14  ;;  %v1568_v6 = vmax.f32 %v1566_v1, %v1567_v23  ;;  %v1572_v24 = vrot.slane %v1571_v7, 4  ;;  %v9988_v14 = vpop.permute.xlu1 %1328 }
 0x2c1   :  { %13181 = vst [vmem:[#allocation61_spill] sm:$0xff] %v9978_v55  ;;  %v8307_v4 = vpop.f32.mrb[84].mxu1  ;;  %v1468_v2 = vmax.f32 %v9945_v40, 0.0  ;;  %v1466_v45 = vmax.f32 %v9953_v53, 0.0  ;;  %v1467_v0 = vmax.f32 %v9978_v55, 0.0  ;;  %v1557_v49 = vsel %vm616_vm1, %v9978_v55, -inf }
 0x2c2   :  { %v1553_v57 = vrot.slane %v1552_v58, 2  ;;  %v1104_v15 = vadd.f32 %v8307_v4, %v9897_v27  ;;  %v1095_v56 = vpop.f32.mrb[85].mxu1  ;;  %v1569_v9 = vrot.slane %v1568_v6, 1  ;;  %v1573_v51 = vmax.f32 %v1571_v7, %v1572_v24 }
 0x2c3   :  { %v8308_v42 = vpop.f32.mrb[86].mxu1  ;;  %v1558_v59 = vrot.slane %v1557_v49, 4  ;;  %v1096_v19 = vadd.f32 %v9897_v27, %v1095_v56  ;;  %v1504_v23 = vpack.c.bf16 %v1467_v0, %v1466_v45  ;;  %v1505_v8 = vpack.c.bf16 %v1469_v25, %v1468_v2 }
 0x2c4   :  { %v1554_v1 = vmax.f32 %v1552_v58, %v1553_v57  ;;  %v1232_v22 = vadd.f32 %v1104_v15, %v9462_v17  ;;  %v1098_v5 = vpop.f32.mrb[87].mxu1  ;;  %v1107_v4 = vadd.f32 %v8308_v42, %v9897_v27  ;;  %v1574_v58 = vrot.slane %v1573_v51, 2 }
 0x2c5   :  { %v1559_v24 = vmax.f32 %v1557_v49, %v1558_v59  ;;  %v1230_v36 = vadd.f32 %v1096_v19, %v9425_v43  ;;  %8369 = vmatprep.mubr.msk.bf16.mxu1 %vm616_vm1, %v1504_v23  ;;  %v1570_v17 = vmax.f32 %v1568_v6, %v1569_v9  ;;  %v1331_v43 = vpop.permute.xlu1 %1330 }
 0x2c6   :  { %v1555_v7 = vrot.slane %v1554_v1, 1  ;;  %v9992_v61 = vadd.f32 %v9940_v44, %v1232_v22  ;;  %8370 = vmatmul.mubr.msk.bf16.gmra.mrb[120].mxu1 %vm616_vm1, %v1505_v8  ;;  %v1233_v45 = vadd.f32 %v1107_v4, %v9471_v29  ;;  %v1575_v49 = vmax.f32 %v1573_v51, %v1574_v58 }
 0x2c7   :  { %v1560_v15 = vrot.slane %v1559_v24, 2  ;;  %v10001_v44 = vadd.f32 %v9908_v35, %v1230_v36  ;;  %v1808_v6 = vmax.f32 %v1570_v17, 0.0  ;;  %v2922_v36 = vpack.c.bf16 %v1570_v17, %v1570_v17 }
 0x2c8   :  { %13182 = vst [vmem:[#allocation62_spill] sm:$0xff] %v9992_v61  ;;  %v1556_v57 = vmax.f32 %v1554_v1, %v1555_v7  ;;  %v1592_v25 = vsel %vm616_vm1, %v9992_v61, -inf  ;;  %v10006_v22 = vadd.f32 %v9948_v30, %v1233_v45  ;;  %v1576_v8 = vrot.slane %v1575_v49, 1 }
 0x2c9   :  { %v1593_v2 = vrot.slane %v1592_v25, 4  ;;  %v1561_v0 = vmax.f32 %v1559_v24, %v1560_v15  ;;  %13183 = vst [vmem:[#allocation63_spill] sm:$0xff] %v10001_v44  ;;  %v1578_v59 = vsel %vm616_vm1, %v10001_v44, -inf  ;;  %v10011_v4 = vpack.c.bf16 %v1808_v6, %v1808_v6  ;;  %v1333_v24 = vpop.permute.xlu1 %1332 }
 0x2ca   :  { %v2920_v56 = vpack.c.bf16 %v1556_v57, %v1556_v57  ;;  %13184 = vst [vmem:[#allocation64_spill] sm:$0xff] %v10006_v22  ;;  %v1579_v35 = vrot.slane %v1578_v59, 4  ;;  %v1806_v58 = vmax.f32 %v1556_v57, 0.0  ;;  %v1472_v30 = vmax.f32 %v9992_v61, 0.0 }
 0x2cb   :  { %v1594_v42 = vmax.f32 %v1592_v25, %v1593_v2  ;;  %v1562_v1 = vrot.slane %v1561_v0, 1  ;;  %v1099_v15 = vadd.f32 %v9897_v27, %v1098_v5  ;;  %v1577_v6 = vmax.f32 %v1575_v49, %v1576_v8 }
 0x2cc   :  { %v3008_v9 = vunpack.c.l.b16 %v2920_v56  ;;  %v1580_v7 = vmax.f32 %v1578_v59, %v1579_v35 }
 0x2cd   :  { %v10009_v19 = vmax.f32 %v1561_v0, %v1562_v1  ;;  %v1595_v23 = vrot.slane %v1594_v42, 2  ;;  %v10019_v0 = vunpack.c.l.b16 %v2922_v36  ;;  %v10033_v40 = vpop.permute.xlu1 %1352 }
 0x2ce   :  { %v3047_v29 = vsel %vm1985_vm6, %v3008_v9, %v3046_v16  ;;  %v1599_v16 = vsel %vm616_vm1, %v10006_v22, -inf  ;;  %v1581_v17 = vrot.slane %v1580_v7, 2  ;;  %v1231_v9 = vadd.f32 %v1099_v15, %v9440_v50 }
 0x2cf   :  { %v2921_v51 = vpack.c.bf16 %v10009_v19, %v10009_v19  ;;  %v1596_v2 = vmax.f32 %v1594_v42, %v1595_v23  ;;  %v1600_v45 = vrot.slane %v1599_v16, 4  ;;  %13185 = vst [vmem:[#allocation65_spill] sm:$0xff] %v10019_v0  ;;  %v1846_v42 = vpack.c.bf16 %v1806_v58, %v1806_v58 }
 0x2d0   :  { %v1582_v61 = vmax.f32 %v1580_v7, %v1581_v17  ;;  %v1473_v23 = vmax.f32 %v10006_v22, 0.0  ;;  %v10029_v36 = vadd.f32 %v9933_v28, %v1231_v9  ;;  %v1470_v7 = vmax.f32 %v10001_v44, 0.0  ;;  %v10039_v28 = vpop.permute.xlu0 %1350 }
 0x2d1   :  { %v3009_v25 = vunpack.c.l.b16 %v2921_v51  ;;  %v1601_v5 = vmax.f32 %v1599_v16, %v1600_v45  ;;  %v1597_v8 = vrot.slane %v1596_v2, 1  ;;  %v1807_v9 = vmax.f32 %v10009_v19, 0.0 }
 0x2d2   :  { %v8311_v56 = vpop.f32.mrb[88].mxu1  ;;  %13187 = vst [vmem:[#allocation67_spill] sm:$0xff] %v10029_v36  ;;  %v1583_v15 = vrot.slane %v1582_v61, 1  ;;  %v1471_v58 = vmax.f32 %v10029_v36, 0.0  ;;  %v1585_v16 = vsel %vm616_vm1, %v10029_v36, -inf  ;;  %v1507_v32 = vpack.c.bf16 %v1473_v23, %v1472_v30 }
 0x2d3   :  { %v1120_v1 = vadd.f32 %v8311_v56, %v9897_v27  ;;  %v1111_v57 = vpop.f32.mrb[89].mxu1  ;;  %v10025_v35 = vsel %vm1987_vm7, %v3009_v25, %v3047_v29  ;;  %v1602_v56 = vrot.slane %v1601_v5, 2  ;;  %v1809_v29 = vmax.f32 %v1577_v6, 0.0 }
 0x2d4   :  { %13186 = vst [vmem:[#allocation66_spill] sm:$0xff] %v10025_v35  ;;  %v8312_v51 = vpop.f32.mrb[90].mxu1  ;;  %v1112_v59 = vadd.f32 %v9897_v27, %v1111_v57  ;;  %v2923_v25 = vpack.c.bf16 %v1577_v6, %v1577_v6  ;;  %v1586_v17 = vrot.slane %v1585_v16, 4  ;;  %v1598_v44 = vmax.f32 %v1596_v2, %v1597_v8  ;;  %v10066_v23 = vpop.permute.xlu0 %1346 }
 0x2d5   :  { %v1236_v49 = vadd.f32 %v1120_v1, %v9520_v46  ;;  %v1114_v50 = vpop.f32.mrb[91].mxu1  ;;  %v1603_v46 = vmax.f32 %v1601_v5, %v1602_v56  ;;  %v1506_v1 = vpack.c.bf16 %v1471_v58, %v1470_v7  ;;  %v1123_v22 = vadd.f32 %v8312_v51, %v9897_v27 }
 0x2d6   :  { %v1234_v57 = vadd.f32 %v1112_v59, %v9491_v20  ;;  %v1584_v55 = vmax.f32 %v1582_v61, %v1583_v15  ;;  %v1587_v53 = vmax.f32 %v1585_v16, %v1586_v17  ;;  %v1943_v5 = vunpack.c.l.b16 %v1846_v42  ;;  %v10058_v61 = vpop.permute.xlu1 %1354 }
 0x2d7   :  { %v10041_v45 = vadd.f32 %v1331_v43, %v1236_v49  ;;  %v1604_v10 = vrot.slane %v1603_v46, 1  ;;  %8373 = vmatprep.mubr.msk.bf16.mxu1 %vm616_vm1, %v1506_v1  ;;  %v1237_v19 = vadd.f32 %v1123_v22, %v9529_v41  ;;  %v10053_v49 = vpack.c.bf16 %v1809_v29, %v1809_v29 }
 0x2d8   :  { %v10050_v43 = vadd.f32 %v9967_v12, %v1234_v57  ;;  %v10055_v20 = vunpack.c.l.b16 %v2923_v25  ;;  %v1588_v2 = vrot.slane %v1587_v53, 2  ;;  %8374 = vmatmul.mubr.msk.bf16.gmra.mrb[124].mxu1 %vm616_vm1, %v1507_v32  ;;  %v10060_v30 = vpack.c.bf16 %v1807_v9, %v1807_v9 }
 0x2d9   :  { %13188 = vst [vmem:[#allocation68_spill] sm:$0xff] %v10041_v45  ;;  %v1620_v6 = vsel %vm616_vm1, %v10041_v45, -inf  ;;  %v10064_v12 = vadd.f32 %v1333_v24, %v1237_v19  ;;  %v1812_v41 = vmax.f32 %v1598_v44, 0.0  ;;  %v2926_v22 = vpack.c.bf16 %v1598_v44, %v1598_v44 }
 0x2da   :  { %13189 = vst [vmem:[#allocation69_spill] sm:$0xff] %v10050_v43  ;;  %13190 = vst [vmem:[#allocation70_spill] sm:$0xff] %v10055_v20  ;;  %v1621_v59 = vrot.slane %v1620_v6, 4  ;;  %v1606_v51 = vsel %vm616_vm1, %v10050_v43, -inf  ;;  %v1810_v42 = vmax.f32 %v1584_v55, 0.0  ;;  %v1589_v8 = vmax.f32 %v1587_v53, %v1588_v2 }
 0x2db   :  { %13191 = vst [vmem:[#allocation71_spill] sm:$0xff] %v10064_v12  ;;  %v1605_v15 = vmax.f32 %v1603_v46, %v1604_v10  ;;  %v1607_v29 = vrot.slane %v1606_v51, 4  ;;  %v1627_v32 = vsel %vm616_vm1, %v10064_v12, -inf  ;;  %v1986_v7 = vsel %vm1985_vm6, %v1943_v5, %v9972_v18 }
 0x2dc   :  { %v1622_v56 = vmax.f32 %v1620_v6, %v1621_v59  ;;  %v1590_v16 = vrot.slane %v1589_v8, 1  ;;  %v1628_v24 = vrot.slane %v1627_v32, 4  ;;  %v2924_v25 = vpack.c.bf16 %v1584_v55, %v1584_v55  ;;  %v10077_v6 = vpop.permute.xlu1 %1356  ;;  %v1335_v55 = vpop.permute.xlu0 %1334 }
 0x2dd   :  { %v1608_v9 = vmax.f32 %v1606_v51, %v1607_v29  ;;  %v1115_v44 = vadd.f32 %v9897_v27, %v1114_v50  ;;  %v1944_v53 = vunpack.c.l.b16 %v10060_v30  ;;  %v10075_v10 = vpack.c.bf16 %v1812_v41, %v1812_v41 }
 0x2de   :  { %v1623_v17 = vrot.slane %v1622_v56, 2  ;;  %v1591_v46 = vmax.f32 %v1589_v8, %v1590_v16  ;;  %v1629_v1 = vmax.f32 %v1627_v32, %v1628_v24  ;;  %v3014_v19 = vunpack.c.l.b16 %v2926_v22 }
 0x2df   :  { %v2927_v18 = vpack.c.bf16 %v1605_v15, %v1605_v15  ;;  %v1609_v5 = vrot.slane %v1608_v9, 2  ;;  %v1235_v2 = vadd.f32 %v1115_v44, %v9500_v37  ;;  %v1850_v58 = vpack.c.bf16 %v1810_v42, %v1810_v42 }
 0x2e0   :  { %v1811_v51 = vmax.f32 %v1591_v46, 0.0  ;;  %v2925_v29 = vpack.c.bf16 %v1591_v46, %v1591_v46  ;;  %v1624_v50 = vmax.f32 %v1622_v56, %v1623_v17  ;;  %v3012_v30 = vunpack.c.l.b16 %v2924_v25  ;;  %v1339_v17 = vpop.permute.xlu0 %1338 }
 0x2e1   :  { %v1610_v41 = vmax.f32 %v1608_v9, %v1609_v5  ;;  %v1630_v20 = vrot.slane %v1629_v1, 2  ;;  %v10081_v8 = vadd.f32 %v9988_v14, %v1235_v2  ;;  %v1813_v22 = vmax.f32 %v1605_v15, 0.0  ;;  %v10091_v15 = vpop.permute.xlu1 %1358 }
 0x2e2   :  { %v8315_v57 = vpop.f32.mrb[92].mxu1  ;;  %v3013_v16 = vunpack.c.l.b16 %v2925_v29  ;;  %v1477_v24 = vmax.f32 %v10064_v12, 0.0  ;;  %v3015_v42 = vunpack.c.l.b16 %v2927_v18  ;;  %v1851_v9 = vpack.c.bf16 %v1811_v51, %v1811_v51 }
 0x2e3   :  { %v1127_v59 = vpop.f32.mrb[93].mxu1  ;;  %13192 = vst [vmem:[#allocation72_spill] sm:$0xff] %v10081_v8  ;;  %v1136_v37 = vadd.f32 %v8315_v57, %v9897_v27  ;;  %v1611_v44 = vrot.slane %v1610_v41, 1  ;;  %v1613_v56 = vsel %vm616_vm1, %v10081_v8, -inf  ;;  %v1625_v46 = vrot.slane %v1624_v50, 1 }
 0x2e4   :  { %v8316_v36 = vpop.f32.mrb[94].mxu1  ;;  %v1128_v25 = vadd.f32 %v9897_v27, %v1127_v59  ;;  %v3051_v14 = vsel %vm1979_vm3, %v3013_v16, %v3012_v30  ;;  %v1614_v5 = vrot.slane %v1613_v56, 4  ;;  %v1631_v57 = vmax.f32 %v1629_v1, %v1630_v20 }
 0x2e5   :  { %v10083_v32 = vpop.f32.mrb[95].mxu1  ;;  %v3052_v2 = vsel %vm1981_vm4, %v3014_v19, %v3051_v14  ;;  %v10094_v29 = vmax.f32 %v1610_v41, %v1611_v44  ;;  %v1475_v18 = vmax.f32 %v10081_v8, 0.0  ;;  %v10097_v12 = vpack.c.bf16 %v1813_v22, %v1813_v22 }
 0x2e6   :  { %v3053_v0 = vsel %vm1983_vm5, %v3015_v42, %v3052_v2  ;;  %v1615_v59 = vmax.f32 %v1613_v56, %v1614_v5  ;;  %v1240_v51 = vadd.f32 %v1136_v37, %v9590_v3  ;;  %v1988_v30 = vsel %vm1987_vm7, %v1944_v53, %v1986_v7  ;;  %v10115_v5 = vpop.permute.xlu1 %1360 }
 0x2e7   :  { %v1949_v16 = vunpack.c.l.b16 %v10075_v10  ;;  %v1474_v11 = vmax.f32 %v10050_v43, 0.0  ;;  %v1238_v19 = vadd.f32 %v1128_v25, %v9551_v13  ;;  %v1948_v20 = vunpack.c.l.b16 %v1851_v9  ;;  %v1341_v10 = vpop.permute.xlu0 %1340  ;;  %13194 = vst [vmem:[#allocation74_spill] sm:$0xff] %v10115_v5 }
 0x2e8   :  { %v1476_v1 = vmax.f32 %v10041_v45, 0.0  ;;  %v10106_v22 = vmax.f32 %v1624_v50, %v1625_v46  ;;  %v2928_v42 = vpack.c.bf16 %v10094_v29, %v10094_v29  ;;  %v1947_v3 = vunpack.c.l.b16 %v1850_v58 }
 0x2e9   :  { %v1632_v37 = vrot.slane %v1631_v57, 1  ;;  %v1616_v56 = vrot.slane %v1615_v59, 2  ;;  %v1508_v7 = vpack.c.bf16 %v1475_v18, %v1474_v11  ;;  %v10113_v9 = vadd.f32 %v1339_v17, %v1240_v51 }
 0x2ea   :  { %v8319_v35 = vpop.f32.mrb[96].mxu1  ;;  %v3016_v13 = vunpack.c.l.b16 %v2928_v42  ;;  %v1509_v25 = vpack.c.bf16 %v1477_v24, %v1476_v1  ;;  %v10118_v46 = vadd.f32 %v1335_v55, %v1238_v19  ;;  %v1139_v58 = vadd.f32 %v8316_v36, %v9897_v27 }
 0x2eb   :  { %v1143_v41 = vpop.f32.mrb[97].mxu1  ;;  %13193 = vst [vmem:[#allocation73_spill] sm:$0xff] %v10113_v9  ;;  %v1617_v50 = vmax.f32 %v1615_v59, %v1616_v56  ;;  %8377 = vmatprep.mubr.msk.bf16.mxu1 %vm616_vm1, %v1508_v7  ;;  %v13196_v11 = vunpack.c.l.b16 %v10011_v4  ;;  %v1993_v18 = vsel %vm1979_vm3, %v1948_v20, %v1947_v3  ;;  %v1816_v24 = vmax.f32 %v10106_v22, 0.0  ;;  %v1343_v7 = vpop.permute.xlu0 %1342 }
 0x2ec   :  { %v8320_v44 = vpop.f32.mrb[98].mxu1  ;;  %13195 = vst [vmem:[#allocation75_spill] sm:$0xff] %v10118_v46  ;;  %v3054_v17 = vsel %vm1985_vm6, %v3016_v13, %v3053_v0  ;;  %8378 = vmatmul.mubr.msk.bf16.gmra.mrb[128].mxu1 %vm616_vm1, %v1509_v25  ;;  %v1648_v59 = vsel %vm616_vm1, %v10113_v9, -inf  ;;  %v10134_v36 = vmax.f32 %v1631_v57, %v1632_v37  ;;  %v1241_v19 = vadd.f32 %v1139_v58, %v9601_v54 }
 0x2ed   :  { %v10110_v53 = vpop.f32.mrb[99].mxu1  ;;  %v10124_v2 = vsel %vm1989_vm8, %v13196_v11, %v1988_v30  ;;  %v1618_v4 = vrot.slane %v1617_v50, 1  ;;  %v1649_v51 = vrot.slane %v1648_v59, 4  ;;  %v1634_v30 = vsel %vm616_vm1, %v10118_v46, -inf }
 0x2ee   :  { %v1131_v0 = vadd.f32 %v9897_v27, %v10083_v32  ;;  %v1152_v20 = vadd.f32 %v8319_v35, %v9897_v27  ;;  %v1994_v42 = vsel %vm1981_vm4, %v1949_v16, %v1993_v18  ;;  %v1635_v57 = vrot.slane %v1634_v30, 4  ;;  %v1337_v35 = vpop.permute.xlu1 %1336 }
 0x2ef   :  { %v1619_v3 = vmax.f32 %v1617_v50, %v1618_v4  ;;  %v1650_v56 = vmax.f32 %v1648_v59, %v1649_v51  ;;  %v1814_v13 = vmax.f32 %v10094_v29, 0.0  ;;  %v10148_v25 = vadd.f32 %v1341_v10, %v1241_v19 }
 0x2f0   :  { %v1239_v54 = vadd.f32 %v1131_v0, %v9571_v34  ;;  %v1244_v32 = vadd.f32 %v1152_v20, %v9630_v39  ;;  %v10154_v11 = vpack.c.bf16 %v1816_v24, %v1816_v24  ;;  %v1636_v18 = vmax.f32 %v1634_v30, %v1635_v57 }
 0x2f1   :  { %13197 = vst [vmem:[#allocation76_spill] sm:$0xff] %v10148_v25  ;;  %v2929_v16 = vpack.c.bf16 %v1619_v3, %v1619_v3  ;;  %v1651_v50 = vrot.slane %v1650_v56, 2  ;;  %v1655_v4 = vsel %vm616_vm1, %v10148_v25, -inf  ;;  %v1144_v39 = vadd.f32 %v9897_v27, %v1143_v41 }
 0x2f2   :  { %v10142_v1 = vpop.f32.mrb[100].mxu1  ;;  %v10160_v29 = vadd.f32 %v1337_v35, %v1239_v54  ;;  %v10163_v10 = vadd.f32 %v10066_v23, %v1244_v32  ;;  %v1817_v34 = vmax.f32 %v10134_v36, 0.0  ;;  %v1637_v19 = vrot.slane %v1636_v18, 2 }
 0x2f3   :  { %v10145_v37 = vpop.f32.mrb[101].mxu1  ;;  %v3017_v51 = vunpack.c.l.b16 %v2929_v16  ;;  %v1652_v24 = vmax.f32 %v1650_v56, %v1651_v50  ;;  %v1854_v0 = vpack.c.bf16 %v1814_v13, %v1814_v13  ;;  %v1656_v20 = vrot.slane %v1655_v4, 4  ;;  %v1345_v50 = vpop.permute.xlu0 %1344 }
 0x2f4   :  { %v10152_v58 = vpop.f32.mrb[102].mxu1  ;;  %13198 = vst [vmem:[#allocation77_spill] sm:$0xff] %v10160_v29  ;;  %13199 = vst [vmem:[#allocation78_spill] sm:$0xff] %v10163_v10  ;;  %v1641_v30 = vsel %vm616_vm1, %v10160_v29, -inf  ;;  %v1155_v57 = vadd.f32 %v8320_v44, %v9897_v27  ;;  %v1815_v14 = vmax.f32 %v1619_v3, 0.0  ;;  %v1638_v32 = vmax.f32 %v1636_v18, %v1637_v19 }
 0x2f5   :  { %v10156_v59 = vpop.f32.mrb[103].mxu1  ;;  %v10171_v54 = vsel %vm1987_vm7, %v3017_v51, %v3054_v17  ;;  %v1653_v23 = vrot.slane %v1652_v24, 1  ;;  %v1657_v35 = vmax.f32 %v1655_v4, %v1656_v20  ;;  %v1642_v41 = vrot.slane %v1641_v30, 4 }
 0x2f6   :  { %13200 = vst [vmem:[#allocation79_spill] sm:$0xff] %v10171_v54  ;;  %v1676_v16 = vsel %vm616_vm1, %v10163_v10, -inf  ;;  %v1242_v56 = vadd.f32 %v1144_v39, %v9645_v60  ;;  %v10178_v55 = vpack.c.bf16 %v1817_v34, %v1817_v34  ;;  %v2931_v44 = vpack.c.bf16 %v10134_v36, %v10134_v36 }
 0x2f7   :  { %v1639_v3 = vrot.slane %v1638_v32, 1  ;;  %v1677_v17 = vrot.slane %v1676_v16, 4  ;;  %v1654_v18 = vmax.f32 %v1652_v24, %v1653_v23  ;;  %v1658_v4 = vrot.slane %v1657_v35, 2 }
 0x2f8   :  { %v1643_v19 = vmax.f32 %v1641_v30, %v1642_v41  ;;  %v10184_v20 = vadd.f32 %v1343_v7, %v1242_v56  ;;  %v1951_v60 = vunpack.c.l.b16 %v1854_v0  ;;  %v1855_v39 = vpack.c.bf16 %v1815_v14, %v1815_v14  ;;  %v1349_v56 = vpop.permute.xlu0 %1348 }
 0x2f9   :  { %v1640_v8 = vmax.f32 %v1638_v32, %v1639_v3  ;;  %v1678_v43 = vmax.f32 %v1676_v16, %v1677_v17  ;;  %v1659_v54 = vmax.f32 %v1657_v35, %v1658_v4  ;;  %v1245_v21 = vadd.f32 %v1155_v57, %v9632_v48 }
 0x2fa   :  { %v10176_v13 = vpop.f32.mrb[104].mxu1  ;;  %13201 = vst [vmem:[#allocation80_spill] sm:$0xff] %v10184_v20  ;;  %v1644_v5 = vrot.slane %v1643_v19, 2  ;;  %v1662_v36 = vsel %vm616_vm1, %v10184_v20, -inf  ;;  %v13202_v7 = vpack.c.bf16 %v10106_v22, %v10106_v22  ;;  %v13203_v14 = vunpack.c.l.b16 %v10097_v12 }
 0x2fb   :  { %v10182_v51 = vpop.f32.mrb[105].mxu1  ;;  %v10202_v23 = vunpack.c.l.b16 %v2931_v44  ;;  %v1820_v32 = vmax.f32 %v1654_v18, 0.0  ;;  %v1660_v35 = vrot.slane %v1659_v54, 1  ;;  %v1663_v16 = vrot.slane %v1662_v36, 4 }
 0x2fc   :  { %v10186_v45 = vpop.f32.mrb[106].mxu1  ;;  %v10197_v30 = vunpack.c.l.b16 %v13202_v7  ;;  %v1995_v0 = vsel %vm1983_vm5, %v13203_v14, %v1994_v42  ;;  %v1645_v41 = vmax.f32 %v1643_v19, %v1644_v5  ;;  %v1818_v57 = vmax.f32 %v1640_v8, 0.0 }
 0x2fd   :  { %v10188_v34 = vpop.f32.mrb[107].mxu1  ;;  %v1479_v3 = vmax.f32 %v10160_v29, 0.0  ;;  %v1679_v17 = vrot.slane %v1678_v43, 2  ;;  %v1996_v22 = vsel %vm1985_vm6, %v1951_v60, %v1995_v0  ;;  %v1952_v4 = vunpack.c.l.b16 %v1855_v39 }
 0x2fe   :  { %v1478_v12 = vmax.f32 %v10118_v46, 0.0  ;;  %v10208_v7 = vadd.f32 %v1349_v56, %v1245_v21  ;;  %v1481_v44 = vmax.f32 %v10148_v25, 0.0  ;;  %v10213_v5 = vmax.f32 %v1659_v54, %v1660_v35 }
 0x2ff   :  { %v1664_v19 = vmax.f32 %v1662_v36, %v1663_v16  ;;  %v1147_v14 = vadd.f32 %v9897_v27, %v10110_v53  ;;  %v10219_v24 = vpack.c.bf16 %v1820_v32, %v1820_v32  ;;  %v2934_v60 = vpack.c.bf16 %v1654_v18, %v1654_v18 }
 0x300   :  { %13204 = vst [vmem:[#allocation81_spill] sm:$0xff] %v10208_v7  ;;  %13205 = vst [vmem:[#allocation82_spill] sm:$0xff] %v10213_v5  ;;  %v2932_v39 = vpack.c.bf16 %v1640_v8, %v1640_v8  ;;  %v1646_v0 = vrot.slane %v1645_v41, 1  ;;  %v10223_v21 = vpack.c.bf16 %v1818_v57, %v1818_v57  ;;  %v1680_v56 = vmax.f32 %v1678_v43, %v1679_v17 }
 0x301   :  { %v1243_v25 = vadd.f32 %v1147_v14, %v9653_v26  ;;  %v1510_v54 = vpack.c.bf16 %v1479_v3, %v1478_v12  ;;  %v1997_v53 = vsel %vm1987_vm7, %v1952_v4, %v1996_v22  ;;  %v1480_v35 = vmax.f32 %v10113_v9, 0.0 }
 0x302   :  { %v10210_v42 = vpop.f32.mrb[108].mxu1  ;;  %v1683_v8 = vsel %vm616_vm1, %v10208_v7, -inf  ;;  %v1821_v18 = vmax.f32 %v10213_v5, 0.0  ;;  %v1482_v16 = vmax.f32 %v10184_v20, 0.0  ;;  %v1665_v43 = vrot.slane %v1664_v19, 2 }
 0x303   :  { %v10217_v48 = vpop.f32.mrb[109].mxu1  ;;  %v10235_v57 = vadd.f32 %v1345_v50, %v1243_v25  ;;  %8381 = vmatprep.mubr.msk.bf16.mxu1 %vm616_vm1, %v1510_v54  ;;  %v10239_v3 = vunpack.c.l.b16 %v2934_v60  ;;  %v1647_v17 = vmax.f32 %v1645_v41, %v1646_v0  ;;  %v1511_v22 = vpack.c.bf16 %v1481_v44, %v1480_v35 }
 0x304   :  { %v10221_v29 = vpop.f32.mrb[110].mxu1  ;;  %v10242_v12 = vunpack.c.l.b16 %v2932_v39  ;;  %v1681_v14 = vrot.slane %v1680_v56, 1  ;;  %v1684_v32 = vrot.slane %v1683_v8, 4  ;;  %v1485_v25 = vmax.f32 %v10208_v7, 0.0 }
 0x305   :  { %v10226_v36 = vpop.f32.mrb[111].mxu1  ;;  %13206 = vst [vmem:[#allocation83_spill] sm:$0xff] %v10235_v57  ;;  %v1669_v50 = vsel %vm616_vm1, %v10235_v57, -inf  ;;  %8382 = vmatmul.mubr.msk.bf16.gmra.mrb[132].mxu1 %vm616_vm1, %v1511_v22  ;;  %v1168_v41 = vadd.f32 %v10142_v1, %v9897_v27  ;;  %v10254_v60 = vpack.c.bf16 %v1821_v18, %v1821_v18  ;;  %v1666_v39 = vmax.f32 %v1664_v19, %v1665_v43 }
 0x306   :  { %v1670_v0 = vrot.slane %v1669_v50, 4  ;;  %v1160_v54 = vadd.f32 %v9897_v27, %v10145_v37  ;;  %v1819_v20 = vmax.f32 %v1647_v17, 0.0  ;;  %v2933_v26 = vpack.c.bf16 %v1647_v17, %v1647_v17 }
 0x307   :  { %v1248_v4 = vadd.f32 %v1168_v41, %v9679_v31  ;;  %v13207_v22 = vunpack.c.l.b16 %v10154_v11  ;;  %v10266_v9 = vmax.f32 %v1680_v56, %v1681_v14  ;;  %v1685_v18 = vmax.f32 %v1683_v8, %v1684_v32 }
 0x308   :  { %v1483_v19 = vmax.f32 %v10235_v57, 0.0  ;;  %v1671_v43 = vmax.f32 %v1669_v50, %v1670_v0  ;;  %v1246_v17 = vadd.f32 %v1160_v54, %v9635_v52  ;;  %v13209_v31 = vunpack.c.l.b16 %v10178_v55  ;;  %v8987_v52 = vld [vmem:[%s13050_s10] sm:$0xff]  }
 0x309   :  { %v1998_v7 = vsel %vm1989_vm8, %v13207_v22, %v1997_v53  ;;  %v10272_v37 = vadd.f32 %v10058_v61, %v1248_v4  ;;  %v1171_v53 = vadd.f32 %v10152_v58, %v9897_v27  ;;  %v1667_v32 = vrot.slane %v1666_v39, 1 }
 0x30a   :  { %v10252_v44 = vpop.f32.mrb[112].mxu1  ;;  %v1999_v11 = vsel %vm1991_vm9, %v13209_v31, %v1998_v7  ;;  %v1672_v8 = vrot.slane %v1671_v43, 2  ;;  %v13210_v14 = vunpack.c.l.b16 %v10053_v49  ;;  %v10288_v61 = vpack.c.bf16 %v1819_v20, %v1819_v20  ;;  %v10302_v20 = vld [vmem:[%s13049_s8] ss:$0 sm:$0xff]  ;;  %v8988_v31 = vld [vmem:[%s13050_s10 + $0x8] sm:$0xff]  }
 0x30b   :  { %v10258_v35 = vpop.f32.mrb[113].mxu1  ;;  %13208 = vst [vmem:[#allocation84_spill] sm:$0xff] %v10272_v37  ;;  %v1704_v55 = vsel %vm616_vm1, %v10272_v37, -inf  ;;  %v10293_v27 = vadd.f32 %v10039_v28, %v1246_v17  ;;  %v3021_v7 = vunpack.c.l.b16 %v2933_v26  ;;  %v1686_v4 = vrot.slane %v1685_v18, 2 }
 0x30c   :  { %v10264_v1 = vpop.f32.mrb[114].mxu1  ;;  %v1992_v50 = vsel %vm1991_vm9, %v13210_v14, %v10124_v2  ;;  %v1705_v41 = vrot.slane %v1704_v55, 4  ;;  %v1249_v49 = vadd.f32 %v1171_v53, %v9682_v33  ;;  %v1673_v0 = vmax.f32 %v1671_v43, %v1672_v8 }
 0x30d   :  { %v10269_v46 = vpop.f32.mrb[115].mxu1  ;;  %13211 = vst [vmem:[#allocation85_spill] sm:$0xff] %v10293_v27  ;;  %v2021_v58 = vpack.c.b16 %v1999_v11, %v1992_v50  ;;  %v1690_v2 = vsel %vm616_vm1, %v10293_v27, -inf  ;;  %v1163_v28 = vadd.f32 %v10302_v20, %v10156_v59  ;;  %v1512_v54 = vpack.c.bf16 %v1483_v19, %v1482_v16 }
 0x30e   :  { %v10306_v26 = vmax.f32 %v1666_v39, %v1667_v32  ;;  %v1706_v22 = vmax.f32 %v1704_v55, %v1705_v41  ;;  %v1691_v17 = vrot.slane %v1690_v2, 4  ;;  %v10309_v33 = vadd.f32 %v10077_v6, %v1249_v49 }
 0x30f   :  { %8346 = vmatmul.mubr.msk.bf16.vlgmr.msra.gmra.mrb[44].mxu0 %vm616_vm1, %v2021_v58  ;;  %v13213_v43 = vmov 0.0   ;;  %v1247_v11 = vadd.f32 %v1163_v28, %v9637_v38  ;;  %8385 = vmatprep.mubr.msk.bf16.mxu1 %vm616_vm1, %v1512_v54  ;;  %v13214_v59 = vmax.f32 %v10163_v10, 0.0  ;;  %v1184_v39 = vadd.f32 %v10302_v20, %v10176_v13  ;;  %v8989_v58 = vld [vmem:[%s13050_s10 + $0x10] sm:$0xff]  }
 0x310   :  { %13212 = vst [vmem:[#allocation86_spill] sm:$0xff] %v10309_v33  ;;  %8349 = vmatprep.mubr.msk.bf16.mxu0 %vm9026_vm2, %v13213_v43  ;;  %8406 = vmatpush3.bf16.msra.mxu0 %v8987_v52  ;;  %v1176_v6 = vadd.f32 %v10302_v20, %v10182_v51  ;;  %v1687_v53 = vmax.f32 %v1685_v18, %v1686_v4  ;;  %v1707_v32 = vrot.slane %v1706_v22, 2  ;;  %v1674_v14 = vrot.slane %v1673_v0, 1 }
 0x311   :  { %v1513_v16 = vpack.c.bf16 %v1485_v25, %v13214_v59  ;;  %v1692_v8 = vmax.f32 %v1690_v2, %v1691_v17  ;;  %8407 = vmatprep.subr.bf16.mxu0 %v13213_v43  ;;  %v1711_v38 = vsel %vm616_vm1, %v10309_v33, -inf  ;;  %v10329_v50 = vadd.f32 %v10033_v40, %v1247_v11  ;;  %v1363_v25 = vpop.permute.xlu1 %1362 }
 0x312   :  { %v1252_v13 = vadd.f32 %v1184_v39, %v9723_v63  ;;  %v1956_v51 = vunpack.c.l.b16 %v10288_v61  ;;  %v1822_v18 = vmax.f32 %v10306_v26, 0.0  ;;  %v1708_v52 = vmax.f32 %v1706_v22, %v1707_v32 }
 0x313   :  { %13215 = vst [vmem:[#allocation87_spill] sm:$0xff] %v10329_v50  ;;  %8386 = vmatmul.mubr.msk.bf16.gmra.mrb[136].mxu1 %vm616_vm1, %v1513_v16  ;;  %v1693_v55 = vrot.slane %v1692_v8, 2  ;;  %v1712_v4 = vrot.slane %v1711_v38, 4  ;;  %v1697_v40 = vsel %vm616_vm1, %v10329_v50, -inf  ;;  %v1250_v63 = vadd.f32 %v1176_v6, %v9684_v47 }
 0x314   :  { %8408 = vmatpush3.bf16.msra.mxu0 %v8988_v31  ;;  %v10340_v41 = vadd.f32 %v1363_v25, %v1252_v13  ;;  %v10346_v61 = vsel %vm1979_vm3, %v3021_v7, %v10242_v12  ;;  %v1688_v49 = vrot.slane %v1687_v53, 1  ;;  %v1709_v2 = vrot.slane %v1708_v52, 1  ;;  %v8990_v12 = vld [vmem:[%s13050_s10 + $0x18] sm:$0xff]  }
 0x315   :  { %8409 = vmatprep.subr.bf16.mxu0 %v13213_v43  ;;  %v1694_v28 = vmax.f32 %v1692_v8, %v1693_v55  ;;  %v10348_v54 = vmax.f32 %v1673_v0, %v1674_v14  ;;  %v1713_v22 = vmax.f32 %v1711_v38, %v1712_v4  ;;  %v1698_v17 = vrot.slane %v1697_v40, 4  ;;  %v10369_v8 = vld [vmem:[%s13051_s9] sm:$0xff]  }
 0x316   :  { %13216 = vst [vmem:[#allocation88_spill] sm:$0xff] %v10340_v41  ;;  %v1732_v31 = vsel %vm616_vm1, %v10340_v41, -inf  ;;  %v10352_v11 = vpack.c.bf16 %v1822_v18, %v1822_v18  ;;  %v1710_v59 = vmax.f32 %v1708_v52, %v1709_v2  ;;  %v13217_v7 = vunpack.c.l.b16 %v10223_v21  ;;  %13219 = vst [vmem:[#allocation90_spill] sm:$0xff] %v10369_v8 }
 0x317   :  { %v1695_v47 = vrot.slane %v1694_v28, 1  ;;  %v1733_v16 = vrot.slane %v1732_v31, 4  ;;  %v1714_v39 = vrot.slane %v1713_v22, 2  ;;  %v1699_v6 = vmax.f32 %v1697_v40, %v1698_v17  ;;  %v1365_v17 = vpop.permute.xlu1 %1364 }
 0x318   :  { %8410 = vmatpush3.bf16.msra.mxu0 %v8989_v58  ;;  %v10360_v0 = vsel %vm1979_vm3, %v1956_v51, %v13217_v7  ;;  %v10363_v32 = vadd.f32 %v10091_v15, %v1250_v63  ;;  %v10371_v14 = vmax.f32 %v1687_v53, %v1688_v49  ;;  %v1187_v21 = vadd.f32 %v10302_v20, %v10186_v45 }
 0x319   :  { %8411 = vmatprep.subr.bf16.mxu0 %v13213_v43  ;;  %v1696_v38 = vmax.f32 %v1694_v28, %v1695_v47  ;;  %v1734_v13 = vmax.f32 %v1732_v31, %v1733_v16  ;;  %v1823_v25 = vmax.f32 %v10348_v54, 0.0  ;;  %v1715_v51 = vmax.f32 %v1713_v22, %v1714_v39 }
 0x31a   :  { %13218 = vst [vmem:[#allocation89_spill] sm:$0xff] %v10363_v32  ;;  %v1700_v18 = vrot.slane %v1699_v6, 2  ;;  %v1718_v15 = vsel %vm616_vm1, %v10363_v32, -inf  ;;  %v1488_v55 = vmax.f32 %v10272_v37, 0.0  ;;  %v1828_v58 = vmax.f32 %v1710_v59, 0.0  ;;  %v13227_v37 = vld [vmem:[#allocation49_spill] sm:$0xff] }
 0x31b   :  { %v1487_v53 = vmax.f32 %v10329_v50, 0.0  ;;  %v1826_v4 = vmax.f32 %v1696_v38, 0.0  ;;  %v1716_v40 = vrot.slane %v1715_v51, 1  ;;  %v1719_v49 = vrot.slane %v1718_v15, 4 }
 0x31c   :  { %8412 = vmatpush3.bf16.msra.mxu0 %v8990_v12  ;;  %v1701_v63 = vmax.f32 %v1699_v6, %v1700_v18  ;;  %v1486_v45 = vmax.f32 %v10293_v27, 0.0  ;;  %v1489_v2 = vmax.f32 %v10309_v33, 0.0  ;;  %v1735_v28 = vrot.slane %v1734_v13, 2 }
 0x31d   :  { %8425 = vmatprep.subr.bf16.mxu0 %v10369_v8  ;;  %v1253_v22 = vadd.f32 %v1187_v21, %v9725_v62  ;;  %v10385_v31 = vpack.c.bf16 %v1823_v25, %v1823_v25  ;;  %v2942_v47 = vpack.c.bf16 %v1710_v59, %v1710_v59  ;;  %v1720_v7 = vmax.f32 %v1718_v15, %v1719_v49  ;;  %v13221_v25 = vld [vmem:[#allocation45_spill] sm:$0xff] }
 0x31e   :  { %v1702_v16 = vrot.slane %v1701_v63, 1  ;;  %v10387_v12 = vmax.f32 %v1715_v51, %v1716_v40  ;;  %v1179_v6 = vadd.f32 %v10302_v20, %v10188_v34  ;;  %v1514_v18 = vpack.c.bf16 %v1487_v53, %v1486_v45  ;;  %v13235_v8 = vld [vmem:[#allocation53_spill] sm:$0xff] }
 0x31f   :  { %v10389_v39 = vadd.f32 %v1365_v17, %v1253_v22  ;;  %v10393_v52 = vpack.c.bf16 %v1828_v58, %v1828_v58  ;;  %v1866_v56 = vpack.c.bf16 %v1826_v4, %v1826_v4  ;;  %v2940_v19 = vpack.c.bf16 %v1696_v38, %v1696_v38  ;;  %v1367_v17 = vpop.permute.xlu0 %1366 }
 0x320   :  { %v1703_v33 = vmax.f32 %v1701_v63, %v1702_v16  ;;  %v1736_v62 = vmax.f32 %v1734_v13, %v1735_v28  ;;  %v1721_v21 = vrot.slane %v1720_v7, 2  ;;  %v1251_v15 = vadd.f32 %v1179_v6, %v13221_v25  ;;  %8389 = vmatprep.mubr.msk.bf16.mxu1 %vm616_vm1, %v1514_v18  ;;  %v13222_v13 = vld [vmem:[#allocation74_spill] sm:$0xff] }
 0x321   :  { %13220 = vst [vmem:[#allocation91_spill] sm:$0xff] %v10389_v39  ;;  %v1739_v59 = vsel %vm616_vm1, %v10389_v39, -inf  ;;  %v1492_v34 = vmax.f32 %v10340_v41, 0.0  ;;  %v1490_v58 = vmax.f32 %v10363_v32, 0.0  ;;  %v1829_v53 = vmax.f32 %v10387_v12, 0.0 }
 0x322   :  { %v1827_v40 = vmax.f32 %v1703_v33, 0.0  ;;  %v1722_v38 = vmax.f32 %v1720_v7, %v1721_v21  ;;  %v1740_v4 = vrot.slane %v1739_v59, 4  ;;  %v10404_v63 = vadd.f32 %v13222_v13, %v1251_v15  ;;  %v13224_v13 = vld [vmem:[#allocation48_spill] sm:$0xff] }
 0x323   :  { %v10407_v45 = vunpack.c.l.b16 %v2942_v47  ;;  %v10409_v28 = vunpack.c.l.b16 %v2940_v19  ;;  %v1515_v22 = vpack.c.bf16 %v1489_v2, %v1488_v55  ;;  %v1963_v16 = vunpack.c.l.b16 %v1866_v56  ;;  %v1369_v19 = vpop.permute.xlu1 %1368  ;;  %v1371_v51 = vpop.permute.xlu0 %1370 }
 0x324   :  { %13223 = vst [vmem:[#allocation45_spill] sm:$0xff] %v10404_v63  ;;  %v1867_v6 = vpack.c.bf16 %v1827_v40, %v1827_v40  ;;  %v1737_v18 = vrot.slane %v1736_v62, 1  ;;  %v1723_v25 = vrot.slane %v1722_v38, 1  ;;  %v1741_v7 = vmax.f32 %v1739_v59, %v1740_v4 }
 0x325   :  { %v1725_v21 = vsel %vm616_vm1, %v10404_v63, -inf  ;;  %8390 = vmatmul.mubr.msk.bf16.gmra.mrb[140].mxu1 %vm616_vm1, %v1515_v22  ;;  %v1200_v47 = vadd.f32 %v10302_v20, %v10210_v42  ;;  %v10418_v15 = vpack.c.bf16 %v1829_v53, %v1829_v53  ;;  %v2941_v55 = vpack.c.bf16 %v1703_v33, %v1703_v33 }
 0x326   :  { %v1726_v56 = vrot.slane %v1725_v21, 4  ;;  %v1192_v2 = vadd.f32 %v10302_v20, %v10217_v48  ;;  %v1493_v40 = vmax.f32 %v10389_v39, 0.0  ;;  %v1203_v4 = vadd.f32 %v10302_v20, %v10221_v29  ;;  %v13226_v48 = vld [vmem:[#allocation46_spill] sm:$0xff] }
 0x327   :  { %v1256_v59 = vadd.f32 %v1200_v47, %v13224_v13  ;;  %v1195_v22 = vadd.f32 %v10302_v20, %v10226_v36  ;;  %v1964_v42 = vunpack.c.l.b16 %v1867_v6  ;;  %v10428_v49 = vmax.f32 %v1736_v62, %v1737_v18  ;;  %v1373_v13 = vpop.permute.xlu1 %1372 }
 0x328   :  { %v10430_v53 = vmax.f32 %v1722_v38, %v1723_v25  ;;  %v1727_v33 = vmax.f32 %v1725_v21, %v1726_v56  ;;  %v1742_v41 = vrot.slane %v1741_v7, 2  ;;  %v1254_v39 = vadd.f32 %v1192_v2, %v13226_v48 }
 0x329   :  { %v10432_v32 = vadd.f32 %v1371_v51, %v1256_v59  ;;  %v1257_v47 = vadd.f32 %v1203_v4, %v13227_v37  ;;  %v10437_v50 = vunpack.c.l.b16 %v2941_v55  ;;  %v1491_v36 = vmax.f32 %v10404_v63, 0.0  ;;  %v13230_v51 = vld [vmem:[#allocation47_spill] sm:$0xff] }
 0x32a   :  { %v1728_v6 = vrot.slane %v1727_v33, 2  ;;  %v10442_v38 = vadd.f32 %v1367_v17, %v1254_v39  ;;  %v1255_v25 = vadd.f32 %v1195_v22, %v13230_v51  ;;  %v10448_v21 = vsel %vm1979_vm3, %v1964_v42, %v1963_v16  ;;  %v1375_v17 = vpop.permute.xlu0 %1374 }
 0x32b   :  { %13225 = vst [vmem:[#allocation74_spill] sm:$0xff] %v10432_v32  ;;  %v1760_v62 = vsel %vm616_vm1, %v10432_v32, -inf  ;;  %v10444_v18 = vadd.f32 %v1373_v13, %v1257_v47  ;;  %v1830_v2 = vmax.f32 %v10430_v53, 0.0  ;;  %v1743_v59 = vmax.f32 %v1741_v7, %v1742_v41 }
 0x32c   :  { %13228 = vst [vmem:[#allocation48_spill] sm:$0xff] %v10442_v38  ;;  %v1729_v56 = vmax.f32 %v1727_v33, %v1728_v6  ;;  %v1761_v55 = vrot.slane %v1760_v62, 4  ;;  %v1746_v4 = vsel %vm616_vm1, %v10442_v38, -inf  ;;  %v10456_v16 = vadd.f32 %v1369_v19, %v1255_v25 }
 0x32d   :  { %13229 = vst [vmem:[#allocation46_spill] sm:$0xff] %v10444_v18  ;;  %v1767_v39 = vsel %vm616_vm1, %v10444_v18, -inf  ;;  %v1747_v22 = vrot.slane %v1746_v4, 4  ;;  %v1516_v42 = vpack.c.bf16 %v1491_v36, %v1490_v58  ;;  %v1517_v51 = vpack.c.bf16 %v1493_v40, %v1492_v34 }
 0x32e   :  { %v1730_v48 = vrot.slane %v1729_v56, 1  ;;  %v1762_v47 = vmax.f32 %v1760_v62, %v1761_v55  ;;  %v1768_v13 = vrot.slane %v1767_v39, 4  ;;  %13231 = vst [vmem:[#allocation49_spill] sm:$0xff] %v10456_v16  ;;  %v1216_v33 = vadd.f32 %v10302_v20, %v10252_v44  ;;  %v13232_v62 = vld [vmem:[#allocation52_spill] sm:$0xff]  ;;  %v1379_v58 = vpop.permute.xlu0 %1378 }
 0x32f   :  { %v1748_v7 = vmax.f32 %v1746_v4, %v1747_v22  ;;  %v10462_v37 = vpack.c.bf16 %v1830_v2, %v1830_v2  ;;  %v1753_v63 = vsel %vm616_vm1, %v10456_v16, -inf  ;;  %8393 = vmatprep.mubr.msk.bf16.mxu1 %vm616_vm1, %v1516_v42  ;;  %v1208_v34 = vadd.f32 %v10302_v20, %v10258_v35  ;;  %v13234_v4 = vld [vmem:[#allocation50_spill] sm:$0xff] }
 0x330   :  { %v10460_v6 = vmax.f32 %v1729_v56, %v1730_v48  ;;  %v1763_v41 = vrot.slane %v1762_v47, 2  ;;  %v1769_v29 = vmax.f32 %v1767_v39, %v1768_v13  ;;  %v1260_v19 = vadd.f32 %v1216_v33, %v13232_v62  ;;  %8394 = vmatmul.mubr.msk.bf16.gmra.mrb[144].mxu1 %vm616_vm1, %v1517_v51 }
 0x331   :  { %v1744_v40 = vrot.slane %v1743_v59, 1  ;;  %v1749_v25 = vrot.slane %v1748_v7, 2  ;;  %v1754_v55 = vrot.slane %v1753_v63, 4  ;;  %v1258_v39 = vadd.f32 %v1208_v34, %v13234_v4 }
 0x332   :  { %v1764_v36 = vmax.f32 %v1762_v47, %v1763_v41  ;;  %v1770_v56 = vrot.slane %v1769_v29, 2  ;;  %v10473_v2 = vadd.f32 %v1379_v58, %v1260_v19  ;;  %v1831_v48 = vmax.f32 %v10460_v6, 0.0 }
 0x333   :  { %v1496_v22 = vmax.f32 %v10432_v32, 0.0  ;;  %v1750_v13 = vmax.f32 %v1748_v7, %v1749_v25  ;;  %v1755_v62 = vmax.f32 %v1753_v63, %v1754_v55  ;;  %v10481_v51 = vmax.f32 %v1743_v59, %v1744_v40 }
 0x334   :  { %13233 = vst [vmem:[#allocation47_spill] sm:$0xff] %v10473_v2  ;;  %v1765_v35 = vrot.slane %v1764_v36, 1  ;;  %v1771_v33 = vmax.f32 %v1769_v29, %v1770_v56  ;;  %v1788_v47 = vsel %vm616_vm1, %v10473_v2, -inf  ;;  %v1494_v34 = vmax.f32 %v10442_v38, 0.0 }
 0x335   :  { %v1751_v19 = vrot.slane %v1750_v13, 1  ;;  %v1789_v58 = vrot.slane %v1788_v47, 4  ;;  %v1756_v44 = vrot.slane %v1755_v62, 2  ;;  %v10486_v27 = vadd.f32 %v1375_v17, %v1258_v39 }
 0x336   :  { %v10483_v41 = vmax.f32 %v1764_v36, %v1765_v35  ;;  %v1772_v4 = vrot.slane %v1771_v33, 1  ;;  %v10488_v7 = vpack.c.bf16 %v1831_v48, %v1831_v48  ;;  %v1497_v56 = vmax.f32 %v10444_v18, 0.0  ;;  %v1377_v48 = vpop.permute.xlu1 %1376 }
 0x337   :  { %v1752_v63 = vmax.f32 %v1750_v13, %v1751_v19  ;;  %v1790_v25 = vmax.f32 %v1788_v47, %v1789_v58  ;;  %v1757_v40 = vmax.f32 %v1755_v62, %v1756_v44  ;;  %v1774_v36 = vsel %vm616_vm1, %v10486_v27, -inf }
 0x338   :  { %v1836_v29 = vmax.f32 %v10483_v41, 0.0  ;;  %v10492_v59 = vmax.f32 %v1771_v33, %v1772_v4  ;;  %v1495_v17 = vmax.f32 %v10456_v16, 0.0  ;;  %v1219_v39 = vadd.f32 %v10302_v20, %v10264_v1 }
 0x339   :  { %v1834_v35 = vmax.f32 %v1752_v63, 0.0  ;;  %v2948_v42 = vpack.c.bf16 %v1752_v63, %v1752_v63  ;;  %v1758_v47 = vrot.slane %v1757_v40, 1  ;;  %v1791_v19 = vrot.slane %v1790_v25, 2 }
 0x33a   :  { %v10496_v55 = vpack.c.bf16 %v1836_v29, %v1836_v29  ;;  %v1837_v13 = vmax.f32 %v10492_v59, 0.0  ;;  %v1500_v62 = vmax.f32 %v10473_v2, 0.0  ;;  %v1775_v58 = vrot.slane %v1774_v36, 4  ;;  %v1381_v32 = vpop.permute.xlu1 %1380 }
 0x33b   :  { %v10506_v4 = vpack.c.bf16 %v1834_v35, %v1834_v35  ;;  %v1759_v29 = vmax.f32 %v1757_v40, %v1758_v47  ;;  %v1792_v10 = vmax.f32 %v1790_v25, %v1791_v19  ;;  %v1498_v1 = vmax.f32 %v10486_v27, 0.0  ;;  %v13236_v25 = vld [vmem:[#allocation51_spill] sm:$0xff] }
 0x33c   :  { %v1973_v63 = vunpack.c.l.b16 %v10496_v55  ;;  %v1776_v57 = vmax.f32 %v1774_v36, %v1775_v58  ;;  %v1261_v18 = vadd.f32 %v1219_v39, %v13235_v8  ;;  %v1211_v33 = vadd.f32 %v10302_v20, %v10269_v46 }
 0x33d   :  { %v3036_v16 = vunpack.c.l.b16 %v2948_v42  ;;  %v10513_v44 = vpack.c.bf16 %v1837_v13, %v1837_v13  ;;  %v1835_v2 = vmax.f32 %v1759_v29, 0.0  ;;  %v2949_v38 = vpack.c.bf16 %v1759_v29, %v1759_v29 }
 0x33e   :  { %v1777_v35 = vrot.slane %v1776_v57, 2  ;;  %v10515_v5 = vadd.f32 %v1381_v32, %v1261_v18  ;;  %v1259_v40 = vadd.f32 %v1211_v33, %v13236_v25  ;;  %v1518_v47 = vpack.c.bf16 %v1495_v17, %v1494_v34 }
 0x33f   :  { %v1971_v19 = vunpack.c.l.b16 %v10506_v4  ;;  %v3037_v36 = vunpack.c.l.b16 %v2949_v38  ;;  %v1793_v58 = vrot.slane %v1792_v10, 1  ;;  %v1519_v8 = vpack.c.bf16 %v1497_v56, %v1496_v22 }
 0x340   :  { %v1778_v39 = vmax.f32 %v1776_v57, %v1777_v35  ;;  %v1501_v46 = vmax.f32 %v10515_v5, 0.0  ;;  %v1795_v20 = vsel %vm616_vm1, %v10515_v5, -inf  ;;  %v10522_v42 = vadd.f32 %v1377_v48, %v1259_v40  ;;  %8397 = vmatprep.mubr.msk.bf16.mxu1 %vm616_vm1, %v1518_v47 }
 0x341   :  { %v1875_v32 = vpack.c.bf16 %v1835_v2, %v1835_v2  ;;  %v10526_v18 = vsel %vm1979_vm3, %v3037_v36, %v3036_v16  ;;  %v1796_v34 = vrot.slane %v1795_v20, 4  ;;  %8398 = vmatmul.mubr.msk.bf16.gmra.mrb[148].mxu1 %vm616_vm1, %v1519_v8  ;;  %v1825_v38 = vmax.f32 %v10371_v14, 0.0 }
 0x342   :  { %v1779_v22 = vrot.slane %v1778_v39, 1  ;;  %v1499_v57 = vmax.f32 %v10522_v42, 0.0  ;;  %v1781_v56 = vsel %vm616_vm1, %v10522_v42, -inf  ;;  %v1521_v17 = vpack.c.bf16 %v1501_v46, %v1500_v62 }
 0x343   :  { %v1797_v48 = vmax.f32 %v1795_v20, %v1796_v34  ;;  %v1782_v13 = vrot.slane %v1781_v56, 4  ;;  %v1833_v33 = vmax.f32 %v10481_v51, 0.0  ;;  %v13237_v2 = vmax.f32 %v10266_v9, 0.0 }
 0x344   :  { %v10537_v4 = vmax.f32 %v1778_v39, %v1779_v22  ;;  %v1520_v29 = vpack.c.bf16 %v1499_v57, %v1498_v1  ;;  %v1865_v35 = vpack.c.bf16 %v1825_v38, %v1825_v38  ;;  %v13238_v25 = vmax.f32 %v10428_v49, 0.0 }
 0x345   :  { %v1864_v16 = vpack.c.bf16 %v13237_v2, %v13237_v2  ;;  %v1974_v47 = vunpack.c.l.b16 %v10513_v44  ;;  %v10543_v36 = vmax.f32 %v1792_v10, %v1793_v58  ;;  %v1798_v62 = vrot.slane %v1797_v48, 2 }
 0x346   :  { %v1872_v40 = vpack.c.bf16 %v13238_v25, %v13238_v25  ;;  %v1783_v8 = vmax.f32 %v1781_v56, %v1782_v13  ;;  %v1972_v46 = vunpack.c.l.b16 %v1875_v32  ;;  %v1838_v20 = vmax.f32 %v10537_v4, 0.0  ;;  %8401 = vmatprep.mubr.msk.bf16.mxu1 %vm616_vm1, %v1520_v29 }
 0x347   :  { %v1873_v34 = vpack.c.bf16 %v1833_v33, %v1833_v33  ;;  %v1961_v39 = vunpack.c.l.b16 %v1864_v16  ;;  %v1799_v22 = vmax.f32 %v1797_v48, %v1798_v62  ;;  %v1962_v38 = vunpack.c.l.b16 %v1865_v35 }
 0x348   :  { %v1784_v1 = vrot.slane %v1783_v8, 2  ;;  %v13239_v57 = vunpack.c.l.b16 %v10219_v24  ;;  %v1878_v44 = vpack.c.bf16 %v1838_v20, %v1838_v20  ;;  %v1969_v10 = vunpack.c.l.b16 %v1872_v40 }
 0x349   :  { %v13240_v58 = vunpack.c.l.b16 %v10254_v60  ;;  %v13241_v56 = vunpack.c.l.b16 %v10393_v52  ;;  %v1800_v33 = vrot.slane %v1799_v22, 1  ;;  %8402 = vmatmul.mubr.msk.bf16.gmra.mrb[152].mxu1 %vm616_vm1, %v1521_v17  ;;  %v13242_v16 = vunpack.c.l.b16 %v10352_v11 }
 0x34a   :  { %v2001_v2 = vsel %vm1981_vm4, %v13239_v57, %v10360_v0  ;;  %v1785_v48 = vmax.f32 %v1783_v8, %v1784_v1  ;;  %v13243_v0 = vunpack.c.l.b16 %v10418_v15  ;;  %v1975_v60 = vunpack.c.l.b16 %v1878_v44  ;;  %8529 = vmatprep.mubr.msk.bf16.mxu1 %vm9026_vm2, %v13213_v43 }
 0x34b   :  { %v2002_v32 = vsel %vm1983_vm5, %v13240_v58, %v2001_v2  ;;  %v2008_v13 = vsel %vm1981_vm4, %v13241_v56, %v10448_v21  ;;  %v1970_v35 = vunpack.c.l.b16 %v1873_v34  ;;  %v13244_v25 = vunpack.c.l.b16 %v10385_v31  ;;  %v13249_v58 = vld [vmem:[#allocation65_spill] sm:$0xff] }
 0x34c   :  { %v2003_v24 = vsel %vm1985_vm6, %v13242_v16, %v2002_v32  ;;  %v2009_v29 = vsel %vm1983_vm5, %v13243_v0, %v2008_v13  ;;  %v13245_v21 = vunpack.c.l.b16 %v10462_v37  ;;  %v10573_v11 = vmax.f32 %v1799_v22, %v1800_v33  ;;  %v13251_v13 = vld [vmem:[#allocation70_spill] sm:$0xff] }
 0x34d   :  { %v2004_v52 = vsel %vm1987_vm7, %v13244_v25, %v2003_v24  ;;  %v1786_v17 = vrot.slane %v1785_v48, 1  ;;  %v13246_v62 = vunpack.c.l.b16 %v10488_v7  ;;  %v1840_v37 = vmax.f32 %v10543_v36, 0.0 }
 0x34e   :  { %v2010_v40 = vsel %vm1985_vm6, %v13245_v21, %v2009_v29  ;;  %v2005_v15 = vsel %vm1989_vm8, %v1961_v39, %v2004_v52  ;;  %v2014_v34 = vsel %vm1979_vm3, %v1972_v46, %v1971_v19  ;;  %v1841_v22 = vmax.f32 %v10573_v11, 0.0 }
 0x34f   :  { %v2011_v8 = vsel %vm1987_vm7, %v13246_v62, %v2010_v40  ;;  %v2006_v31 = vsel %vm1991_vm9, %v1962_v38, %v2005_v15  ;;  %v1787_v1 = vmax.f32 %v1785_v48, %v1786_v17  ;;  %v2015_v39 = vsel %vm1981_vm4, %v1973_v63, %v2014_v34  ;;  %v13252_v48 = vld [vmem:[#allocation79_spill] sm:$0xff] }
 0x350   :  { %v2012_v20 = vsel %vm1989_vm8, %v1969_v10, %v2011_v8  ;;  %v13247_v7 = vpack.c.bf16 %v10387_v12, %v10387_v12  ;;  %v2016_v44 = vsel %vm1983_vm5, %v1974_v47, %v2015_v39  ;;  %v13248_v10 = vld [vmem:[#allocation66_spill] sm:$0xff]  ;;  %v3065_v46 = vsel %vm1979_vm3, %v10437_v50, %v10409_v28 }
 0x351   :  { %v2013_v57 = vsel %vm1991_vm9, %v1970_v35, %v2012_v20  ;;  %v3049_v19 = vsel %vm1989_vm8, %v13249_v58, %v13248_v10  ;;  %v13250_v55 = vpack.c.bf16 %v10430_v53, %v10430_v53  ;;  %v1839_v63 = vmax.f32 %v1787_v1, 0.0 }
 0x352   :  { %v3031_v2 = vunpack.c.l.b16 %v13247_v7  ;;  %v2022_v38 = vpack.c.b16 %v2013_v57, %v2006_v31  ;;  %v2017_v56 = vsel %vm1985_vm6, %v1975_v60, %v2016_v44  ;;  %v2950_v12 = vpack.c.bf16 %v10483_v41, %v10483_v41  ;;  %v13254_v44 = vld [vmem:[#allocation82_spill] sm:$0xff] }
 0x353   :  { %v3032_v32 = vunpack.c.l.b16 %v13250_v55  ;;  %v1880_v47 = vpack.c.bf16 %v1840_v37, %v1840_v37  ;;  %v3050_v33 = vsel %vm1991_vm9, %v13251_v13, %v3049_v19  ;;  %v3056_v50 = vsel %vm1989_vm8, %v10197_v30, %v13252_v48  ;;  %v13258_v13 = vld [vmem:[#allocation74_spill] sm:$0xff] }
 0x354   :  { %8350 = vmatmul.mubr.msk.bf16.gmra.mrb[48].mxu0 %vm616_vm1, %v2022_v38  ;;  %v13253_v28 = vpack.c.bf16 %v10460_v6, %v10460_v6  ;;  %v1879_v16 = vpack.c.bf16 %v1839_v63, %v1839_v63  ;;  %v1881_v24 = vpack.c.bf16 %v1841_v22, %v1841_v22  ;;  %v3057_v41 = vsel %vm1991_vm9, %v10202_v23, %v3056_v50 }
 0x355   :  { %8353 = vmatprep.mubr.msk.bf16.mxu0 %vm9026_vm2, %v13213_v43  ;;  %v2951_v0 = vpack.c.bf16 %v10492_v59, %v10492_v59  ;;  %v3079_v29 = vpack.c.b16 %v3057_v41, %v3050_v33  ;;  %v2946_v60 = vpack.c.bf16 %v10428_v49, %v10428_v49  ;;  %v2947_v30 = vpack.c.bf16 %v10481_v51, %v10481_v51  ;;  %v13259_v33 = vld [vmem:[#allocation46_spill] sm:$0xff] }
 0x356   :  { %v3033_v53 = vunpack.c.l.b16 %v13253_v28  ;;  %v2936_v6 = vpack.c.bf16 %v10306_v26, %v10306_v26  ;;  %v2952_v35 = vpack.c.bf16 %v10537_v4, %v10537_v4  ;;  %v1976_v25 = vunpack.c.l.b16 %v1879_v16  ;;  %v13260_v28 = vld [vmem:[#allocation47_spill] sm:$0xff] }
 0x357   :  { %v3066_v23 = vsel %vm1981_vm4, %v10407_v45, %v3065_v46  ;;  %v3038_v52 = vunpack.c.l.b16 %v2950_v12  ;;  %v2953_v21 = vpack.c.bf16 %v1787_v1, %v1787_v1  ;;  %v1977_v59 = vunpack.c.l.b16 %v1880_v47  ;;  %v13257_v12 = vld [vmem:[#allocation49_spill] sm:$0xff] }
 0x358   :  { %v3067_v40 = vsel %vm1983_vm5, %v3031_v2, %v3066_v23  ;;  %v1978_v17 = vunpack.c.l.b16 %v1881_v24  ;;  %v2018_v49 = vsel %vm1987_vm7, %v1976_v25, %v2017_v56  ;;  %v3034_v15 = vunpack.c.l.b16 %v2946_v60  ;;  %v13256_v56 = vld [vmem:[#allocation48_spill] sm:$0xff]  ;;  %v8995_v25 = vld [vmem:[%s13046_s7 + $0x20] sm:$0xff]  }
 0x359   :  { %v3068_v51 = vsel %vm1985_vm6, %v3032_v32, %v3067_v40  ;;  %v3039_v62 = vunpack.c.l.b16 %v2951_v0  ;;  %v2019_v26 = vsel %vm1989_vm8, %v1977_v59, %v2018_v49  ;;  %v3035_v8 = vunpack.c.l.b16 %v2947_v30  ;;  %v13261_v0 = vld [vmem:[#allocation90_spill] sm:$0xff]  ;;  %v8993_v30 = vld [vmem:[%s13051_s9 + $0x10] sm:$0xff]   ;;  %v8996_v40 = vld [vmem:[%s13046_s7 + $0x28] sm:$0xff]  }
 0x35a   :  { %v3069_v4 = vsel %vm1987_vm7, %v3033_v53, %v3068_v51  ;;  %v3040_v31 = vunpack.c.l.b16 %v2952_v35  ;;  %v2020_v45 = vsel %vm1991_vm9, %v1978_v17, %v2019_v26  ;;  %v2954_v37 = vpack.c.bf16 %v10543_v36, %v10543_v36  ;;  %v13265_v17 = vld [vmem:[#allocation59_spill] sm:$0xff]  ;;  %v13266_v49 = vld [vmem:[#allocation61_spill] sm:$0xff]  ;;  %v13267_v51 = vld [vmem:[#allocation56_spill] sm:$0xff] }
 0x35b   :  { %v3070_v20 = vsel %vm1989_vm8, %v3034_v15, %v3069_v4  ;;  %v3041_v34 = vunpack.c.l.b16 %v2953_v21  ;;  %v2023_v1 = vpack.c.b16 %v2020_v45, %v2020_v45  ;;  %v2955_v22 = vpack.c.bf16 %v10573_v11, %v10573_v11  ;;  %v13263_v21 = vld [vmem:[#allocation55_spill] sm:$0xff]  ;;  %v8997_v4 = vld [vmem:[%s13046_s7 + $0x30] sm:$0xff]  }
 0x35c   :  { %v3071_v57 = vsel %vm1991_vm9, %v3035_v8, %v3070_v20  ;;  %v3024_v39 = vunpack.c.l.b16 %v2936_v6  ;;  %v2937_v7 = vpack.c.bf16 %v10348_v54, %v10348_v54  ;;  %v3059_v2 = vsel %vm1981_vm4, %v10239_v3, %v10346_v61 }
 0x35d   :  { %v3073_v38 = vsel %vm1981_vm4, %v3038_v52, %v10526_v18  ;;  %v13255_v36 = vpack.c.bf16 %v13254_v44, %v13254_v44  ;;  %8354 = vmatmul.mubr.msk.bf16.gmra.mrb[52].mxu0 %vm616_vm1, %v2023_v1  ;;  %v3042_v11 = vunpack.c.l.b16 %v2954_v37  ;;  %v3043_v3 = vunpack.c.l.b16 %v2955_v22  ;;  %v13262_v52 = vld [vmem:[#allocation57_spill] sm:$0xff]  ;;  %v13270_v37 = vld [vmem:[#allocation58_spill] sm:$0xff]  ;;  %v13272_v22 = vld [vmem:[#allocation63_spill] sm:$0xff] }
 0x35e   :  { %v3074_v58 = vsel %vm1983_vm5, %v3039_v62, %v3073_v38  ;;  %8413 = vmatprep.mubr.msk.bf16.mxu0 %vm9026_vm2, %v13213_v43  ;;  %v3025_v18 = vunpack.c.l.b16 %v2937_v7  ;;  %v2938_v46 = vpack.c.bf16 %v10266_v9, %v10266_v9  ;;  %v2904_v47 = vpack.c.bf16 %v13257_v12, %v13256_v56  ;;  %v8992_v9 = vld [vmem:[%s13051_s9 + $0x8] sm:$0xff]   ;;  %v13268_v62 = vld [vmem:[#allocation54_spill] sm:$0xff] }
 0x35f   :  { %v3023_v10 = vunpack.c.l.b16 %v13255_v36  ;;  %v3075_v54 = vsel %vm1985_vm6, %v3040_v31, %v3074_v58  ;;  %v2905_v48 = vpack.c.bf16 %v13259_v33, %v13258_v13  ;;  %v2906_v50 = vpack.c.bf16 %v10522_v42, %v10486_v27  ;;  %v13275_v38 = vld [vmem:[#allocation64_spill] sm:$0xff]  ;;  %v13276_v36 = vld [vmem:[#allocation69_spill] sm:$0xff] }
 0x360   :  { %v3076_v61 = vsel %vm1987_vm7, %v3041_v34, %v3075_v54  ;;  %v2907_v53 = vpack.c.bf16 %v10515_v5, %v13260_v28  ;;  %v2939_v16 = vpack.c.bf16 %v10371_v14, %v10371_v14  ;;  %v3026_v41 = vunpack.c.l.b16 %v2938_v46  ;;  %v13271_v34 = vld [vmem:[#allocation60_spill] sm:$0xff]  ;;  %v13279_v54 = vld [vmem:[#allocation71_spill] sm:$0xff] }
 0x361   :  { %v3060_v19 = vsel %vm1983_vm5, %v3023_v10, %v3059_v2  ;;  %v3077_v32 = vsel %vm1989_vm8, %v3042_v11, %v3076_v61  ;;  %v13264_v59 = vpack.c.bf16 %v13262_v52, %v13263_v21  ;;  %v2890_v15 = vpack.c.bf16 %v13266_v49, %v13265_v17  ;;  %v13274_v2 = vld [vmem:[#allocation62_spill] sm:$0xff]  ;;  %v13277_v10 = vld [vmem:[#allocation72_spill] sm:$0xff]  ;;  %v13281_v61 = vld [vmem:[#allocation77_spill] sm:$0xff] }
 0x362   :  { %v3061_v55 = vsel %vm1985_vm6, %v3024_v39, %v3060_v19  ;;  %v3078_v63 = vsel %vm1991_vm9, %v3043_v3, %v3077_v32  ;;  %v3027_v6 = vunpack.c.l.b16 %v2939_v16  ;;  %v13269_v26 = vpack.c.bf16 %v13267_v51, %v13268_v62  ;;  %v13273_v39 = vld [vmem:[#allocation67_spill] sm:$0xff]  ;;  %v13278_v11 = vld [vmem:[#allocation68_spill] sm:$0xff]  ;;  %v13291_v52 = vld [vmem:[#allocation86_spill] sm:$0xff] }
 0x363   :  { %v3062_v24 = vsel %vm1987_vm7, %v3025_v18, %v3061_v55  ;;  %v3081_v23 = vpack.c.b16 %v3078_v63, %v3078_v63  ;;  %v2891_v1 = vpack.c.bf16 %v13271_v34, %v13270_v37  ;;  %v2892_v7 = vpack.c.bf16 %v13273_v39, %v13272_v22  ;;  %v13280_v3 = vld [vmem:[#allocation75_spill] sm:$0xff]  ;;  %v13283_v16 = vld [vmem:[#allocation76_spill] sm:$0xff]  ;;  %v13293_v17 = vld [vmem:[#allocation45_spill] sm:$0xff] }
 0x364   :  { %v3063_v60 = vsel %vm1989_vm8, %v3026_v41, %v3062_v24  ;;  %v2893_v44 = vpack.c.bf16 %v13275_v38, %v13274_v2  ;;  %v2894_v58 = vpack.c.bf16 %v13277_v10, %v13276_v36  ;;  %v2895_v19 = vpack.c.bf16 %v13279_v54, %v13278_v11  ;;  %v13284_v41 = vld [vmem:[#allocation80_spill] sm:$0xff] }
 0x365   :  { %8414 = vmatmul.mubr.msk.bf16.vlgmr.msra.gmra.mrb[56].mxu0 %vm616_vm1, %v3079_v29  ;;  %v3064_v14 = vsel %vm1991_vm9, %v3027_v6, %v3063_v60  ;;  %v8994_v29 = vld [vmem:[%s13051_s9 + $0x18] sm:$0xff]   ;;  %v2896_v18 = vpack.c.bf16 %v13281_v61, %v13280_v3  ;;  %v9027_v56 = vmov 1966171168  }
 0x366   :  { %8417 = vmatprep.mubr.msk.bf16.mxu0 %vm9026_vm2, %v13213_v43  ;;  %8426 = vmatpush3.bf16.msra.mxu0 %v13261_v0  ;;  %v3080_v35 = vpack.c.b16 %v3071_v57, %v3064_v14  ;;  %v8998_v57 = vld [vmem:[%s13046_s7 + $0x38] sm:$0xff]   ;;  %v13285_v0 = vld [vmem:[#allocation83_spill] sm:$0xff]  ;;  %v2120_v12 = vunpack.c.l.s4 %v9027_v56 }
 0x367   :  { %8427 = vmatprep.subr.bf16.mxu0 %v8992_v9  ;;  %v2898_v60 = vpack.c.bf16 %v13285_v0, %v13284_v41  ;;  %v13287_v6 = vld [vmem:[#allocation81_spill] sm:$0xff] }
 0x368   :  { %v2121_v42 = vunpack.c.0.s8 %v2120_v12 }
 0x36a   :  { %8428 = vmatpush3.bf16.msra.mxu0 %v8992_v9  ;;  %v13282_v9 = vld [vmem:[#allocation73_spill] sm:$0xff] }
 0x36b   :  { %8429 = vmatprep.subr.bf16.mxu0 %v8993_v30  ;;  %v2897_v24 = vpack.c.bf16 %v13283_v16, %v13282_v9  ;;  %v13298_v9 = vld [vmem:[#allocation4_spill] sm:$0xff] }
 0x36d   :  { %8418 = vmatmul.mubr.msk.bf16.gmra.mrb[60].mxu0 %vm616_vm1, %v3080_v35  ;;  %v13288_v35 = vld [vmem:[#allocation85_spill] sm:$0xff] }
 0x36e   :  { %8421 = vmatprep.mubr.msk.bf16.mxu0 %vm9026_vm2, %v13213_v43  ;;  %8430 = vmatpush3.bf16.msra.mxu0 %v8993_v30  ;;  %v13286_v30 = vld [vmem:[#allocation78_spill] sm:$0xff] }
 0x36f   :  { %8431 = vmatprep.subr.bf16.mxu0 %v8994_v29  ;;  %v2899_v14 = vpack.c.bf16 %v13287_v6, %v13286_v30 }
 0x372   :  { %8432 = vmatpush3.bf16.msra.mxu0 %v8994_v29  ;;  %v13289_v29 = vld [vmem:[#allocation87_spill] sm:$0xff] }
 0x373   :  { %8473 = vmatprep.subr.bf16.mxu0 %v8995_v25 }
 0x375   :  { %8422 = vmatmul.mubr.msk.bf16.gmra.mrb[64].mxu0 %vm616_vm1, %v3081_v23  ;;  %v13290_v23 = vld [vmem:[#allocation84_spill] sm:$0xff] }
 0x376   :  { %8433 = vmatprep.mubr.msk.bf16.mxu0 %vm616_vm1, %v13264_v59  ;;  %v2901_v21 = vpack.c.bf16 %v13291_v52, %v13290_v23 }
 0x37d   :  { %8434 = vmatmul.mubr.msk.bf16.vlgmr.msra.gmra.mrb[68].mxu0 %vm616_vm1, %v13269_v26  ;;  %v13294_v26 = vld [vmem:[#allocation88_spill] sm:$0xff] }
 0x37e   :  { %8437 = vmatprep.mubr.msk.bf16.mxu0 %vm616_vm1, %v2890_v15  ;;  %8474 = vmatpush3.bf16.msra.mxu0 %v8995_v25  ;;  %v2900_v25 = vpack.c.bf16 %v13289_v29, %v13288_v35  ;;  %v10834_v29 = vld [vmem:[%s13047_s6 + $0x1] ss:$0 sm:$0xff] }
 0x37f   :  { %8475 = vmatprep.subr.bf16.mxu0 %v8996_v40 }
 0x382   :  { %8476 = vmatpush3.bf16.msra.mxu0 %v8996_v40  ;;  %v13292_v40 = vld [vmem:[#allocation89_spill] sm:$0xff] }
 0x383   :  { %v10710_v8 = vpop.f32.mrb[116].mxu1  ;;  %8477 = vmatprep.subr.bf16.mxu0 %v8997_v4  ;;  %v2902_v49 = vpack.c.bf16 %v13293_v17, %v13292_v40 }
 0x384   :  { %v10715_v31 = vpop.f32.mrb[117].mxu1 }
 0x385   :  { %v10717_v45 = vpop.f32.mrb[118].mxu1  ;;  %8438 = vmatmul.mubr.msk.bf16.gmra.mrb[72].mxu0 %vm616_vm1, %v2891_v1 }
 0x386   :  { %v10719_v20 = vpop.f32.mrb[119].mxu1  ;;  %8441 = vmatprep.mubr.msk.bf16.mxu0 %vm616_vm1, %v2892_v7  ;;  %8478 = vmatpush3.bf16.msra.mxu0 %v8997_v4  ;;  %v13295_v4 = vld [vmem:[#allocation91_spill] sm:$0xff] }
 0x387   :  { %8479 = vmatprep.subr.bf16.mxu0 %v8998_v57  ;;  %v2903_v37 = vpack.c.bf16 %v13295_v4, %v13294_v26 }
 0x38a   :  { %8480 = vmatpush3.bf16.msra.mxu0 %v8998_v57 }
 0x38d   :  { %8442 = vmatmul.mubr.msk.bf16.gmra.mrb[76].mxu0 %vm616_vm1, %v2893_v44 }
 0x38e   :  { %8445 = vmatprep.mubr.msk.bf16.mxu0 %vm616_vm1, %v2894_v58 }
 0x395   :  { %8446 = vmatmul.mubr.msk.bf16.gmra.mrb[80].mxu0 %vm616_vm1, %v2895_v19 }
 0x396   :  { %8449 = vmatprep.mubr.msk.bf16.mxu0 %vm616_vm1, %v2896_v18 }
 0x399   :  { %v10742_v46 = vpop.f32.mrb[120].mxu1 }
 0x39a   :  { %v10744_v55 = vpop.f32.mrb[121].mxu1 }
 0x39b   :  { %v10746_v32 = vpop.f32.mrb[122].mxu1 }
 0x39c   :  { %v10748_v63 = vpop.f32.mrb[123].mxu1 }
 0x39d   :  { %8450 = vmatmul.mubr.msk.bf16.gmra.mrb[84].mxu0 %vm616_vm1, %v2897_v24 }
 0x39e   :  { %8453 = vmatprep.mubr.msk.bf16.mxu0 %vm616_vm1, %v2898_v60 }
 0x3a5   :  { %8454 = vmatmul.mubr.msk.bf16.gmra.mrb[88].mxu0 %vm616_vm1, %v2899_v14 }
 0x3a6   :  { %8457 = vmatprep.mubr.msk.bf16.mxu0 %vm616_vm1, %v2900_v25 }
 0x3ab   :  { %v10764_v59 = vpop.f32.mrb[124].mxu1 }
 0x3ac   :  { %v10768_v15 = vpop.f32.mrb[125].mxu1 }
 0x3ad   :  { %8458 = vmatmul.mubr.msk.bf16.gmra.mrb[92].mxu0 %vm616_vm1, %v2901_v21  ;;  %v10771_v51 = vpop.f32.mrb[126].mxu1 }
 0x3ae   :  { %8461 = vmatprep.mubr.msk.bf16.mxu0 %vm616_vm1, %v2902_v49  ;;  %v10774_v62 = vpop.f32.mrb[127].mxu1 }
 0x3b5   :  { %8462 = vmatmul.mubr.msk.bf16.gmra.mrb[96].mxu0 %vm616_vm1, %v2903_v37 }
 0x3b6   :  { %8465 = vmatprep.mubr.msk.bf16.mxu0 %vm616_vm1, %v2904_v47 }
 0x3bd   :  { %8466 = vmatmul.mubr.msk.bf16.gmra.mrb[100].mxu0 %vm616_vm1, %v2905_v48  ;;  %v13296_v48 = vld [vmem:[#allocation3_spill] sm:$0xff] }
 0x3be   :  { %8469 = vmatprep.mubr.msk.bf16.mxu0 %vm616_vm1, %v2906_v50  ;;  %v10812_v50 = vsub.s32 %v2121_v42, %v13296_v48 }
 0x3bf   :  { %v10791_v34 = vpop.f32.mrb[128].mxu1 }
 0x3c0   :  { %v10793_v1 = vpop.f32.mrb[129].mxu1  ;;  %13297 = vst [vmem:[#allocation52_spill] sm:$0xff] %v10812_v50 }
 0x3c1   :  { %v10795_v57 = vpop.f32.mrb[130].mxu1 }
 0x3c2   :  { %v10797_v22 = vpop.f32.mrb[131].mxu1 }
 0x3c5   :  { %8470 = vmatmul.mubr.msk.bf16.gmra.mrb[104].mxu0 %vm616_vm1, %v2907_v53 }
 0x3d8   :  { %v10803_v47 = vpop.f32.mrb[132].mxu1 }
 0x3d9   :  { %v10805_v27 = vpop.f32.mrb[133].mxu1 }
 0x3da   :  { %v10807_v13 = vpop.f32.mrb[134].mxu1 }
 0x3db   :  { %v10809_v33 = vpop.f32.mrb[135].mxu1 }
 0x3e2   :  { %v2091_v39 = vpop.f32.mrb[44].mxu0 }
 0x3e3   :  { %v2118_v7 = vcombine.high %v2091_v39, %v2091_v39  ;;  %v2125_v5 = vrot.slane %v2091_v39, %v10812_v50  ;;  %v8347_v28 = vpop.f32.mrb[45].mxu0 }
 0x3e4   :  { %v2094_v53 = vpop.f32.mrb[46].mxu0 }
 0x3e5   :  { %v2132_v2 = vrot.slane %v2118_v7, %v10812_v50  ;;  %v2133_v38 = vcombine.high %v2125_v5, %v2125_v5  ;;  %v2141_v44 = vrot.slane %v2125_v5, %v10812_v50  ;;  %v2167_v36 = vcombine.high %v2094_v53, %v2094_v53  ;;  %v8348_v10 = vpop.f32.mrb[47].mxu0 }
 0x3e6   :  { %v2174_v58 = vrot.slane %v2094_v53, %v10812_v50  ;;  %v10818_v11 = vpop.f32.mrb[136].mxu1 }
 0x3e7   :  { %v2134_v54 = vcombine.high %v2132_v2, %v2132_v2  ;;  %v2148_v19 = vrot.slane %v2132_v2, %v10812_v50  ;;  %v2155_v3 = vrot.slane %v2133_v38, %v10812_v50  ;;  %v2163_v61 = vcombine.high %v2141_v44, %v2141_v44  ;;  %v10822_v18 = vpop.f32.mrb[137].mxu1 }
 0x3e8   :  { %v2366_v16 = vrot.slane %v2141_v44, %v13298_v9  ;;  %v2181_v24 = vrot.slane %v2167_v36, %v10812_v50  ;;  %v2182_v41 = vcombine.high %v2174_v58, %v2174_v58  ;;  %v2190_v0 = vrot.slane %v2174_v58, %v10812_v50  ;;  %v10827_v60 = vpop.f32.mrb[138].mxu1 }
 0x3e9   :  { %v2162_v30 = vrot.slane %v2134_v54, %v10812_v50  ;;  %v2164_v6 = vcombine.high %v2148_v19, %v2148_v19  ;;  %v2165_v14 = vcombine.high %v2155_v3, %v2155_v3  ;;  %v2370_v35 = vrot.slane %v2155_v3, %v13298_v9  ;;  %v10836_v25 = vpop.f32.mrb[139].mxu1 }
 0x3ea   :  { %v2374_v23 = vrot.slane %v2163_v61, %v13298_v9  ;;  %v2382_v52 = vrot.slane %v2148_v19, %v13298_v9  ;;  %v2682_v21 = vadd.f32 %v10715_v31, %v2366_v16  ;;  %v2183_v40 = vcombine.high %v2181_v24, %v2181_v24 }
 0x3eb   :  { %v2166_v17 = vcombine.high %v2162_v30, %v2162_v30  ;;  %v2378_v49 = vrot.slane %v2165_v14, %v13298_v9  ;;  %v2386_v26 = vrot.slane %v2162_v30, %v13298_v9  ;;  %v2390_v4 = vrot.slane %v2164_v6, %v13298_v9 }
 0x3ec   :  { %v2690_v37 = vadd.f32 %v10710_v8, %v2374_v23  ;;  %v2685_v56 = vadd.f32 %v10719_v20, %v2370_v35  ;;  %v2698_v12 = vadd.f32 %v10744_v55, %v2382_v52  ;;  %v2848_v42 = vadd.f32 %v10834_v29, %v2682_v21  ;;  %v8999_v55 = vld [vmem:[%s13051_s9 + $0x20] sm:$0xff]  }
 0x3ed   :  { %v2394_v39 = vrot.slane %v2166_v17, %v13298_v9  ;;  %v2693_v31 = vadd.f32 %v10717_v45, %v2378_v49  ;;  %v2706_v7 = vadd.f32 %v10742_v46, %v2390_v4  ;;  %v2701_v5 = vadd.f32 %v10748_v63, %v2386_v26  ;;  %8609 = vmatprep.subr.bf16.mxu0 %v8999_v55 }
 0x3ee   :  { %v2850_v28 = vadd.f32 %v10834_v29, %v2690_v37  ;;  %v2197_v53 = vrot.slane %v2181_v24, %v10812_v50  ;;  %v2204_v8 = vrot.slane %v2182_v41, %v10812_v50  ;;  %v2211_v20 = vrot.slane %v2183_v40, %v10812_v50 }
 0x3ef   :  { %v2851_v2 = vadd.f32 %v10834_v29, %v2693_v31  ;;  %v2212_v38 = vcombine.high %v2190_v0, %v2190_v0  ;;  %v2398_v45 = vrot.slane %v2190_v0, %v13298_v9  ;;  %v2849_v46 = vadd.f32 %v10834_v29, %v2685_v56 }
 0x3f0   :  { %v3900_v63 = vmax.f32 %v2850_v28, 0.0  ;;  %v2213_v44 = vcombine.high %v2197_v53, %v2197_v53  ;;  %v2214_v36 = vcombine.high %v2204_v8, %v2204_v8  ;;  %v2215_v10 = vcombine.high %v2211_v20, %v2211_v20 }
 0x3f1   :  { %v3901_v58 = vmax.f32 %v2851_v2, 0.0  ;;  %v2402_v54 = vrot.slane %v2204_v8, %v13298_v9  ;;  %v2406_v19 = vrot.slane %v2212_v38, %v13298_v9  ;;  %v2414_v3 = vrot.slane %v2197_v53, %v13298_v9 }
 0x3f2   :  { %v2410_v61 = vrot.slane %v2214_v36, %v13298_v9  ;;  %v2418_v16 = vrot.slane %v2211_v20, %v13298_v9  ;;  %v2422_v24 = vrot.slane %v2213_v44, %v13298_v9  ;;  %v2426_v41 = vrot.slane %v2215_v10, %v13298_v9 }
 0x3f3   :  { %v3939_v0 = vpack.c.bf16 %v3901_v58, %v3900_v63  ;;  %v2714_v30 = vadd.f32 %v10768_v15, %v2398_v45  ;;  %v2722_v6 = vadd.f32 %v10764_v59, %v2406_v19  ;;  %v2717_v14 = vadd.f32 %v10774_v62, %v2402_v54 }
 0x3f4   :  { %v2725_v35 = vadd.f32 %v10771_v51, %v2410_v61  ;;  %v2730_v23 = vadd.f32 %v10793_v1, %v2414_v3  ;;  %v2738_v52 = vadd.f32 %v10791_v34, %v2422_v24  ;;  %v2733_v21 = vadd.f32 %v10797_v22, %v2418_v16 }
 0x3f5   :  { %v2856_v40 = vadd.f32 %v10834_v29, %v2714_v30  ;;  %v3898_v17 = vmax.f32 %v2848_v42, 0.0  ;;  %v3899_v49 = vmax.f32 %v2849_v46, 0.0  ;;  %v2852_v26 = vadd.f32 %v10834_v29, %v2698_v12  ;;  %v9000_v12 = vld [vmem:[%s13051_s9 + $0x28] sm:$0xff]  }
 0x3f6   :  { %v2853_v15 = vadd.f32 %v10834_v29, %v2701_v5  ;;  %v2709_v59 = vadd.f32 %v10746_v32, %v2394_v39  ;;  %v2854_v62 = vadd.f32 %v10834_v29, %v2706_v7  ;;  %v2857_v51 = vadd.f32 %v10834_v29, %v2717_v14 }
 0x3f7   :  { %v3938_v4 = vpack.c.bf16 %v3899_v49, %v3898_v17  ;;  %v3902_v1 = vmax.f32 %v2852_v26, 0.0  ;;  %v3906_v37 = vmax.f32 %v2856_v40, 0.0  ;;  %v2858_v34 = vadd.f32 %v10834_v29, %v2722_v6 }
 0x3f8   :  { %v3903_v22 = vmax.f32 %v2853_v15, 0.0  ;;  %v2855_v56 = vadd.f32 %v10834_v29, %v2709_v59  ;;  %v3904_v42 = vmax.f32 %v2854_v62, 0.0  ;;  %v3907_v31 = vmax.f32 %v2857_v51, 0.0  ;;  %v10891_v28 = vpop.f32.mrb[140].mxu1 }
 0x3f9   :  { %8481 = vmatprep.mubr.msk.bf16.mxu0 %vm616_vm1, %v3938_v4  ;;  %v2859_v32 = vadd.f32 %v10834_v29, %v2725_v35  ;;  %v3908_v39 = vmax.f32 %v2858_v34, 0.0  ;;  %v2860_v7 = vadd.f32 %v10834_v29, %v2730_v23  ;;  %v2861_v5 = vadd.f32 %v10834_v29, %v2733_v21  ;;  %v10895_v38 = vpop.f32.mrb[141].mxu1 }
 0x3fa   :  { %8482 = vmatmul.mubr.msk.bf16.vlgmr.msra.gmra.mrb[68].mxu0 %vm616_vm1, %v3939_v0  ;;  %v3940_v53 = vpack.c.bf16 %v3903_v22, %v3902_v1  ;;  %v3905_v8 = vmax.f32 %v2855_v56, 0.0  ;;  %v3942_v20 = vpack.c.bf16 %v3907_v31, %v3906_v37  ;;  %v2741_v2 = vadd.f32 %v10795_v57, %v2426_v41  ;;  %v10898_v36 = vpop.f32.mrb[142].mxu1 }
 0x3fb   :  { %v3909_v45 = vmax.f32 %v2859_v32, 0.0  ;;  %v3910_v46 = vmax.f32 %v2860_v7, 0.0  ;;  %v3911_v63 = vmax.f32 %v2861_v5, 0.0  ;;  %v2862_v44 = vadd.f32 %v10834_v29, %v2738_v52  ;;  %8610 = vmatpush3.bf16.msra.mxu0 %v8999_v55  ;;  %v10902_v54 = vpop.f32.mrb[143].mxu1 }
 0x3fc   :  { %8485 = vmatprep.mubr.msk.bf16.mxu0 %vm616_vm1, %v3940_v53  ;;  %v3941_v10 = vpack.c.bf16 %v3905_v8, %v3904_v42  ;;  %v2863_v58 = vadd.f32 %v10834_v29, %v2741_v2  ;;  %8611 = vmatprep.subr.bf16.mxu0 %v9000_v12 }
 0x3fd   :  { %v3943_v19 = vpack.c.bf16 %v3909_v45, %v3908_v39  ;;  %v3944_v57 = vpack.c.bf16 %v3911_v63, %v3910_v46  ;;  %v3912_v3 = vmax.f32 %v2862_v44, 0.0 }
 0x3fe   :  { %v3913_v61 = vmax.f32 %v2863_v58, 0.0 }
 0x3ff   :  { %8612 = vmatpush3.bf16.msra.mxu0 %v9000_v12 }
 0x400   :  { %v3945_v16 = vpack.c.bf16 %v3913_v61, %v3912_v3 }
 0x402   :  { %8486 = vmatmul.mubr.msk.bf16.gmra.mrb[72].mxu0 %vm616_vm1, %v3941_v10 }
 0x403   :  { %8489 = vmatprep.mubr.msk.bf16.mxu0 %vm616_vm1, %v3942_v20  ;;  %v10906_v55 = vpop.f32.mrb[144].mxu1 }
 0x404   :  { %v10908_v24 = vpop.f32.mrb[145].mxu1 }
 0x405   :  { %v10910_v41 = vpop.f32.mrb[146].mxu1 }
 0x406   :  { %v10912_v0 = vpop.f32.mrb[147].mxu1 }
 0x40a   :  { %8490 = vmatmul.mubr.msk.bf16.gmra.mrb[76].mxu0 %vm616_vm1, %v3943_v19 }
 0x40b   :  { %8493 = vmatprep.mubr.msk.bf16.mxu0 %vm616_vm1, %v3944_v57 }
 0x412   :  { %8494 = vmatmul.mubr.msk.bf16.gmra.mrb[80].mxu0 %vm616_vm1, %v3945_v16 }
 0x414   :  { %v10917_v30 = vpop.f32.mrb[148].mxu1 }
 0x415   :  { %v10919_v6 = vpop.f32.mrb[149].mxu1 }
 0x416   :  { %v10921_v14 = vpop.f32.mrb[150].mxu1 }
 0x417   :  { %v10923_v35 = vpop.f32.mrb[151].mxu1 }
 0x41c   :  { %v10925_v23 = vpop.f32.mrb[152].mxu1 }
 0x41d   :  { %v10927_v52 = vpop.f32.mrb[153].mxu1 }
 0x41e   :  { %v10929_v21 = vpop.f32.mrb[154].mxu1 }
 0x41f   :  { %v10931_v40 = vpop.f32.mrb[155].mxu1 }
 0x427   :  { %v2099_v17 = vpop.f32.mrb[48].mxu0 }
 0x428   :  { %v2216_v49 = vcombine.high %v2099_v17, %v2099_v17  ;;  %v2223_v26 = vrot.slane %v2099_v17, %v10812_v50  ;;  %v8351_v15 = vpop.f32.mrb[49].mxu0 }
 0x429   :  { %v2102_v59 = vpop.f32.mrb[50].mxu0 }
 0x42a   :  { %v2230_v62 = vrot.slane %v2216_v49, %v10812_v50  ;;  %v2231_v51 = vcombine.high %v2223_v26, %v2223_v26  ;;  %v2239_v4 = vrot.slane %v2223_v26, %v10812_v50  ;;  %v2265_v1 = vcombine.high %v2102_v59, %v2102_v59  ;;  %v8352_v37 = vpop.f32.mrb[51].mxu0 }
 0x42b   :  { %v2272_v34 = vrot.slane %v2102_v59, %v10812_v50 }
 0x42c   :  { %v2232_v22 = vcombine.high %v2230_v62, %v2230_v62  ;;  %v2246_v56 = vrot.slane %v2230_v62, %v10812_v50  ;;  %v2253_v42 = vrot.slane %v2231_v51, %v10812_v50  ;;  %v2261_v31 = vcombine.high %v2239_v4, %v2239_v4 }
 0x42d   :  { %v2430_v12 = vrot.slane %v2239_v4, %v13298_v9  ;;  %v2279_v32 = vrot.slane %v2265_v1, %v10812_v50  ;;  %v2280_v39 = vcombine.high %v2272_v34, %v2272_v34  ;;  %v2288_v7 = vrot.slane %v2272_v34, %v10812_v50 }
 0x42e   :  { %v10943_v5 = vrot.slane %v2232_v22, %v10812_v50  ;;  %v2262_v53 = vcombine.high %v2246_v56, %v2246_v56  ;;  %v2263_v8 = vcombine.high %v2253_v42, %v2253_v42  ;;  %v2434_v20 = vrot.slane %v2253_v42, %v13298_v9 }
 0x42f   :  { %v2438_v2 = vrot.slane %v2261_v31, %v13298_v9  ;;  %v2446_v45 = vrot.slane %v2246_v56, %v13298_v9  ;;  %v2746_v46 = vadd.f32 %v10805_v27, %v2430_v12  ;;  %v2281_v63 = vcombine.high %v2279_v32, %v2279_v32 }
 0x430   :  { %v2442_v44 = vrot.slane %v2263_v8, %v13298_v9  ;;  %v2450_v10 = vrot.slane %v10943_v5, %v13298_v9  ;;  %v2454_v58 = vrot.slane %v2262_v53, %v13298_v9  ;;  %v2749_v57 = vadd.f32 %v10809_v33, %v2434_v20  ;;  %v2107_v61 = vpop.f32.mrb[52].mxu0 }
 0x431   :  { %v2754_v19 = vadd.f32 %v10803_v47, %v2438_v2  ;;  %v10956_v3 = vadd.f32 %v10822_v18, %v2446_v45  ;;  %v8355_v49 = vpop.f32.mrb[53].mxu0  ;;  %v2295_v26 = vrot.slane %v2279_v32, %v10812_v50  ;;  %v2302_v15 = vrot.slane %v2280_v39, %v10812_v50 }
 0x432   :  { %v2757_v16 = vadd.f32 %v10807_v13, %v2442_v44  ;;  %v10960_v27 = vadd.f32 %v10818_v11, %v2454_v58  ;;  %v10963_v17 = vadd.f32 %v10836_v25, %v2450_v10  ;;  %v10968_v47 = vrot.slane %v2281_v63, %v10812_v50  ;;  %v2110_v18 = vpop.f32.mrb[54].mxu0 }
 0x433   :  { %v2310_v33 = vcombine.high %v2288_v7, %v2288_v7  ;;  %v2864_v59 = vadd.f32 %v10834_v29, %v2746_v46  ;;  %v2462_v13 = vrot.slane %v2288_v7, %v13298_v9  ;;  %v2314_v62 = vcombine.high %v2107_v61, %v2107_v61  ;;  %v8356_v51 = vpop.f32.mrb[55].mxu0 }
 0x434   :  { %v2321_v11 = vrot.slane %v2107_v61, %v10812_v50  ;;  %v2311_v25 = vcombine.high %v2295_v26, %v2295_v26  ;;  %v2312_v4 = vcombine.high %v2302_v15, %v2302_v15  ;;  %v2466_v1 = vrot.slane %v2302_v15, %v13298_v9 }
 0x435   :  { %v2865_v37 = vadd.f32 %v10834_v29, %v2749_v57  ;;  %v2470_v34 = vrot.slane %v2310_v33, %v13298_v9  ;;  %v2478_v22 = vrot.slane %v2295_v26, %v13298_v9  ;;  %v2482_v56 = vrot.slane %v10968_v47, %v13298_v9 }
 0x436   :  { %v2778_v42 = vadd.f32 %v10895_v38, %v2462_v13  ;;  %v2474_v31 = vrot.slane %v2312_v4, %v13298_v9  ;;  %v2486_v12 = vrot.slane %v2311_v25, %v13298_v9  ;;  %v2781_v32 = vadd.f32 %v10902_v54, %v2466_v1 }
 0x437   :  { %v10984_v39 = vadd.f32 %v10891_v28, %v2470_v34  ;;  %v10987_v7 = vadd.f32 %v10908_v24, %v2478_v22  ;;  %v10990_v53 = vadd.f32 %v10912_v0, %v2482_v56  ;;  %v2328_v20 = vrot.slane %v2314_v62, %v10812_v50 }
 0x438   :  { %v10993_v8 = vadd.f32 %v10898_v36, %v2474_v31  ;;  %v10996_v38 = vadd.f32 %v10906_v55, %v2486_v12  ;;  %v2329_v2 = vcombine.high %v2321_v11, %v2321_v11  ;;  %v10999_v45 = vpop.f32.mrb[56].mxu0  ;;  %v2264_v28 = vcombine.high %v10943_v5, %v10943_v5 }
 0x439   :  { %v2337_v54 = vrot.slane %v2321_v11, %v10812_v50  ;;  %v3914_v24 = vmax.f32 %v2864_v59, 0.0  ;;  %v3915_v46 = vmax.f32 %v2865_v37, 0.0  ;;  %v8415_v0 = vpop.f32.mrb[57].mxu0  ;;  %v2330_v63 = vcombine.high %v2328_v20, %v2328_v20 }
 0x43a   :  { %v2344_v36 = vrot.slane %v2328_v20, %v10812_v50  ;;  %v2351_v44 = vrot.slane %v2329_v2, %v10812_v50  ;;  %v2867_v55 = vadd.f32 %v10834_v29, %v2757_v16  ;;  %v11007_v10 = vpop.f32.mrb[58].mxu0  ;;  %v2866_v5 = vadd.f32 %v10834_v29, %v2754_v19 }
 0x43b   :  { %v2359_v58 = vcombine.high %v2337_v54, %v2337_v54  ;;  %v2494_v57 = vrot.slane %v2337_v54, %v13298_v9  ;;  %v3946_v61 = vpack.c.bf16 %v3915_v46, %v3914_v24  ;;  %v8416_v49 = vpop.f32.mrb[59].mxu0  ;;  %v11012_v26 = vrot.slane %v2330_v63, %v10812_v50 }
 0x43c   :  { %v2360_v15 = vcombine.high %v2344_v36, %v2344_v36  ;;  %v2361_v33 = vcombine.high %v2351_v44, %v2351_v44  ;;  %v2498_v18 = vrot.slane %v2351_v44, %v13298_v9  ;;  %v2510_v16 = vrot.slane %v2344_v36, %v13298_v9 }
 0x43d   :  { %v2502_v59 = vrot.slane %v2359_v58, %v13298_v9  ;;  %v2810_v13 = vadd.f32 %v10919_v6, %v2494_v57  ;;  %8497 = vmatprep.mubr.msk.bf16.mxu0 %vm616_vm1, %v3946_v61  ;;  %v3917_v62 = vmax.f32 %v2867_v55, 0.0  ;;  %v2458_v11 = vrot.slane %v2264_v28, %v13298_v9 }
 0x43e   :  { %v2506_v19 = vrot.slane %v2361_v33, %v13298_v9  ;;  %v2514_v51 = vrot.slane %v11012_v26, %v13298_v9  ;;  %v2518_v25 = vrot.slane %v2360_v15, %v13298_v9  ;;  %v2813_v1 = vadd.f32 %v10923_v35, %v2498_v18 }
 0x43f   :  { %v2818_v4 = vadd.f32 %v10917_v30, %v2502_v59  ;;  %v2826_v37 = vadd.f32 %v10927_v52, %v2510_v16  ;;  %v3916_v34 = vmax.f32 %v2866_v5, 0.0  ;;  %v2868_v20 = vadd.f32 %v10834_v29, %v10956_v3 }
 0x440   :  { %v2821_v6 = vadd.f32 %v10921_v14, %v2506_v19  ;;  %v11029_v22 = vadd.f32 %v10925_v23, %v2518_v25  ;;  %v2829_v56 = vadd.f32 %v10931_v40, %v2514_v51  ;;  %v11032_v31 = vpop.f32.mrb[60].mxu0  ;;  %v2869_v30 = vadd.f32 %v10834_v29, %v10963_v17 }
 0x441   :  { %v3947_v12 = vpack.c.bf16 %v3917_v62, %v3916_v34  ;;  %v8419_v35 = vpop.f32.mrb[61].mxu0  ;;  %v2773_v52 = vadd.f32 %v10827_v60, %v2458_v11  ;;  %v3918_v14 = vmax.f32 %v2868_v20, 0.0  ;;  %v2870_v54 = vadd.f32 %v10834_v29, %v10960_v27 }
 0x442   :  { %v11039_v2 = vpop.f32.mrb[62].mxu0  ;;  %v3919_v23 = vmax.f32 %v2869_v30, 0.0  ;;  %v2872_v24 = vadd.f32 %v10834_v29, %v2778_v42  ;;  %v2313_v60 = vcombine.high %v10968_v47, %v10968_v47  ;;  %v2873_v17 = vadd.f32 %v10834_v29, %v2781_v32 }
 0x443   :  { %8498 = vmatmul.mubr.msk.bf16.gmra.mrb[84].mxu0 %vm616_vm1, %v3947_v12  ;;  %v8420_v28 = vpop.f32.mrb[63].mxu0  ;;  %v2871_v3 = vadd.f32 %v10834_v29, %v2773_v52  ;;  %v3920_v0 = vmax.f32 %v2870_v54, 0.0  ;;  %v2874_v42 = vadd.f32 %v10834_v29, %v10984_v39  ;;  %v2875_v57 = vadd.f32 %v10834_v29, %v10993_v8 }
 0x444   :  { %v3948_v40 = vpack.c.bf16 %v3919_v23, %v3918_v14  ;;  %v3922_v44 = vmax.f32 %v2872_v24, 0.0  ;;  %v3923_v55 = vmax.f32 %v2873_v17, 0.0  ;;  %v2490_v47 = vrot.slane %v2313_v60, %v13298_v9  ;;  %v9022_v17 = vld [vmem:[%s13044_s3] sm:$0x3] }
 0x445   :  { %v3921_v63 = vmax.f32 %v2871_v3, 0.0  ;;  %v2362_v32 = vcombine.high %v11012_v26, %v11012_v26  ;;  %v2880_v49 = vadd.f32 %v10834_v29, %v2810_v13  ;;  %v3924_v15 = vmax.f32 %v2874_v42, 0.0  ;;  %v13303_v42 = vld [vmem:[#allocation9_spill] sm:$0xff] }
 0x446   :  { %8501 = vmatprep.mubr.msk.bf16.mxu0 %vm616_vm1, %v3948_v40  ;;  %v3950_v5 = vpack.c.bf16 %v3923_v55, %v3922_v44  ;;  %v3925_v33 = vmax.f32 %v2875_v57, 0.0  ;;  %v2876_v39 = vadd.f32 %v10834_v29, %v10987_v7  ;;  %v2877_v8 = vadd.f32 %v10834_v29, %v10990_v53  ;;  %v13300_v44 = vld [vmem:[#allocation6_spill] sm:$0xff] }
 0x447   :  { %v3949_v27 = vpack.c.bf16 %v3921_v63, %v3920_v0  ;;  %v2805_v18 = vadd.f32 %v10910_v41, %v2490_v47  ;;  %v2878_v16 = vadd.f32 %v10834_v29, %v10996_v38  ;;  %v2881_v26 = vadd.f32 %v10834_v29, %v2813_v1  ;;  %v13299_v63 = vld [vmem:[#allocation5_spill] sm:$0xff]  ;;  %v13306_v47 = vld [vmem:[#allocation10_spill] sm:$0xff] }
 0x448   :  { %v11050_v46 = vpop.f32.mrb[64].mxu0  ;;  %v3951_v59 = vpack.c.bf16 %v3925_v33, %v3924_v15  ;;  %v3926_v62 = vmax.f32 %v2876_v39, 0.0  ;;  %v3927_v11 = vmax.f32 %v2877_v8, 0.0  ;;  %v2522_v13 = vrot.slane %v2362_v32, %v13298_v9  ;;  %v13308_v32 = vld [vmem:[#allocation11_spill] sm:$0xff]  ;;  %v13309_v15 = vld [vmem:[#allocation13_spill] sm:$0xff]  ;;  %v13310_v39 = vld [vmem:[#allocation12_spill] sm:$0xff] }
 0x449   :  { %v8423_v36 = vpop.f32.mrb[65].mxu0  ;;  %v2879_v19 = vadd.f32 %v10834_v29, %v2805_v18  ;;  %v3930_v51 = vmax.f32 %v2880_v49, 0.0  ;;  %v3931_v25 = vmax.f32 %v2881_v26, 0.0  ;;  %v3928_v53 = vmax.f32 %v2878_v16, 0.0  ;;  %v13312_v18 = vld [vmem:[#allocation14_spill] sm:$0xff]  ;;  %v13314_v16 = vld [vmem:[#allocation15_spill] sm:$0xff] }
 0x44a   :  { %v3168_v58 = vpop.f32.mrb[66].mxu0  ;;  %v3952_v7 = vpack.c.bf16 %v3927_v11, %v3926_v62  ;;  %v2882_v12 = vadd.f32 %v10834_v29, %v2818_v4  ;;  %v2883_v38 = vadd.f32 %v10834_v29, %v2821_v6  ;;  %v2884_v1 = vadd.f32 %v10834_v29, %v2826_v37  ;;  %v13315_v62 = vld [vmem:[#allocation17_spill] sm:$0xff] }
 0x44b   :  { %v8424_v61 = vpop.f32.mrb[67].mxu0  ;;  %8502 = vmatmul.mubr.msk.bf16.gmra.mrb[88].mxu0 %vm616_vm1, %v3949_v27  ;;  %v3929_v34 = vmax.f32 %v2879_v19, 0.0  ;;  %v3954_v41 = vpack.c.bf16 %v3931_v25, %v3930_v51  ;;  %v2885_v20 = vadd.f32 %v10834_v29, %v2829_v56  ;;  %v2837_v35 = vadd.f32 %v10929_v21, %v2522_v13  ;;  %v9001_v21 = vld [vmem:[%s13051_s9 + $0x30] sm:$0xff]   ;;  %v9004_v56 = vld [vmem:[%s13048_s5 + $0x28] sm:$0xff]   ;;  %v13318_v51 = vld [vmem:[#allocation18_spill] sm:$0xff] }
 0x44c   :  { %8505 = vmatprep.mubr.msk.bf16.mxu0 %vm616_vm1, %v3950_v5  ;;  %v2886_v52 = vadd.f32 %v10834_v29, %v11029_v22  ;;  %v3932_v14 = vmax.f32 %v2882_v12, 0.0  ;;  %v3933_v23 = vmax.f32 %v2883_v38, 0.0  ;;  %v3934_v28 = vmax.f32 %v2884_v1, 0.0  ;;  %8613 = vmatprep.subr.bf16.mxu0 %v9001_v21  ;;  %v9003_v22 = vld [vmem:[%s13048_s5 + $0x20] sm:$0xff]   ;;  %v13316_v13 = vld [vmem:[#allocation16_spill] sm:$0xff] }
 0x44d   :  { %v3953_v30 = vpack.c.bf16 %v3929_v34, %v3928_v53  ;;  %v3935_v40 = vmax.f32 %v2885_v20, 0.0  ;;  %v2887_v4 = vadd.f32 %v10834_v29, %v2837_v35  ;;  %v9002_v29 = vld [vmem:[%s13051_s9 + $0x38] sm:$0xff]   ;;  %8614 = vmatpush3.bf16.msra.mxu0 %v9001_v21  ;;  %8522 = vmatpush3.bf16.msra.mxu1 %v9003_v22  ;;  %v119_v60 = vsub.s32 1, %v13296_v48  ;;  %v13302_v58 = vld [vmem:[#allocation7_spill] sm:$0xff]  ;;  %v13304_v48 = vld [vmem:[#allocation8_spill] sm:$0xff] }
 0x44e   :  { %v3955_v54 = vpack.c.bf16 %v3933_v23, %v3932_v14  ;;  %v3936_v3 = vmax.f32 %v2886_v52, 0.0  ;;  %8615 = vmatprep.subr.bf16.mxu0 %v9002_v29  ;;  %8523 = vmatprep.subr.bf16.mxu1 %v13213_v43  ;;  %v13321_v34 = vld [vmem:[#allocation21_spill] sm:$0xff]  ;;  %v13322_v12 = vld [vmem:[#allocation20_spill] sm:$0xff]  ;;  %v13324_v1 = vld [vmem:[#allocation22_spill] sm:$0xff] }
 0x44f   :  { %v3956_v24 = vpack.c.bf16 %v3935_v40, %v3934_v28  ;;  %v3937_v6 = vmax.f32 %v2887_v4, 0.0  ;;  %v120_v0 = vrot.slane %v9022_v17, %v119_v60  ;;  %v13327_v52 = vld [vmem:[#allocation25_spill] sm:$0xff]  ;;  %v13328_v23 = vld [vmem:[#allocation24_spill] sm:$0xff]  ;;  %v3176_v40 = vcombine.high %v10999_v45, %v10999_v45  ;;  %v13330_v4 = vld [vmem:[#allocation27_spill] sm:$0xff] }
 0x450   :  { %v13334_v21 = vld [vmem:[#allocation28_spill] sm:$0xff]  ;;  %v13336_v22 = vld [vmem:[#allocation31_spill] sm:$0xff]  ;;  %v13337_v60 = vld [vmem:[#allocation30_spill] sm:$0xff] }
 0x451   :  { %v3957_v37 = vpack.c.bf16 %v3937_v6, %v3936_v3  ;;  %8616 = vmatpush3.bf16.msra.mxu0 %v9002_v29  ;;  %8524 = vmatpush3.bf16.msra.mxu1 %v9004_v56  ;;  %v11106_v36 = vadd.f32 %v13299_v63, %v120_v0  ;;  %v11109_v55 = vadd.f32 %v13300_v44, %v120_v0  ;;  %v13332_v6 = vld [vmem:[#allocation26_spill] sm:$0xff] }
 0x452   :  { %8525 = vmatprep.subr.bf16.mxu1 %v13213_v43  ;;  %v11112_v27 = vadd.f32 %v13302_v58, %v120_v0  ;;  %v11115_v57 = vadd.f32 %v13303_v42, %v120_v0  ;;  %v11118_v61 = vadd.f32 %v13304_v48, %v120_v0  ;;  %v11121_v5 = vadd.f32 %v13306_v47, %v120_v0  ;;  %v13339_v58 = vld [vmem:[#allocation33_spill] sm:$0xff]  ;;  %v13340_v48 = vld [vmem:[#allocation32_spill] sm:$0xff] }
 0x453   :  { %8506 = vmatmul.mubr.msk.bf16.gmra.mrb[92].mxu0 %vm616_vm1, %v3951_v59  ;;  %13301 = vst [vmem:[#allocation50_spill] sm:$0xff] %v11109_v55  ;;  %v11124_v49 = vadd.f32 %v13308_v32, %v120_v0  ;;  %v11127_v33 = vadd.f32 %v13309_v15, %v120_v0  ;;  %v11130_v8 = vadd.f32 %v13310_v39, %v120_v0  ;;  %v13342_v32 = vld [vmem:[#allocation34_spill] sm:$0xff] }
 0x454   :  { %8509 = vmatprep.mubr.msk.bf16.mxu0 %vm616_vm1, %v3952_v7  ;;  %13305 = vst [vmem:[#allocation53_spill] sm:$0xff] %v11118_v61  ;;  %13307 = vst [vmem:[#allocation51_spill] sm:$0xff] %v11121_v5  ;;  %v11133_v59 = vadd.f32 %v13312_v18, %v120_v0  ;;  %v11136_v26 = vadd.f32 %v13314_v16, %v120_v0  ;;  %v11139_v11 = vadd.f32 %v13315_v62, %v120_v0  ;;  %v13320_v7 = vld [vmem:[#allocation19_spill] sm:$0xff]  ;;  %v13345_v62 = vld [vmem:[#allocation36_spill] sm:$0xff] }
 0x455   :  { %13311 = vst [vmem:[#allocation66_spill] sm:$0xff] %v11130_v8  ;;  %v11142_v19 = vadd.f32 %v13316_v13, %v120_v0  ;;  %v11145_v25 = vadd.f32 %v13318_v51, %v120_v0  ;;  %v11148_v53 = vadd.f32 %v13320_v7, %v120_v0  ;;  %v11154_v38 = vadd.f32 %v13322_v12, %v120_v0  ;;  %v13344_v18 = vld [vmem:[#allocation35_spill] sm:$0xff]  ;;  %v13347_v7 = vld [vmem:[#allocation37_spill] sm:$0xff] }
 0x456   :  { %13313 = vst [vmem:[#allocation65_spill] sm:$0xff] %v11133_v59  ;;  %v11157_v20 = vadd.f32 %v13324_v1, %v120_v0  ;;  %v11163_v14 = vadd.f32 %v13327_v52, %v120_v0  ;;  %v11166_v28 = vadd.f32 %v13328_v23, %v120_v0  ;;  %v11180_v29 = vadd.f32 %v13334_v21, %v120_v0  ;;  %v13349_v12 = vld [vmem:[#allocation39_spill] sm:$0xff] }
 0x457   :  { %13317 = vst [vmem:[#allocation70_spill] sm:$0xff] %v11142_v19  ;;  %13319 = vst [vmem:[#allocation79_spill] sm:$0xff] %v11145_v25  ;;  %v11183_v56 = vadd.f32 %v13336_v22, %v120_v0  ;;  %v11186_v17 = vadd.f32 %v13337_v60, %v120_v0  ;;  %v3183_v63 = vrot.slane %v10999_v45, %v10812_v50  ;;  %v13357_v22 = vld [vmem:[#allocation42_spill] sm:$0xff] }
 0x458   :  { %13323 = vst [vmem:[#allocation82_spill] sm:$0xff] %v11154_v38  ;;  %13325 = vst [vmem:[#allocation48_spill] sm:$0xff] %v11157_v20  ;;  %v3225_v44 = vcombine.high %v11007_v10, %v11007_v10  ;;  %v11193_v42 = vadd.f32 %v13339_v58, %v120_v0  ;;  %v11196_v47 = vadd.f32 %v13340_v48, %v120_v0 }
 0x459   :  { %13329 = vst [vmem:[#allocation49_spill] sm:$0xff] %v11166_v28  ;;  %13335 = vst [vmem:[#allocation46_spill] sm:$0xff] %v11180_v29  ;;  %v11199_v15 = vadd.f32 %v13342_v32, %v120_v0  ;;  %v3274_v39 = vcombine.high %v11032_v31, %v11032_v31  ;;  %v11204_v16 = vadd.f32 %v13344_v18, %v120_v0  ;;  %v13359_v18 = vld [vmem:[#allocation43_spill] sm:$0xff] }
 0x45a   :  { %13338 = vst [vmem:[#allocation47_spill] sm:$0xff] %v11186_v17  ;;  %13341 = vst [vmem:[#allocation90_spill] sm:$0xff] %v11196_v47  ;;  %v11207_v45 = vadd.f32 %v13345_v62, %v120_v0  ;;  %v3190_v13 = vrot.slane %v3176_v40, %v10812_v50  ;;  %v3232_v51 = vrot.slane %v11007_v10, %v10812_v50 }
 0x45b   :  { %8510 = vmatmul.mubr.msk.bf16.gmra.mrb[96].mxu0 %vm616_vm1, %v3953_v30  ;;  %v13326_v30 = vld [vmem:[#allocation23_spill] sm:$0xff]  ;;  %13343 = vst [vmem:[#allocation57_spill] sm:$0xff] %v11199_v15  ;;  %v11216_v1 = vadd.f32 %v13349_v12, %v120_v0  ;;  %v3323_v23 = vcombine.high %v11039_v2, %v11039_v2  ;;  %v3191_v21 = vcombine.high %v3183_v63, %v3183_v63 }
 0x45c   :  { %8513 = vmatprep.mubr.msk.bf16.mxu0 %vm616_vm1, %v3954_v41  ;;  %v11151_v41 = vadd.f32 %v13321_v34, %v120_v0  ;;  %v11160_v35 = vadd.f32 %v13326_v30, %v120_v0  ;;  %13346 = vst [vmem:[#allocation55_spill] sm:$0xff] %v11207_v45  ;;  %v11213_v34 = vadd.f32 %v13347_v7, %v120_v0  ;;  %v13351_v30 = vld [vmem:[#allocation38_spill] sm:$0xff] }
 0x45d   :  { %13350 = vst [vmem:[#allocation61_spill] sm:$0xff] %v11216_v1  ;;  %v11219_v52 = vadd.f32 %v13351_v30, %v120_v0  ;;  %v3239_v10 = vrot.slane %v3225_v44, %v10812_v50  ;;  %v11231_v60 = vadd.f32 %v13357_v22, %v120_v0  ;;  %v3281_v58 = vrot.slane %v11032_v31, %v10812_v50  ;;  %v13361_v44 = vld [vmem:[#allocation44_spill] sm:$0xff] }
 0x45e   :  { %13348 = vst [vmem:[#allocation59_spill] sm:$0xff] %v11213_v34  ;;  %v3288_v48 = vrot.slane %v3274_v39, %v10812_v50  ;;  %v3372_v32 = vcombine.high %v11050_v46, %v11050_v46  ;;  %v11239_v62 = vadd.f32 %v13359_v18, %v120_v0  ;;  %v3192_v7 = vcombine.high %v3190_v13, %v3190_v13 }
 0x45f   :  { %13352 = vst [vmem:[#allocation56_spill] sm:$0xff] %v11219_v52  ;;  %13358 = vst [vmem:[#allocation60_spill] sm:$0xff] %v11231_v60  ;;  %v3240_v12 = vcombine.high %v3232_v51, %v3232_v51  ;;  %v3330_v30 = vrot.slane %v11039_v2, %v10812_v50  ;;  %v3337_v31 = vrot.slane %v3323_v23, %v10812_v50  ;;  %v9005_v23 = vld [vmem:[%s13048_s5 + $0x30] sm:$0xff]  }
 0x460   :  { %13360 = vst [vmem:[#allocation63_spill] sm:$0xff] %v11239_v62  ;;  %v3379_v39 = vrot.slane %v11050_v46, %v10812_v50  ;;  %v11253_v22 = vrot.slane %v3183_v63, %v10812_v50  ;;  %v3206_v18 = vrot.slane %v3190_v13, %v10812_v50  ;;  %v3213_v45 = vrot.slane %v3191_v21, %v10812_v50 }
 0x461   :  { %v3289_v2 = vcombine.high %v3281_v58, %v3281_v58  ;;  %v3290_v15 = vcombine.high %v3288_v48, %v3288_v48  ;;  %v3220_v46 = vrot.slane %v3192_v7, %v10812_v50  ;;  %v3255_v63 = vrot.slane %v3239_v10, %v10812_v50  ;;  %8526 = vmatpush3.bf16.msra.mxu1 %v9005_v23 }
 0x462   :  { %v3262_v13 = vrot.slane %v3240_v12, %v10812_v50  ;;  %v3339_v52 = vcombine.high %v3337_v31, %v3337_v31  ;;  %v3387_v29 = vcombine.high %v3379_v39, %v3379_v39  ;;  %v11276_v47 = vrot.slane %v3288_v48, %v10812_v50  ;;  %8527 = vmatprep.subr.bf16.mxu1 %v13213_v43 }
 0x463   :  { %8514 = vmatmul.mubr.msk.bf16.gmra.mrb[100].mxu0 %vm616_vm1, %v3955_v54  ;;  %v11171_v54 = vadd.f32 %v13330_v4, %v120_v0  ;;  %v13353_v4 = vld [vmem:[#allocation41_spill] sm:$0xff]  ;;  %v3223_v7 = vcombine.high %v3213_v45, %v3213_v45  ;;  %v11283_v12 = vrot.slane %v3289_v2, %v10812_v50  ;;  %v3224_v17 = vcombine.high %v3220_v46, %v3220_v46 }
 0x464   :  { %8517 = vmatprep.mubr.msk.bf16.mxu0 %vm616_vm1, %v3956_v24  ;;  %v13331_v24 = vld [vmem:[#allocation29_spill] sm:$0xff]  ;;  %v11297_v38 = vrot.slane %v3339_v52, %v10812_v50  ;;  %v11305_v28 = vrot.slane %v3387_v29, %v10812_v50  ;;  %v3428_v52 = vrot.slane %v3213_v45, %v13298_v9  ;;  %v3440_v29 = vrot.slane %v3206_v18, %v13298_v9 }
 0x465   :  { %v11174_v3 = vadd.f32 %v13331_v24, %v120_v0  ;;  %v11224_v24 = vadd.f32 %v13353_v4, %v120_v0  ;;  %v11244_v4 = vadd.f32 %v13361_v44, %v120_v0  ;;  %v3338_v44 = vcombine.high %v3330_v30, %v3330_v30 }
 0x466   :  { %v3436_v25 = vrot.slane %v3223_v7, %v13298_v9  ;;  %v3444_v8 = vrot.slane %v3220_v46, %v13298_v9  ;;  %v3452_v5 = vrot.slane %v3224_v17, %v13298_v9  ;;  %v3271_v45 = vcombine.high %v3255_v63, %v3255_v63 }
 0x467   :  { %13354 = vst [vmem:[#allocation54_spill] sm:$0xff] %v11224_v24  ;;  %13362 = vst [vmem:[#allocation67_spill] sm:$0xff] %v11244_v4  ;;  %v11294_v48 = vrot.slane %v3338_v44, %v10812_v50  ;;  %v3221_v44 = vcombine.high %v11253_v22, %v11253_v22  ;;  %v3460_v59 = vrot.slane %v3262_v13, %v13298_v9 }
 0x468   :  { %v3492_v61 = vrot.slane %v11283_v12, %v13298_v9 }
 0x469   :  { %v3432_v46 = vrot.slane %v3221_v44, %v13298_v9 }
 0x46b   :  { %8518 = vmatmul.mubr.msk.bf16.gmra.mrb[104].mxu0 %vm616_vm1, %v3957_v37  ;;  %v11177_v37 = vadd.f32 %v13332_v6, %v120_v0  ;;  %v13355_v6 = vld [vmem:[#allocation40_spill] sm:$0xff] }
 0x46c   :  { %v11227_v40 = vadd.f32 %v13355_v6, %v120_v0  ;;  %v11247_v6 = vrot.slane %v3232_v51, %v10812_v50  ;;  %v11258_v0 = vrot.slane %v3281_v58, %v10812_v50  ;;  %v3386_v51 = vrot.slane %v3372_v32, %v10812_v50 }
 0x46d   :  { %13333 = vst [vmem:[#allocation74_spill] sm:$0xff] %v11177_v37  ;;  %v11270_v58 = vrot.slane %v3330_v30, %v10812_v50  ;;  %v11286_v30 = vrot.slane %v3290_v15, %v10812_v50  ;;  %v11291_v37 = vrot.slane %v3337_v31, %v10812_v50  ;;  %v3272_v31 = vcombine.high %v3262_v13, %v3262_v13 }
 0x46e   :  { %13356 = vst [vmem:[#allocation58_spill] sm:$0xff] %v11227_v40  ;;  %v3241_v40 = vcombine.high %v3239_v10, %v3239_v10  ;;  %v3270_v21 = vcombine.high %v11247_v6, %v11247_v6  ;;  %v11279_v10 = vrot.slane %v3379_v39, %v10812_v50  ;;  %v3319_v23 = vcombine.high %v11258_v0, %v11258_v0 }
 0x46f   :  { %v3222_v39 = vcombine.high %v3206_v18, %v3206_v18  ;;  %v3368_v2 = vcombine.high %v11270_v58, %v11270_v58  ;;  %v11302_v15 = vrot.slane %v3386_v51, %v10812_v50  ;;  %v3321_v13 = vcombine.high %v11283_v12, %v11283_v12 }
 0x470   :  { %v11273_v32 = vrot.slane %v3241_v40, %v10812_v50  ;;  %v3388_v40 = vcombine.high %v3386_v51, %v3386_v51  ;;  %v11319_v51 = vld [vmem:[%s13049_s8 + $0x1] ss:$0 sm:$0xff]  ;;  %v3464_v7 = vrot.slane %v3270_v21, %v13298_v9  ;;  %v3472_v21 = vrot.slane %v3255_v63, %v13298_v9 }
 0x471   :  { %v3448_v19 = vrot.slane %v3222_v39, %v13298_v9  ;;  %v8723_v39 = vadd.f32 %v11319_v51, %v3436_v25  ;;  %v11336_v17 = vadd.f32 %v11319_v51, %v3428_v52  ;;  %v11340_v4 = vadd.f32 %v11319_v51, %v3440_v29 }
 0x472   :  { %v11314_v20 = vrot.slane %v3388_v40, %v10812_v50  ;;  %v3424_v40 = vrot.slane %v11253_v22, %v13298_v9  ;;  %v3456_v50 = vrot.slane %v11247_v6, %v13298_v9  ;;  %v3273_v18 = vcombine.high %v11273_v32, %v11273_v32 }
 0x473   :  { %v11343_v22 = vadd.f32 %v11319_v51, %v3444_v8  ;;  %v3468_v6 = vrot.slane %v3272_v31, %v13298_v9  ;;  %v11349_v44 = vadd.f32 %v11319_v51, %v3448_v19  ;;  %v11352_v25 = vadd.f32 %v11319_v51, %v3452_v5  ;;  %v9006_v5 = vld [vmem:[%s13048_s5 + $0x38] sm:$0xff]  }
 0x474   :  { %v11355_v52 = vadd.f32 %v11319_v51, %v3464_v7  ;;  %v3480_v63 = vrot.slane %v3271_v45, %v13298_v9  ;;  %v11359_v29 = vadd.f32 %v11319_v51, %v3456_v50  ;;  %v11362_v8 = vadd.f32 %v11319_v51, %v3460_v59  ;;  %8528 = vmatpush3.bf16.msra.mxu1 %v9006_v5 }
 0x475   :  { %v3484_v31 = vrot.slane %v3273_v18, %v13298_v9  ;;  %v3476_v19 = vrot.slane %v11273_v32, %v13298_v9  ;;  %v11371_v7 = vadd.f32 %v11319_v51, %v3472_v21  ;;  %v3496_v45 = vrot.slane %v3319_v23, %v13298_v9 }
 0x476   :  { %v3488_v50 = vrot.slane %v11258_v0, %v13298_v9  ;;  %v3320_v59 = vcombine.high %v11276_v47, %v11276_v47  ;;  %v11379_v18 = vadd.f32 %v11319_v51, %v3468_v6  ;;  %v3500_v32 = vrot.slane %v3321_v13, %v13298_v9 }
 0x477   :  { %v3322_v21 = vcombine.high %v11286_v30, %v11286_v30  ;;  %v11387_v23 = vadd.f32 %v11319_v51, %v3480_v63  ;;  %v3504_v0 = vrot.slane %v11276_v47, %v13298_v9  ;;  %v3508_v43 = vrot.slane %v11286_v30, %v13298_v9 }
 0x478   :  { %v3370_v6 = vcombine.high %v11294_v48, %v11294_v48  ;;  %v11396_v13 = vadd.f32 %v11319_v51, %v3484_v31  ;;  %v11399_v12 = vadd.f32 %v11319_v51, %v3476_v19  ;;  %v3528_v5 = vrot.slane %v3368_v2, %v13298_v9 }
 0x479   :  { %v3520_v63 = vrot.slane %v11270_v58, %v13298_v9  ;;  %v11405_v62 = vadd.f32 %v11319_v51, %v3496_v45  ;;  %v11408_v47 = vadd.f32 %v11319_v51, %v3488_v50  ;;  %v3512_v30 = vrot.slane %v3320_v59, %v13298_v9 }
 0x47a   :  { %v3369_v31 = vcombine.high %v11291_v37, %v11291_v37  ;;  %v11414_v55 = vadd.f32 %v11319_v51, %v3500_v32  ;;  %v11417_v19 = vadd.f32 %v11319_v51, %v3492_v61  ;;  %v3516_v2 = vrot.slane %v3322_v21, %v13298_v9 }
 0x47b   :  { %13363 = vst [vmem:[#allocation62_spill] sm:$0xff] %v11405_v62  ;;  %13364 = vst [vmem:[#allocation64_spill] sm:$0xff] %v11408_v47  ;;  %v3524_v58 = vrot.slane %v11294_v48, %v13298_v9  ;;  %v11423_v45 = vadd.f32 %v11319_v51, %v3504_v0  ;;  %v11426_v50 = vadd.f32 %v11319_v51, %v3508_v43 }
 0x47c   :  { %13365 = vst [vmem:[#allocation69_spill] sm:$0xff] %v11414_v55  ;;  %13366 = vst [vmem:[#allocation72_spill] sm:$0xff] %v11417_v19  ;;  %v3532_v59 = vrot.slane %v3370_v6, %v13298_v9  ;;  %v3536_v32 = vrot.slane %v11291_v37, %v13298_v9  ;;  %v11432_v61 = vadd.f32 %v11319_v51, %v3528_v5 }
 0x47d   :  { %13367 = vst [vmem:[#allocation68_spill] sm:$0xff] %v11423_v45  ;;  %13368 = vst [vmem:[#allocation71_spill] sm:$0xff] %v11426_v50  ;;  %v11435_v21 = vadd.f32 %v11319_v51, %v3520_v63  ;;  %v3371_v48 = vcombine.high %v11297_v38, %v11297_v38  ;;  %v3540_v0 = vrot.slane %v11297_v38, %v13298_v9 }
 0x47e   :  { %13369 = vst [vmem:[#allocation75_spill] sm:$0xff] %v11432_v61  ;;  %v11442_v6 = vadd.f32 %v11319_v51, %v3512_v30  ;;  %v3544_v37 = vrot.slane %v3369_v31, %v13298_v9  ;;  %v13372_v5 = vcombine.high %v11279_v10, %v11279_v10  ;;  %v11450_v45 = vadd.f32 %v11319_v51, %v3516_v2 }
 0x47f   :  { %13370 = vst [vmem:[#allocation77_spill] sm:$0xff] %v11435_v21  ;;  %v11453_v60 = vadd.f32 %v11319_v51, %v3524_v58  ;;  %v3552_v38 = vrot.slane %v11279_v10, %v13298_v9  ;;  %v11459_v31 = vadd.f32 %v11319_v51, %v3532_v59  ;;  %v11467_v58 = vrot.slane %v3371_v48, %v13298_v9 }
 0x480   :  { %13371 = vst [vmem:[#allocation73_spill] sm:$0xff] %v11442_v6  ;;  %v3560_v61 = vrot.slane %v13372_v5, %v13298_v9  ;;  %13373 = vst [vmem:[#allocation76_spill] sm:$0xff] %v11450_v45  ;;  %v11462_v5 = vadd.f32 %v11319_v51, %v3536_v32  ;;  %v11475_v59 = vadd.f32 %v11319_v51, %v3544_v37 }
 0x481   :  { %13374 = vst [vmem:[#allocation80_spill] sm:$0xff] %v11453_v60  ;;  %13375 = vst [vmem:[#allocation83_spill] sm:$0xff] %v11459_v31  ;;  %v11487_v48 = vadd.f32 %v11319_v51, %v3552_v38 }
 0x482   :  { %13376 = vst [vmem:[#allocation78_spill] sm:$0xff] %v11462_v5  ;;  %13378 = vst [vmem:[#allocation85_spill] sm:$0xff] %v11475_v59  ;;  %v11478_v32 = vadd.f32 %v11319_v51, %v3560_v61 }
 0x483   :  { %13380 = vst [vmem:[#allocation84_spill] sm:$0xff] %v11487_v48 }
 0x484   :  { %13379 = vst [vmem:[#allocation87_spill] sm:$0xff] %v11478_v32 }
 0x4cd   :  { %v8483_v1 = vpop.f32.mrb[68].mxu0 }
 0x4ce   :  { %v8719_v43 = vadd.f32 %v8483_v1, %v3432_v46  ;;  %v4093_v50 = vpop.f32.mrb[69].mxu0 }
 0x4cf   :  { %v8721_v63 = vadd.f32 %v4093_v50, %v3424_v40  ;;  %v8484_v21 = vpop.f32.mrb[70].mxu0  ;;  %v11470_v50 = vadd.f32 %v11319_v51, %v3540_v0 }
 0x4d0   :  { %v8720_v1 = vadd.f32 %v8719_v43, %v11319_v51  ;;  %v8724_v46 = vadd.f32 %v8723_v39, %v8484_v21  ;;  %v4096_v30 = vpop.f32.mrb[71].mxu0 }
 0x4d1   :  { %v8722_v40 = vadd.f32 %v8721_v63, %v11319_v51  ;;  %v8726_v2 = vadd.f32 %v11336_v17, %v4096_v30  ;;  %13377 = vst [vmem:[#allocation81_spill] sm:$0xff] %v11470_v50 }
 0x4d2   :  { %v4294_v10 = vadd.f32 %v8720_v1, %v11115_v57  ;;  %v4295_v39 = vadd.f32 %v8724_v46, %v11124_v49  ;;  %v3419_v57 = vcombine.high %v11305_v28, %v11305_v28 }
 0x4d3   :  { %v11481_v21 = vadd.f32 %v8722_v40, %v11106_v36  ;;  %v11484_v17 = vadd.f32 %v8726_v2, %v11112_v27 }
 0x4d4   :  { %v4334_v0 = vmax.f32 %v4294_v10, 0.0  ;;  %v4406_v49 = vsel %vm616_vm1, %v4294_v10, -inf  ;;  %v4335_v43 = vmax.f32 %v4295_v39, 0.0  ;;  %v4413_v37 = vsel %vm616_vm1, %v4295_v39, -inf }
 0x4d5   :  { %v4407_v61 = vrot.slane %v4406_v49, 4  ;;  %v4392_v36 = vsel %vm616_vm1, %v11481_v21, -inf  ;;  %v4414_v63 = vrot.slane %v4413_v37, 4  ;;  %v8487_v1 = vpop.f32.mrb[72].mxu0  ;;  %v5753_v30 = vpack.c.bf16 %v4295_v39, %v4294_v10 }
 0x4d6   :  { %v4393_v38 = vrot.slane %v4392_v36, 4  ;;  %v11497_v46 = vpack.c.bf16 %v4335_v43, %v4334_v0  ;;  %v4109_v40 = vpop.f32.mrb[73].mxu0  ;;  %v4399_v50 = vsel %vm616_vm1, %v11484_v17, -inf  ;;  %v5752_v5 = vpack.c.bf16 %v11484_v17, %v11481_v21 }
 0x4d7   :  { %v4408_v48 = vmax.f32 %v4406_v49, %v4407_v61  ;;  %v4415_v32 = vmax.f32 %v4413_v37, %v4414_v63  ;;  %v8488_v59 = vpop.f32.mrb[74].mxu0  ;;  %v4400_v31 = vrot.slane %v4399_v50, 4  ;;  %v8728_v27 = vadd.f32 %v11349_v44, %v8487_v1 }
 0x4d8   :  { %13381 = vst [vmem:[#allocation86_spill] sm:$0xff] %v11497_v46  ;;  %v4394_v60 = vmax.f32 %v4392_v36, %v4393_v38  ;;  %v8730_v0 = vadd.f32 %v11340_v4, %v4109_v40  ;;  %v4112_v10 = vpop.f32.mrb[75].mxu0  ;;  %v8732_v2 = vadd.f32 %v11352_v25, %v8488_v59  ;;  %8617 = vmatprep.mubr.msk.bf16.mxu0 %vm616_vm1, %v5752_v5 }
 0x4d9   :  { %v4409_v39 = vrot.slane %v4408_v48, 2  ;;  %v4416_v43 = vrot.slane %v4415_v32, 2  ;;  %v8734_v49 = vadd.f32 %v11343_v22, %v4112_v10  ;;  %v4401_v61 = vmax.f32 %v4399_v50, %v4400_v31  ;;  %8618 = vmatmul.mubr.msk.bf16.vlgmr.msra.gmra.mrb[108].mxu0 %vm616_vm1, %v5753_v30 }
 0x4da   :  { %v4395_v37 = vrot.slane %v4394_v60, 2  ;;  %v11511_v63 = vadd.f32 %v8728_v27, %v11139_v11  ;;  %v11514_v36 = vadd.f32 %v8730_v0, %v11127_v33  ;;  %v11518_v1 = vadd.f32 %v8732_v2, %v11148_v53 }
 0x4db   :  { %v4410_v4 = vmax.f32 %v4408_v48, %v4409_v39  ;;  %v4417_v44 = vmax.f32 %v4415_v32, %v4416_v43  ;;  %v11521_v25 = vadd.f32 %v8734_v49, %v11136_v26  ;;  %v4402_v22 = vrot.slane %v4401_v61, 2 }
 0x4dc   :  { %v4396_v5 = vmax.f32 %v4394_v60, %v4395_v37  ;;  %v4434_v31 = vsel %vm616_vm1, %v11511_v63, -inf  ;;  %v11530_v32 = vrot.slane %v3419_v57, %v13298_v9  ;;  %v4420_v26 = vsel %vm616_vm1, %v11514_v36, -inf }
 0x4dd   :  { %v4411_v33 = vrot.slane %v4410_v4, 1  ;;  %v4418_v50 = vrot.slane %v4417_v44, 1  ;;  %v4435_v59 = vrot.slane %v4434_v31, 4  ;;  %v11527_v27 = vpop.f32.mrb[76].mxu0  ;;  %v4403_v48 = vmax.f32 %v4401_v61, %v4402_v22 }
 0x4de   :  { %13382 = vst [vmem:[#allocation89_spill] sm:$0xff] %v11530_v32  ;;  %v4397_v53 = vrot.slane %v4396_v5, 1  ;;  %v11534_v60 = vpop.f32.mrb[77].mxu0  ;;  %v4421_v43 = vrot.slane %v4420_v26, 4  ;;  %v5755_v49 = vpack.c.bf16 %v11518_v1, %v11511_v63 }
 0x4df   :  { %v4412_v30 = vmax.f32 %v4410_v4, %v4411_v33  ;;  %v4419_v40 = vmax.f32 %v4417_v44, %v4418_v50  ;;  %v4436_v2 = vmax.f32 %v4434_v31, %v4435_v59  ;;  %v11538_v0 = vpop.f32.mrb[78].mxu0  ;;  %v4404_v39 = vrot.slane %v4403_v48, 1 }
 0x4e0   :  { %v4398_v57 = vmax.f32 %v4396_v5, %v4397_v53  ;;  %v11544_v37 = vpop.f32.mrb[79].mxu0  ;;  %v4441_v5 = vsel %vm616_vm1, %v11518_v1, -inf }
 0x4e1   :  { %v4674_v61 = vmax.f32 %v4412_v30, 0.0  ;;  %v5783_v22 = vpack.c.bf16 %v4412_v30, %v4412_v30  ;;  %v4675_v11 = vmax.f32 %v4419_v40, 0.0  ;;  %v5784_v38 = vpack.c.bf16 %v4419_v40, %v4419_v40 }
 0x4e2   :  { %v4672_v4 = vmax.f32 %v4398_v57, 0.0  ;;  %v5781_v44 = vpack.c.bf16 %v4398_v57, %v4398_v57  ;;  %v4405_v31 = vmax.f32 %v4403_v48, %v4404_v39  ;;  %v4437_v33 = vrot.slane %v4436_v2, 2 }
 0x4e3   :  { %v4714_v50 = vpack.c.bf16 %v4674_v61, %v4674_v61  ;;  %v5872_v59 = vunpack.c.l.b16 %v5783_v22  ;;  %v4715_v46 = vpack.c.bf16 %v4675_v11, %v4675_v11  ;;  %v5873_v34 = vunpack.c.l.b16 %v5784_v38 }
 0x4e4   :  { %v4712_v53 = vpack.c.bf16 %v4672_v4, %v4672_v4  ;;  %v5870_v10 = vunpack.c.l.b16 %v5781_v44  ;;  %v4673_v45 = vmax.f32 %v4405_v31, 0.0  ;;  %v5782_v6 = vpack.c.bf16 %v4405_v31, %v4405_v31 }
 0x4e5   :  { %v4812_v19 = vunpack.c.l.b16 %v4714_v50  ;;  %v4438_v55 = vmax.f32 %v4436_v2, %v4437_v33  ;;  %v4422_v30 = vmax.f32 %v4420_v26, %v4421_v43  ;;  %v11548_v24 = vpop.f32.mrb[80].mxu0  ;;  %v4442_v39 = vrot.slane %v4441_v5, 4 }
 0x4e6   :  { %v4810_v40 = vunpack.c.l.b16 %v4712_v53  ;;  %v4713_v57 = vpack.c.bf16 %v4673_v45, %v4673_v45  ;;  %v5871_v48 = vunpack.c.l.b16 %v5782_v6  ;;  %v11550_v61 = vpop.f32.mrb[81].mxu0  ;;  %v4813_v11 = vunpack.c.l.b16 %v4715_v46 }
 0x4e7   :  { %v4439_v22 = vrot.slane %v4438_v55, 1  ;;  %v4423_v47 = vrot.slane %v4422_v30, 2  ;;  %v4427_v4 = vsel %vm616_vm1, %v11521_v25, -inf  ;;  %v11554_v44 = vpop.f32.mrb[82].mxu0  ;;  %v4443_v26 = vmax.f32 %v4441_v5, %v4442_v39 }
 0x4e8   :  { %v4811_v31 = vunpack.c.l.b16 %v4713_v57  ;;  %v5910_v38 = vsel %vm1979_vm3, %v5871_v48, %v5870_v10  ;;  %v4428_v2 = vrot.slane %v4427_v4, 4  ;;  %v11557_v43 = vpop.f32.mrb[83].mxu0  ;;  %v5754_v46 = vpack.c.bf16 %v11521_v25, %v11514_v36 }
 0x4e9   :  { %v5911_v45 = vsel %vm1981_vm4, %v5872_v59, %v5910_v38  ;;  %v4440_v6 = vmax.f32 %v4438_v55, %v4439_v22  ;;  %v4424_v33 = vmax.f32 %v4422_v30, %v4423_v47  ;;  %v4444_v62 = vrot.slane %v4443_v26, 2 }
 0x4ea   :  { %v4850_v50 = vsel %vm1979_vm3, %v4811_v31, %v4810_v40  ;;  %v5912_v53 = vsel %vm1983_vm5, %v5873_v34, %v5911_v45  ;;  %v4429_v32 = vmax.f32 %v4427_v4, %v4428_v2  ;;  %v4332_v57 = vmax.f32 %v11481_v21, 0.0  ;;  %8621 = vmatprep.mubr.msk.bf16.mxu0 %vm616_vm1, %v5754_v46 }
 0x4eb   :  { %v4851_v10 = vsel %vm1981_vm4, %v4812_v19, %v4850_v50  ;;  %v4678_v5 = vmax.f32 %v4440_v6, 0.0  ;;  %v4425_v48 = vrot.slane %v4424_v33, 1  ;;  %v4445_v47 = vmax.f32 %v4443_v26, %v4444_v62  ;;  %8622 = vmatmul.mubr.msk.bf16.gmra.mrb[112].mxu0 %vm616_vm1, %v5755_v49 }
 0x4ec   :  { %v4852_v55 = vsel %vm1983_vm5, %v4813_v11, %v4851_v10  ;;  %v4430_v59 = vrot.slane %v4429_v32, 2  ;;  %v8736_v30 = vadd.f32 %v11355_v52, %v11527_v27  ;;  %v4333_v34 = vmax.f32 %v11484_v17, 0.0 }
 0x4ed   :  { %v4338_v40 = vmax.f32 %v11511_v63, 0.0  ;;  %v4426_v39 = vmax.f32 %v4424_v33, %v4425_v48  ;;  %v8738_v19 = vadd.f32 %v11359_v29, %v11534_v60  ;;  %v4446_v22 = vrot.slane %v4445_v47, 1 }
 0x4ee   :  { %v4431_v4 = vmax.f32 %v4429_v32, %v4430_v59  ;;  %v11576_v31 = vadd.f32 %v8736_v30, %v11163_v14  ;;  %v8740_v62 = vadd.f32 %v11379_v18, %v11538_v0  ;;  %v4336_v52 = vmax.f32 %v11514_v36, 0.0 }
 0x4ef   :  { %v4676_v27 = vmax.f32 %v4426_v39, 0.0  ;;  %v5785_v49 = vpack.c.bf16 %v4426_v39, %v4426_v39  ;;  %v11582_v11 = vadd.f32 %v8738_v19, %v11151_v41  ;;  %v11584_v38 = vpack.c.bf16 %v4678_v5, %v4678_v5 }
 0x4f0   :  { %v5787_v26 = vpack.c.bf16 %v4440_v6, %v4440_v6  ;;  %v4432_v2 = vrot.slane %v4431_v4, 1  ;;  %v4462_v29 = vsel %vm616_vm1, %v11576_v31, -inf  ;;  %v4339_v60 = vmax.f32 %v11518_v1, 0.0 }
 0x4f1   :  { %v4716_v32 = vpack.c.bf16 %v4676_v27, %v4676_v27  ;;  %v5874_v14 = vunpack.c.l.b16 %v5785_v49  ;;  %v4463_v45 = vrot.slane %v4462_v29, 4  ;;  %v11589_v18 = vmax.f32 %v4445_v47, %v4446_v22 }
 0x4f2   :  { %v4337_v0 = vmax.f32 %v11521_v25, 0.0  ;;  %v4433_v33 = vmax.f32 %v4431_v4, %v4432_v2  ;;  %v4448_v41 = vsel %vm616_vm1, %v11582_v11, -inf  ;;  %v4816_v5 = vunpack.c.l.b16 %v11584_v38 }
 0x4f3   :  { %v4814_v46 = vunpack.c.l.b16 %v4716_v32  ;;  %v5913_v6 = vsel %vm1985_vm6, %v5874_v14, %v5912_v53  ;;  %v4464_v50 = vmax.f32 %v4462_v29, %v4463_v45  ;;  %v4449_v10 = vrot.slane %v4448_v41, 4 }
 0x4f4   :  { %v11596_v48 = vunpack.c.l.b16 %v5787_v26  ;;  %v4677_v59 = vmax.f32 %v4433_v33, 0.0  ;;  %v5786_v30 = vpack.c.bf16 %v4433_v33, %v4433_v33  ;;  %v11600_v22 = vadd.f32 %v8740_v62, %v11171_v54 }
 0x4f5   :  { %v4853_v47 = vsel %vm1985_vm6, %v4814_v46, %v4852_v55  ;;  %v4465_v39 = vrot.slane %v4464_v50, 2  ;;  %v4450_v19 = vmax.f32 %v4448_v41, %v4449_v10  ;;  %v8742_v53 = vadd.f32 %v11362_v8, %v11544_v37 }
 0x4f6   :  { %v4717_v4 = vpack.c.bf16 %v4677_v59, %v4677_v59  ;;  %v5875_v27 = vunpack.c.l.b16 %v5786_v30  ;;  %v4679_v2 = vmax.f32 %v11589_v18, 0.0  ;;  %v4469_v32 = vsel %vm616_vm1, %v11600_v22, -inf }
 0x4f7   :  { %v4466_v26 = vmax.f32 %v4464_v50, %v4465_v39  ;;  %v4451_v29 = vrot.slane %v4450_v19, 2  ;;  %v4470_v54 = vrot.slane %v4469_v32, 4  ;;  %v5757_v62 = vpack.c.bf16 %v11600_v22, %v11576_v31 }
 0x4f8   :  { %v4815_v55 = vunpack.c.l.b16 %v4717_v4  ;;  %v11609_v14 = vsel %vm1987_vm7, %v5875_v27, %v5913_v6  ;;  %v11614_v41 = vadd.f32 %v8742_v53, %v11160_v35  ;;  %v8744_v8 = vadd.f32 %v11387_v23, %v11548_v24 }
 0x4f9   :  { %v4467_v45 = vrot.slane %v4466_v26, 1  ;;  %v4452_v33 = vmax.f32 %v4450_v19, %v4451_v29  ;;  %v4471_v46 = vmax.f32 %v4469_v32, %v4470_v54  ;;  %v8746_v50 = vadd.f32 %v11371_v7, %v11550_v61 }
 0x4fa   :  { %v4854_v37 = vsel %vm1987_vm7, %v4815_v55, %v4853_v47  ;;  %v8748_v6 = vadd.f32 %v11396_v13, %v11554_v44  ;;  %v4719_v10 = vpack.c.bf16 %v4679_v2, %v4679_v2  ;;  %v4455_v39 = vsel %vm616_vm1, %v11614_v41, -inf }
 0x4fb   :  { %v4468_v59 = vmax.f32 %v4466_v26, %v4467_v45  ;;  %v4453_v30 = vrot.slane %v4452_v33, 1  ;;  %v4472_v35 = vrot.slane %v4471_v46, 2  ;;  %v4456_v19 = vrot.slane %v4455_v39, 4 }
 0x4fc   :  { %v5756_v24 = vpack.c.bf16 %v11614_v41, %v11582_v11  ;;  %v11628_v23 = vadd.f32 %v8744_v8, %v11193_v42  ;;  %v4340_v7 = vmax.f32 %v11582_v11, 0.0  ;;  %v11632_v13 = vadd.f32 %v8746_v50, %v11174_v3  ;;  %v11648_v50 = vld [vmem:[%s13043_s4 + $0x40] sm:$0xff]  }
 0x4fd   :  { %v4682_v47 = vmax.f32 %v4468_v59, 0.0  ;;  %v4454_v61 = vmax.f32 %v4452_v33, %v4453_v30  ;;  %v4473_v4 = vmax.f32 %v4471_v46, %v4472_v35  ;;  %v4457_v27 = vmax.f32 %v4455_v39, %v4456_v19  ;;  %8541 = vmatprep.subr.bf16.mxu1 %v11648_v50 }
 0x4fe   :  { %v4490_v53 = vsel %vm616_vm1, %v11628_v23, -inf  ;;  %8625 = vmatprep.mubr.msk.bf16.mxu0 %vm616_vm1, %v5756_v24  ;;  %v4817_v2 = vunpack.c.l.b16 %v4719_v10  ;;  %v5791_v42 = vpack.c.bf16 %v4468_v59, %v4468_v59  ;;  %v4476_v46 = vsel %vm616_vm1, %v11632_v13, -inf }
 0x4ff   :  { %8626 = vmatmul.mubr.msk.bf16.gmra.mrb[116].mxu0 %vm616_vm1, %v5757_v62  ;;  %v4474_v3 = vrot.slane %v4473_v4, 1  ;;  %v4458_v32 = vrot.slane %v4457_v27, 2  ;;  %v4491_v54 = vrot.slane %v4490_v53, 4  ;;  %v4722_v45 = vpack.c.bf16 %v4682_v47, %v4682_v47 }
 0x500   :  { %v4680_v33 = vmax.f32 %v4454_v61, 0.0  ;;  %v5789_v8 = vpack.c.bf16 %v4454_v61, %v4454_v61  ;;  %v4477_v62 = vrot.slane %v4476_v46, 4  ;;  %v5880_v39 = vunpack.c.l.b16 %v5791_v42 }
 0x501   :  { %v4475_v10 = vmax.f32 %v4473_v4, %v4474_v3  ;;  %v4459_v59 = vmax.f32 %v4457_v27, %v4458_v32  ;;  %v4492_v30 = vmax.f32 %v4490_v53, %v4491_v54  ;;  %v11651_v35 = vadd.f32 %v8748_v6, %v11204_v16 }
 0x502   :  { %v8750_v19 = vadd.f32 %v11399_v12, %v11557_v43  ;;  %v4855_v24 = vsel %vm1989_vm8, %v4816_v5, %v4854_v37  ;;  %v4344_v4 = vmax.f32 %v11632_v13, 0.0  ;;  %v4720_v27 = vpack.c.bf16 %v4680_v33, %v4680_v33 }
 0x503   :  { %v4683_v47 = vmax.f32 %v4475_v10, 0.0  ;;  %v4460_v61 = vrot.slane %v4459_v59, 1  ;;  %v4493_v55 = vrot.slane %v4492_v30, 2  ;;  %v4478_v53 = vmax.f32 %v4476_v46, %v4477_v62 }
 0x504   :  { %v4497_v16 = vsel %vm616_vm1, %v11651_v35, -inf  ;;  %v5759_v6 = vpack.c.bf16 %v11651_v35, %v11628_v23  ;;  %v4820_v12 = vunpack.c.l.b16 %v4722_v45  ;;  %v5878_v43 = vunpack.c.l.b16 %v5789_v8 }
 0x505   :  { %v4461_v38 = vmax.f32 %v4459_v59, %v4460_v61  ;;  %v4494_v42 = vmax.f32 %v4492_v30, %v4493_v55  ;;  %v4479_v5 = vrot.slane %v4478_v53, 2  ;;  %v4498_v37 = vrot.slane %v4497_v16, 4 }
 0x506   :  { %v4305_v3 = vadd.f32 %v8750_v19, %v11183_v56  ;;  %v11666_v32 = vsel %vm1991_vm9, %v4817_v2, %v4855_v24  ;;  %v4723_v54 = vpack.c.bf16 %v4683_v47, %v4683_v47  ;;  %v5792_v33 = vpack.c.bf16 %v4475_v10, %v4475_v10 }
 0x507   :  { %v4681_v46 = vmax.f32 %v4461_v38, 0.0  ;;  %v5790_v62 = vpack.c.bf16 %v4461_v38, %v4461_v38  ;;  %v4818_v44 = vunpack.c.l.b16 %v4720_v27  ;;  %v4480_v26 = vmax.f32 %v4478_v53, %v4479_v5 }
 0x508   :  { %v4499_v49 = vmax.f32 %v4497_v16, %v4498_v37  ;;  %v4483_v29 = vsel %vm616_vm1, %v4305_v3, -inf  ;;  %v4495_v59 = vrot.slane %v4494_v42, 1  ;;  %v5758_v56 = vpack.c.bf16 %v4305_v3, %v11632_v13 }
 0x509   :  { %v4721_v45 = vpack.c.bf16 %v4681_v46, %v4681_v46  ;;  %v5879_v8 = vunpack.c.l.b16 %v5790_v62  ;;  %v4484_v55 = vrot.slane %v4483_v29, 4  ;;  %v4481_v30 = vrot.slane %v4480_v26, 1 }
 0x50a   :  { %v4500_v61 = vrot.slane %v4499_v49, 2  ;;  %v11674_v2 = vpack.c.bf16 %v4333_v34, %v4332_v57  ;;  %v4821_v10 = vunpack.c.l.b16 %v4723_v54  ;;  %v5881_v19 = vunpack.c.l.b16 %v5792_v33  ;;  %8629 = vmatprep.mubr.msk.bf16.mxu0 %vm616_vm1, %v5758_v56 }
 0x50b   :  { %v4819_v24 = vunpack.c.l.b16 %v4721_v45  ;;  %v5917_v47 = vsel %vm1979_vm3, %v5879_v8, %v5878_v43  ;;  %v4482_v53 = vmax.f32 %v4480_v26, %v4481_v30  ;;  %v4485_v38 = vmax.f32 %v4483_v29, %v4484_v55  ;;  %8630 = vmatmul.mubr.msk.bf16.gmra.mrb[120].mxu0 %vm616_vm1, %v5759_v6 }
 0x50c   :  { %13383 = vst [vmem:[#allocation45_spill] sm:$0xff] %v11674_v2  ;;  %v5918_v27 = vsel %vm1981_vm4, %v5880_v39, %v5917_v47  ;;  %v4501_v16 = vmax.f32 %v4499_v49, %v4500_v61  ;;  %v4496_v5 = vmax.f32 %v4494_v42, %v4495_v59  ;;  %v4345_v17 = vmax.f32 %v4305_v3, 0.0 }
 0x50d   :  { %v4857_v13 = vsel %vm1979_vm3, %v4819_v24, %v4818_v44  ;;  %v5919_v21 = vsel %vm1983_vm5, %v5881_v19, %v5918_v27  ;;  %v4684_v34 = vmax.f32 %v4482_v53, 0.0  ;;  %v5793_v37 = vpack.c.bf16 %v4482_v53, %v4482_v53  ;;  %v13400_v19 = vld [vmem:[#allocation89_spill] sm:$0xff] }
 0x50e   :  { %v4858_v57 = vsel %vm1981_vm4, %v4820_v12, %v4857_v13  ;;  %v4502_v43 = vrot.slane %v4501_v16, 1  ;;  %v4347_v49 = vmax.f32 %v11651_v35, 0.0  ;;  %v4486_v26 = vrot.slane %v4485_v38, 2 }
 0x50f   :  { %v4859_v39 = vsel %vm1983_vm5, %v4821_v10, %v4858_v57  ;;  %v11689_v44 = vpack.c.bf16 %v4337_v0, %v4336_v52  ;;  %v4724_v29 = vpack.c.bf16 %v4684_v34, %v4684_v34  ;;  %v5882_v42 = vunpack.c.l.b16 %v5793_v37 }
 0x510   :  { %v4503_v3 = vmax.f32 %v4501_v16, %v4502_v43  ;;  %v11695_v6 = vpack.c.bf16 %v4339_v60, %v4338_v40  ;;  %v4487_v12 = vmax.f32 %v4485_v38, %v4486_v26  ;;  %v13386_v35 = vmax.f32 %v11614_v41, 0.0  ;;  %v13404_v43 = vld [vmem:[#allocation54_spill] sm:$0xff] }
 0x511   :  { %13384 = vst [vmem:[#allocation88_spill] sm:$0xff] %v11689_v44  ;;  %v13388_v36 = vmax.f32 %v11576_v31, 0.0  ;;  %v13389_v25 = vmax.f32 %v11600_v22, 0.0  ;;  %v11709_v0 = vpack.c.bf16 %v4345_v17, %v4344_v4  ;;  %v13392_v63 = vpack.c.bf16 %v11589_v18, %v11589_v18 }
 0x512   :  { %13385 = vst [vmem:[#allocation91_spill] sm:$0xff] %v11695_v6  ;;  %v11701_v54 = vpack.c.bf16 %v13386_v35, %v4340_v7  ;;  %v4686_v40 = vmax.f32 %v4496_v5, 0.0  ;;  %v4822_v60 = vunpack.c.l.b16 %v4724_v29  ;;  %v5920_v11 = vsel %vm1985_vm6, %v5882_v42, %v5919_v21  ;;  %v13403_v21 = vld [vmem:[#allocation64_spill] sm:$0xff] }
 0x513   :  { %v11707_v52 = vpack.c.bf16 %v13389_v25, %v13388_v36  ;;  %13391 = vst [vmem:[#allocation6_spill] sm:$0xff] %v11709_v0  ;;  %v5877_v1 = vunpack.c.l.b16 %v13392_v63  ;;  %v4488_v33 = vrot.slane %v4487_v12, 1  ;;  %v13393_v41 = vcombine.high %v11302_v15, %v11302_v15  ;;  %v13407_v36 = vld [vmem:[#allocation72_spill] sm:$0xff]  ;;  %v13435_v0 = vld [vmem:[#allocation78_spill] sm:$0xff] }
 0x514   :  { %13387 = vst [vmem:[#allocation3_spill] sm:$0xff] %v11701_v54  ;;  %v13394_v22 = vmax.f32 %v11628_v23, 0.0  ;;  %v5915_v4 = vsel %vm1989_vm8, %v11596_v48, %v11609_v14  ;;  %v4860_v18 = vsel %vm1985_vm6, %v4822_v60, %v4859_v39  ;;  %v4687_v46 = vmax.f32 %v4503_v3, 0.0 }
 0x515   :  { %13390 = vst [vmem:[#allocation5_spill] sm:$0xff] %v11707_v52  ;;  %v3576_v31 = vrot.slane %v13393_v41, %v13298_v9  ;;  %v13396_v62 = vcombine.high %v11314_v20, %v11314_v20  ;;  %v11732_v8 = vsel %vm1991_vm9, %v5877_v1, %v5915_v4  ;;  %v4489_v59 = vmax.f32 %v4487_v12, %v4488_v33  ;;  %v13406_v12 = vld [vmem:[#allocation59_spill] sm:$0xff] }
 0x516   :  { %v11721_v7 = vpack.c.bf16 %v4347_v49, %v13394_v22  ;;  %13397 = vst [vmem:[#allocation9_spill] sm:$0xff] %v11732_v8  ;;  %v11736_v23 = vadd.f32 %v11319_v51, %v11467_v58  ;;  %v13398_v55 = vrot.slane %v11305_v28, %v13298_v9  ;;  %v13399_v14 = vrot.slane %v11302_v15, %v13298_v9  ;;  %v8499_v10 = vpop.f32.mrb[84].mxu0  ;;  %v13402_v15 = vld [vmem:[#allocation62_spill] sm:$0xff]  ;;  %v13405_v49 = vld [vmem:[#allocation69_spill] sm:$0xff] }
 0x517   :  { %v3580_v45 = vrot.slane %v13396_v62, %v13298_v9  ;;  %v4726_v61 = vpack.c.bf16 %v4686_v40, %v4686_v40  ;;  %v5795_v56 = vpack.c.bf16 %v4496_v5, %v4496_v5  ;;  %v11752_v24 = vadd.f32 %v11319_v51, %v13400_v19  ;;  %v4157_v38 = vpop.f32.mrb[85].mxu0  ;;  %v13410_v62 = vld [vmem:[#allocation61_spill] sm:$0xff] }
 0x518   :  { %13395 = vst [vmem:[#allocation7_spill] sm:$0xff] %v11721_v7  ;;  %v11742_v48 = vadd.f32 %v11319_v51, %v13398_v55  ;;  %v11748_v30 = vadd.f32 %v11319_v51, %v13399_v14  ;;  %v13401_v58 = vrot.slane %v11314_v20, %v13298_v9  ;;  %v5796_v47 = vpack.c.bf16 %v4503_v3, %v4503_v3  ;;  %v8500_v17 = vpop.f32.mrb[86].mxu0 }
 0x519   :  { %v4685_v27 = vmax.f32 %v4489_v59, 0.0  ;;  %v5794_v53 = vpack.c.bf16 %v4489_v59, %v4489_v59  ;;  %v8752_v16 = vadd.f32 %v13402_v15, %v8499_v10  ;;  %v4727_v13 = vpack.c.bf16 %v4687_v46, %v4687_v46  ;;  %v4160_v29 = vpop.f32.mrb[87].mxu0 }
 0x51a   :  { %v11758_v28 = vadd.f32 %v11319_v51, %v13401_v58  ;;  %v8754_v5 = vadd.f32 %v13403_v21, %v4157_v38  ;;  %v11763_v57 = vadd.f32 %v11319_v51, %v3576_v31  ;;  %v11766_v34 = vadd.f32 %v11319_v51, %v3580_v45  ;;  %v13409_v31 = vld [vmem:[#allocation60_spill] sm:$0xff] }
 0x51b   :  { %v4725_v20 = vpack.c.bf16 %v4685_v27, %v4685_v27  ;;  %v5883_v37 = vunpack.c.l.b16 %v5794_v53  ;;  %v11769_v39 = vadd.f32 %v8752_v16, %v13404_v43  ;;  %v8756_v26 = vadd.f32 %v13405_v49, %v8500_v17  ;;  %v13413_v43 = vld [vmem:[#allocation68_spill] sm:$0xff] }
 0x51c   :  { %v4824_v42 = vunpack.c.l.b16 %v4726_v61  ;;  %v5884_v3 = vunpack.c.l.b16 %v5795_v56  ;;  %v11773_v35 = vadd.f32 %v8754_v5, %v13406_v12  ;;  %v8758_v25 = vadd.f32 %v13407_v36, %v4160_v29  ;;  %v13414_v36 = vld [vmem:[#allocation50_spill] sm:$0xff] }
 0x51d   :  { %v11776_v63 = vunpack.c.l.b16 %v5796_v47  ;;  %v4823_v1 = vunpack.c.l.b16 %v4725_v20  ;;  %v5921_v51 = vsel %vm1987_vm7, %v5883_v37, %v5920_v11  ;;  %v4518_v40 = vsel %vm616_vm1, %v11769_v39, -inf }
 0x51e   :  { %v4825_v60 = vunpack.c.l.b16 %v4727_v13  ;;  %v4519_v33 = vrot.slane %v4518_v40, 4  ;;  %v4504_v41 = vsel %vm616_vm1, %v11773_v35, -inf  ;;  %v11784_v22 = vadd.f32 %v8756_v26, %v13409_v31  ;;  %v8503_v53 = vpop.f32.mrb[88].mxu0  ;;  %v13412_v13 = vld [vmem:[#allocation73_spill] sm:$0xff] }
 0x51f   :  { %13408 = vst [vmem:[#allocation8_spill] sm:$0xff] %v11776_v63  ;;  %v4861_v4 = vsel %vm1987_vm7, %v4823_v1, %v4860_v18  ;;  %v4505_v46 = vrot.slane %v4504_v41, 4  ;;  %v11788_v45 = vadd.f32 %v8758_v25, %v13410_v62  ;;  %v11791_v59 = vsel %vm1989_vm8, %v5884_v3, %v5921_v51  ;;  %v4173_v5 = vpop.f32.mrb[89].mxu0  ;;  %v13415_v1 = vld [vmem:[#allocation76_spill] sm:$0xff] }
 0x520   :  { %13411 = vst [vmem:[#allocation10_spill] sm:$0xff] %v11791_v59  ;;  %v4520_v55 = vmax.f32 %v4518_v40, %v4519_v33  ;;  %v4525_v14 = vsel %vm616_vm1, %v11784_v22, -inf  ;;  %v5761_v61 = vpack.c.bf16 %v11784_v22, %v11769_v39  ;;  %v4862_v15 = vsel %vm1989_vm8, %v4824_v42, %v4861_v4  ;;  %v8504_v26 = vpop.f32.mrb[90].mxu0  ;;  %v9008_v42 = vld [vmem:[%s13043_s4 + $0x48] sm:$0xff]  }
 0x521   :  { %v4506_v10 = vmax.f32 %v4504_v41, %v4505_v46  ;;  %v4526_v18 = vrot.slane %v4525_v14, 4  ;;  %v4511_v19 = vsel %vm616_vm1, %v11788_v45, -inf  ;;  %v5760_v27 = vpack.c.bf16 %v11788_v45, %v11773_v35  ;;  %v4176_v40 = vpop.f32.mrb[91].mxu0  ;;  %v13416_v41 = vld [vmem:[#allocation63_spill] sm:$0xff] }
 0x522   :  { %v4521_v58 = vrot.slane %v4520_v55, 2  ;;  %v4512_v47 = vrot.slane %v4511_v19, 4  ;;  %v8760_v21 = vadd.f32 %v13412_v13, %v8503_v53  ;;  %v4863_v17 = vsel %vm1991_vm9, %v4825_v60, %v4862_v15 }
 0x523   :  { %v4507_v16 = vrot.slane %v4506_v10, 2  ;;  %v4527_v38 = vmax.f32 %v4525_v14, %v4526_v18  ;;  %v8762_v49 = vadd.f32 %v13413_v43, %v4173_v5  ;;  %8633 = vmatprep.mubr.msk.bf16.mxu0 %vm616_vm1, %v5760_v27  ;;  %v4885_v29 = vpack.c.b16 %v4863_v17, %v11666_v32  ;;  %v13417_v32 = vld [vmem:[#allocation71_spill] sm:$0xff] }
 0x524   :  { %v4522_v20 = vmax.f32 %v4520_v55, %v4521_v58  ;;  %v4513_v37 = vmax.f32 %v4511_v19, %v4512_v47  ;;  %v11813_v25 = vadd.f32 %v8760_v21, %v13414_v36  ;;  %v8764_v51 = vadd.f32 %v13415_v1, %v8504_v26  ;;  %8634 = vmatmul.mubr.msk.bf16.gmra.mrb[124].mxu0 %vm616_vm1, %v5761_v61  ;;  %v9009_v47 = vld [vmem:[%s13043_s4 + $0x50] sm:$0xff]  }
 0x525   :  { %v4508_v3 = vmax.f32 %v4506_v10, %v4507_v16  ;;  %v4528_v12 = vrot.slane %v4527_v38, 2  ;;  %v11818_v31 = vadd.f32 %v8762_v49, %v13416_v41  ;;  %v11821_v4 = vadd.f32 %v13417_v32, %v4176_v40  ;;  %8530 = vmatmul.mubr.msk.bf16.vlgmr.msra.gmra.mrb[156].mxu1 %vm616_vm1, %v4885_v29  ;;  %v13419_v16 = vld [vmem:[#allocation53_spill] sm:$0xff] }
 0x526   :  { %v4523_v60 = vrot.slane %v4522_v20, 1  ;;  %v4514_v33 = vrot.slane %v4513_v37, 2  ;;  %v4546_v14 = vsel %vm616_vm1, %v11813_v25, -inf  ;;  %v13418_v10 = vmov 0.0   ;;  %8542 = vmatpush3.bf16.msra.mxu1 %v11648_v50  ;;  %v8507_v17 = vpop.f32.mrb[92].mxu0 }
 0x527   :  { %v4509_v46 = vrot.slane %v4508_v3, 1  ;;  %v4529_v55 = vmax.f32 %v4527_v38, %v4528_v12  ;;  %8533 = vmatprep.mubr.msk.bf16.mxu1 %vm9026_vm2, %v13418_v10  ;;  %v4547_v58 = vrot.slane %v4546_v14, 4  ;;  %8543 = vmatprep.subr.bf16.mxu1 %v9008_v42  ;;  %v4532_v15 = vsel %vm616_vm1, %v11818_v31, -inf  ;;  %v4189_v26 = vpop.f32.mrb[93].mxu0 }
 0x528   :  { %v4524_v61 = vmax.f32 %v4522_v20, %v4523_v60  ;;  %v4515_v19 = vmax.f32 %v4513_v37, %v4514_v33  ;;  %v11837_v38 = vadd.f32 %v8764_v51, %v13419_v16  ;;  %v4533_v49 = vrot.slane %v4532_v15, 4  ;;  %v8508_v1 = vpop.f32.mrb[94].mxu0  ;;  %v9010_v51 = vld [vmem:[%s13043_s4 + $0x58] sm:$0xff]  }
 0x529   :  { %v4510_v27 = vmax.f32 %v4508_v3, %v4509_v46  ;;  %v4530_v53 = vrot.slane %v4529_v55, 1  ;;  %v4548_v5 = vmax.f32 %v4546_v14, %v4547_v58  ;;  %v4192_v32 = vpop.f32.mrb[95].mxu0 }
 0x52a   :  { %v4690_v13 = vmax.f32 %v4524_v61, 0.0  ;;  %v5799_v50 = vpack.c.bf16 %v4524_v61, %v4524_v61  ;;  %v4516_v21 = vrot.slane %v4515_v19, 1  ;;  %8544 = vmatpush3.bf16.msra.mxu1 %v9008_v42 }
 0x52b   :  { %v4688_v20 = vmax.f32 %v4510_v27, 0.0  ;;  %v5797_v37 = vpack.c.bf16 %v4510_v27, %v4510_v27  ;;  %v4531_v43 = vmax.f32 %v4529_v55, %v4530_v53  ;;  %v4549_v36 = vrot.slane %v4548_v5, 2  ;;  %8545 = vmatprep.subr.bf16.mxu1 %v9009_v47 }
 0x52c   :  { %v11839_v29 = vpack.c.bf16 %v4690_v13, %v4690_v13  ;;  %v4517_v3 = vmax.f32 %v4515_v19, %v4516_v21  ;;  %v11846_v46 = vunpack.c.l.b16 %v5799_v50  ;;  %v4534_v27 = vmax.f32 %v4532_v15, %v4533_v49 }
 0x52d   :  { %v4728_v40 = vpack.c.bf16 %v4688_v20, %v4688_v20  ;;  %v4691_v60 = vmax.f32 %v4531_v43, 0.0  ;;  %v5800_v33 = vpack.c.bf16 %v4531_v43, %v4531_v43  ;;  %v4550_v14 = vmax.f32 %v4548_v5, %v4549_v36 }
 0x52e   :  { %13420 = vst [vmem:[#allocation11_spill] sm:$0xff] %v11846_v46  ;;  %v4689_v42 = vmax.f32 %v4517_v3, 0.0  ;;  %v5798_v55 = vpack.c.bf16 %v4517_v3, %v4517_v3  ;;  %v5886_v58 = vunpack.c.l.b16 %v5797_v37  ;;  %8546 = vmatpush3.bf16.msra.mxu1 %v9009_v47  ;;  %v4535_v43 = vrot.slane %v4534_v27, 2  ;;  %v8511_v49 = vpop.f32.mrb[96].mxu0 }
 0x52f   :  { %v4826_v19 = vunpack.c.l.b16 %v4728_v40  ;;  %v11849_v53 = vpack.c.bf16 %v4691_v60, %v4691_v60  ;;  %v4551_v21 = vrot.slane %v4550_v14, 1  ;;  %8547 = vmatprep.subr.bf16.mxu1 %v9010_v51  ;;  %v11851_v20 = vunpack.c.l.b16 %v5800_v33  ;;  %v13423_v40 = vld [vmem:[#allocation67_spill] sm:$0xff]  ;;  %v4205_v41 = vpop.f32.mrb[97].mxu0 }
 0x530   :  { %v4729_v16 = vpack.c.bf16 %v4689_v42, %v4689_v42  ;;  %v5887_v13 = vunpack.c.l.b16 %v5798_v55  ;;  %v4553_v50 = vsel %vm616_vm1, %v11837_v38, -inf  ;;  %v5763_v5 = vpack.c.bf16 %v11837_v38, %v11813_v25  ;;  %v13424_v33 = vld [vmem:[#allocation75_spill] sm:$0xff]  ;;  %v13425_v55 = vld [vmem:[#allocation77_spill] sm:$0xff] }
 0x531   :  { %13421 = vst [vmem:[#allocation13_spill] sm:$0xff] %v11851_v20  ;;  %v4552_v47 = vmax.f32 %v4550_v14, %v4551_v21  ;;  %v4554_v15 = vrot.slane %v4553_v50, 4  ;;  %v4536_v36 = vmax.f32 %v4534_v27, %v4535_v43  ;;  %v11862_v60 = vadd.f32 %v11821_v4, %v13423_v40 }
 0x532   :  { %v4827_v3 = vunpack.c.l.b16 %v4729_v16  ;;  %v11858_v37 = vsel %vm1979_vm3, %v5887_v13, %v5886_v58  ;;  %v8768_v42 = vadd.f32 %v13424_v33, %v8507_v17  ;;  %v8770_v12 = vadd.f32 %v13425_v55, %v4189_v26  ;;  %8548 = vmatpush3.bf16.msra.mxu1 %v9010_v51  ;;  %v8512_v13 = vpop.f32.mrb[98].mxu0  ;;  %v13428_v55 = vld [vmem:[#allocation83_spill] sm:$0xff]  ;;  %v13429_v51 = vld [vmem:[#allocation80_spill] sm:$0xff] }
 0x533   :  { %13422 = vst [vmem:[#allocation12_spill] sm:$0xff] %v11858_v37  ;;  %v4694_v16 = vmax.f32 %v4552_v47, 0.0  ;;  %v4555_v14 = vmax.f32 %v4553_v50, %v4554_v15  ;;  %8589 = vmatprep.subr.bf16.mxu1 %v13418_v10  ;;  %v5803_v27 = vpack.c.bf16 %v4552_v47, %v4552_v47  ;;  %v4537_v21 = vrot.slane %v4536_v36, 1  ;;  %v11875_v26 = vpop.f32.mrb[99].mxu0  ;;  %v13426_v15 = vld [vmem:[#allocation65_spill] sm:$0xff]  ;;  %v13427_v47 = vld [vmem:[#allocation51_spill] sm:$0xff] }
 0x534   :  { %v11867_v62 = vsel %vm1979_vm3, %v4827_v3, %v4826_v19  ;;  %v4539_v4 = vsel %vm616_vm1, %v11862_v60, -inf  ;;  %v5762_v17 = vpack.c.bf16 %v11862_v60, %v11818_v31  ;;  %v11881_v40 = vadd.f32 %v8768_v42, %v13426_v15  ;;  %v13452_v10 = vld [vmem:[#allocation46_spill] sm:$0xff] }
 0x535   :  { %v11878_v19 = vpack.c.bf16 %v4694_v16, %v4694_v16  ;;  %v4556_v43 = vrot.slane %v4555_v14, 2  ;;  %v4540_v3 = vrot.slane %v4539_v4, 4  ;;  %v4538_v50 = vmax.f32 %v4536_v36, %v4537_v21 }
 0x536   :  { %v11884_v33 = vadd.f32 %v8770_v12, %v13427_v47  ;;  %v8772_v58 = vadd.f32 %v13428_v55, %v8508_v1  ;;  %8637 = vmatprep.mubr.msk.bf16.mxu0 %vm616_vm1, %v5762_v17  ;;  %v8774_v16 = vadd.f32 %v13429_v51, %v4192_v32  ;;  %v11891_v61 = vunpack.c.l.b16 %v5803_v27  ;;  %v13431_v27 = vld [vmem:[#allocation70_spill] sm:$0xff] }
 0x537   :  { %v4557_v11 = vmax.f32 %v4555_v14, %v4556_v43  ;;  %v4541_v56 = vmax.f32 %v4539_v4, %v4540_v3  ;;  %8638 = vmatmul.mubr.msk.bf16.gmra.mrb[128].mxu0 %vm616_vm1, %v5763_v5  ;;  %v4692_v36 = vmax.f32 %v4538_v50, 0.0  ;;  %v5801_v42 = vpack.c.bf16 %v4538_v50, %v4538_v50  ;;  %v11896_v14 = vpop.f32.mrb[100].mxu0 }
 0x538   :  { %13430 = vst [vmem:[#allocation14_spill] sm:$0xff] %v11891_v61  ;;  %v4574_v12 = vsel %vm616_vm1, %v11881_v40, -inf  ;;  %v4560_v5 = vsel %vm616_vm1, %v11884_v33, -inf  ;;  %v11903_v51 = vadd.f32 %v8772_v58, %v13431_v27  ;;  %v11905_v43 = vpop.f32.mrb[101].mxu0 }
 0x539   :  { %v4558_v1 = vrot.slane %v4557_v11, 1  ;;  %v4542_v15 = vrot.slane %v4541_v56, 2  ;;  %v4575_v17 = vrot.slane %v4574_v12, 4  ;;  %v11907_v3 = vpack.c.bf16 %v4692_v36, %v4692_v36  ;;  %v11909_v18 = vpop.f32.mrb[102].mxu0 }
 0x53a   :  { %v4561_v55 = vrot.slane %v4560_v5, 4  ;;  %v11911_v21 = vunpack.c.l.b16 %v5801_v42  ;;  %v4581_v32 = vsel %vm616_vm1, %v11903_v51, -inf  ;;  %v5765_v58 = vpack.c.bf16 %v11903_v51, %v11881_v40  ;;  %v11919_v27 = vpop.f32.mrb[103].mxu0 }
 0x53b   :  { %v4543_v50 = vmax.f32 %v4541_v56, %v4542_v15  ;;  %v4576_v47 = vmax.f32 %v4574_v12, %v4575_v17  ;;  %v11913_v4 = vmax.f32 %v4557_v11, %v4558_v1  ;;  %v4582_v56 = vrot.slane %v4581_v32, 4  ;;  %v13433_v12 = vld [vmem:[#allocation66_spill] sm:$0xff]  ;;  %v13434_v17 = vld [vmem:[#allocation85_spill] sm:$0xff] }
 0x53c   :  { %13432 = vst [vmem:[#allocation15_spill] sm:$0xff] %v11911_v21  ;;  %v4562_v7 = vmax.f32 %v4560_v5, %v4561_v55  ;;  %v11922_v15 = vadd.f32 %v8774_v16, %v13433_v12  ;;  %v8776_v42 = vadd.f32 %v13434_v17, %v8511_v49  ;;  %v8778_v11 = vadd.f32 %v13435_v0, %v4205_v41  ;;  %v13436_v16 = vld [vmem:[#allocation48_spill] sm:$0xff] }
 0x53d   :  { %v4544_v9 = vrot.slane %v4543_v50, 1  ;;  %v4577_v36 = vrot.slane %v4576_v47, 2  ;;  %v8780_v1 = vadd.f32 %v11736_v23, %v8512_v13  ;;  %v4583_v44 = vmax.f32 %v4581_v32, %v4582_v56  ;;  %v13437_v23 = vld [vmem:[#allocation79_spill] sm:$0xff] }
 0x53e   :  { %v4563_v6 = vrot.slane %v4562_v7, 2  ;;  %v4567_v61 = vsel %vm616_vm1, %v11922_v15, -inf  ;;  %v5764_v5 = vpack.c.bf16 %v11922_v15, %v11884_v33  ;;  %v11933_v55 = vadd.f32 %v8776_v42, %v13436_v16 }
 0x53f   :  { %v4545_v52 = vmax.f32 %v4543_v50, %v4544_v9  ;;  %v4578_v54 = vmax.f32 %v4576_v47, %v4577_v36  ;;  %v11936_v9 = vpop.f32.mrb[104].mxu0  ;;  %v4584_v13 = vrot.slane %v4583_v44, 2  ;;  %v4568_v32 = vrot.slane %v4567_v61, 4 }
 0x540   :  { %v4564_v0 = vmax.f32 %v4562_v7, %v4563_v6  ;;  %v4602_v50 = vsel %vm616_vm1, %v11933_v55, -inf  ;;  %8641 = vmatprep.mubr.msk.bf16.mxu0 %vm616_vm1, %v5764_v5  ;;  %v11941_v47 = vpop.f32.mrb[105].mxu0  ;;  %v11950_v2 = vadd.f32 %v8778_v11, %v13437_v23 }
 0x541   :  { %v4693_v49 = vmax.f32 %v4545_v52, 0.0  ;;  %v4579_v12 = vrot.slane %v4578_v54, 1  ;;  %v5802_v41 = vpack.c.bf16 %v4545_v52, %v4545_v52  ;;  %8642 = vmatmul.mubr.msk.bf16.gmra.mrb[132].mxu0 %vm616_vm1, %v5765_v58  ;;  %v11947_v7 = vpop.f32.mrb[106].mxu0  ;;  %v4585_v52 = vmax.f32 %v4583_v44, %v4584_v13 }
 0x542   :  { %v4565_v17 = vrot.slane %v4564_v0, 1  ;;  %v4569_v42 = vmax.f32 %v4567_v61, %v4568_v32  ;;  %v4603_v16 = vrot.slane %v4602_v50, 4  ;;  %v11952_v21 = vpop.f32.mrb[107].mxu0 }
 0x543   :  { %v11943_v36 = vpack.c.bf16 %v4693_v49, %v4693_v49  ;;  %v4580_v56 = vmax.f32 %v4578_v54, %v4579_v12  ;;  %v11955_v12 = vunpack.c.l.b16 %v5802_v41  ;;  %v4586_v6 = vrot.slane %v4585_v52, 1 }
 0x544   :  { %v4566_v49 = vmax.f32 %v4564_v0, %v4565_v17  ;;  %v4570_v46 = vrot.slane %v4569_v42, 2  ;;  %v4604_v58 = vmax.f32 %v4602_v50, %v4603_v16 }
 0x545   :  { %v4698_v5 = vmax.f32 %v4580_v56, 0.0  ;;  %v5807_v20 = vpack.c.bf16 %v4580_v56, %v4580_v56  ;;  %13438 = vst [vmem:[#allocation17_spill] sm:$0xff] %v11955_v12  ;;  %v4587_v11 = vmax.f32 %v4585_v52, %v4586_v6  ;;  %v4588_v56 = vsel %vm616_vm1, %v11950_v2, -inf }
 0x546   :  { %v4696_v61 = vmax.f32 %v4566_v49, 0.0  ;;  %v5805_v13 = vpack.c.bf16 %v4566_v49, %v4566_v49  ;;  %v4571_v23 = vmax.f32 %v4569_v42, %v4570_v46  ;;  %v4605_v32 = vrot.slane %v4604_v58, 2  ;;  %v13440_v49 = vld [vmem:[#allocation49_spill] sm:$0xff] }
 0x547   :  { %v11958_v44 = vpack.c.bf16 %v4698_v5, %v4698_v5  ;;  %v11962_v0 = vunpack.c.l.b16 %v5807_v20  ;;  %v4589_v54 = vrot.slane %v4588_v56, 4  ;;  %v4699_v12 = vmax.f32 %v4587_v11, 0.0  ;;  %v13441_v46 = vld [vmem:[#allocation81_spill] sm:$0xff] }
 0x548   :  { %v4736_v17 = vpack.c.bf16 %v4696_v61, %v4696_v61  ;;  %v5808_v50 = vpack.c.bf16 %v4587_v11, %v4587_v11  ;;  %v4572_v16 = vrot.slane %v4571_v23, 1  ;;  %v4606_v37 = vmax.f32 %v4604_v58, %v4605_v32 }
 0x549   :  { %13439 = vst [vmem:[#allocation16_spill] sm:$0xff] %v11962_v0  ;;  %v4590_v8 = vmax.f32 %v4588_v56, %v4589_v54  ;;  %v11967_v6 = vadd.f32 %v8780_v1, %v13440_v49  ;;  %v8782_v52 = vadd.f32 %v13441_v46, %v11875_v26  ;;  %v5894_v20 = vunpack.c.l.b16 %v5805_v13 }
 0x54a   :  { %v4834_v42 = vunpack.c.l.b16 %v4736_v17  ;;  %v4573_v0 = vmax.f32 %v4571_v23, %v4572_v16  ;;  %v4607_v61 = vrot.slane %v4606_v37, 1  ;;  %v11971_v63 = vpack.c.bf16 %v4699_v12, %v4699_v12  ;;  %v13443_v17 = vld [vmem:[#allocation82_spill] sm:$0xff]  ;;  %v13444_v12 = vld [vmem:[#allocation87_spill] sm:$0xff] }
 0x54b   :  { %v4591_v41 = vrot.slane %v4590_v8, 2  ;;  %v4609_v11 = vsel %vm616_vm1, %v11967_v6, -inf  ;;  %v5767_v58 = vpack.c.bf16 %v11967_v6, %v11933_v55  ;;  %v11977_v54 = vunpack.c.l.b16 %v5808_v50 }
 0x54c   :  { %v4697_v1 = vmax.f32 %v4573_v0, 0.0  ;;  %v5806_v32 = vpack.c.bf16 %v4573_v0, %v4573_v0  ;;  %v4608_v56 = vmax.f32 %v4606_v37, %v4607_v61  ;;  %v4610_v26 = vrot.slane %v4609_v11, 4 }
 0x54d   :  { %13442 = vst [vmem:[#allocation18_spill] sm:$0xff] %v11977_v54  ;;  %v4592_v49 = vmax.f32 %v4590_v8, %v4591_v41  ;;  %v11980_v13 = vadd.f32 %v8782_v52, %v13443_v17  ;;  %v8784_v23 = vadd.f32 %v13444_v12, %v11896_v14 }
 0x54e   :  { %v4737_v16 = vpack.c.bf16 %v4697_v1, %v4697_v1  ;;  %v5895_v46 = vunpack.c.l.b16 %v5806_v32  ;;  %v4702_v5 = vmax.f32 %v4608_v56, 0.0  ;;  %v4611_v54 = vmax.f32 %v4609_v11, %v4610_v26  ;;  %v13446_v26 = vld [vmem:[#allocation47_spill] sm:$0xff] }
 0x54f   :  { %v4593_v50 = vrot.slane %v4592_v49, 1  ;;  %v4595_v37 = vsel %vm616_vm1, %v11980_v13, -inf  ;;  %v5811_v52 = vpack.c.bf16 %v4608_v56, %v4608_v56  ;;  %v5766_v32 = vpack.c.bf16 %v11980_v13, %v11950_v2 }
 0x550   :  { %v4835_v8 = vunpack.c.l.b16 %v4737_v16  ;;  %v11989_v0 = vsel %vm1979_vm3, %v5895_v46, %v5894_v20  ;;  %v11991_v41 = vpack.c.bf16 %v4702_v5, %v4702_v5  ;;  %v4612_v61 = vrot.slane %v4611_v54, 2  ;;  %v13447_v20 = vld [vmem:[#allocation84_spill] sm:$0xff] }
 0x551   :  { %13445 = vst [vmem:[#allocation19_spill] sm:$0xff] %v11989_v0  ;;  %v4594_v14 = vmax.f32 %v4592_v49, %v4593_v50  ;;  %v4596_v1 = vrot.slane %v4595_v37, 4  ;;  %v12000_v12 = vadd.f32 %v8784_v23, %v13446_v26  ;;  %v8786_v16 = vadd.f32 %v13447_v20, %v11905_v43  ;;  %8645 = vmatprep.mubr.msk.bf16.mxu0 %vm616_vm1, %v5766_v32  ;;  %v13451_v32 = vld [vmem:[#allocation90_spill] sm:$0xff] }
 0x552   :  { %v11996_v17 = vsel %vm1979_vm3, %v4835_v8, %v4834_v42  ;;  %v4613_v56 = vmax.f32 %v4611_v54, %v4612_v61  ;;  %v12005_v50 = vunpack.c.l.b16 %v5811_v52  ;;  %v13449_v8 = vld [vmem:[#allocation74_spill] sm:$0xff]  ;;  %v8788_v23 = vadd.f32 %v11752_v24, %v11909_v18  ;;  %8646 = vmatmul.mubr.msk.bf16.gmra.mrb[136].mxu0 %vm616_vm1, %v5767_v58 }
 0x553   :  { %v4700_v5 = vmax.f32 %v4594_v14, 0.0  ;;  %v5809_v46 = vpack.c.bf16 %v4594_v14, %v4594_v14  ;;  %v4597_v49 = vmax.f32 %v4595_v37, %v4596_v1  ;;  %v4630_v42 = vsel %vm616_vm1, %v12000_v12, -inf }
 0x554   :  { %13448 = vst [vmem:[#allocation21_spill] sm:$0xff] %v12005_v50  ;;  %v12010_v59 = vadd.f32 %v8786_v16, %v13449_v8  ;;  %v4631_v61 = vrot.slane %v4630_v42, 4  ;;  %v12024_v26 = vadd.f32 %v8788_v23, %v13451_v32  ;;  %v4614_v20 = vrot.slane %v4613_v56, 1 }
 0x555   :  { %v12016_v14 = vpack.c.bf16 %v4700_v5, %v4700_v5  ;;  %v4598_v54 = vrot.slane %v4597_v49, 2  ;;  %v12019_v52 = vunpack.c.l.b16 %v5809_v46  ;;  %v8790_v23 = vadd.f32 %v11742_v48, %v11919_v27  ;;  %v13454_v48 = vld [vmem:[#allocation57_spill] sm:$0xff] }
 0x556   :  { %v4616_v1 = vsel %vm616_vm1, %v12010_v59, -inf  ;;  %v4632_v5 = vmax.f32 %v4630_v42, %v4631_v61  ;;  %v4637_v8 = vsel %vm616_vm1, %v12024_v26, -inf  ;;  %v5769_v46 = vpack.c.bf16 %v12024_v26, %v12000_v12 }
 0x557   :  { %13450 = vst [vmem:[#allocation20_spill] sm:$0xff] %v12019_v52  ;;  %v4599_v24 = vmax.f32 %v4597_v49, %v4598_v54  ;;  %v4617_v58 = vrot.slane %v4616_v1, 4  ;;  %v4638_v43 = vrot.slane %v4637_v8, 4  ;;  %v8792_v49 = vadd.f32 %v11763_v57, %v11936_v9  ;;  %v13455_v57 = vld [vmem:[#allocation58_spill] sm:$0xff] }
 0x558   :  { %v4633_v32 = vrot.slane %v4632_v5, 2  ;;  %v8794_v54 = vadd.f32 %v11748_v30, %v11941_v47  ;;  %v8796_v42 = vadd.f32 %v11766_v34, %v11947_v7  ;;  %v12041_v50 = vadd.f32 %v8790_v23, %v13452_v10 }
 0x559   :  { %v4600_v37 = vrot.slane %v4599_v24, 1  ;;  %v4618_v11 = vmax.f32 %v4616_v1, %v4617_v58  ;;  %v4639_v16 = vmax.f32 %v4637_v8, %v4638_v43  ;;  %v13453_v58 = vld [vmem:[#allocation56_spill] sm:$0xff]  ;;  %v12052_v7 = vmax.f32 %v4613_v56, %v4614_v20 }
 0x55a   :  { %v4634_v1 = vmax.f32 %v4632_v5, %v4633_v32  ;;  %v12044_v52 = vadd.f32 %v8792_v49, %v13453_v58  ;;  %v12047_v27 = vadd.f32 %v8794_v54, %v13454_v48  ;;  %v12050_v9 = vadd.f32 %v8796_v42, %v13455_v57 }
 0x55b   :  { %v4601_v61 = vmax.f32 %v4599_v24, %v4600_v37  ;;  %v4619_v18 = vrot.slane %v4618_v11, 2  ;;  %v4640_v34 = vrot.slane %v4639_v16, 2  ;;  %13456 = vst [vmem:[#allocation22_spill] sm:$0xff] %v12052_v7  ;;  %v4623_v10 = vsel %vm616_vm1, %v12041_v50, -inf }
 0x55c   :  { %v4635_v43 = vrot.slane %v4634_v1, 1  ;;  %v5768_v37 = vpack.c.bf16 %v12041_v50, %v12010_v59  ;;  %v4658_v56 = vsel %vm616_vm1, %v12044_v52, -inf }
 0x55d   :  { %v4701_v30 = vmax.f32 %v4601_v61, 0.0  ;;  %v5810_v47 = vpack.c.bf16 %v4601_v61, %v4601_v61  ;;  %v4620_v0 = vmax.f32 %v4618_v11, %v4619_v18  ;;  %v4641_v8 = vmax.f32 %v4639_v16, %v4640_v34 }
 0x55e   :  { %v4636_v49 = vmax.f32 %v4634_v1, %v4635_v43  ;;  %v4624_v11 = vrot.slane %v4623_v10, 4  ;;  %8649 = vmatprep.mubr.msk.bf16.mxu0 %vm616_vm1, %v5768_v37  ;;  %v4659_v42 = vrot.slane %v4658_v56, 4 }
 0x55f   :  { %v4621_v24 = vrot.slane %v4620_v0, 1  ;;  %v12060_v32 = vpack.c.bf16 %v4701_v30, %v4701_v30  ;;  %v12065_v20 = vunpack.c.l.b16 %v5810_v47  ;;  %v4642_v54 = vrot.slane %v4641_v8, 1  ;;  %8650 = vmatmul.mubr.msk.bf16.gmra.mrb[140].mxu0 %vm616_vm1, %v5769_v46 }
 0x560   :  { %v4706_v61 = vmax.f32 %v4636_v49, 0.0  ;;  %v5815_v16 = vpack.c.bf16 %v4636_v49, %v4636_v49  ;;  %v4625_v58 = vmax.f32 %v4623_v10, %v4624_v11  ;;  %v4660_v34 = vmax.f32 %v4658_v56, %v4659_v42 }
 0x561   :  { %13457 = vst [vmem:[#allocation23_spill] sm:$0xff] %v12065_v20  ;;  %v4622_v18 = vmax.f32 %v4620_v0, %v4621_v24  ;;  %v4643_v30 = vmax.f32 %v4641_v8, %v4642_v54  ;;  %v4644_v0 = vsel %vm616_vm1, %v12047_v27, -inf }
 0x562   :  { %v12070_v5 = vpack.c.bf16 %v4706_v61, %v4706_v61  ;;  %v4626_v47 = vrot.slane %v4625_v58, 2  ;;  %v12075_v10 = vunpack.c.l.b16 %v5815_v16  ;;  %v4661_v48 = vrot.slane %v4660_v34, 2 }
 0x563   :  { %v4704_v57 = vmax.f32 %v4622_v18, 0.0  ;;  %v5813_v1 = vpack.c.bf16 %v4622_v18, %v4622_v18  ;;  %v4707_v24 = vmax.f32 %v4643_v30, 0.0  ;;  %v5816_v46 = vpack.c.bf16 %v4643_v30, %v4643_v30 }
 0x564   :  { %13458 = vst [vmem:[#allocation25_spill] sm:$0xff] %v12075_v10  ;;  %v4627_v11 = vmax.f32 %v4625_v58, %v4626_v47  ;;  %v4645_v18 = vrot.slane %v4644_v0, 4  ;;  %v4844_v8 = vunpack.c.l.b16 %v12070_v5  ;;  %v4662_v23 = vmax.f32 %v4660_v34, %v4661_v48  ;;  %v13460_v48 = vld [vmem:[#allocation55_spill] sm:$0xff] }
 0x565   :  { %v4744_v37 = vpack.c.bf16 %v4704_v57, %v4704_v57  ;;  %v5902_v54 = vunpack.c.l.b16 %v5813_v1  ;;  %v12078_v42 = vpack.c.bf16 %v4707_v24, %v4707_v24  ;;  %v4665_v57 = vsel %vm616_vm1, %v12050_v9, -inf }
 0x566   :  { %v4628_v61 = vrot.slane %v4627_v11, 1  ;;  %v4646_v43 = vmax.f32 %v4644_v0, %v4645_v18  ;;  %v12082_v30 = vunpack.c.l.b16 %v5816_v46  ;;  %v4666_v49 = vrot.slane %v4665_v57, 4 }
 0x567   :  { %v4842_v56 = vunpack.c.l.b16 %v4744_v37  ;;  %v5771_v16 = vpack.c.bf16 %v12050_v9, %v12044_v52  ;;  %v8798_v58 = vadd.f32 %v11758_v28, %v11952_v21  ;;  %v4663_v47 = vrot.slane %v4662_v23, 1 }
 0x568   :  { %13459 = vst [vmem:[#allocation24_spill] sm:$0xff] %v12082_v30  ;;  %v4629_v5 = vmax.f32 %v4627_v11, %v4628_v61  ;;  %v4647_v1 = vrot.slane %v4646_v43, 2  ;;  %v4695_v37 = vmax.f32 %v11913_v4, 0.0  ;;  %v4667_v24 = vmax.f32 %v4665_v57, %v4666_v49 }
 0x569   :  { %v12090_v34 = vadd.f32 %v8798_v58, %v13460_v48  ;;  %v4703_v0 = vmax.f32 %v12052_v7, 0.0  ;;  %v13461_v46 = vunpack.c.l.b16 %v11839_v29  ;;  %v12097_v20 = vmax.f32 %v4662_v23, %v4663_v47  ;;  %v9015_v23 = vld [vmem:[%s13046_s7 + $0x40] sm:$0xff]  }
 0x56a   :  { %v4705_v30 = vmax.f32 %v4629_v5, 0.0  ;;  %v5814_v10 = vpack.c.bf16 %v4629_v5, %v4629_v5  ;;  %v4648_v28 = vmax.f32 %v4646_v43, %v4647_v1  ;;  %v4668_v11 = vrot.slane %v4667_v24, 2  ;;  %8657 = vmatprep.subr.bf16.mxu0 %v9015_v23 }
 0x56b   :  { %v4865_v18 = vsel %vm1981_vm4, %v13461_v46, %v11867_v62  ;;  %v4651_v49 = vsel %vm616_vm1, %v12090_v34, -inf  ;;  %v5770_v61 = vpack.c.bf16 %v12090_v34, %v12047_v27  ;;  %v4845_v57 = vunpack.c.l.b16 %v12078_v42  ;;  %8658 = vmatpush3.bf16.msra.mxu0 %v9015_v23 }
 0x56c   :  { %v4745_v58 = vpack.c.bf16 %v4705_v30, %v4705_v30  ;;  %v5903_v29 = vunpack.c.l.b16 %v5814_v10  ;;  %v4710_v62 = vmax.f32 %v12097_v20, 0.0  ;;  %v4649_v43 = vrot.slane %v4648_v28, 1 }
 0x56d   :  { %v4669_v5 = vmax.f32 %v4667_v24, %v4668_v11  ;;  %v4652_v47 = vrot.slane %v4651_v49, 4  ;;  %8653 = vmatprep.mubr.msk.bf16.mxu0 %vm616_vm1, %v5770_v61  ;;  %v4735_v1 = vpack.c.bf16 %v4695_v37, %v4695_v37  ;;  %v4369_v42 = vmax.f32 %v12090_v34, 0.0 }
 0x56e   :  { %v4843_v48 = vunpack.c.l.b16 %v4745_v58  ;;  %v12111_v46 = vsel %vm1979_vm3, %v5903_v29, %v5902_v54  ;;  %8654 = vmatmul.mubr.msk.bf16.gmra.mrb[144].mxu0 %vm616_vm1, %v5771_v16  ;;  %v4743_v10 = vpack.c.bf16 %v4703_v0, %v4703_v0  ;;  %v5819_v30 = vpack.c.bf16 %v12097_v20, %v12097_v20  ;;  %v9011_v20 = vld [vmem:[%s13050_s10 + $0x20] sm:$0xff]  }
 0x56f   :  { %v4650_v21 = vmax.f32 %v4648_v28, %v4649_v43  ;;  %v4670_v7 = vrot.slane %v4669_v5, 1  ;;  %v4653_v24 = vmax.f32 %v4651_v49, %v4652_v47  ;;  %v12118_v37 = vpack.c.bf16 %v4710_v62, %v4710_v62 }
 0x570   :  { %v4878_v11 = vsel %vm1979_vm3, %v4843_v48, %v4842_v56  ;;  %v13462_v54 = vunpack.c.l.b16 %v11849_v53  ;;  %v13463_v16 = vunpack.c.l.b16 %v11958_v44  ;;  %v4833_v29 = vunpack.c.l.b16 %v4735_v1 }
 0x571   :  { %v4708_v0 = vmax.f32 %v4650_v21, 0.0  ;;  %v12127_v58 = vmax.f32 %v4669_v5, %v4670_v7  ;;  %v4654_v28 = vrot.slane %v4653_v24, 2  ;;  %v4841_v49 = vunpack.c.l.b16 %v4743_v10 }
 0x572   :  { %v4866_v61 = vsel %vm1983_vm5, %v13462_v54, %v4865_v18  ;;  %v4872_v34 = vsel %vm1981_vm4, %v13463_v16, %v11996_v17  ;;  %v13464_v23 = vunpack.c.l.b16 %v11907_v3  ;;  %v13465_v62 = vunpack.c.l.b16 %v11971_v63 }
 0x573   :  { %v4879_v18 = vsel %vm1981_vm4, %v4844_v8, %v4878_v11  ;;  %v4748_v43 = vpack.c.bf16 %v4708_v0, %v4708_v0  ;;  %v5817_v44 = vpack.c.bf16 %v4650_v21, %v4650_v21  ;;  %v4655_v47 = vmax.f32 %v4653_v24, %v4654_v28 }
 0x574   :  { %v4867_v56 = vsel %vm1985_vm6, %v13464_v23, %v4866_v61  ;;  %v4873_v53 = vsel %vm1983_vm5, %v13465_v62, %v4872_v34  ;;  %v13466_v17 = vunpack.c.l.b16 %v11943_v36  ;;  %v13467_v5 = vunpack.c.l.b16 %v11878_v19 }
 0x575   :  { %v13468_v3 = vunpack.c.l.b16 %v12016_v14  ;;  %v4711_v63 = vmax.f32 %v12127_v58, 0.0  ;;  %v4880_v10 = vsel %vm1983_vm5, %v4845_v57, %v4879_v18  ;;  %v4846_v8 = vunpack.c.l.b16 %v4748_v43 }
 0x576   :  { %v4868_v7 = vsel %vm1987_vm7, %v13466_v17, %v4867_v56  ;;  %v4656_v11 = vrot.slane %v4655_v47, 1  ;;  %v13469_v36 = vunpack.c.l.b16 %v12060_v32  ;;  %v13470_v19 = vunpack.c.l.b16 %v11991_v41 }
 0x577   :  { %v4869_v1 = vsel %vm1989_vm8, %v13467_v5, %v4868_v7  ;;  %v4874_v48 = vsel %vm1985_vm6, %v13468_v3, %v4873_v53  ;;  %v4848_v14 = vunpack.c.l.b16 %v12118_v37  ;;  %v13471_v61 = vmax.f32 %v11773_v35, 0.0 }
 0x578   :  { %v4870_v21 = vsel %vm1991_vm9, %v4833_v29, %v4869_v1  ;;  %v4875_v24 = vsel %vm1987_vm7, %v13469_v36, %v4874_v48  ;;  %v13472_v16 = vmax.f32 %v11788_v45, 0.0  ;;  %v13473_v57 = vmax.f32 %v11769_v39, 0.0 }
 0x579   :  { %v4876_v54 = vsel %vm1989_vm8, %v13470_v19, %v4875_v24  ;;  %v13474_v0 = vmax.f32 %v11784_v22, 0.0  ;;  %v4657_v32 = vmax.f32 %v4655_v47, %v4656_v11  ;;  %v4881_v41 = vsel %vm1985_vm6, %v4846_v8, %v4880_v10  ;;  %v13496_v11 = vld [vmem:[#allocation8_spill] sm:$0xff] }
 0x57a   :  { %v12159_v34 = vpack.c.bf16 %v13472_v16, %v13471_v61  ;;  %v4877_v29 = vsel %vm1991_vm9, %v4841_v49, %v4876_v54  ;;  %v13475_v23 = vmax.f32 %v11818_v31, 0.0  ;;  %v13476_v37 = vmax.f32 %v11862_v60, 0.0  ;;  %v13499_v24 = vld [vmem:[#allocation12_spill] sm:$0xff] }
 0x57b   :  { %v12165_v28 = vpack.c.bf16 %v13474_v0, %v13473_v57  ;;  %v4886_v45 = vpack.c.b16 %v4877_v29, %v4870_v21  ;;  %v4751_v56 = vpack.c.bf16 %v4711_v63, %v4711_v63  ;;  %v13477_v62 = vmax.f32 %v11813_v25, 0.0  ;;  %v13497_v21 = vld [vmem:[#allocation9_spill] sm:$0xff]  ;;  %v9016_v19 = vld [vmem:[%s13046_s7 + $0x48] sm:$0xff]  }
 0x57c   :  { %v12173_v35 = vpack.c.bf16 %v13476_v37, %v13475_v23  ;;  %v13478_v39 = vmax.f32 %v11837_v38, 0.0  ;;  %v13479_v53 = vmax.f32 %v11884_v33, 0.0  ;;  %v13480_v49 = vmax.f32 %v11922_v15, 0.0  ;;  %v9017_v54 = vld [vmem:[%s13046_s7 + $0x50] sm:$0xff]   ;;  %v13502_v0 = vld [vmem:[#allocation19_spill] sm:$0xff]  ;;  %8659 = vmatprep.subr.bf16.mxu0 %v9016_v19 }
 0x57d   :  { %v4709_v43 = vmax.f32 %v4657_v32, 0.0  ;;  %v5818_v31 = vpack.c.bf16 %v4657_v32, %v4657_v32  ;;  %v13481_v60 = vmax.f32 %v11881_v40, 0.0  ;;  %v13482_v47 = vmax.f32 %v11903_v51, 0.0  ;;  %8534 = vmatmul.mubr.msk.bf16.gmra.mrb[160].mxu1 %vm616_vm1, %v4886_v45  ;;  %v13501_v57 = vld [vmem:[#allocation13_spill] sm:$0xff]  ;;  %v13503_v32 = vld [vmem:[#allocation16_spill] sm:$0xff]  ;;  %v13504_v37 = vld [vmem:[#allocation15_spill] sm:$0xff]  ;;  %8660 = vmatpush3.bf16.msra.mxu0 %v9016_v19 }
 0x57e   :  { %v12179_v22 = vpack.c.bf16 %v13478_v39, %v13477_v62  ;;  %v12185_v18 = vpack.c.bf16 %v13480_v49, %v13479_v53  ;;  %v13483_v25 = vmax.f32 %v11950_v2, 0.0  ;;  %v13484_v38 = vmax.f32 %v11980_v13, 0.0  ;;  %v13505_v62 = vld [vmem:[#allocation18_spill] sm:$0xff]  ;;  %8661 = vmatprep.subr.bf16.mxu0 %v9017_v54  ;;  %v9012_v19 = vld [vmem:[%s13050_s10 + $0x28] sm:$0xff]  }
 0x57f   :  { %v12191_v17 = vpack.c.bf16 %v13482_v47, %v13481_v60  ;;  %v13485_v33 = vmax.f32 %v11933_v55, 0.0  ;;  %v13486_v15 = vmax.f32 %v11967_v6, 0.0  ;;  %v13487_v40 = vmax.f32 %v12010_v59, 0.0  ;;  %v13507_v47 = vld [vmem:[#allocation20_spill] sm:$0xff] }
 0x580   :  { %v12197_v7 = vpack.c.bf16 %v13484_v38, %v13483_v25  ;;  %v13488_v51 = vmax.f32 %v12041_v50, 0.0  ;;  %v13489_v2 = vmax.f32 %v12000_v12, 0.0  ;;  %v13490_v13 = vmax.f32 %v12024_v26, 0.0  ;;  %v13495_v12 = vld [vmem:[#allocation10_spill] sm:$0xff] }
 0x581   :  { %v12204_v5 = vpack.c.bf16 %v13486_v15, %v13485_v33  ;;  %v13491_v48 = vmax.f32 %v12047_v27, 0.0  ;;  %v5906_v55 = vunpack.c.l.b16 %v5817_v44  ;;  %v4749_v6 = vpack.c.bf16 %v4709_v43, %v4709_v43  ;;  %v13498_v44 = vld [vmem:[#allocation22_spill] sm:$0xff]  ;;  %v13506_v43 = vld [vmem:[#allocation17_spill] sm:$0xff]  ;;  %8662 = vmatpush3.bf16.msra.mxu0 %v9017_v54 }
 0x582   :  { %v12210_v1 = vpack.c.bf16 %v13488_v51, %v13487_v40  ;;  %v12216_v3 = vpack.c.bf16 %v13490_v13, %v13489_v2  ;;  %v13492_v10 = vmov 0.0   ;;  %v13493_v59 = vmax.f32 %v12044_v52, 0.0  ;;  %v13500_v52 = vld [vmem:[#allocation11_spill] sm:$0xff]  ;;  %v13508_v33 = vld [vmem:[#allocation14_spill] sm:$0xff]  ;;  %v13510_v2 = vld [vmem:[#allocation21_spill] sm:$0xff] }
 0x583   :  { %v12220_v63 = vpack.c.bf16 %v4369_v42, %v13491_v48  ;;  %8537 = vmatprep.mubr.msk.bf16.mxu1 %vm9026_vm2, %v13492_v10  ;;  %v13494_v50 = vmax.f32 %v12050_v9, 0.0  ;;  %v12233_v26 = vsel %vm1991_vm9, %v13496_v11, %v13495_v12  ;;  %v5804_v42 = vpack.c.bf16 %v11913_v4, %v11913_v4  ;;  %v13509_v40 = vld [vmem:[#allocation23_spill] sm:$0xff]  ;;  %v13511_v48 = vld [vmem:[#allocation25_spill] sm:$0xff] }
 0x584   :  { %v5945_v27 = vpack.c.b16 %v12233_v26, %v13497_v21  ;;  %v5812_v36 = vpack.c.bf16 %v13498_v44, %v13498_v44  ;;  %v5925_v9 = vsel %vm1981_vm4, %v13500_v52, %v13499_v24  ;;  %v4847_v61 = vunpack.c.l.b16 %v4749_v6  ;;  %v9013_v54 = vld [vmem:[%s13050_s10 + $0x30] sm:$0xff]  }
 0x585   :  { %v12228_v8 = vpack.c.bf16 %v13494_v50, %v13493_v59  ;;  %v4849_v16 = vunpack.c.l.b16 %v4751_v56  ;;  %v5926_v4 = vsel %vm1983_vm5, %v13501_v57, %v5925_v9  ;;  %v5932_v29 = vsel %vm1981_vm4, %v13503_v32, %v13502_v0  ;;  %v13512_v50 = vld [vmem:[#allocation24_spill] sm:$0xff]  ;;  %v9014_v57 = vld [vmem:[%s13050_s10 + $0x38] sm:$0xff]   ;;  %v13520_v32 = vld [vmem:[#allocation7_spill] sm:$0xff] }
 0x586   :  { %v5907_v23 = vunpack.c.l.b16 %v5818_v31  ;;  %v5927_v45 = vsel %vm1985_vm6, %v13504_v37, %v5926_v4  ;;  %v5933_v39 = vsel %vm1983_vm5, %v13505_v62, %v5932_v29  ;;  %v5820_v53 = vpack.c.bf16 %v12127_v58, %v12127_v58  ;;  %v13518_v4 = vld [vmem:[#allocation5_spill] sm:$0xff]  ;;  %v13519_v0 = vld [vmem:[#allocation6_spill] sm:$0xff] }
 0x587   :  { %v4882_v56 = vsel %vm1987_vm7, %v4847_v61, %v4881_v41  ;;  %v5893_v49 = vunpack.c.l.b16 %v5804_v42  ;;  %v5928_v60 = vsel %vm1987_vm7, %v13506_v43, %v5927_v45  ;;  %v5934_v25 = vsel %vm1985_vm6, %v13507_v47, %v5933_v39  ;;  %v13516_v61 = vld [vmem:[#allocation91_spill] sm:$0xff] }
 0x588   :  { %v4883_v31 = vsel %vm1989_vm8, %v4848_v14, %v4882_v56  ;;  %v5901_v38 = vunpack.c.l.b16 %v5812_v36  ;;  %v5929_v15 = vsel %vm1989_vm8, %v13508_v33, %v5928_v60  ;;  %v5935_v58 = vsel %vm1987_vm7, %v13509_v40, %v5934_v25  ;;  %v13522_v60 = vld [vmem:[#allocation4_spill] sm:$0xff] }
 0x589   :  { %v4884_v41 = vsel %vm1991_vm9, %v4849_v16, %v4883_v31  ;;  %v5930_v51 = vsel %vm1991_vm9, %v5893_v49, %v5929_v15  ;;  %v5936_v13 = vsel %vm1989_vm8, %v13510_v2, %v5935_v58  ;;  %v5939_v6 = vsel %vm1981_vm4, %v13511_v48, %v12111_v46  ;;  %v13513_v46 = vld [vmem:[#allocation45_spill] sm:$0xff]  ;;  %v13517_v16 = vld [vmem:[#allocation3_spill] sm:$0xff] }
 0x58a   :  { %v4887_v14 = vpack.c.b16 %v4884_v41, %v4884_v41  ;;  %v5937_v59 = vsel %vm1991_vm9, %v5901_v38, %v5936_v13  ;;  %v5940_v12 = vsel %vm1983_vm5, %v13512_v50, %v5939_v6  ;;  %v5908_v42 = vunpack.c.l.b16 %v5819_v30  ;;  %v13514_v30 = vld [vmem:[#allocation86_spill] sm:$0xff]  ;;  %v12377_v31 = vld [vmem:[%s13047_s6 + $0x2] ss:$0 sm:$0xff] }
 0x58b   :  { %v5946_v11 = vpack.c.b16 %v5937_v59, %v5930_v51  ;;  %v5941_v44 = vsel %vm1985_vm6, %v5906_v55, %v5940_v12  ;;  %v5909_v36 = vunpack.c.l.b16 %v5820_v53  ;;  %v13515_v55 = vld [vmem:[#allocation88_spill] sm:$0xff] }
 0x58c   :  { %8538 = vmatmul.mubr.msk.bf16.gmra.mrb[164].mxu1 %vm616_vm1, %v4887_v14  ;;  %v5942_v24 = vsel %vm1987_vm7, %v5907_v23, %v5941_v44 }
 0x58d   :  { %8549 = vmatprep.mubr.msk.bf16.mxu1 %vm616_vm1, %v13513_v46  ;;  %v5943_v52 = vsel %vm1989_vm8, %v5908_v42, %v5942_v24 }
 0x58e   :  { %v5944_v9 = vsel %vm1991_vm9, %v5909_v36, %v5943_v52 }
 0x594   :  { %8550 = vmatmul.mubr.msk.bf16.vlgmr.msra.gmra.mrb[168].mxu1 %vm616_vm1, %v13514_v30 }
 0x595   :  { %8553 = vmatprep.mubr.msk.bf16.mxu1 %vm616_vm1, %v13515_v55  ;;  %8590 = vmatpush3.bf16.msra.mxu1 %v9011_v20 }
 0x596   :  { %8591 = vmatprep.subr.bf16.mxu1 %v13492_v10 }
 0x599   :  { %8592 = vmatpush3.bf16.msra.mxu1 %v9012_v19 }
 0x59a   :  { %8593 = vmatprep.subr.bf16.mxu1 %v13492_v10 }
 0x59c   :  { %8554 = vmatmul.mubr.msk.bf16.gmra.mrb[172].mxu1 %vm616_vm1, %v13516_v61 }
 0x59d   :  { %8557 = vmatprep.mubr.msk.bf16.mxu1 %vm616_vm1, %v13517_v16  ;;  %8594 = vmatpush3.bf16.msra.mxu1 %v9013_v54 }
 0x59e   :  { %8595 = vmatprep.subr.bf16.mxu1 %v13492_v10 }
 0x5a1   :  { %8596 = vmatpush3.bf16.msra.mxu1 %v9014_v57 }
 0x5a2   :  { %8705 = vmatprep.subr.bf16.mxu1 %v13492_v10 }
 0x5a4   :  { %8558 = vmatmul.mubr.msk.bf16.gmra.mrb[176].mxu1 %vm616_vm1, %v13518_v4 }
 0x5a5   :  { %8561 = vmatprep.mubr.msk.bf16.mxu1 %vm616_vm1, %v13519_v0 }
 0x5ac   :  { %8562 = vmatmul.mubr.msk.bf16.gmra.mrb[180].mxu1 %vm616_vm1, %v13520_v32 }
 0x5ad   :  { %8565 = vmatprep.mubr.msk.bf16.mxu1 %vm616_vm1, %v12159_v34  ;;  %v9018_v34 = vld [vmem:[%s13046_s7 + $0x58] sm:$0xff]  }
 0x5ae   :  { %8663 = vmatprep.subr.bf16.mxu0 %v9018_v34 }
 0x5af   :  { %8664 = vmatpush3.bf16.msra.mxu0 %v9018_v34 }
 0x5b4   :  { %8566 = vmatmul.mubr.msk.bf16.gmra.mrb[184].mxu1 %vm616_vm1, %v12165_v28  ;;  %v5947_v28 = vpack.c.b16 %v5944_v9, %v5944_v9 }
 0x5b5   :  { %8569 = vmatprep.mubr.msk.bf16.mxu1 %vm616_vm1, %v12173_v35 }
 0x5bc   :  { %8570 = vmatmul.mubr.msk.bf16.gmra.mrb[188].mxu1 %vm616_vm1, %v12179_v22 }
 0x5bd   :  { %8573 = vmatprep.mubr.msk.bf16.mxu1 %vm616_vm1, %v12185_v18 }
 0x5c4   :  { %8574 = vmatmul.mubr.msk.bf16.gmra.mrb[192].mxu1 %vm616_vm1, %v12191_v17 }
 0x5c5   :  { %8577 = vmatprep.mubr.msk.bf16.mxu1 %vm616_vm1, %v12197_v7 }
 0x5cc   :  { %8578 = vmatmul.mubr.msk.bf16.gmra.mrb[196].mxu1 %vm616_vm1, %v12204_v5 }
 0x5cd   :  { %8581 = vmatprep.mubr.msk.bf16.mxu1 %vm616_vm1, %v12210_v1 }
 0x5d4   :  { %8582 = vmatmul.mubr.msk.bf16.gmra.mrb[200].mxu1 %vm616_vm1, %v12216_v3  ;;  %v13521_v3 = vld [vmem:[#allocation52_spill] sm:$0xff] }
 0x5d5   :  { %8585 = vmatprep.mubr.msk.bf16.mxu1 %vm616_vm1, %v12220_v63 }
 0x5dc   :  { %8586 = vmatmul.mubr.msk.bf16.gmra.mrb[204].mxu1 %vm616_vm1, %v12228_v8 }
 0x5dd   :  { %8597 = vmatprep.mubr.msk.bf16.mxu1 %vm9026_vm2, %v13492_v10 }
 0x5e4   :  { %8598 = vmatmul.mubr.msk.bf16.vlgmr.msra.gmra.mrb[208].mxu1 %vm616_vm1, %v5945_v27 }
 0x5e5   :  { %8601 = vmatprep.mubr.msk.bf16.mxu1 %vm9026_vm2, %v13492_v10 }
 0x5ec   :  { %8602 = vmatmul.mubr.msk.bf16.gmra.mrb[212].mxu1 %vm616_vm1, %v5946_v11 }
 0x5ed   :  { %8605 = vmatprep.mubr.msk.bf16.mxu1 %vm9026_vm2, %v13492_v10 }
 0x5f4   :  { %8606 = vmatmul.mubr.msk.bf16.gmra.mrb[216].mxu1 %vm616_vm1, %v5947_v28 }
 0x5f5   :  { %8711 = vmatprep.mubr.msk.bf16.mxu1 %vm9026_vm2, %v13492_v10 }
 0x5f8   :  { %v4955_v35 = vpop.f32.mrb[156].mxu1 }
 0x5f9   :  { %v8531_v22 = vpop.f32.mrb[157].mxu1  ;;  %v4989_v63 = vrot.slane %v4955_v35, %v13521_v3  ;;  %v4982_v26 = vcombine.high %v4955_v35, %v4955_v35 }
 0x5fa   :  { %v4958_v18 = vpop.f32.mrb[158].mxu1 }
 0x5fb   :  { %v8532_v17 = vpop.f32.mrb[159].mxu1  ;;  %v4997_v21 = vcombine.high %v4989_v63, %v4989_v63  ;;  %v5005_v27 = vrot.slane %v4989_v63, %v13521_v3  ;;  %v4996_v23 = vrot.slane %v4982_v26, %v13521_v3  ;;  %v5038_v33 = vrot.slane %v4958_v18, %v13521_v3 }
 0x5fc   :  { %v5031_v50 = vcombine.high %v4958_v18, %v4958_v18 }
 0x5fd   :  { %v5019_v37 = vrot.slane %v4997_v21, %v13521_v3  ;;  %v5027_v53 = vcombine.high %v5005_v27, %v5005_v27  ;;  %v4998_v56 = vcombine.high %v4996_v23, %v4996_v23  ;;  %v5012_v43 = vrot.slane %v4996_v23, %v13521_v3 }
 0x5fe   :  { %v5230_v38 = vrot.slane %v5005_v27, %v13522_v60  ;;  %v5046_v42 = vcombine.high %v5038_v33, %v5038_v33  ;;  %v5054_v46 = vrot.slane %v5038_v33, %v13521_v3  ;;  %v5045_v30 = vrot.slane %v5031_v50, %v13521_v3 }
 0x5ff   :  { %v5029_v49 = vcombine.high %v5019_v37, %v5019_v37  ;;  %v5238_v47 = vrot.slane %v5027_v53, %v13522_v60  ;;  %v5026_v41 = vrot.slane %v4998_v56, %v13521_v3  ;;  %v5234_v13 = vrot.slane %v5019_v37, %v13522_v60 }
 0x600   :  { %v5028_v59 = vcombine.high %v5012_v43, %v5012_v43  ;;  %v5246_v61 = vrot.slane %v5012_v43, %v13522_v60  ;;  %v5068_v16 = vrot.slane %v5046_v42, %v13521_v3  ;;  %v5076_v63 = vcombine.high %v5054_v46, %v5054_v46 }
 0x601   :  { %v5242_v58 = vrot.slane %v5029_v49, %v13522_v60  ;;  %v5030_v36 = vcombine.high %v5026_v41, %v5026_v41  ;;  %v5250_v22 = vrot.slane %v5026_v41, %v13522_v60 }
 0x602   :  { %v5254_v20 = vrot.slane %v5028_v59, %v13522_v60  ;;  %v5078_v23 = vcombine.high %v5068_v16, %v5068_v16  ;;  %v5270_v53 = vrot.slane %v5076_v63, %v13522_v60 }
 0x603   :  { %v5258_v32 = vrot.slane %v5030_v36, %v13522_v60 }
 0x650   :  { %v12362_v7 = vpop.f32.mrb[160].mxu1 }
 0x651   :  { %v8535_v5 = vpop.f32.mrb[161].mxu1  ;;  %v5080_v42 = vcombine.high %v12362_v7, %v12362_v7 }
 0x652   :  { %v12364_v1 = vpop.f32.mrb[162].mxu1 }
 0x653   :  { %v8536_v8 = vpop.f32.mrb[163].mxu1 }
 0x654   :  { %v5047_v8 = vcombine.high %v5045_v30, %v5045_v30 }
 0x65f   :  { %v12368_v29 = vpop.f32.mrb[164].mxu1 }
 0x660   :  { %v8539_v45 = vpop.f32.mrb[165].mxu1 }
 0x661   :  { %v4974_v62 = vpop.f32.mrb[166].mxu1  ;;  %v5061_v45 = vrot.slane %v5045_v30, %v13521_v3 }
 0x662   :  { %v8540_v39 = vpop.f32.mrb[167].mxu1 }
 0x663   :  { %v5077_v59 = vcombine.high %v5061_v45, %v5061_v45 }
 0x667   :  { %v8551_v25 = vpop.f32.mrb[168].mxu1 }
 0x668   :  { %v5554_v15 = vadd.f32 %v8551_v25, %v5238_v47  ;;  %v5545_v40 = vpop.f32.mrb[169].mxu1  ;;  %v5262_v47 = vrot.slane %v5054_v46, %v13522_v60  ;;  %v5075_v25 = vrot.slane %v5047_v8, %v13521_v3 }
 0x669   :  { %v5546_v51 = vadd.f32 %v5545_v40, %v5230_v38  ;;  %v8552_v2 = vpop.f32.mrb[170].mxu1  ;;  %v5087_v38 = vrot.slane %v12362_v7, %v13521_v3 }
 0x66a   :  { %v5714_v48 = vadd.f32 %v12377_v31, %v5554_v15  ;;  %v5557_v6 = vadd.f32 %v8552_v2, %v5242_v58  ;;  %v5548_v14 = vpop.f32.mrb[171].mxu1  ;;  %v5274_v58 = vrot.slane %v5078_v23, %v13522_v60 }
 0x66b   :  { %v5712_v12 = vadd.f32 %v12377_v31, %v5546_v51  ;;  %v5549_v11 = vadd.f32 %v5548_v14, %v5234_v13  ;;  %v5266_v13 = vrot.slane %v5068_v16, %v13522_v60  ;;  %v5103_v46 = vrot.slane %v5087_v38, %v13521_v3 }
 0x66c   :  { %v5715_v44 = vadd.f32 %v12377_v31, %v5557_v6  ;;  %v6766_v52 = vmax.f32 %v5714_v48, 0.0 }
 0x66d   :  { %v5713_v24 = vadd.f32 %v12377_v31, %v5549_v11  ;;  %v6764_v55 = vmax.f32 %v5712_v12, 0.0  ;;  %v5079_v11 = vcombine.high %v5075_v25, %v5075_v25 }
 0x66e   :  { %v6767_v9 = vmax.f32 %v5715_v44, 0.0  ;;  %v5095_v44 = vcombine.high %v5087_v38, %v5087_v38 }
 0x66f   :  { %v6765_v19 = vmax.f32 %v5713_v24, 0.0  ;;  %v8555_v54 = vpop.f32.mrb[172].mxu1  ;;  %v5290_v7 = vrot.slane %v5079_v11, %v13522_v60 }
 0x670   :  { %v6805_v57 = vpack.c.bf16 %v6767_v9, %v6766_v52  ;;  %v5570_v4 = vadd.f32 %v8555_v54, %v5254_v20  ;;  %v5561_v0 = vpop.f32.mrb[173].mxu1  ;;  %v5286_v20 = vrot.slane %v5077_v59, %v13522_v60  ;;  %v5278_v54 = vrot.slane %v5061_v45, %v13522_v60 }
 0x671   :  { %v6804_v34 = vpack.c.bf16 %v6765_v19, %v6764_v55  ;;  %v5562_v28 = vadd.f32 %v5561_v0, %v5246_v61  ;;  %v8556_v35 = vpop.f32.mrb[174].mxu1  ;;  %v5094_v61 = vrot.slane %v5080_v42, %v13521_v3  ;;  %v5117_v16 = vrot.slane %v5095_v44, %v13521_v3 }
 0x672   :  { %v5718_v18 = vadd.f32 %v12377_v31, %v5570_v4  ;;  %v5573_v17 = vadd.f32 %v8556_v35, %v5258_v32  ;;  %v5564_v5 = vpop.f32.mrb[175].mxu1  ;;  %v5282_v35 = vrot.slane %v5075_v25, %v13522_v60  ;;  %v5129_v59 = vcombine.high %v12364_v1, %v12364_v1 }
 0x673   :  { %v5716_v26 = vadd.f32 %v12377_v31, %v5562_v28  ;;  %v5565_v21 = vadd.f32 %v5564_v5, %v5250_v22  ;;  %8665 = vmatprep.mubr.msk.bf16.mxu0 %vm616_vm1, %v6804_v34  ;;  %v5125_v5 = vcombine.high %v5103_v46, %v5103_v46 }
 0x674   :  { %v5719_v27 = vadd.f32 %v12377_v31, %v5573_v17  ;;  %8666 = vmatmul.mubr.msk.bf16.vlgmr.msra.gmra.mrb[108].mxu0 %vm616_vm1, %v6805_v57  ;;  %v6770_v62 = vmax.f32 %v5718_v18, 0.0 }
 0x675   :  { %v5717_v37 = vadd.f32 %v12377_v31, %v5565_v21  ;;  %v6768_v56 = vmax.f32 %v5716_v26, 0.0  ;;  %v5096_v26 = vcombine.high %v5094_v61, %v5094_v61 }
 0x676   :  { %v6771_v39 = vmax.f32 %v5719_v27, 0.0  ;;  %v5127_v27 = vcombine.high %v5117_v16, %v5117_v16 }
 0x677   :  { %v6769_v49 = vmax.f32 %v5717_v37, 0.0  ;;  %v8559_v43 = vpop.f32.mrb[176].mxu1  ;;  %v5110_v37 = vrot.slane %v5094_v61, %v13521_v3 }
 0x678   :  { %v6807_v33 = vpack.c.bf16 %v6771_v39, %v6770_v62  ;;  %v5586_v15 = vadd.f32 %v8559_v43, %v5270_v53  ;;  %v5577_v40 = vpop.f32.mrb[177].mxu1  ;;  %v5302_v39 = vrot.slane %v5125_v5, %v13522_v60  ;;  %v5136_v53 = vrot.slane %v12364_v1, %v13521_v3 }
 0x679   :  { %v6806_v41 = vpack.c.bf16 %v6769_v49, %v6768_v56  ;;  %v5578_v51 = vadd.f32 %v5577_v40, %v5262_v47  ;;  %v8560_v2 = vpop.f32.mrb[178].mxu1  ;;  %v5294_v47 = vrot.slane %v5103_v46, %v13522_v60  ;;  %v5124_v40 = vrot.slane %v5096_v26, %v13521_v3 }
 0x67a   :  { %v5722_v48 = vadd.f32 %v12377_v31, %v5586_v15  ;;  %v5589_v6 = vadd.f32 %v8560_v2, %v5274_v58  ;;  %v5580_v14 = vpop.f32.mrb[179].mxu1  ;;  %v5306_v15 = vrot.slane %v5127_v27, %v13522_v60  ;;  %v5298_v2 = vrot.slane %v5117_v16, %v13522_v60 }
 0x67b   :  { %v5720_v50 = vadd.f32 %v12377_v31, %v5578_v51  ;;  %v5581_v12 = vadd.f32 %v5580_v14, %v5266_v13  ;;  %8669 = vmatprep.mubr.msk.bf16.mxu0 %vm616_vm1, %v6806_v41  ;;  %v5126_v14 = vcombine.high %v5110_v37, %v5110_v37  ;;  %v5144_v11 = vcombine.high %v5136_v53, %v5136_v53 }
 0x67c   :  { %v5723_v36 = vadd.f32 %v12377_v31, %v5589_v6  ;;  %8670 = vmatmul.mubr.msk.bf16.gmra.mrb[112].mxu0 %vm616_vm1, %v6807_v33  ;;  %v6774_v52 = vmax.f32 %v5722_v48, 0.0  ;;  %v5128_v44 = vcombine.high %v5124_v40, %v5124_v40  ;;  %v5143_v1 = vrot.slane %v5129_v59, %v13521_v3 }
 0x67d   :  { %v5721_v24 = vadd.f32 %v12377_v31, %v5581_v12  ;;  %v6772_v30 = vmax.f32 %v5720_v50, 0.0 }
 0x67e   :  { %v6775_v9 = vmax.f32 %v5723_v36, 0.0  ;;  %v5159_v27 = vrot.slane %v5143_v1, %v13521_v3 }
 0x67f   :  { %v6773_v55 = vmax.f32 %v5721_v24, 0.0  ;;  %v8563_v19 = vpop.f32.mrb[180].mxu1  ;;  %v5152_v24 = vrot.slane %v5136_v53, %v13521_v3 }
 0x680   :  { %v6809_v57 = vpack.c.bf16 %v6775_v9, %v6774_v52  ;;  %v5602_v4 = vadd.f32 %v8563_v19, %v5286_v20  ;;  %v5593_v0 = vpop.f32.mrb[181].mxu1  ;;  %v5318_v9 = vrot.slane %v5126_v14, %v13522_v60  ;;  %v5310_v19 = vrot.slane %v5110_v37, %v13522_v60 }
 0x681   :  { %v6808_v32 = vpack.c.bf16 %v6773_v55, %v6772_v30  ;;  %v5594_v34 = vadd.f32 %v5593_v0, %v5278_v54  ;;  %v8564_v28 = vpop.f32.mrb[182].mxu1  ;;  %v5166_v54 = vrot.slane %v5144_v11, %v13521_v3 }
 0x682   :  { %v5726_v22 = vadd.f32 %v12377_v31, %v5602_v4  ;;  %v5605_v18 = vadd.f32 %v8564_v28, %v5290_v7  ;;  %v5596_v17 = vpop.f32.mrb[183].mxu1 }
 0x683   :  { %v5724_v63 = vadd.f32 %v12377_v31, %v5594_v34  ;;  %v5597_v8 = vadd.f32 %v5596_v17, %v5282_v35  ;;  %8673 = vmatprep.mubr.msk.bf16.mxu0 %vm616_vm1, %v6808_v32  ;;  %v5314_v34 = vrot.slane %v5124_v40, %v13522_v60  ;;  %v5176_v26 = vcombine.high %v5166_v54, %v5166_v54 }
 0x684   :  { %v5727_v21 = vadd.f32 %v12377_v31, %v5605_v18  ;;  %8674 = vmatmul.mubr.msk.bf16.gmra.mrb[116].mxu0 %vm616_vm1, %v6809_v57  ;;  %v6778_v45 = vmax.f32 %v5726_v22, 0.0  ;;  %v5322_v57 = vrot.slane %v5128_v44, %v13522_v60  ;;  %v5174_v18 = vcombine.high %v5152_v24, %v5152_v24 }
 0x685   :  { %v5725_v23 = vadd.f32 %v12377_v31, %v5597_v8  ;;  %v6776_v56 = vmax.f32 %v5724_v63, 0.0  ;;  %v5145_v63 = vcombine.high %v5143_v1, %v5143_v1 }
 0x686   :  { %v6779_v62 = vmax.f32 %v5727_v21, 0.0 }
 0x687   :  { %v6777_v49 = vmax.f32 %v5725_v23, 0.0  ;;  %v8567_v43 = vpop.f32.mrb[184].mxu1 }
 0x688   :  { %v6811_v25 = vpack.c.bf16 %v6779_v62, %v6778_v45  ;;  %v5618_v38 = vadd.f32 %v8567_v43, %v5302_v39  ;;  %v5609_v33 = vpop.f32.mrb[185].mxu1  ;;  %v5334_v45 = vrot.slane %v5174_v18, %v13522_v60  ;;  %v5185_v62 = vrot.slane %v12368_v29, %v13521_v3 }
 0x689   :  { %v6810_v58 = vpack.c.bf16 %v6777_v49, %v6776_v56  ;;  %v5610_v41 = vadd.f32 %v5609_v33, %v5294_v47  ;;  %v8568_v51 = vpop.f32.mrb[186].mxu1  ;;  %v5326_v49 = vrot.slane %v5152_v24, %v13522_v60  ;;  %v5173_v33 = vrot.slane %v5145_v63, %v13521_v3 }
 0x68a   :  { %v5730_v13 = vadd.f32 %v12377_v31, %v5618_v38  ;;  %v5621_v48 = vadd.f32 %v8568_v51, %v5306_v15  ;;  %v5612_v6 = vpop.f32.mrb[187].mxu1  ;;  %v5338_v38 = vrot.slane %v5176_v26, %v13522_v60  ;;  %v5201_v44 = vrot.slane %v5185_v62, %v13521_v3 }
 0x68b   :  { %v5728_v50 = vadd.f32 %v12377_v31, %v5610_v41  ;;  %v5613_v12 = vadd.f32 %v5612_v6, %v5298_v2  ;;  %8677 = vmatprep.mubr.msk.bf16.mxu0 %vm616_vm1, %v6810_v58  ;;  %v5330_v41 = vrot.slane %v5166_v54, %v13522_v60  ;;  %v5178_v6 = vcombine.high %v12368_v29, %v12368_v29 }
 0x68c   :  { %v5731_v42 = vadd.f32 %v12377_v31, %v5621_v48  ;;  %8678 = vmatmul.mubr.msk.bf16.gmra.mrb[120].mxu0 %vm616_vm1, %v6811_v25  ;;  %v6782_v46 = vmax.f32 %v5730_v13, 0.0  ;;  %v5175_v48 = vcombine.high %v5159_v27, %v5159_v27  ;;  %v5177_v11 = vcombine.high %v5173_v33, %v5173_v33 }
 0x68d   :  { %v5729_v36 = vadd.f32 %v12377_v31, %v5613_v12  ;;  %v6780_v20 = vmax.f32 %v5728_v50, 0.0  ;;  %v5193_v50 = vcombine.high %v5185_v62, %v5185_v62  ;;  %v5192_v29 = vrot.slane %v5178_v6, %v13521_v3 }
 0x68e   :  { %v6783_v52 = vmax.f32 %v5731_v42, 0.0  ;;  %v5358_v62 = vrot.slane %v5201_v44, %v13522_v60 }
 0x68f   :  { %v6781_v30 = vmax.f32 %v5729_v36, 0.0  ;;  %v8571_v55 = vpop.f32.mrb[188].mxu1  ;;  %v5194_v18 = vcombine.high %v5192_v29, %v5192_v29 }
 0x690   :  { %v6813_v7 = vpack.c.bf16 %v6783_v52, %v6782_v46  ;;  %v5634_v61 = vadd.f32 %v8571_v55, %v5318_v9  ;;  %v5625_v16 = vpop.f32.mrb[189].mxu1  ;;  %v5350_v46 = vrot.slane %v5175_v48, %v13522_v60 }
 0x691   :  { %v6812_v4 = vpack.c.bf16 %v6781_v30, %v6780_v20  ;;  %v5626_v0 = vadd.f32 %v5625_v16, %v5310_v19  ;;  %v8572_v32 = vpop.f32.mrb[190].mxu1  ;;  %v5342_v20 = vrot.slane %v5159_v27, %v13522_v60  ;;  %v5215_v30 = vrot.slane %v5193_v50, %v13521_v3 }
 0x692   :  { %v5734_v28 = vadd.f32 %v12377_v31, %v5634_v61  ;;  %v5637_v35 = vadd.f32 %v8572_v32, %v5322_v57  ;;  %v5628_v22 = vpop.f32.mrb[191].mxu1 }
 0x693   :  { %v5732_v17 = vadd.f32 %v12377_v31, %v5626_v0  ;;  %v5629_v5 = vadd.f32 %v5628_v22, %v5314_v34  ;;  %8681 = vmatprep.mubr.msk.bf16.mxu0 %vm616_vm1, %v6812_v4  ;;  %v5346_v4 = vrot.slane %v5173_v33, %v13522_v60  ;;  %v5362_v33 = vrot.slane %v5215_v30, %v13522_v60 }
 0x694   :  { %v5735_v8 = vadd.f32 %v12377_v31, %v5637_v35  ;;  %8682 = vmatmul.mubr.msk.bf16.gmra.mrb[124].mxu0 %vm616_vm1, %v6813_v7  ;;  %v6786_v23 = vmax.f32 %v5734_v28, 0.0  ;;  %v5354_v7 = vrot.slane %v5177_v11, %v13522_v60  ;;  %v5223_v28 = vcombine.high %v5201_v44, %v5201_v44 }
 0x695   :  { %v5733_v21 = vadd.f32 %v12377_v31, %v5629_v5  ;;  %v6784_v39 = vmax.f32 %v5732_v17, 0.0  ;;  %v5225_v5 = vcombine.high %v5215_v30, %v5215_v30 }
 0x696   :  { %v6787_v37 = vmax.f32 %v5735_v8, 0.0  ;;  %v5208_v8 = vrot.slane %v5192_v29, %v13521_v3  ;;  %v5366_v27 = vrot.slane %v5223_v28, %v13522_v60 }
 0x697   :  { %v6785_v53 = vmax.f32 %v5733_v21, 0.0  ;;  %v8575_v56 = vpop.f32.mrb[192].mxu1 }
 0x698   :  { %v6815_v43 = vpack.c.bf16 %v6787_v37, %v6786_v23  ;;  %v5650_v47 = vadd.f32 %v8575_v56, %v5334_v45  ;;  %v5641_v25 = vpop.f32.mrb[193].mxu1  ;;  %v5374_v44 = vrot.slane %v5208_v8, %v13522_v60 }
 0x699   :  { %v6814_v15 = vpack.c.bf16 %v6785_v53, %v6784_v39  ;;  %v5642_v40 = vadd.f32 %v5641_v25, %v5326_v49  ;;  %v8576_v58 = vpop.f32.mrb[194].mxu1  ;;  %v5370_v49 = vrot.slane %v5225_v5, %v13522_v60 }
 0x69a   :  { %v5738_v51 = vadd.f32 %v12377_v31, %v5650_v47  ;;  %v5653_v2 = vadd.f32 %v8576_v58, %v5338_v38  ;;  %v5644_v13 = vpop.f32.mrb[195].mxu1 }
 0x69b   :  { %v5736_v14 = vadd.f32 %v12377_v31, %v5642_v40  ;;  %v5645_v59 = vadd.f32 %v5644_v13, %v5330_v41  ;;  %8685 = vmatprep.mubr.msk.bf16.mxu0 %vm616_vm1, %v6814_v15  ;;  %v5224_v41 = vcombine.high %v5208_v8, %v5208_v8 }
 0x69c   :  { %v5739_v12 = vadd.f32 %v12377_v31, %v5653_v2  ;;  %8686 = vmatmul.mubr.msk.bf16.gmra.mrb[128].mxu0 %vm616_vm1, %v6815_v43  ;;  %v6790_v36 = vmax.f32 %v5738_v51, 0.0  ;;  %v5222_v43 = vrot.slane %v5194_v18, %v13521_v3 }
 0x69d   :  { %v5737_v42 = vadd.f32 %v12377_v31, %v5645_v59  ;;  %v6788_v52 = vmax.f32 %v5736_v14, 0.0  ;;  %v5382_v50 = vrot.slane %v5224_v41, %v13522_v60 }
 0x69e   :  { %v6791_v24 = vmax.f32 %v5739_v12, 0.0  ;;  %v5226_v48 = vcombine.high %v5222_v43, %v5222_v43 }
 0x69f   :  { %v6789_v9 = vmax.f32 %v5737_v42, 0.0  ;;  %v8579_v1 = vpop.f32.mrb[196].mxu1 }
 0x6a0   :  { %v6817_v55 = vpack.c.bf16 %v6791_v24, %v6790_v36  ;;  %v5666_v19 = vadd.f32 %v8579_v1, %v5350_v46  ;;  %v5657_v54 = vpop.f32.mrb[197].mxu1  ;;  %v5386_v29 = vrot.slane %v5226_v48, %v13522_v60 }
 0x6a1   :  { %v6816_v61 = vpack.c.bf16 %v6789_v9, %v6788_v52  ;;  %v5658_v16 = vadd.f32 %v5657_v54, %v5342_v20  ;;  %v8580_v57 = vpop.f32.mrb[198].mxu1  ;;  %v5378_v20 = vrot.slane %v5222_v43, %v13522_v60 }
 0x6a2   :  { %v5742_v0 = vadd.f32 %v12377_v31, %v5666_v19  ;;  %v5669_v32 = vadd.f32 %v8580_v57, %v5354_v7  ;;  %v5660_v34 = vpop.f32.mrb[199].mxu1 }
 0x6a3   :  { %v5740_v35 = vadd.f32 %v12377_v31, %v5658_v16  ;;  %v5661_v22 = vadd.f32 %v5660_v34, %v5346_v4  ;;  %8689 = vmatprep.mubr.msk.bf16.mxu0 %vm616_vm1, %v6816_v61 }
 0x6a4   :  { %v5743_v17 = vadd.f32 %v12377_v31, %v5669_v32  ;;  %8690 = vmatmul.mubr.msk.bf16.gmra.mrb[132].mxu0 %vm616_vm1, %v6817_v55  ;;  %v6794_v26 = vmax.f32 %v5742_v0, 0.0 }
 0x6a5   :  { %v5741_v63 = vadd.f32 %v12377_v31, %v5661_v22  ;;  %v6792_v23 = vmax.f32 %v5740_v35, 0.0 }
 0x6a6   :  { %v6795_v21 = vmax.f32 %v5743_v17, 0.0 }
 0x6a7   :  { %v6793_v37 = vmax.f32 %v5741_v63, 0.0  ;;  %v8583_v45 = vpop.f32.mrb[200].mxu1 }
 0x6a8   :  { %v6819_v39 = vpack.c.bf16 %v6795_v21, %v6794_v26  ;;  %v5682_v53 = vadd.f32 %v8583_v45, %v5366_v27  ;;  %v5673_v56 = vpop.f32.mrb[201].mxu1 }
 0x6a9   :  { %v6818_v47 = vpack.c.bf16 %v6793_v37, %v6792_v23  ;;  %v5674_v25 = vadd.f32 %v5673_v56, %v5358_v62  ;;  %v8584_v38 = vpop.f32.mrb[202].mxu1 }
 0x6aa   :  { %v5746_v15 = vadd.f32 %v12377_v31, %v5682_v53  ;;  %v5685_v40 = vadd.f32 %v8584_v38, %v5370_v49  ;;  %v5676_v58 = vpop.f32.mrb[203].mxu1 }
 0x6ab   :  { %v5744_v51 = vadd.f32 %v12377_v31, %v5674_v25  ;;  %v5677_v2 = vadd.f32 %v5676_v58, %v5362_v33  ;;  %8693 = vmatprep.mubr.msk.bf16.mxu0 %vm616_vm1, %v6818_v47 }
 0x6ac   :  { %v5747_v13 = vadd.f32 %v12377_v31, %v5685_v40  ;;  %8694 = vmatmul.mubr.msk.bf16.gmra.mrb[136].mxu0 %vm616_vm1, %v6819_v39  ;;  %v6798_v14 = vmax.f32 %v5746_v15, 0.0 }
 0x6ad   :  { %v5745_v6 = vadd.f32 %v12377_v31, %v5677_v2  ;;  %v6796_v12 = vmax.f32 %v5744_v51, 0.0 }
 0x6ae   :  { %v6799_v59 = vmax.f32 %v5747_v13, 0.0 }
 0x6af   :  { %v6797_v11 = vmax.f32 %v5745_v6, 0.0  ;;  %v8587_v42 = vpop.f32.mrb[204].mxu1 }
 0x6b0   :  { %v6821_v36 = vpack.c.bf16 %v6799_v59, %v6798_v14  ;;  %v5698_v24 = vadd.f32 %v8587_v42, %v5382_v50  ;;  %v5689_v46 = vpop.f32.mrb[205].mxu1  ;;  %v12531_v50 = vld [vmem:[%s13049_s8 + $0x2] ss:$0 sm:$0xff] }
 0x6b1   :  { %v6820_v52 = vpack.c.bf16 %v6797_v11, %v6796_v12  ;;  %v5690_v9 = vadd.f32 %v5689_v46, %v5374_v44  ;;  %v8588_v1 = vpop.f32.mrb[206].mxu1 }
 0x6b2   :  { %v5750_v30 = vadd.f32 %v12377_v31, %v5698_v24  ;;  %v5701_v55 = vadd.f32 %v8588_v1, %v5386_v29  ;;  %v5692_v19 = vpop.f32.mrb[207].mxu1 }
 0x6b3   :  { %v5748_v54 = vadd.f32 %v12377_v31, %v5690_v9  ;;  %v5693_v7 = vadd.f32 %v5692_v19, %v5378_v20  ;;  %8697 = vmatprep.mubr.msk.bf16.mxu0 %vm616_vm1, %v6820_v52 }
 0x6b4   :  { %v5751_v61 = vadd.f32 %v12377_v31, %v5701_v55  ;;  %8698 = vmatmul.mubr.msk.bf16.gmra.mrb[140].mxu0 %vm616_vm1, %v6821_v36  ;;  %v6802_v57 = vmax.f32 %v5750_v30, 0.0 }
 0x6b5   :  { %v5749_v16 = vadd.f32 %v12377_v31, %v5693_v7  ;;  %v6800_v0 = vmax.f32 %v5748_v54, 0.0 }
 0x6b6   :  { %v6803_v4 = vmax.f32 %v5751_v61, 0.0 }
 0x6b7   :  { %v6801_v32 = vmax.f32 %v5749_v16, 0.0  ;;  %v6015_v34 = vpop.f32.mrb[208].mxu1 }
 0x6b8   :  { %v6823_v28 = vpack.c.bf16 %v6803_v4, %v6802_v57  ;;  %v8599_v35 = vpop.f32.mrb[209].mxu1  ;;  %v6049_v37 = vrot.slane %v6015_v34, %v13521_v3  ;;  %v6042_v45 = vcombine.high %v6015_v34, %v6015_v34 }
 0x6b9   :  { %v6822_v22 = vpack.c.bf16 %v6801_v32, %v6800_v0  ;;  %v6018_v18 = vpop.f32.mrb[210].mxu1 }
 0x6ba   :  { %v8600_v17 = vpop.f32.mrb[211].mxu1  ;;  %v6057_v62 = vcombine.high %v6049_v37, %v6049_v37  ;;  %v6056_v39 = vrot.slane %v6042_v45, %v13521_v3  ;;  %v6091_v53 = vcombine.high %v6018_v18, %v6018_v18  ;;  %v6098_v49 = vrot.slane %v6018_v18, %v13521_v3 }
 0x6bb   :  { %8701 = vmatprep.mubr.msk.bf16.mxu0 %vm616_vm1, %v6822_v22  ;;  %v12517_v47 = vrot.slane %v6049_v37, %v13521_v3 }
 0x6bc   :  { %8702 = vmatmul.mubr.msk.bf16.gmra.mrb[144].mxu0 %vm616_vm1, %v6823_v28  ;;  %v6079_v56 = vrot.slane %v6057_v62, %v13521_v3  ;;  %v6058_v43 = vcombine.high %v6056_v39, %v6056_v39  ;;  %v6105_v25 = vrot.slane %v6091_v53, %v13521_v3  ;;  %v6072_v38 = vrot.slane %v6056_v39, %v13521_v3 }
 0x6bd   :  { %v6106_v40 = vcombine.high %v6098_v49, %v6098_v49  ;;  %v6114_v58 = vrot.slane %v6098_v49, %v13521_v3  ;;  %v6087_v13 = vcombine.high %v12517_v47, %v12517_v47  ;;  %v6290_v12 = vrot.slane %v12517_v47, %v13522_v60 }
 0x6be   :  { %v6089_v15 = vcombine.high %v6079_v56, %v6079_v56  ;;  %v6086_v41 = vrot.slane %v6058_v43, %v13521_v3  ;;  %v6107_v51 = vcombine.high %v6105_v25, %v6105_v25  ;;  %v6294_v6 = vrot.slane %v6079_v56, %v13522_v60 }
 0x6bf   :  { %v6023_v5 = vpop.f32.mrb[212].mxu1  ;;  %v6088_v14 = vcombine.high %v6072_v38, %v6072_v38  ;;  %v6306_v42 = vrot.slane %v6072_v38, %v13522_v60  ;;  %v6121_v44 = vrot.slane %v6105_v25, %v13521_v3  ;;  %v6128_v36 = vrot.slane %v6106_v40, %v13521_v3 }
 0x6c0   :  { %v8603_v63 = vpop.f32.mrb[213].mxu1  ;;  %v6140_v33 = vcombine.high %v6023_v5, %v6023_v5  ;;  %v6147_v2 = vrot.slane %v6023_v5, %v13521_v3  ;;  %v6302_v11 = vrot.slane %v6089_v15, %v13522_v60  ;;  %v6136_v24 = vcombine.high %v6114_v58, %v6114_v58 }
 0x6c1   :  { %v6026_v8 = vpop.f32.mrb[214].mxu1  ;;  %v6135_v29 = vrot.slane %v6107_v51, %v13521_v3  ;;  %v12542_v9 = vrot.slane %v6087_v13, %v13522_v60  ;;  %v6090_v1 = vcombine.high %v6086_v41, %v6086_v41  ;;  %v12547_v55 = vadd.f32 %v12531_v50, %v6294_v6 }
 0x6c2   :  { %v8604_v26 = vpop.f32.mrb[215].mxu1  ;;  %v6189_v48 = vcombine.high %v6026_v8, %v6026_v8  ;;  %v6154_v59 = vrot.slane %v6140_v33, %v13521_v3  ;;  %v6196_v46 = vrot.slane %v6026_v8, %v13521_v3  ;;  %v6155_v52 = vcombine.high %v6147_v2, %v6147_v2 }
 0x6c3   :  { %v6163_v20 = vrot.slane %v6147_v2, %v13521_v3  ;;  %v6314_v19 = vrot.slane %v6088_v14, %v13522_v60  ;;  %v12551_v61 = vadd.f32 %v12531_v50, %v6302_v11  ;;  %v12554_v16 = vadd.f32 %v12531_v50, %v6306_v42 }
 0x6c4   :  { %v6203_v30 = vrot.slane %v6189_v48, %v13521_v3  ;;  %v6156_v54 = vcombine.high %v6154_v59, %v6154_v59  ;;  %v12557_v57 = vrot.slane %v6154_v59, %v13521_v3  ;;  %v6204_v4 = vcombine.high %v6196_v46, %v6196_v46 }
 0x6c5   :  { %v12560_v0 = vrot.slane %v6196_v46, %v13521_v3  ;;  %v6177_v34 = vrot.slane %v6155_v52, %v13521_v3  ;;  %v6318_v28 = vrot.slane %v6090_v1, %v13522_v60  ;;  %v6310_v35 = vrot.slane %v6086_v41, %v13522_v60 }
 0x6c6   :  { %v6138_v22 = vcombine.high %v6128_v36, %v6128_v36  ;;  %v6185_v18 = vcombine.high %v6163_v20, %v6163_v20  ;;  %v6205_v17 = vcombine.high %v6203_v30, %v6203_v30  ;;  %v12567_v5 = vadd.f32 %v12531_v50, %v6314_v19 }
 0x6c7   :  { %v6031_v21 = vpop.f32.mrb[216].mxu1  ;;  %v6330_v63 = vrot.slane %v6136_v24, %v13522_v60  ;;  %v6184_v8 = vrot.slane %v6156_v54, %v13521_v3  ;;  %v6234_v37 = vcombine.high %v12560_v0, %v12560_v0  ;;  %v12585_v39 = vadd.f32 %v12531_v50, %v6318_v28 }
 0x6c8   :  { %v8607_v31 = vpop.f32.mrb[217].mxu1  ;;  %v6238_v7 = vcombine.high %v6031_v21, %v6031_v21  ;;  %v6245_v32 = vrot.slane %v6031_v21, %v13521_v3  ;;  %v6322_v21 = vrot.slane %v6114_v58, %v13522_v60  ;;  %v12588_v53 = vadd.f32 %v12531_v50, %v6310_v35 }
 0x6c9   :  { %v6034_v27 = vpop.f32.mrb[218].mxu1  ;;  %v6137_v31 = vcombine.high %v6121_v44, %v6121_v44  ;;  %v6334_v56 = vrot.slane %v6138_v22, %v13522_v60  ;;  %v12592_v49 = vrot.slane %v6205_v17, %v13521_v3  ;;  %v12595_v43 = vadd.f32 %v12531_v50, %v6330_v63 }
 0x6ca   :  { %v8608_v23 = vpop.f32.mrb[219].mxu1  ;;  %v6252_v26 = vrot.slane %v6238_v7, %v13521_v3  ;;  %v12574_v27 = vrot.slane %v6203_v30, %v13521_v3  ;;  %v6253_v45 = vcombine.high %v6245_v32, %v6245_v32  ;;  %v12582_v62 = vrot.slane %v6245_v32, %v13521_v3 }
 0x6cb   :  { %v12577_v23 = vrot.slane %v6204_v4, %v13521_v3  ;;  %v6326_v25 = vrot.slane %v6128_v36, %v13522_v60  ;;  %v6338_v38 = vrot.slane %v6121_v44, %v13522_v60  ;;  %v12600_v15 = vadd.f32 %v12531_v50, %v6322_v21 }
 0x6cc   :  { %v6254_v33 = vcombine.high %v6252_v26, %v6252_v26  ;;  %v6346_v40 = vrot.slane %v6137_v31, %v13522_v60  ;;  %v6139_v58 = vcombine.high %v6135_v29, %v6135_v29  ;;  %v12604_v41 = vrot.slane %v6252_v26, %v13521_v3 }
 0x6cd   :  { %v12607_v51 = vrot.slane %v6253_v45, %v13521_v3  ;;  %v6342_v2 = vrot.slane %v6135_v29, %v13522_v60  ;;  %v6187_v13 = vcombine.high %v6177_v34, %v6177_v34  ;;  %v6283_v48 = vcombine.high %v12582_v62, %v12582_v62 }
 0x6ce   :  { %v12613_v6 = vadd.f32 %v12531_v50, %v6334_v56  ;;  %v6362_v14 = vrot.slane %v6185_v18, %v13522_v60  ;;  %v6354_v59 = vrot.slane %v6163_v20, %v13522_v60  ;;  %v12618_v11 = vadd.f32 %v12531_v50, %v6326_v25 }
 0x6cf   :  { %v12621_v42 = vadd.f32 %v12531_v50, %v6338_v38  ;;  %v6358_v44 = vrot.slane %v6177_v34, %v13522_v60  ;;  %v6186_v36 = vcombine.high %v12557_v57, %v12557_v57  ;;  %v12627_v24 = vrot.slane %v6254_v33, %v13521_v3 }
 0x6d0   :  { %v12630_v46 = vadd.f32 %v12531_v50, %v6346_v40  ;;  %v6350_v29 = vrot.slane %v6139_v58, %v13522_v60  ;;  %v6188_v52 = vcombine.high %v6184_v8, %v6184_v8  ;;  %v12634_v1 = vadd.f32 %v12531_v50, %v6342_v2 }
 0x6d1   :  { %v6366_v20 = vrot.slane %v6187_v13, %v13522_v60  ;;  %v6236_v30 = vcombine.high %v12577_v23, %v12577_v23  ;;  %v6235_v19 = vcombine.high %v12574_v27, %v12574_v27  ;;  %v12642_v3 = vadd.f32 %v12531_v50, %v6362_v14 }
 0x6d2   :  { %v12645_v54 = vadd.f32 %v12531_v50, %v6354_v59  ;;  %v6370_v7 = vrot.slane %v12557_v57, %v13522_v60  ;;  %v6237_v4 = vcombine.high %v12592_v49, %v12592_v49  ;;  %v12652_v32 = vadd.f32 %v12531_v50, %v6358_v44 }
 0x6d3   :  { %v6378_v34 = vrot.slane %v6186_v36, %v13522_v60  ;;  %v6374_v28 = vrot.slane %v6184_v8, %v13522_v60  ;;  %v6394_v35 = vrot.slane %v6234_v37, %v13522_v60  ;;  %v12658_v22 = vadd.f32 %v12531_v50, %v6350_v29 }
 0x6d4   :  { %v6382_v18 = vrot.slane %v6188_v52, %v13522_v60  ;;  %v6386_v57 = vrot.slane %v12560_v0, %v13522_v60  ;;  %v6390_v17 = vrot.slane %v12577_v23, %v13522_v60  ;;  %v12666_v63 = vadd.f32 %v12531_v50, %v6366_v20 }
 0x6d5   :  { %v6398_v26 = vrot.slane %v6236_v30, %v13522_v60  ;;  %v6410_v8 = vrot.slane %v6235_v19, %v13522_v60  ;;  %v6402_v21 = vrot.slane %v12574_v27, %v13522_v60  ;;  %v12673_v31 = vadd.f32 %v12531_v50, %v6370_v7 }
 0x6d6   :  { %v6414_v37 = vrot.slane %v6237_v4, %v13522_v60  ;;  %v6406_v0 = vrot.slane %v12592_v49, %v13522_v60  ;;  %v6426_v23 = vrot.slane %v6283_v48, %v13522_v60  ;;  %v12680_v45 = vadd.f32 %v12531_v50, %v6378_v34 }
 0x6d7   :  { %v12683_v56 = vadd.f32 %v12531_v50, %v6374_v28  ;;  %v12686_v25 = vadd.f32 %v12531_v50, %v6394_v35  ;;  %v6418_v27 = vrot.slane %v12582_v62, %v13522_v60  ;;  %v12691_v33 = vadd.f32 %v12531_v50, %v6382_v18 }
 0x6d8   :  { %v12694_v49 = vadd.f32 %v12531_v50, %v6386_v57  ;;  %v12697_v40 = vadd.f32 %v12531_v50, %v6390_v17  ;;  %v6285_v58 = vcombine.high %v12607_v51, %v12607_v51  ;;  %v12703_v48 = vadd.f32 %v12531_v50, %v6398_v26 }
 0x6d9   :  { %v12706_v62 = vadd.f32 %v12531_v50, %v6410_v8  ;;  %v12709_v14 = vadd.f32 %v12531_v50, %v6402_v21  ;;  %v12715_v36 = vadd.f32 %v12531_v50, %v6414_v37  ;;  %v12721_v29 = vadd.f32 %v12531_v50, %v6426_v23 }
 0x6da   :  { %v12726_v19 = vadd.f32 %v12531_v50, %v6418_v27  ;;  %v6422_v47 = vrot.slane %v12607_v51, %v13522_v60  ;;  %v6430_v4 = vrot.slane %v6285_v58, %v13522_v60  ;;  %v6284_v34 = vcombine.high %v12604_v41, %v12604_v41 }
 0x6db   :  { %v6434_v35 = vrot.slane %v12604_v41, %v13522_v60  ;;  %v6286_v18 = vcombine.high %v12627_v24, %v12627_v24  ;;  %v6438_v37 = vrot.slane %v12627_v24, %v13522_v60 }
 0x6dc   :  { %v12744_v21 = vadd.f32 %v12531_v50, %v6422_v47  ;;  %v12749_v27 = vadd.f32 %v12531_v50, %v6430_v4 }
 0x6dd   :  { %v12760_v47 = vrot.slane %v6286_v18, %v13522_v60 }
 0x6de   :  { %13523 = vst [vmem:[#allocation27_spill] sm:$0xff] %v12744_v21  ;;  %13524 = vst [vmem:[#allocation29_spill] sm:$0xff] %v12749_v27 }
 0x747   :  { %v8667_v38 = vpop.f32.mrb[108].mxu0 }
 0x748   :  { %v8799_v2 = vadd.f32 %v8667_v38, %v12542_v9  ;;  %v6959_v13 = vpop.f32.mrb[109].mxu0  ;;  %v12718_v9 = vadd.f32 %v12531_v50, %v6406_v0  ;;  %v12752_v38 = vrot.slane %v6284_v34, %v13522_v60 }
 0x749   :  { %v8801_v59 = vadd.f32 %v6959_v13, %v6290_v12  ;;  %v8668_v44 = vpop.f32.mrb[110].mxu0 }
 0x74a   :  { %v8800_v52 = vadd.f32 %v8799_v2, %v12531_v50  ;;  %v8804_v20 = vadd.f32 %v12551_v61, %v8668_v44  ;;  %v6962_v30 = vpop.f32.mrb[111].mxu0  ;;  %v12756_v44 = vadd.f32 %v12531_v50, %v6434_v35 }
 0x74b   :  { %v8802_v12 = vadd.f32 %v8801_v59, %v12531_v50  ;;  %v8806_v7 = vadd.f32 %v12547_v55, %v6962_v30 }
 0x74c   :  { %v7172_v28 = vsel %vm616_vm1, %v8800_v52, -inf  ;;  %v7179_v61 = vsel %vm616_vm1, %v8804_v20, -inf  ;;  %13525 = vst [vmem:[#allocation26_spill] sm:$0xff] %v12756_v44 }
 0x74d   :  { %v7173_v51 = vrot.slane %v7172_v28, 4  ;;  %v7158_v57 = vsel %vm616_vm1, %v8802_v12, -inf  ;;  %v7180_v17 = vrot.slane %v7179_v61, 4  ;;  %v7165_v55 = vsel %vm616_vm1, %v8806_v7, -inf }
 0x74e   :  { %v7159_v26 = vrot.slane %v7158_v57, 4  ;;  %v7166_v8 = vrot.slane %v7165_v55, 4 }
 0x74f   :  { %v7174_v0 = vmax.f32 %v7172_v28, %v7173_v51  ;;  %v7181_v23 = vmax.f32 %v7179_v61, %v7180_v17  ;;  %v8671_v41 = vpop.f32.mrb[112].mxu0 }
 0x750   :  { %v7160_v58 = vmax.f32 %v7158_v57, %v7159_v26  ;;  %v7167_v2 = vmax.f32 %v7165_v55, %v7166_v8  ;;  %v8808_v13 = vadd.f32 %v12567_v5, %v8671_v41  ;;  %v6975_v59 = vpop.f32.mrb[113].mxu0 }
 0x751   :  { %v7175_v52 = vrot.slane %v7174_v0, 2  ;;  %v7182_v20 = vrot.slane %v7181_v23, 2  ;;  %v8810_v24 = vadd.f32 %v12554_v16, %v6975_v59  ;;  %v8672_v30 = vpop.f32.mrb[114].mxu0 }
 0x752   :  { %v7161_v12 = vrot.slane %v7160_v58, 2  ;;  %v7168_v7 = vrot.slane %v7167_v2, 2  ;;  %v7200_v4 = vsel %vm616_vm1, %v8808_v13, -inf  ;;  %v8812_v34 = vadd.f32 %v12585_v39, %v8672_v30  ;;  %v6978_v28 = vpop.f32.mrb[115].mxu0 }
 0x753   :  { %v7176_v5 = vmax.f32 %v7174_v0, %v7175_v52  ;;  %v7183_v61 = vmax.f32 %v7181_v23, %v7182_v20  ;;  %v7201_v51 = vrot.slane %v7200_v4, 4  ;;  %v7186_v35 = vsel %vm616_vm1, %v8810_v24, -inf }
 0x754   :  { %v7162_v57 = vmax.f32 %v7160_v58, %v7161_v12  ;;  %v7169_v17 = vmax.f32 %v7167_v2, %v7168_v7  ;;  %v7187_v55 = vrot.slane %v7186_v35, 4  ;;  %v7207_v16 = vsel %vm616_vm1, %v8812_v34, -inf }
 0x755   :  { %v7177_v26 = vrot.slane %v7176_v5, 1  ;;  %v7184_v18 = vrot.slane %v7183_v61, 1  ;;  %v7202_v8 = vmax.f32 %v7200_v4, %v7201_v51  ;;  %v7208_v41 = vrot.slane %v7207_v16, 4 }
 0x756   :  { %v7163_v59 = vrot.slane %v7162_v57, 1  ;;  %v7170_v60 = vrot.slane %v7169_v17, 1  ;;  %v7188_v13 = vmax.f32 %v7186_v35, %v7187_v55  ;;  %v8814_v39 = vadd.f32 %v12588_v53, %v6978_v28 }
 0x757   :  { %v7178_v30 = vmax.f32 %v7176_v5, %v7177_v26  ;;  %v7185_v0 = vmax.f32 %v7183_v61, %v7184_v18  ;;  %v7203_v23 = vrot.slane %v7202_v8, 2  ;;  %v7209_v52 = vmax.f32 %v7207_v16, %v7208_v41  ;;  %v8675_v20 = vpop.f32.mrb[116].mxu0 }
 0x758   :  { %v7164_v24 = vmax.f32 %v7162_v57, %v7163_v59  ;;  %v7171_v58 = vmax.f32 %v7169_v17, %v7170_v60  ;;  %v7189_v2 = vrot.slane %v7188_v13, 2  ;;  %v7193_v12 = vsel %vm616_vm1, %v8814_v39, -inf  ;;  %v6991_v7 = vpop.f32.mrb[117].mxu0 }
 0x759   :  { %v7440_v34 = vmax.f32 %v7178_v30, 0.0  ;;  %v7441_v44 = vmax.f32 %v7185_v0, 0.0  ;;  %v7204_v4 = vmax.f32 %v7202_v8, %v7203_v23  ;;  %v7210_v51 = vrot.slane %v7209_v52, 2  ;;  %v8676_v21 = vpop.f32.mrb[118].mxu0 }
 0x75a   :  { %v7438_v27 = vmax.f32 %v7164_v24, 0.0  ;;  %v7439_v35 = vmax.f32 %v7171_v58, 0.0  ;;  %v7190_v55 = vmax.f32 %v7188_v13, %v7189_v2  ;;  %v7194_v53 = vrot.slane %v7193_v12, 4  ;;  %v6994_v28 = vpop.f32.mrb[119].mxu0 }
 0x75b   :  { %v7480_v5 = vpack.c.bf16 %v7440_v34, %v7440_v34  ;;  %v7205_v61 = vrot.slane %v7204_v4, 1  ;;  %v7211_v16 = vmax.f32 %v7209_v52, %v7210_v51  ;;  %v12769_v57 = vadd.f32 %v12531_v50, %v6438_v37 }
 0x75c   :  { %v7478_v60 = vpack.c.bf16 %v7438_v27, %v7438_v27  ;;  %v7479_v17 = vpack.c.bf16 %v7439_v35, %v7439_v35  ;;  %v7191_v26 = vrot.slane %v7190_v55, 1  ;;  %v7195_v18 = vmax.f32 %v7193_v12, %v7194_v53 }
 0x75d   :  { %v7571_v41 = vunpack.c.l.b16 %v7480_v5  ;;  %v12771_v59 = vpack.c.bf16 %v7441_v44, %v7441_v44  ;;  %v7206_v8 = vmax.f32 %v7204_v4, %v7205_v61  ;;  %v7212_v39 = vrot.slane %v7211_v16, 1 }
 0x75e   :  { %v7569_v30 = vunpack.c.l.b16 %v7478_v60  ;;  %v7570_v0 = vunpack.c.l.b16 %v7479_v17  ;;  %v7192_v13 = vmax.f32 %v7190_v55, %v7191_v26  ;;  %v7196_v23 = vrot.slane %v7195_v18, 2 }
 0x75f   :  { %v7444_v24 = vmax.f32 %v7206_v8, 0.0  ;;  %v7213_v58 = vmax.f32 %v7211_v16, %v7212_v39  ;;  %v8816_v52 = vadd.f32 %v12595_v43, %v8675_v20  ;;  %v8818_v37 = vadd.f32 %v12600_v15, %v6991_v7  ;;  %v8679_v2 = vpop.f32.mrb[120].mxu0 }
 0x760   :  { %v7609_v27 = vsel %vm1979_vm3, %v7570_v0, %v7569_v30  ;;  %v7442_v34 = vmax.f32 %v7192_v13, 0.0  ;;  %v7197_v12 = vmax.f32 %v7195_v18, %v7196_v23  ;;  %v8820_v44 = vadd.f32 %v12613_v6, %v8676_v21  ;;  %v7007_v51 = vpop.f32.mrb[121].mxu0 }
 0x761   :  { %v12778_v4 = vsel %vm1981_vm4, %v7571_v41, %v7609_v27  ;;  %v12780_v35 = vpack.c.bf16 %v7444_v24, %v7444_v24  ;;  %v7228_v55 = vsel %vm616_vm1, %v8816_v52, -inf  ;;  %v8680_v53 = vpop.f32.mrb[122].mxu0  ;;  %v12785_v43 = vadd.f32 %v12531_v50, %v12752_v38 }
 0x762   :  { %v7198_v15 = vrot.slane %v7197_v12, 1  ;;  %v7229_v20 = vrot.slane %v7228_v55, 4  ;;  %v7214_v7 = vsel %vm616_vm1, %v8818_v37, -inf  ;;  %v7010_v5 = vpop.f32.mrb[123].mxu0  ;;  %v12790_v6 = vadd.f32 %v12531_v50, %v12760_v47 }
 0x763   :  { %v7445_v61 = vmax.f32 %v7213_v58, 0.0  ;;  %v7215_v16 = vrot.slane %v7214_v7, 4  ;;  %v7235_v60 = vsel %vm616_vm1, %v8820_v44, -inf  ;;  %v12794_v17 = vpack.c.bf16 %v7442_v34, %v7442_v34 }
 0x764   :  { %v7199_v26 = vmax.f32 %v7197_v12, %v7198_v15  ;;  %v7230_v38 = vmax.f32 %v7228_v55, %v7229_v20  ;;  %v7236_v18 = vrot.slane %v7235_v60, 4  ;;  %v8822_v39 = vadd.f32 %v12618_v11, %v6994_v28 }
 0x765   :  { %v7216_v8 = vmax.f32 %v7214_v7, %v7215_v16  ;;  %v8824_v30 = vadd.f32 %v12630_v46, %v8679_v2  ;;  %v8826_v13 = vadd.f32 %v12621_v42, %v7007_v51  ;;  %v8828_v52 = vadd.f32 %v12658_v22, %v8680_v53 }
 0x766   :  { %v7443_v50 = vmax.f32 %v7199_v26, 0.0  ;;  %v7231_v47 = vrot.slane %v7230_v38, 2  ;;  %v7237_v0 = vmax.f32 %v7235_v60, %v7236_v18  ;;  %v7221_v24 = vsel %vm616_vm1, %v8822_v39, -inf }
 0x767   :  { %v7217_v23 = vrot.slane %v7216_v8, 2  ;;  %v7256_v58 = vsel %vm616_vm1, %v8824_v30, -inf  ;;  %v8683_v37 = vpop.f32.mrb[124].mxu0  ;;  %v12803_v27 = vpack.c.bf16 %v7445_v61, %v7445_v61  ;;  %v7222_v11 = vrot.slane %v7221_v24, 4 }
 0x768   :  { %v7232_v34 = vmax.f32 %v7230_v38, %v7231_v47  ;;  %v7238_v12 = vrot.slane %v7237_v0, 2  ;;  %v7023_v28 = vpop.f32.mrb[125].mxu0  ;;  %v7257_v2 = vrot.slane %v7256_v58, 4  ;;  %v7242_v44 = vsel %vm616_vm1, %v8826_v13, -inf }
 0x769   :  { %v7218_v46 = vmax.f32 %v7216_v8, %v7217_v23  ;;  %v7263_v42 = vsel %vm616_vm1, %v8828_v52, -inf  ;;  %v8684_v51 = vpop.f32.mrb[126].mxu0  ;;  %v12807_v55 = vpack.c.bf16 %v7443_v50, %v7443_v50  ;;  %v7223_v7 = vmax.f32 %v7221_v24, %v7222_v11 }
 0x76a   :  { %v7233_v15 = vrot.slane %v7232_v34, 1  ;;  %v7239_v20 = vmax.f32 %v7237_v0, %v7238_v12  ;;  %v12809_v22 = vpop.f32.mrb[127].mxu0  ;;  %v7258_v61 = vmax.f32 %v7256_v58, %v7257_v2  ;;  %v7243_v16 = vrot.slane %v7242_v44, 4 }
 0x76b   :  { %v7219_v53 = vrot.slane %v7218_v46, 1  ;;  %v7264_v60 = vrot.slane %v7263_v42, 4  ;;  %v7224_v18 = vrot.slane %v7223_v7, 2  ;;  %v8830_v8 = vadd.f32 %v12634_v1, %v7010_v5 }
 0x76c   :  { %v7234_v26 = vmax.f32 %v7232_v34, %v7233_v15  ;;  %v7240_v38 = vrot.slane %v7239_v20, 1  ;;  %v7259_v30 = vrot.slane %v7258_v61, 2  ;;  %v7244_v47 = vmax.f32 %v7242_v44, %v7243_v16 }
 0x76d   :  { %v7220_v39 = vmax.f32 %v7218_v46, %v7219_v53  ;;  %v7265_v13 = vmax.f32 %v7263_v42, %v7264_v60  ;;  %v7225_v52 = vmax.f32 %v7223_v7, %v7224_v18  ;;  %v7249_v0 = vsel %vm616_vm1, %v8830_v8, -inf }
 0x76e   :  { %v7448_v50 = vmax.f32 %v7234_v26, 0.0  ;;  %v7241_v23 = vmax.f32 %v7239_v20, %v7240_v38  ;;  %v7260_v12 = vmax.f32 %v7258_v61, %v7259_v30  ;;  %v7245_v11 = vrot.slane %v7244_v47, 2 }
 0x76f   :  { %v7446_v24 = vmax.f32 %v7220_v39, 0.0  ;;  %v7266_v58 = vrot.slane %v7265_v13, 2  ;;  %v8687_v2 = vpop.f32.mrb[128].mxu0  ;;  %v7226_v41 = vrot.slane %v7225_v52, 1  ;;  %v7250_v21 = vrot.slane %v7249_v0, 4 }
 0x770   :  { %v7449_v15 = vmax.f32 %v7241_v23, 0.0  ;;  %v7039_v1 = vpop.f32.mrb[129].mxu0  ;;  %v7261_v46 = vrot.slane %v7260_v12, 1  ;;  %v7246_v44 = vmax.f32 %v7244_v47, %v7245_v11  ;;  %v7488_v53 = vpack.c.bf16 %v7448_v50, %v7448_v50 }
 0x771   :  { %v7267_v42 = vmax.f32 %v7265_v13, %v7266_v58  ;;  %v8688_v20 = vpop.f32.mrb[130].mxu0  ;;  %v7227_v16 = vmax.f32 %v7225_v52, %v7226_v41  ;;  %v7251_v61 = vmax.f32 %v7249_v0, %v7250_v21  ;;  %v7486_v26 = vpack.c.bf16 %v7446_v24, %v7446_v24 }
 0x772   :  { %v12816_v60 = vpop.f32.mrb[131].mxu0  ;;  %v7262_v38 = vmax.f32 %v7260_v12, %v7261_v46  ;;  %v7247_v18 = vrot.slane %v7246_v44, 1  ;;  %v12818_v39 = vpack.c.bf16 %v7449_v15, %v7449_v15  ;;  %v8832_v5 = vadd.f32 %v12642_v3, %v8683_v37 }
 0x773   :  { %v7268_v8 = vrot.slane %v7267_v42, 1  ;;  %v7447_v30 = vmax.f32 %v7227_v16, 0.0  ;;  %v7252_v23 = vrot.slane %v7251_v61, 2  ;;  %v8834_v58 = vadd.f32 %v12645_v54, %v7023_v28 }
 0x774   :  { %v7452_v47 = vmax.f32 %v7262_v38, 0.0  ;;  %v7248_v13 = vmax.f32 %v7246_v44, %v7247_v18  ;;  %v7284_v21 = vsel %vm616_vm1, %v8832_v5, -inf  ;;  %v8836_v52 = vadd.f32 %v12666_v63, %v8684_v51 }
 0x775   :  { %v7269_v11 = vmax.f32 %v7267_v42, %v7268_v8  ;;  %v7487_v50 = vpack.c.bf16 %v7447_v30, %v7447_v30  ;;  %v7253_v41 = vmax.f32 %v7251_v61, %v7252_v23  ;;  %v7577_v0 = vunpack.c.l.b16 %v7486_v26 }
 0x776   :  { %v12824_v24 = vpack.c.bf16 %v7452_v47, %v7452_v47  ;;  %v7450_v12 = vmax.f32 %v7248_v13, 0.0  ;;  %v7285_v15 = vrot.slane %v7284_v21, 4  ;;  %v7270_v37 = vsel %vm616_vm1, %v8834_v58, -inf }
 0x777   :  { %v12826_v46 = vpop.f32.mrb[132].mxu0  ;;  %v7578_v16 = vunpack.c.l.b16 %v7487_v50  ;;  %v7254_v3 = vrot.slane %v7253_v41, 1  ;;  %v7291_v44 = vsel %vm616_vm1, %v8836_v52, -inf  ;;  %v7579_v28 = vunpack.c.l.b16 %v7488_v53 }
 0x778   :  { %v12830_v54 = vpop.f32.mrb[133].mxu0  ;;  %v7453_v42 = vmax.f32 %v7269_v11, 0.0  ;;  %v7286_v63 = vmax.f32 %v7284_v21, %v7285_v15  ;;  %v7271_v38 = vrot.slane %v7270_v37, 4  ;;  %v7292_v18 = vrot.slane %v7291_v44, 4 }
 0x779   :  { %v12833_v51 = vpop.f32.mrb[134].mxu0  ;;  %v7616_v61 = vsel %vm1979_vm3, %v7578_v16, %v7577_v0  ;;  %v7255_v26 = vmax.f32 %v7253_v41, %v7254_v3  ;;  %v12842_v47 = vpack.c.bf16 %v7450_v12, %v7450_v12  ;;  %v8838_v50 = vadd.f32 %v12652_v32, %v12809_v22 }
 0x77a   :  { %v12836_v8 = vpop.f32.mrb[135].mxu0  ;;  %v12839_v30 = vsel %vm1981_vm4, %v7579_v28, %v7616_v61  ;;  %v7287_v53 = vrot.slane %v7286_v63, 2  ;;  %v7272_v11 = vmax.f32 %v7270_v37, %v7271_v38  ;;  %v7293_v58 = vmax.f32 %v7291_v44, %v7292_v18 }
 0x77b   :  { %v7451_v13 = vmax.f32 %v7255_v26, 0.0  ;;  %v8840_v41 = vadd.f32 %v12680_v45, %v8687_v2  ;;  %v8842_v52 = vadd.f32 %v12673_v31, %v7039_v1  ;;  %v8844_v0 = vadd.f32 %v12691_v33, %v8688_v20 }
 0x77c   :  { %v7288_v21 = vmax.f32 %v7286_v63, %v7287_v53  ;;  %v12849_v15 = vpack.c.bf16 %v7453_v42, %v7453_v42  ;;  %v7273_v16 = vrot.slane %v7272_v11, 2  ;;  %v7294_v3 = vrot.slane %v7293_v58, 2 }
 0x77d   :  { %v7277_v12 = vsel %vm616_vm1, %v8838_v50, -inf  ;;  %v7312_v37 = vsel %vm616_vm1, %v8840_v41, -inf  ;;  %v7298_v44 = vsel %vm616_vm1, %v8842_v52, -inf  ;;  %v12856_v22 = vpack.c.bf16 %v7451_v13, %v7451_v13 }
 0x77e   :  { %v7289_v28 = vrot.slane %v7288_v21, 1  ;;  %v7278_v61 = vrot.slane %v7277_v12, 4  ;;  %v7274_v45 = vmax.f32 %v7272_v11, %v7273_v16  ;;  %v7295_v31 = vmax.f32 %v7293_v58, %v7294_v3 }
 0x77f   :  { %v12854_v32 = vpop.f32.mrb[136].mxu0  ;;  %v7313_v2 = vrot.slane %v7312_v37, 4  ;;  %v7299_v42 = vrot.slane %v7298_v44, 4  ;;  %v7319_v63 = vsel %vm616_vm1, %v8844_v0, -inf  ;;  %v8846_v58 = vadd.f32 %v12683_v56, %v12816_v60 }
 0x780   :  { %v12858_v33 = vpop.f32.mrb[137].mxu0  ;;  %v7290_v1 = vmax.f32 %v7288_v21, %v7289_v28  ;;  %v7279_v20 = vmax.f32 %v7277_v12, %v7278_v61  ;;  %v7275_v38 = vrot.slane %v7274_v45, 1  ;;  %v7296_v18 = vrot.slane %v7295_v31, 1 }
 0x781   :  { %v12861_v26 = vpop.f32.mrb[138].mxu0  ;;  %v7314_v53 = vmax.f32 %v7312_v37, %v7313_v2  ;;  %v7320_v50 = vrot.slane %v7319_v63, 4  ;;  %v7300_v11 = vmax.f32 %v7298_v44, %v7299_v42  ;;  %v7581_v0 = vunpack.c.l.b16 %v12842_v47 }
 0x782   :  { %v12863_v41 = vpop.f32.mrb[139].mxu0  ;;  %v7456_v13 = vmax.f32 %v7290_v1, 0.0  ;;  %v7280_v52 = vrot.slane %v7279_v20, 2  ;;  %v7276_v16 = vmax.f32 %v7274_v45, %v7275_v38  ;;  %v7297_v21 = vmax.f32 %v7295_v31, %v7296_v18 }
 0x783   :  { %v7315_v3 = vrot.slane %v7314_v53, 2  ;;  %v7321_v12 = vmax.f32 %v7319_v63, %v7320_v50  ;;  %v7301_v61 = vrot.slane %v7300_v11, 2  ;;  %v7305_v23 = vsel %vm616_vm1, %v8846_v58, -inf }
 0x784   :  { %v7281_v28 = vmax.f32 %v7279_v20, %v7280_v52  ;;  %v7454_v37 = vmax.f32 %v7276_v16, 0.0  ;;  %v7457_v2 = vmax.f32 %v7297_v21, 0.0  ;;  %v7306_v34 = vrot.slane %v7305_v23, 4 }
 0x785   :  { %v7316_v7 = vmax.f32 %v7314_v53, %v7315_v3  ;;  %v7322_v5 = vrot.slane %v7321_v12, 2  ;;  %v7302_v42 = vmax.f32 %v7300_v11, %v7301_v61  ;;  %v7582_v60 = vunpack.c.l.b16 %v12856_v22 }
 0x786   :  { %v7282_v44 = vrot.slane %v7281_v28, 1  ;;  %v7496_v45 = vpack.c.bf16 %v7456_v13, %v7456_v13  ;;  %v7307_v50 = vmax.f32 %v7305_v23, %v7306_v34  ;;  %v8848_v53 = vadd.f32 %v12686_v25, %v12826_v46 }
 0x787   :  { %v12870_v56 = vpop.f32.mrb[140].mxu0  ;;  %v7317_v31 = vrot.slane %v7316_v7, 1  ;;  %v7323_v63 = vmax.f32 %v7321_v12, %v7322_v5  ;;  %v7303_v18 = vrot.slane %v7302_v42, 1  ;;  %v7494_v58 = vpack.c.bf16 %v7454_v37, %v7454_v37 }
 0x788   :  { %v12873_v20 = vpop.f32.mrb[141].mxu0  ;;  %v7283_v38 = vmax.f32 %v7281_v28, %v7282_v44  ;;  %v12879_v11 = vpack.c.bf16 %v7457_v2, %v7457_v2  ;;  %v7308_v5 = vrot.slane %v7307_v50, 2  ;;  %v7340_v12 = vsel %vm616_vm1, %v8848_v53, -inf }
 0x789   :  { %v12877_v52 = vpop.f32.mrb[142].mxu0  ;;  %v7318_v16 = vmax.f32 %v7316_v7, %v7317_v31  ;;  %v7324_v21 = vrot.slane %v7323_v63, 1  ;;  %v7304_v61 = vmax.f32 %v7302_v42, %v7303_v18  ;;  %v7341_v34 = vrot.slane %v7340_v12, 4 }
 0x78a   :  { %v12881_v3 = vpop.f32.mrb[143].mxu0  ;;  %v7455_v13 = vmax.f32 %v7283_v38, 0.0  ;;  %v8850_v25 = vadd.f32 %v12694_v49, %v12830_v54  ;;  %v7309_v37 = vmax.f32 %v7307_v50, %v7308_v5  ;;  %v8852_v7 = vadd.f32 %v12703_v48, %v12833_v51 }
 0x78b   :  { %v7460_v28 = vmax.f32 %v7318_v16, 0.0  ;;  %v7325_v44 = vmax.f32 %v7323_v63, %v7324_v21  ;;  %v7458_v23 = vmax.f32 %v7304_v61, 0.0  ;;  %v7342_v38 = vmax.f32 %v7340_v12, %v7341_v34 }
 0x78c   :  { %v7495_v46 = vpack.c.bf16 %v7455_v13, %v7455_v13  ;;  %v7326_v42 = vsel %vm616_vm1, %v8850_v25, -inf  ;;  %v7585_v18 = vunpack.c.l.b16 %v7494_v58  ;;  %v7310_v16 = vrot.slane %v7309_v37, 1 }
 0x78d   :  { %v12888_v2 = vpack.c.bf16 %v7460_v28, %v7460_v28  ;;  %v7461_v31 = vmax.f32 %v7325_v44, 0.0  ;;  %v7327_v63 = vrot.slane %v7326_v42, 4  ;;  %v7587_v1 = vunpack.c.l.b16 %v7496_v45 }
 0x78e   :  { %v7586_v53 = vunpack.c.l.b16 %v7495_v46  ;;  %v7588_v49 = vunpack.c.l.b16 %v12879_v11  ;;  %v7343_v54 = vrot.slane %v7342_v38, 2  ;;  %v7347_v50 = vsel %vm616_vm1, %v8852_v7, -inf }
 0x78f   :  { %v12891_v21 = vpop.f32.mrb[144].mxu0  ;;  %v7591_v51 = vunpack.c.l.b16 %v12888_v2  ;;  %v12899_v61 = vpack.c.bf16 %v7458_v23, %v7458_v23  ;;  %v7328_v58 = vmax.f32 %v7326_v42, %v7327_v63  ;;  %v12906_v45 = vpack.c.bf16 %v7461_v31, %v7461_v31 }
 0x790   :  { %v12895_v13 = vpop.f32.mrb[145].mxu0  ;;  %v7623_v48 = vsel %vm1979_vm3, %v7586_v53, %v7585_v18  ;;  %v7344_v28 = vmax.f32 %v7342_v38, %v7343_v54  ;;  %v7348_v44 = vrot.slane %v7347_v50, 4  ;;  %v7311_v25 = vmax.f32 %v7309_v37, %v7310_v16 }
 0x791   :  { %v12901_v5 = vpop.f32.mrb[146].mxu0  ;;  %v12904_v12 = vsel %vm1981_vm4, %v7587_v1, %v7623_v48  ;;  %v7329_v46 = vrot.slane %v7328_v58, 2  ;;  %v8854_v7 = vadd.f32 %v12697_v40, %v12836_v8  ;;  %v13526_v23 = vunpack.c.l.b16 %v12771_v59 }
 0x792   :  { %v12908_v34 = vpop.f32.mrb[147].mxu0  ;;  %v7345_v18 = vrot.slane %v7344_v28, 1  ;;  %v7349_v53 = vmax.f32 %v7347_v50, %v7348_v44  ;;  %v13527_v1 = vunpack.c.l.b16 %v12794_v17  ;;  %v13528_v38 = vunpack.c.l.b16 %v12818_v39 }
 0x793   :  { %v7611_v42 = vsel %vm1983_vm5, %v13526_v23, %v12778_v4  ;;  %v7589_v16 = vunpack.c.l.b16 %v12899_v61  ;;  %v7330_v63 = vmax.f32 %v7328_v58, %v7329_v46  ;;  %v7333_v40 = vsel %vm616_vm1, %v8854_v7, -inf }
 0x794   :  { %v7612_v31 = vsel %vm1985_vm6, %v13527_v1, %v7611_v42  ;;  %v7618_v37 = vsel %vm1983_vm5, %v13528_v38, %v12839_v30  ;;  %v13529_v59 = vunpack.c.l.b16 %v12807_v55  ;;  %v7346_v8 = vmax.f32 %v7344_v28, %v7345_v18 }
 0x795   :  { %v7350_v54 = vrot.slane %v7349_v53, 2  ;;  %v7334_v50 = vrot.slane %v7333_v40, 4  ;;  %v13530_v17 = vunpack.c.l.b16 %v12780_v35  ;;  %v7459_v44 = vmax.f32 %v7311_v25, 0.0 }
 0x796   :  { %v7613_v4 = vsel %vm1987_vm7, %v13529_v59, %v7612_v31  ;;  %v7331_v39 = vrot.slane %v7330_v63, 1  ;;  %v13531_v30 = vunpack.c.l.b16 %v12803_v27  ;;  %v7619_v58 = vsel %vm1985_vm6, %v7581_v0, %v7618_v37 }
 0x797   :  { %v7614_v48 = vsel %vm1989_vm8, %v13530_v17, %v7613_v4  ;;  %v7464_v55 = vmax.f32 %v7346_v8, 0.0  ;;  %v7351_v46 = vmax.f32 %v7349_v53, %v7350_v54  ;;  %v7335_v7 = vmax.f32 %v7333_v40, %v7334_v50 }
 0x798   :  { %v7615_v23 = vsel %vm1991_vm9, %v13531_v30, %v7614_v48  ;;  %v7620_v28 = vsel %vm1987_vm7, %v7582_v60, %v7619_v58  ;;  %v7332_v35 = vmax.f32 %v7330_v63, %v7331_v39  ;;  %v13532_v42 = vunpack.c.l.b16 %v12824_v24 }
 0x799   :  { %v8856_v27 = vadd.f32 %v12706_v62, %v12854_v32  ;;  %v8858_v47 = vadd.f32 %v12709_v14, %v12858_v33  ;;  %v12947_v18 = vpack.c.bf16 %v7464_v55, %v7464_v55  ;;  %v7352_v0 = vrot.slane %v7351_v46, 1 }
 0x79a   :  { %v7621_v25 = vsel %vm1989_vm8, %v13532_v42, %v7620_v28  ;;  %v7336_v53 = vrot.slane %v7335_v7, 2  ;;  %v13533_v1 = vunpack.c.l.b16 %v12849_v15  ;;  %v7462_v60 = vmax.f32 %v7332_v35, 0.0 }
 0x79b   :  { %v7368_v24 = vsel %vm616_vm1, %v8856_v27, -inf  ;;  %v7354_v38 = vsel %vm616_vm1, %v8858_v47, -inf  ;;  %v7592_v37 = vunpack.c.l.b16 %v12906_v45  ;;  %v7353_v62 = vmax.f32 %v7351_v46, %v7352_v0 }
 0x79c   :  { %v7622_v22 = vsel %vm1991_vm9, %v13533_v1, %v7621_v25  ;;  %v7337_v32 = vmax.f32 %v7335_v7, %v7336_v53  ;;  %v7369_v63 = vrot.slane %v7368_v24, 4  ;;  %v12955_v14 = vpack.c.bf16 %v7459_v44, %v7459_v44 }
 0x79d   :  { %v7644_v31 = vpack.c.b16 %v7622_v22, %v7615_v23  ;;  %v7355_v40 = vrot.slane %v7354_v38, 4  ;;  %v8860_v15 = vadd.f32 %v12715_v36, %v12861_v26  ;;  %v7502_v59 = vpack.c.bf16 %v7462_v60, %v7462_v60  ;;  %v13534_v22 = vld [vmem:[#allocation29_spill] sm:$0xff] }
 0x79e   :  { %v7338_v4 = vrot.slane %v7337_v32, 1  ;;  %v7370_v8 = vmax.f32 %v7368_v24, %v7369_v63  ;;  %v8862_v54 = vadd.f32 %v12718_v9, %v12863_v41  ;;  %v7595_v50 = vunpack.c.l.b16 %v12947_v18 }
 0x79f   :  { %v7651_v33 = vsel %vm616_vm1, %v7644_v31, 0  ;;  %v7356_v17 = vmax.f32 %v7354_v38, %v7355_v40  ;;  %v7375_v48 = vsel %vm616_vm1, %v8860_v15, -inf  ;;  %v8864_v44 = vadd.f32 %v12721_v29, %v12870_v56 }
 0x7a0   :  { %8706 = vmatpush3.bf16.xpose.msra.mxu1 %v7651_v33  ;;  %v7465_v39 = vmax.f32 %v7353_v62, 0.0  ;;  %v7339_v30 = vmax.f32 %v7337_v32, %v7338_v4  ;;  %v7371_v36 = vrot.slane %v7370_v8, 2  ;;  %v7376_v26 = vrot.slane %v7375_v48, 4 }
 0x7a1   :  { %8707 = vmatprep.subr.bf16.mxu1 %v13492_v10  ;;  %v7357_v23 = vrot.slane %v7356_v17, 2  ;;  %v7361_v58 = vsel %vm616_vm1, %v8862_v54, -inf  ;;  %v7396_v55 = vsel %vm616_vm1, %v8864_v44, -inf  ;;  %v8866_v9 = vadd.f32 %v12726_v19, %v12873_v20 }
 0x7a2   :  { %v7593_v41 = vunpack.c.l.b16 %v7502_v59  ;;  %v7463_v46 = vmax.f32 %v7339_v30, 0.0  ;;  %v7372_v7 = vmax.f32 %v7370_v8, %v7371_v36  ;;  %v7377_v28 = vmax.f32 %v7375_v48, %v7376_v26 }
 0x7a3   :  { %v7358_v35 = vmax.f32 %v7356_v17, %v7357_v23  ;;  %v7362_v29 = vrot.slane %v7361_v58, 4  ;;  %v7397_v56 = vrot.slane %v7396_v55, 4  ;;  %v7382_v42 = vsel %vm616_vm1, %v8866_v9, -inf }
 0x7a4   :  { %v7503_v25 = vpack.c.bf16 %v7463_v46, %v7463_v46  ;;  %v7373_v27 = vrot.slane %v7372_v7, 1  ;;  %v7378_v47 = vrot.slane %v7377_v28, 2  ;;  %v7383_v18 = vrot.slane %v7382_v42, 4 }
 0x7a5   :  { %v7359_v0 = vrot.slane %v7358_v35, 1  ;;  %v7363_v53 = vmax.f32 %v7361_v58, %v7362_v29  ;;  %v7398_v1 = vmax.f32 %v7396_v55, %v7397_v56  ;;  %v8868_v60 = vadd.f32 %v13534_v22, %v12877_v52  ;;  %v13535_v58 = vld [vmem:[#allocation27_spill] sm:$0xff] }
 0x7a6   :  { %v7594_v19 = vunpack.c.l.b16 %v7503_v25  ;;  %v7374_v20 = vmax.f32 %v7372_v7, %v7373_v27  ;;  %v7379_v31 = vmax.f32 %v7377_v28, %v7378_v47  ;;  %v7384_v24 = vmax.f32 %v7382_v42, %v7383_v18  ;;  %v13536_v18 = vld [vmem:[#allocation26_spill] sm:$0xff] }
 0x7a7   :  { %v7360_v38 = vmax.f32 %v7358_v35, %v7359_v0  ;;  %v7364_v62 = vrot.slane %v7363_v53, 2  ;;  %v7399_v32 = vrot.slane %v7398_v1, 2  ;;  %v7403_v63 = vsel %vm616_vm1, %v8868_v60, -inf }
 0x7a8   :  { %v7630_v33 = vsel %vm1979_vm3, %v7594_v19, %v7593_v41  ;;  %v7468_v40 = vmax.f32 %v7374_v20, 0.0  ;;  %v7380_v15 = vrot.slane %v7379_v31, 1  ;;  %v7385_v59 = vrot.slane %v7384_v24, 2 }
 0x7a9   :  { %v7631_v4 = vsel %vm1981_vm4, %v7595_v50, %v7630_v33  ;;  %v7466_v8 = vmax.f32 %v7360_v38, 0.0  ;;  %v7365_v54 = vmax.f32 %v7363_v53, %v7364_v62  ;;  %v7400_v17 = vmax.f32 %v7398_v1, %v7399_v32 }
 0x7aa   :  { %v7590_v52 = vunpack.c.l.b16 %v12955_v14  ;;  %v7381_v48 = vmax.f32 %v7379_v31, %v7380_v15  ;;  %v7386_v44 = vmax.f32 %v7384_v24, %v7385_v59  ;;  %v7404_v30 = vrot.slane %v7403_v63, 4 }
 0x7ab   :  { %v7505_v36 = vpack.c.bf16 %v7465_v39, %v7465_v39  ;;  %v7366_v26 = vrot.slane %v7365_v54, 1  ;;  %v7401_v23 = vrot.slane %v7400_v17, 1  ;;  %v8870_v55 = vadd.f32 %v13535_v58, %v12881_v3 }
 0x7ac   :  { %v12980_v9 = vpack.c.bf16 %v7468_v40, %v7468_v40  ;;  %v7469_v41 = vmax.f32 %v7381_v48, 0.0  ;;  %v7387_v46 = vrot.slane %v7386_v44, 1  ;;  %v7405_v7 = vmax.f32 %v7403_v63, %v7404_v30 }
 0x7ad   :  { %v7506_v50 = vpack.c.bf16 %v7466_v8, %v7466_v8  ;;  %v7367_v28 = vmax.f32 %v7365_v54, %v7366_v26  ;;  %v7402_v35 = vmax.f32 %v7400_v17, %v7401_v23  ;;  %v7389_v29 = vsel %vm616_vm1, %v8870_v55, -inf }
 0x7ae   :  { %v12983_v56 = vpack.c.bf16 %v7469_v41, %v7469_v41  ;;  %v7388_v42 = vmax.f32 %v7386_v44, %v7387_v46  ;;  %v7406_v25 = vrot.slane %v7405_v7, 2  ;;  %v7390_v39 = vrot.slane %v7389_v29, 4 }
 0x7af   :  { %v7467_v27 = vmax.f32 %v7367_v28, 0.0  ;;  %v7472_v47 = vmax.f32 %v7402_v35, 0.0  ;;  %v8872_v3 = vadd.f32 %v12785_v43, %v12891_v21  ;;  %v8874_v0 = vadd.f32 %v13536_v18, %v12895_v13 }
 0x7b0   :  { %v7596_v53 = vunpack.c.l.b16 %v7505_v36  ;;  %v7470_v1 = vmax.f32 %v7388_v42, 0.0  ;;  %v7407_v22 = vmax.f32 %v7405_v7, %v7406_v25  ;;  %v7391_v60 = vmax.f32 %v7389_v29, %v7390_v39 }
 0x7b1   :  { %v7599_v19 = vunpack.c.l.b16 %v12980_v9  ;;  %v7597_v20 = vunpack.c.l.b16 %v7506_v50  ;;  %v7424_v31 = vsel %vm616_vm1, %v8872_v3, -inf  ;;  %v7410_v24 = vsel %vm616_vm1, %v8874_v0, -inf }
 0x7b2   :  { %v7507_v38 = vpack.c.bf16 %v7467_v27, %v7467_v27  ;;  %v7408_v62 = vrot.slane %v7407_v22, 1  ;;  %v7392_v32 = vrot.slane %v7391_v60, 2  ;;  %v7425_v63 = vrot.slane %v7424_v31, 4 }
 0x7b3   :  { %v7600_v43 = vunpack.c.l.b16 %v12983_v56  ;;  %v7512_v21 = vpack.c.bf16 %v7472_v47, %v7472_v47  ;;  %v7411_v33 = vrot.slane %v7410_v24, 4  ;;  %v8876_v13 = vadd.f32 %v12790_v6, %v12901_v5 }
 0x7b4   :  { %v7510_v40 = vpack.c.bf16 %v7470_v1, %v7470_v1  ;;  %v7409_v15 = vmax.f32 %v7407_v22, %v7408_v62  ;;  %v7393_v59 = vmax.f32 %v7391_v60, %v7392_v32  ;;  %v7426_v8 = vmax.f32 %v7424_v31, %v7425_v63 }
 0x7b5   :  { %v7412_v54 = vmax.f32 %v7410_v24, %v7411_v33  ;;  %v7431_v17 = vsel %vm616_vm1, %v8876_v13, -inf  ;;  %v8878_v48 = vadd.f32 %v12769_v57, %v12908_v34  ;;  %v7625_v44 = vsel %vm1983_vm5, %v7588_v49, %v12904_v12 }
 0x7b6   :  { %v7598_v30 = vunpack.c.l.b16 %v7507_v38  ;;  %v7394_v36 = vrot.slane %v7393_v59, 1  ;;  %v7427_v26 = vrot.slane %v7426_v8, 2  ;;  %v7432_v23 = vrot.slane %v7431_v17, 4 }
 0x7b7   :  { %v7413_v6 = vrot.slane %v7412_v54, 2  ;;  %v7417_v5 = vsel %vm616_vm1, %v8878_v48, -inf  ;;  %v7626_v58 = vsel %vm1985_vm6, %v7589_v16, %v7625_v44  ;;  %v7632_v55 = vsel %vm1983_vm5, %v7596_v53, %v7631_v4 }
 0x7b8   :  { %v7473_v9 = vmax.f32 %v7409_v15, 0.0  ;;  %v7395_v57 = vmax.f32 %v7393_v59, %v7394_v36  ;;  %v7428_v34 = vmax.f32 %v7426_v8, %v7427_v26  ;;  %v7433_v41 = vmax.f32 %v7431_v17, %v7432_v23  ;;  %v7518_v26 = vld [vmem:[%s13053_s11] sm:$0x1] }
 0x7b9   :  { %v7414_v11 = vmax.f32 %v7412_v54, %v7413_v6  ;;  %v7418_v46 = vrot.slane %v7417_v5, 4  ;;  %v7627_v49 = vsel %vm1987_vm7, %v7590_v52, %v7626_v58  ;;  %v7633_v12 = vsel %vm1985_vm6, %v7597_v20, %v7632_v55  ;;  %v13537_v6 = vld [vmem:[#allocation4_spill] sm:$0xff] }
 0x7ba   :  { %v7601_v7 = vunpack.c.l.b16 %v7510_v40  ;;  %v7471_v50 = vmax.f32 %v7395_v57, 0.0  ;;  %v7429_v28 = vrot.slane %v7428_v34, 1  ;;  %v7434_v61 = vrot.slane %v7433_v41, 2 }
 0x7bb   :  { %v7415_v35 = vrot.slane %v7414_v11, 1  ;;  %v7419_v16 = vmax.f32 %v7417_v5, %v7418_v46  ;;  %v7628_v4 = vsel %vm1989_vm8, %v7591_v51, %v7627_v49  ;;  %v7634_v29 = vsel %vm1987_vm7, %v7598_v30, %v7633_v12 }
 0x7bc   :  { %v7513_v56 = vpack.c.bf16 %v7473_v9, %v7473_v9  ;;  %v7511_v42 = vpack.c.bf16 %v7471_v50, %v7471_v50  ;;  %v7435_v25 = vmax.f32 %v7433_v41, %v7434_v61  ;;  %v7629_v14 = vsel %vm1991_vm9, %v7592_v37, %v7628_v4 }
 0x7bd   :  { %v7416_v52 = vmax.f32 %v7414_v11, %v7415_v35  ;;  %v7420_v39 = vrot.slane %v7419_v16, 2  ;;  %v7635_v27 = vsel %vm1989_vm8, %v7599_v19, %v7634_v29  ;;  %v18_v47 = vstv %s13052_s12 }
 0x7be   :  { %v7602_v2 = vunpack.c.l.b16 %v7511_v42  ;;  %v7430_v3 = vmax.f32 %v7428_v34, %v7429_v28  ;;  %v7436_v51 = vrot.slane %v7435_v25, 1  ;;  %v7636_v18 = vsel %vm1991_vm9, %v7600_v43, %v7635_v27  ;;  %19 = vst [vmem:[#allocation2] sm:$0x1] %v18_v47 }
 0x7bf   :  { %v7603_v0 = vunpack.c.l.b16 %v7512_v21  ;;  %v7474_v53 = vmax.f32 %v7416_v52, 0.0  ;;  %v7421_v1 = vmax.f32 %v7419_v16, %v7420_v39  ;;  %v7645_v45 = vpack.c.b16 %v7636_v18, %v7629_v14 }
 0x7c0   :  { %v7604_v22 = vunpack.c.l.b16 %v7513_v56  ;;  %v7637_v37 = vsel %vm1979_vm3, %v7602_v2, %v7601_v7  ;;  %v7437_v60 = vmax.f32 %v7435_v25, %v7436_v51  ;;  %v7476_v38 = vmax.f32 %v7430_v3, 0.0 }
 0x7c1   :  { %v7638_v19 = vsel %vm1981_vm4, %v7603_v0, %v7637_v37  ;;  %v7514_v20 = vpack.c.bf16 %v7474_v53, %v7474_v53  ;;  %v7422_v31 = vrot.slane %v7421_v1, 1  ;;  %v7654_v24 = vsel %vm616_vm1, %v7645_v45, 0 }
 0x7c2   :  { %8708 = vmatpush3.bf16.xpose.msra.mxu1 %v7654_v24  ;;  %v7639_v62 = vsel %vm1983_vm5, %v7604_v22, %v7638_v19  ;;  %v7477_v63 = vmax.f32 %v7437_v60, 0.0  ;;  %v7516_v40 = vpack.c.bf16 %v7476_v38, %v7476_v38 }
 0x7c3   :  { %v7605_v32 = vunpack.c.l.b16 %v7514_v20  ;;  %v7423_v43 = vmax.f32 %v7421_v1, %v7422_v31  ;;  %8709 = vmatprep.subr.bf16.mxu1 %v13492_v10 }
 0x7c4   :  { %v7517_v15 = vpack.c.bf16 %v7477_v63, %v7477_v63  ;;  %v7607_v54 = vunpack.c.l.b16 %v7516_v40 }
 0x7c5   :  { %v7475_v21 = vmax.f32 %v7423_v43, 0.0  ;;  %v7640_v33 = vsel %vm1985_vm6, %v7605_v32, %v7639_v62  ;;  %v7519_v13 = vld [vmem:[#allocation2] sm:$0x1] }
 0x7c6   :  { %7522 = vperm.xlu0 %8964, %v7519_v13   ;;  %v7608_v17 = vunpack.c.l.b16 %v7517_v15 }
 0x7c7   :  { %v7515_v59 = vpack.c.bf16 %v7475_v21, %v7475_v21 }
 0x7c9   :  { %v7606_v8 = vunpack.c.l.b16 %v7515_v59 }
 0x7cb   :  { %v7641_v48 = vsel %vm1987_vm7, %v7606_v8, %v7640_v33 }
 0x7cc   :  { %v7642_v44 = vsel %vm1989_vm8, %v7607_v54, %v7641_v48 }
 0x7cd   :  { %v7643_v30 = vsel %vm1991_vm9, %v7608_v17, %v7642_v44 }
 0x7ce   :  { %v7646_v36 = vpack.c.b16 %v7643_v30, %v7643_v30 }
 0x7d0   :  { %v7657_v10 = vsel %vm616_vm1, %v7646_v36, 0 }
 0x7d1   :  { %8710 = vmatpush3.bf16.xpose.msra.mxu1 %v7657_v10 }
 0x7d8   :  { %8712 = vmatmul.mubr.msk.bf16.vlgmr.msra.gmra.mrb[220].mxu1 %vm616_vm1, %v7518_v26 }
 0x845   :  { %v7523_v23 = vpop.permute.xlu0 %7522 }
 0x846   :  { %v7528_v5 = vrot.slane %v7523_v23, %v13537_v6 }
 0x8ab   :  { %v7693_v58 = vpop.f32.mrb[220].mxu1 }
 0x8ac   :  { %v7694_v55 = vadd.f32 %v7693_v58, %v7528_v5  ;;  %v8713_v9 = vpop.f32.mrb[221].mxu1 }
 0x8ad   :  { %v7696_v57 = vpop.f32.mrb[222].mxu1 }
 0x8ae   :  { %9019 = vtanh.f32 %v7694_v55  ;;  %v8714_v34 = vpop.f32.mrb[223].mxu1 }
 0x8b8   :  { %v9020_v41 = vpop.eup %9019 }
 0x8b9   :  { %7701 = vst.msk [vmem:[%s13054_s13] sm:$0x1] %vm7700_vm10, %v9020_v41 }

</bundles_post_ra>
